<compile_context>
chip_gen: v7x
topology: tpu7x:2x2x1
jax: 0.10.0
libtpu: 0.0.40
codegen_flags: <defaults>
</compile_context>

<pallas_src>
import functools

import jax
import jax.numpy as jnp
from jax import lax
from jax.experimental import pallas as pl
from jax.experimental.pallas import tpu as pltpu


# ----------------------------- Pallas kernels -----------------------------

def matmul_kernel(a_ref, b_ref, o_ref):
    # Single K step -> no accumulator scratch, no pl.when phases; the output
    # tile is written straight from the MXU result (lane-dense, tn >= 128).
    o_ref[...] = jnp.dot(a_ref[...], b_ref[...],
                         preferred_element_type=jnp.float32)


def pallas_matmul(a, b):
    """a[M,K] @ b[K,N] -> f32[M,N].

    a/b are bf16 (weights pre-cast at prepare time); K and N are multiples of
    128 by construction; M uses a full-extent block (no padding).  N is split
    into two lane-aligned tiles when large enough so the grid keeps a 2-wide
    "parallel" axis (v7x megacore); otherwise the grid collapses to (1,).
    """
    M, K = a.shape
    K2, N = b.shape
    assert K == K2, (a.shape, b.shape)
    tn = N // 2 if (N % 256 == 0 and N >= 1024) else N
    return pl.pallas_call(
        matmul_kernel,
        out_shape=jax.ShapeDtypeStruct((M, N), jnp.float32),
        grid_spec=pltpu.PrefetchScalarGridSpec(
            num_scalar_prefetch=0,
            grid=(N // tn,),
            in_specs=[pl.BlockSpec((M, K), lambda j: (0, 0)),
                      pl.BlockSpec((K, tn), lambda j: (0, j))],
            out_specs=pl.BlockSpec((M, tn), lambda j: (0, j))),
        compiler_params=pltpu.CompilerParams(
            dimension_semantics=("parallel",)),
    )(a, b)


def bn_relu_channel_kernel(x_ref, coef_ref, o_ref, *, eps):
    """Fused conv-bias + BatchNorm2d (batch stats) + ReLU (+ affine), per channel.

    coef rows: 0=conv bias, 1=gamma, 2=beta, 3=post_scale, 4=post_shift.
    """
    c = coef_ref[...]
    x = x_ref[...] + c[0:1, :]                               # conv bias
    inv_n = 1.0 / x_ref.shape[0]
    mean = jnp.sum(x, axis=0, keepdims=True) * inv_n
    xc = x - mean                                            # two-pass variance
    var = jnp.sum(xc * xc, axis=0, keepdims=True) * inv_n
    scale = c[1:2, :] * lax.rsqrt(var + eps)
    y = jnp.maximum(xc * scale + c[2:3, :], 0.0)
    o_ref[...] = (y * c[3:4, :] + c[4:5, :]).astype(o_ref.dtype)


def bn_relu_scalar_kernel(x_ref, coef_ref, o_ref, *, eps, count):
    """Same fusion for the C==1 stage on a lane-dense [R//128, 128] block.

    coef (SMEM, shape (8,)): 0=conv3 bias, 1=gamma, 2=beta, 3=conv4 w, 4=conv4 b.
    """
    x = x_ref[...] + coef_ref[0]
    inv_n = 1.0 / count
    mean = jnp.sum(x) * inv_n
    xc = x - mean
    var = jnp.sum(xc * xc) * inv_n
    scale = coef_ref[1] * lax.rsqrt(var + eps)
    y = jnp.maximum(xc * scale + coef_ref[2], 0.0)
    o_ref[...] = (y * coef_ref[3] + coef_ref[4]).astype(o_ref.dtype)


# ----------------------------- layer wrappers -----------------------------

def col2im_stride2(cols):
    """Scatter cols[N,H,W,C,k,k] into the stride-2 upsampled output.

    Decomposed into the 4 output parity planes: each plane is a sum of a few
    zero-padded dense slices of the tiny `cols` array, and the planes are then
    interleaved with a single reshape -- no overlapping scatter-adds on the
    full-size output.
    """
    # TODO(synk): this interleave stays as (jit-fused) XLA glue; a strided
    # parity-interleave store has no clean rectangular BlockSpec equivalent and
    # its FLOPs are negligible vs. the GEMM.
    N, H, W_, C, k, _ = cols.shape
    s = 2
    Hout, Wout = s * (H - 1) + k, s * (W_ - 1) + k
    Up, Vp = H + 1, W_ + 1                       # padded parity-plane extents
    planes = []
    for rp in range(s):
        row = []
        for rq in range(s):
            acc = None
            for mi in range((k - rp + 1) // 2):
                for mj in range((k - rq + 1) // 2):
                    term = jnp.pad(
                        cols[:, :, :, :, rp + 2 * mi, rq + 2 * mj],
                        ((0, 0), (mi, Up - mi - H), (mj, Vp - mj - W_), (0, 0)))
                    acc = term if acc is None else acc + term
            row.append(acc)
        planes.append(row)
    # out[n, 2u+rp, 2v+rq, c] = planes[rp][rq][n, u, v, c]
    full = jnp.stack([jnp.stack(r, axis=3) for r in planes], axis=2)
    full = full.reshape(N, s * Up, s * Vp, C)
    return full[:, :Hout, :Wout, :]


def conv_transpose_2d(x_nhwc, w_flat, cout, k):
    """ConvTranspose2d(stride=2, padding=0); w_flat: [Cin, >=Cout*k*k] bf16.
    Bias is NOT added here; it is fused into the following BN kernel."""
    N, H, W_, Cin = x_nhwc.shape
    xf = x_nhwc.reshape(N * H * W_, Cin)
    cols = pallas_matmul(xf, w_flat)                  # Pallas MXU GEMM (hot path)
    cols = cols[:, :cout * k * k].reshape(N, H, W_, cout, k, k)
    return col2im_stride2(cols)


def bn_relu_fused(x_nhwc, coef, out_dtype, eps=1e-5):
    """Training-mode BatchNorm2d + conv bias + ReLU (+ post affine), one kernel."""
    N, H, W_, C = x_nhwc.shape
    R = N * H * W_
    if C == 1:
        lanes = 128 if R % 128 == 0 else 1            # lane-dense layout for C==1
        x2d = x_nhwc.reshape(R // lanes, lanes)
        kern = functools.partial(bn_relu_scalar_kernel, eps=eps, count=R)
        y = pl.pallas_call(
            kern,
            out_shape=jax.ShapeDtypeStruct(x2d.shape, out_dtype),
            grid=(1,),
            in_specs=[pl.BlockSpec(x2d.shape, lambda i: (0, 0)),
                      pl.BlockSpec(memory_space=pltpu.MemorySpace.SMEM)],
            out_specs=pl.BlockSpec(x2d.shape, lambda i: (0, 0)),
        )(x2d, coef)
    else:
        x2d = x_nhwc.reshape(R, C)
        kern = functools.partial(bn_relu_channel_kernel, eps=eps)
        y = pl.pallas_call(
            kern,
            out_shape=jax.ShapeDtypeStruct((R, C), out_dtype),
            grid=(1,),
            in_specs=[pl.BlockSpec((R, C), lambda i: (0, 0)),
                      pl.BlockSpec((8, C), lambda i: (0, 0))],
            out_specs=pl.BlockSpec((R, C), lambda i: (0, 0)),
        )(x2d, coef)
    return y.reshape(N, H, W_, C)


def heatmap_decoder_forward(x_nchw, q):
    # NCHW in/out (PyTorch convention); NHWC + bf16 GEMM inputs internally.
    x = jnp.transpose(x_nchw, (0, 2, 3, 1)).astype(jnp.bfloat16)

    x = conv_transpose_2d(x, q["wf1"], cout=256, k=3)          # 512 -> 256
    x = bn_relu_fused(x, q["coef1"], out_dtype=jnp.bfloat16)

    x = conv_transpose_2d(x, q["wf2"], cout=128, k=3)          # 256 -> 128
    x = bn_relu_fused(x, q["coef2"], out_dtype=jnp.bfloat16)

    x = conv_transpose_2d(x, q["wf3"], cout=1, k=4)            # 128 -> 1
    x = bn_relu_fused(x, q["coef3"], out_dtype=jnp.float32)    # + fused conv4 affine

    return jnp.transpose(x, (0, 3, 1, 2))                      # back to NCHW


# ----------------------------- parameters -----------------------------

def init_params(key):
    """Raw parameters in PyTorch layouts."""
    ks = jax.random.split(key, 8)

    def w(k, shape, scale=0.05):
        return scale * jax.random.normal(k, shape, dtype=jnp.float32)

    return dict(
        # ConvTranspose2d weights: [Cin, Cout, kH, kW]
        w1=w(ks[0], (512, 256, 3, 3)), b1=w(ks[1], (256,)),
        g1=jnp.ones((256,), jnp.float32), be1=jnp.zeros((256,), jnp.float32),
        w2=w(ks[2], (256, 128, 3, 3)), b2=w(ks[3], (128,)),
        g2=jnp.ones((128,), jnp.float32), be2=jnp.zeros((128,), jnp.float32),
        w3=w(ks[4], (128, 1, 4, 4)), b3=w(ks[5], (1,)),
        g3=jnp.ones((1,), jnp.float32), be3=jnp.zeros((1,), jnp.float32),
        # Conv2d(1, 1, 1): weight [Cout, Cin, 1, 1], bias [1]
        w4=w(ks[6], (1, 1, 1, 1)), b4=w(ks[7], (1,)),
    )


def prepare_params(p):
    """One-time, off-hot-path conversion to GEMM/kernel-ready tensors."""
    def coef_rows(bias, gamma, beta, post_scale, post_shift):
        z = jnp.zeros_like(gamma)
        return jnp.stack([bias, gamma, beta, post_scale, post_shift, z, z, z],
                         axis=0).astype(jnp.float32)

    one = lambda c: jnp.ones((c,), jnp.float32)
    zero = lambda c: jnp.zeros((c,), jnp.float32)

    return dict(
        wf1=p["w1"].reshape(512, 256 * 9).astype(jnp.bfloat16),
        wf2=p["w2"].reshape(256, 128 * 9).astype(jnp.bfloat16),
        # layer-3 weight padded [128,16] -> [128,128] once (lane-dense GEMM out)
        wf3=jnp.pad(p["w3"].reshape(128, 16),
                    ((0, 0), (0, 112))).astype(jnp.bfloat16),
        coef1=coef_rows(p["b1"], p["g1"], p["be1"], one(256), zero(256)),
        coef2=coef_rows(p["b2"], p["g2"], p["be2"], one(128), zero(128)),
        # scalar coefs for the C==1 stage: conv3 bias, bn3 gamma/beta, conv4 w/b
        coef3=jnp.concatenate([p["b3"], p["g3"], p["be3"],
                               p["w4"].reshape(1), p["b4"],
                               jnp.zeros((3,), jnp.float32)]).astype(jnp.float32),
    )


if __name__ == "__main__":
    key = jax.random.PRNGKey(0)
    k_x, k_p = jax.random.split(key)
    params = prepare_params(init_params(k_p))

    # small input consistent with the module: N=2, C=512, H=W=4
    x = jax.random.normal(k_x, (2, 512, 4, 4), dtype=jnp.float32)

    fwd = jax.jit(heatmap_decoder_forward)
    out = jax.block_until_ready(fwd(x, params))

    # spatial sizes: 4 -> 9 -> 19 -> 40 ; channels: 512 -> 256 -> 128 -> 1
    assert out.shape == (2, 1, 40, 40), out.shape
    assert bool(jnp.isfinite(out).all())
    print("KERNEL_OK")
</pallas_src>

<mosaic_0001>
module attributes {stable_mosaic.version = 11 : i64} {
  func.func @matmul_kernel(%arg0: i32, %arg1: memref<32x512xbf16, #tpu.memory_space<vmem>>, %arg2: memref<512x1152xbf16, #tpu.memory_space<vmem>>, %arg3: memref<32x1152xf32, #tpu.memory_space<vmem>>) attributes {dimension_semantics = [#tpu.dimension_semantics<parallel>], iteration_bounds = array<i64: 2>, scalar_prefetch = 0 : i64, scratch_operands = 0 : i64, tpu.core_type = #tpu.core_type<tc>, window_params = [{pipeline_mode = #tpu.pipeline_mode<synchronous>, transform_indices = @transform_0, window_bounds = array<i64: 32, 512>}, {transform_indices = @transform_1, window_bounds = array<i64: 512, 1152>}, {transform_indices = @transform_2, window_bounds = array<i64: 32, 1152>}]} {
    %c0 = arith.constant 0 : index
    %c0_0 = arith.constant 0 : index
    %0 = vector.load %arg1[%c0, %c0_0] : memref<32x512xbf16, #tpu.memory_space<vmem>>, vector<32x512xbf16>
    %c0_1 = arith.constant 0 : index
    %c0_2 = arith.constant 0 : index
    %1 = vector.load %arg2[%c0_1, %c0_2] : memref<512x1152xbf16, #tpu.memory_space<vmem>>, vector<512x1152xbf16>
    %cst = arith.constant dense<0.000000e+00> : vector<32x1152xf32>
    %2 = tpu.matmul %0, %1, %cst {dimension_numbers = #tpu.dot_dimension_numbers<[1], [0], [0], [1], [0, 0, 1, 1], [], []>} : vector<32x512xbf16>, vector<512x1152xbf16>, vector<32x1152xf32> -> vector<32x1152xf32>
    %c0_3 = arith.constant 0 : index
    %c0_4 = arith.constant 0 : index
    %3 = vector.load %arg3[%c0_3, %c0_4] : memref<32x1152xf32, #tpu.memory_space<vmem>>, vector<32x1152xf32>
    tpu.vector_store %arg3[%c0_3, %c0_4], %2 {strides = array<i32>} : memref<32x1152xf32, #tpu.memory_space<vmem>>, vector<32x1152xf32>,
    return
  }
  func.func @transform_0(%arg0: i32) -> (i32, i32) {
    %c0_i32 = arith.constant 0 : i32
    %c0_i32_0 = arith.constant 0 : i32
    %c0_i32_1 = arith.constant 0 : i32
    return %c0_i32, %c0_i32_0 : i32, i32
  }
  func.func @transform_1(%arg0: i32) -> (i32, i32) {
    %c0_i32 = arith.constant 0 : i32
    %c0_i32_0 = arith.constant 0 : i32
    return %c0_i32, %arg0 : i32, i32
  }
  func.func @transform_2(%arg0: i32) -> (i32, i32) {
    %c0_i32 = arith.constant 0 : i32
    %c0_i32_0 = arith.constant 0 : i32
    return %c0_i32, %arg0 : i32, i32
  }
}

module attributes {stable_mosaic.version = 11 : i64} {
  func.func @bn_relu_channel_kernel(%arg0: i32, %arg1: memref<162x256xf32, #tpu.memory_space<vmem>>, %arg2: memref<8x256xf32, #tpu.memory_space<vmem>>, %arg3: memref<162x256xbf16, #tpu.memory_space<vmem>>) attributes {dimension_semantics = [#tpu.dimension_semantics<arbitrary>], iteration_bounds = array<i64: 1>, scalar_prefetch = 0 : i64, scratch_operands = 0 : i64, tpu.core_type = #tpu.core_type<tc>, window_params = [{pipeline_mode = #tpu.pipeline_mode<synchronous>, transform_indices = @transform_0, window_bounds = array<i64: 162, 256>}, {pipeline_mode = #tpu.pipeline_mode<synchronous>, transform_indices = @transform_1, window_bounds = array<i64: 8, 256>}, {pipeline_mode = #tpu.pipeline_mode<synchronous>, transform_indices = @transform_2, window_bounds = array<i64: 162, 256>}]} {
    %c0 = arith.constant 0 : index
    %c0_0 = arith.constant 0 : index
    %0 = vector.load %arg2[%c0, %c0_0] : memref<8x256xf32, #tpu.memory_space<vmem>>, vector<8x256xf32>
    %c0_1 = arith.constant 0 : index
    %c0_2 = arith.constant 0 : index
    %1 = vector.load %arg1[%c0_1, %c0_2] : memref<162x256xf32, #tpu.memory_space<vmem>>, vector<162x256xf32>
    %2 = vector.extract_strided_slice %0 {offsets = [0, 0], sizes = [1, 256], strides = [1, 1]} : vector<8x256xf32> to vector<1x256xf32>
    %3 = vector.broadcast %2 : vector<1x256xf32> to vector<162x256xf32>
    %4 = arith.addf %1, %3 : vector<162x256xf32>
    %cst = arith.constant dense<0.000000e+00> : vector<256xf32>
    %5 = vector.multi_reduction <add>, %4, %cst [0] : vector<162x256xf32> to vector<256xf32>
    %6 = vector.shape_cast %5 : vector<256xf32> to vector<1x256xf32>
    %cst_3 = arith.constant 0.00617283955 : f32
    %7 = vector.broadcast %cst_3 : f32 to vector<1x256xf32>
    %8 = arith.mulf %6, %7 : vector<1x256xf32>
    %9 = vector.broadcast %8 : vector<1x256xf32> to vector<162x256xf32>
    %10 = arith.subf %4, %9 : vector<162x256xf32>
    %11 = arith.mulf %10, %10 : vector<162x256xf32>
    %cst_4 = arith.constant dense<0.000000e+00> : vector<256xf32>
    %12 = vector.multi_reduction <add>, %11, %cst_4 [0] : vector<162x256xf32> to vector<256xf32>
    %13 = vector.shape_cast %12 : vector<256xf32> to vector<1x256xf32>
    %cst_5 = arith.constant 0.00617283955 : f32
    %14 = vector.broadcast %cst_5 : f32 to vector<1x256xf32>
    %15 = arith.mulf %13, %14 : vector<1x256xf32>
    %16 = vector.extract_strided_slice %0 {offsets = [1, 0], sizes = [1, 256], strides = [1, 1]} : vector<8x256xf32> to vector<1x256xf32>
    %cst_6 = arith.constant 9.99999974E-6 : f32
    %17 = vector.broadcast %cst_6 : f32 to vector<1x256xf32>
    %18 = arith.addf %15, %17 : vector<1x256xf32>
    %19 = math.rsqrt %18 : vector<1x256xf32>
    %20 = arith.mulf %16, %19 : vector<1x256xf32>
    %21 = vector.broadcast %20 : vector<1x256xf32> to vector<162x256xf32>
    %22 = arith.mulf %10, %21 : vector<162x256xf32>
    %23 = vector.extract_strided_slice %0 {offsets = [2, 0], sizes = [1, 256], strides = [1, 1]} : vector<8x256xf32> to vector<1x256xf32>
    %24 = vector.broadcast %23 : vector<1x256xf32> to vector<162x256xf32>
    %25 = arith.addf %22, %24 : vector<162x256xf32>
    %cst_7 = arith.constant 0.000000e+00 : f32
    %26 = vector.broadcast %cst_7 : f32 to vector<162x256xf32>
    %27 = arith.maximumf %25, %26 : vector<162x256xf32>
    %28 = vector.extract_strided_slice %0 {offsets = [3, 0], sizes = [1, 256], strides = [1, 1]} : vector<8x256xf32> to vector<1x256xf32>
    %29 = vector.broadcast %28 : vector<1x256xf32> to vector<162x256xf32>
    %30 = arith.mulf %27, %29 : vector<162x256xf32>
    %31 = vector.extract_strided_slice %0 {offsets = [4, 0], sizes = [1, 256], strides = [1, 1]} : vector<8x256xf32> to vector<1x256xf32>
    %32 = vector.broadcast %31 : vector<1x256xf32> to vector<162x256xf32>
    %33 = arith.addf %30, %32 : vector<162x256xf32>
    %34 = arith.truncf %33 : vector<162x256xf32> to vector<162x256xbf16>
    %c0_8 = arith.constant 0 : index
    %c0_9 = arith.constant 0 : index
    %35 = vector.load %arg3[%c0_8, %c0_9] : memref<162x256xbf16, #tpu.memory_space<vmem>>, vector<162x256xbf16>
    tpu.vector_store %arg3[%c0_8, %c0_9], %34 {strides = array<i32>} : memref<162x256xbf16, #tpu.memory_space<vmem>>, vector<162x256xbf16>,
    return
  }
  func.func @transform_0(%arg0: i32) -> (i32, i32) {
    %c0_i32 = arith.constant 0 : i32
    %c0_i32_0 = arith.constant 0 : i32
    %c0_i32_1 = arith.constant 0 : i32
    return %c0_i32, %c0_i32_0 : i32, i32
  }
  func.func @transform_1(%arg0: i32) -> (i32, i32) {
    %c0_i32 = arith.constant 0 : i32
    %c0_i32_0 = arith.constant 0 : i32
    %c0_i32_1 = arith.constant 0 : i32
    return %c0_i32, %c0_i32_0 : i32, i32
  }
  func.func @transform_2(%arg0: i32) -> (i32, i32) {
    %c0_i32 = arith.constant 0 : i32
    %c0_i32_0 = arith.constant 0 : i32
    %c0_i32_1 = arith.constant 0 : i32
    return %c0_i32, %c0_i32_0 : i32, i32
  }
}

module attributes {stable_mosaic.version = 11 : i64} {
  func.func @matmul_kernel(%arg0: i32, %arg1: memref<162x256xbf16, #tpu.memory_space<vmem>>, %arg2: memref<256x1152xbf16, #tpu.memory_space<vmem>>, %arg3: memref<162x1152xf32, #tpu.memory_space<vmem>>) attributes {dimension_semantics = [#tpu.dimension_semantics<parallel>], iteration_bounds = array<i64: 1>, scalar_prefetch = 0 : i64, scratch_operands = 0 : i64, tpu.core_type = #tpu.core_type<tc>, window_params = [{pipeline_mode = #tpu.pipeline_mode<synchronous>, transform_indices = @transform_0, window_bounds = array<i64: 162, 256>}, {transform_indices = @transform_1, window_bounds = array<i64: 256, 1152>}, {transform_indices = @transform_2, window_bounds = array<i64: 162, 1152>}]} {
    %c0 = arith.constant 0 : index
    %c0_0 = arith.constant 0 : index
    %0 = vector.load %arg1[%c0, %c0_0] : memref<162x256xbf16, #tpu.memory_space<vmem>>, vector<162x256xbf16>
    %c0_1 = arith.constant 0 : index
    %c0_2 = arith.constant 0 : index
    %1 = vector.load %arg2[%c0_1, %c0_2] : memref<256x1152xbf16, #tpu.memory_space<vmem>>, vector<256x1152xbf16>
    %cst = arith.constant dense<0.000000e+00> : vector<162x1152xf32>
    %2 = tpu.matmul %0, %1, %cst {dimension_numbers = #tpu.dot_dimension_numbers<[1], [0], [0], [1], [0, 0, 1, 1], [], []>} : vector<162x256xbf16>, vector<256x1152xbf16>, vector<162x1152xf32> -> vector<162x1152xf32>
    %c0_3 = arith.constant 0 : index
    %c0_4 = arith.constant 0 : index
    %3 = vector.load %arg3[%c0_3, %c0_4] : memref<162x1152xf32, #tpu.memory_space<vmem>>, vector<162x1152xf32>
    tpu.vector_store %arg3[%c0_3, %c0_4], %2 {strides = array<i32>} : memref<162x1152xf32, #tpu.memory_space<vmem>>, vector<162x1152xf32>,
    return
  }
  func.func @transform_0(%arg0: i32) -> (i32, i32) {
    %c0_i32 = arith.constant 0 : i32
    %c0_i32_0 = arith.constant 0 : i32
    %c0_i32_1 = arith.constant 0 : i32
    return %c0_i32, %c0_i32_0 : i32, i32
  }
  func.func @transform_1(%arg0: i32) -> (i32, i32) {
    %c0_i32 = arith.constant 0 : i32
    %c0_i32_0 = arith.constant 0 : i32
    return %c0_i32, %arg0 : i32, i32
  }
  func.func @transform_2(%arg0: i32) -> (i32, i32) {
    %c0_i32 = arith.constant 0 : i32
    %c0_i32_0 = arith.constant 0 : i32
    return %c0_i32, %arg0 : i32, i32
  }
}

module attributes {stable_mosaic.version = 11 : i64} {
  func.func @bn_relu_channel_kernel(%arg0: i32, %arg1: memref<722x128xf32, #tpu.memory_space<vmem>>, %arg2: memref<8x128xf32, #tpu.memory_space<vmem>>, %arg3: memref<722x128xbf16, #tpu.memory_space<vmem>>) attributes {dimension_semantics = [#tpu.dimension_semantics<arbitrary>], iteration_bounds = array<i64: 1>, scalar_prefetch = 0 : i64, scratch_operands = 0 : i64, tpu.core_type = #tpu.core_type<tc>, window_params = [{pipeline_mode = #tpu.pipeline_mode<synchronous>, transform_indices = @transform_0, window_bounds = array<i64: 722, 128>}, {pipeline_mode = #tpu.pipeline_mode<synchronous>, transform_indices = @transform_1, window_bounds = array<i64: 8, 128>}, {pipeline_mode = #tpu.pipeline_mode<synchronous>, transform_indices = @transform_2, window_bounds = array<i64: 722, 128>}]} {
    %c0 = arith.constant 0 : index
    %c0_0 = arith.constant 0 : index
    %0 = vector.load %arg2[%c0, %c0_0] : memref<8x128xf32, #tpu.memory_space<vmem>>, vector<8x128xf32>
    %c0_1 = arith.constant 0 : index
    %c0_2 = arith.constant 0 : index
    %1 = vector.load %arg1[%c0_1, %c0_2] : memref<722x128xf32, #tpu.memory_space<vmem>>, vector<722x128xf32>
    %2 = vector.extract_strided_slice %0 {offsets = [0, 0], sizes = [1, 128], strides = [1, 1]} : vector<8x128xf32> to vector<1x128xf32>
    %3 = vector.broadcast %2 : vector<1x128xf32> to vector<722x128xf32>
    %4 = arith.addf %1, %3 : vector<722x128xf32>
    %cst = arith.constant dense<0.000000e+00> : vector<128xf32>
    %5 = vector.multi_reduction <add>, %4, %cst [0] : vector<722x128xf32> to vector<128xf32>
    %6 = vector.shape_cast %5 : vector<128xf32> to vector<1x128xf32>
    %cst_3 = arith.constant 0.00138504151 : f32
    %7 = vector.broadcast %cst_3 : f32 to vector<1x128xf32>
    %8 = arith.mulf %6, %7 : vector<1x128xf32>
    %9 = vector.broadcast %8 : vector<1x128xf32> to vector<722x128xf32>
    %10 = arith.subf %4, %9 : vector<722x128xf32>
    %11 = arith.mulf %10, %10 : vector<722x128xf32>
    %cst_4 = arith.constant dense<0.000000e+00> : vector<128xf32>
    %12 = vector.multi_reduction <add>, %11, %cst_4 [0] : vector<722x128xf32> to vector<128xf32>
    %13 = vector.shape_cast %12 : vector<128xf32> to vector<1x128xf32>
    %cst_5 = arith.constant 0.00138504151 : f32
    %14 = vector.broadcast %cst_5 : f32 to vector<1x128xf32>
    %15 = arith.mulf %13, %14 : vector<1x128xf32>
    %16 = vector.extract_strided_slice %0 {offsets = [1, 0], sizes = [1, 128], strides = [1, 1]} : vector<8x128xf32> to vector<1x128xf32>
    %cst_6 = arith.constant 9.99999974E-6 : f32
    %17 = vector.broadcast %cst_6 : f32 to vector<1x128xf32>
    %18 = arith.addf %15, %17 : vector<1x128xf32>
    %19 = math.rsqrt %18 : vector<1x128xf32>
    %20 = arith.mulf %16, %19 : vector<1x128xf32>
    %21 = vector.broadcast %20 : vector<1x128xf32> to vector<722x128xf32>
    %22 = arith.mulf %10, %21 : vector<722x128xf32>
    %23 = vector.extract_strided_slice %0 {offsets = [2, 0], sizes = [1, 128], strides = [1, 1]} : vector<8x128xf32> to vector<1x128xf32>
    %24 = vector.broadcast %23 : vector<1x128xf32> to vector<722x128xf32>
    %25 = arith.addf %22, %24 : vector<722x128xf32>
    %cst_7 = arith.constant 0.000000e+00 : f32
    %26 = vector.broadcast %cst_7 : f32 to vector<722x128xf32>
    %27 = arith.maximumf %25, %26 : vector<722x128xf32>
    %28 = vector.extract_strided_slice %0 {offsets = [3, 0], sizes = [1, 128], strides = [1, 1]} : vector<8x128xf32> to vector<1x128xf32>
    %29 = vector.broadcast %28 : vector<1x128xf32> to vector<722x128xf32>
    %30 = arith.mulf %27, %29 : vector<722x128xf32>
    %31 = vector.extract_strided_slice %0 {offsets = [4, 0], sizes = [1, 128], strides = [1, 1]} : vector<8x128xf32> to vector<1x128xf32>
    %32 = vector.broadcast %31 : vector<1x128xf32> to vector<722x128xf32>
    %33 = arith.addf %30, %32 : vector<722x128xf32>
    %34 = arith.truncf %33 : vector<722x128xf32> to vector<722x128xbf16>
    %c0_8 = arith.constant 0 : index
    %c0_9 = arith.constant 0 : index
    %35 = vector.load %arg3[%c0_8, %c0_9] : memref<722x128xbf16, #tpu.memory_space<vmem>>, vector<722x128xbf16>
    tpu.vector_store %arg3[%c0_8, %c0_9], %34 {strides = array<i32>} : memref<722x128xbf16, #tpu.memory_space<vmem>>, vector<722x128xbf16>,
    return
  }
  func.func @transform_0(%arg0: i32) -> (i32, i32) {
    %c0_i32 = arith.constant 0 : i32
    %c0_i32_0 = arith.constant 0 : i32
    %c0_i32_1 = arith.constant 0 : i32
    return %c0_i32, %c0_i32_0 : i32, i32
  }
  func.func @transform_1(%arg0: i32) -> (i32, i32) {
    %c0_i32 = arith.constant 0 : i32
    %c0_i32_0 = arith.constant 0 : i32
    %c0_i32_1 = arith.constant 0 : i32
    return %c0_i32, %c0_i32_0 : i32, i32
  }
  func.func @transform_2(%arg0: i32) -> (i32, i32) {
    %c0_i32 = arith.constant 0 : i32
    %c0_i32_0 = arith.constant 0 : i32
    %c0_i32_1 = arith.constant 0 : i32
    return %c0_i32, %c0_i32_0 : i32, i32
  }
}

module attributes {stable_mosaic.version = 11 : i64} {
  func.func @matmul_kernel(%arg0: i32, %arg1: memref<722x128xbf16, #tpu.memory_space<vmem>>, %arg2: memref<128x128xbf16, #tpu.memory_space<vmem>>, %arg3: memref<722x128xf32, #tpu.memory_space<vmem>>) attributes {dimension_semantics = [#tpu.dimension_semantics<parallel>], iteration_bounds = array<i64: 1>, scalar_prefetch = 0 : i64, scratch_operands = 0 : i64, tpu.core_type = #tpu.core_type<tc>, window_params = [{pipeline_mode = #tpu.pipeline_mode<synchronous>, transform_indices = @transform_0, window_bounds = array<i64: 722, 128>}, {transform_indices = @transform_1, window_bounds = array<i64: 128, 128>}, {transform_indices = @transform_2, window_bounds = array<i64: 722, 128>}]} {
    %c0 = arith.constant 0 : index
    %c0_0 = arith.constant 0 : index
    %0 = vector.load %arg1[%c0, %c0_0] : memref<722x128xbf16, #tpu.memory_space<vmem>>, vector<722x128xbf16>
    %c0_1 = arith.constant 0 : index
    %c0_2 = arith.constant 0 : index
    %1 = vector.load %arg2[%c0_1, %c0_2] : memref<128x128xbf16, #tpu.memory_space<vmem>>, vector<128x128xbf16>
    %cst = arith.constant dense<0.000000e+00> : vector<722x128xf32>
    %2 = tpu.matmul %0, %1, %cst {dimension_numbers = #tpu.dot_dimension_numbers<[1], [0], [0], [1], [0, 0, 1, 1], [], []>} : vector<722x128xbf16>, vector<128x128xbf16>, vector<722x128xf32> -> vector<722x128xf32>
    %c0_3 = arith.constant 0 : index
    %c0_4 = arith.constant 0 : index
    %3 = vector.load %arg3[%c0_3, %c0_4] : memref<722x128xf32, #tpu.memory_space<vmem>>, vector<722x128xf32>
    tpu.vector_store %arg3[%c0_3, %c0_4], %2 {strides = array<i32>} : memref<722x128xf32, #tpu.memory_space<vmem>>, vector<722x128xf32>,
    return
  }
  func.func @transform_0(%arg0: i32) -> (i32, i32) {
    %c0_i32 = arith.constant 0 : i32
    %c0_i32_0 = arith.constant 0 : i32
    %c0_i32_1 = arith.constant 0 : i32
    return %c0_i32, %c0_i32_0 : i32, i32
  }
  func.func @transform_1(%arg0: i32) -> (i32, i32) {
    %c0_i32 = arith.constant 0 : i32
    %c0_i32_0 = arith.constant 0 : i32
    return %c0_i32, %arg0 : i32, i32
  }
  func.func @transform_2(%arg0: i32) -> (i32, i32) {
    %c0_i32 = arith.constant 0 : i32
    %c0_i32_0 = arith.constant 0 : i32
    return %c0_i32, %arg0 : i32, i32
  }
}

module attributes {stable_mosaic.version = 11 : i64} {
  func.func @bn_relu_scalar_kernel(%arg0: i32, %arg1: memref<25x128xf32, #tpu.memory_space<vmem>>, %arg2: memref<8xf32, #tpu.memory_space<smem>>, %arg3: memref<25x128xf32, #tpu.memory_space<vmem>>) attributes {dimension_semantics = [#tpu.dimension_semantics<arbitrary>], iteration_bounds = array<i64: 1>, scalar_prefetch = 0 : i64, scratch_operands = 0 : i64, tpu.core_type = #tpu.core_type<tc>, window_params = [{pipeline_mode = #tpu.pipeline_mode<synchronous>, transform_indices = @transform_0, window_bounds = array<i64: 25, 128>}, {transform_indices = @transform_1, window_bounds = array<i64: 8>}, {pipeline_mode = #tpu.pipeline_mode<synchronous>, transform_indices = @transform_2, window_bounds = array<i64: 25, 128>}]} {
    %c0 = arith.constant 0 : index
    %c0_0 = arith.constant 0 : index
    %0 = vector.load %arg1[%c0, %c0_0] : memref<25x128xf32, #tpu.memory_space<vmem>>, vector<25x128xf32>
    %c0_1 = arith.constant 0 : index
    %1 = memref.load %arg2[%c0_1] : memref<8xf32, #tpu.memory_space<smem>>
    %2 = vector.broadcast %1 : f32 to vector<25x128xf32>
    %3 = arith.addf %0, %2 : vector<25x128xf32>
    %4 = vector.shape_cast %3 : vector<25x128xf32> to vector<1x25x128xf32>
    %cst = arith.constant dense<0.000000e+00> : vector<1xf32>
    %5 = vector.multi_reduction <add>, %4, %cst [1, 2] : vector<1x25x128xf32> to vector<1xf32>
    %6 = vector.shape_cast %5 : vector<1xf32> to vector<1x1x1xf32>
    %7 = vector.extract %6[0, 0, 0] : f32 from vector<1x1x1xf32>
    %cst_2 = arith.constant 3.125000e-04 : f32
    %8 = arith.mulf %7, %cst_2 : f32
    %9 = vector.broadcast %8 : f32 to vector<25x128xf32>
    %10 = arith.subf %3, %9 : vector<25x128xf32>
    %11 = arith.mulf %10, %10 : vector<25x128xf32>
    %12 = vector.shape_cast %11 : vector<25x128xf32> to vector<1x25x128xf32>
    %cst_3 = arith.constant dense<0.000000e+00> : vector<1xf32>
    %13 = vector.multi_reduction <add>, %12, %cst_3 [1, 2] : vector<1x25x128xf32> to vector<1xf32>
    %14 = vector.shape_cast %13 : vector<1xf32> to vector<1x1x1xf32>
    %15 = vector.extract %14[0, 0, 0] : f32 from vector<1x1x1xf32>
    %cst_4 = arith.constant 3.125000e-04 : f32
    %16 = arith.mulf %15, %cst_4 : f32
    %c1 = arith.constant 1 : index
    %17 = memref.load %arg2[%c1] : memref<8xf32, #tpu.memory_space<smem>>
    %cst_5 = arith.constant 9.99999974E-6 : f32
    %18 = arith.addf %16, %cst_5 : f32
    %19 = math.rsqrt %18 : f32
    %20 = arith.mulf %17, %19 : f32
    %21 = vector.broadcast %20 : f32 to vector<25x128xf32>
    %22 = arith.mulf %10, %21 : vector<25x128xf32>
    %c2 = arith.constant 2 : index
    %23 = memref.load %arg2[%c2] : memref<8xf32, #tpu.memory_space<smem>>
    %24 = vector.broadcast %23 : f32 to vector<25x128xf32>
    %25 = arith.addf %22, %24 : vector<25x128xf32>
    %cst_6 = arith.constant 0.000000e+00 : f32
    %26 = vector.broadcast %cst_6 : f32 to vector<25x128xf32>
    %27 = arith.maximumf %25, %26 : vector<25x128xf32>
    %c3 = arith.constant 3 : index
    %28 = memref.load %arg2[%c3] : memref<8xf32, #tpu.memory_space<smem>>
    %29 = vector.broadcast %28 : f32 to vector<25x128xf32>
    %30 = arith.mulf %27, %29 : vector<25x128xf32>
    %c4 = arith.constant 4 : index
    %31 = memref.load %arg2[%c4] : memref<8xf32, #tpu.memory_space<smem>>
    %32 = vector.broadcast %31 : f32 to vector<25x128xf32>
    %33 = arith.addf %30, %32 : vector<25x128xf32>
    %c0_7 = arith.constant 0 : index
    %c0_8 = arith.constant 0 : index
    %34 = vector.load %arg3[%c0_7, %c0_8] : memref<25x128xf32, #tpu.memory_space<vmem>>, vector<25x128xf32>
    tpu.vector_store %arg3[%c0_7, %c0_8], %33 {strides = array<i32>} : memref<25x128xf32, #tpu.memory_space<vmem>>, vector<25x128xf32>,
    return
  }
  func.func @transform_0(%arg0: i32) -> (i32, i32) {
    %c0_i32 = arith.constant 0 : i32
    %c0_i32_0 = arith.constant 0 : i32
    %c0_i32_1 = arith.constant 0 : i32
    return %c0_i32, %c0_i32_0 : i32, i32
  }
  func.func @transform_1(%arg0: i32) -> i32 {
    %c0_i32 = arith.constant 0 : i32
    %c0_i32_0 = arith.constant 0 : i32
    return %c0_i32 : i32
  }
  func.func @transform_2(%arg0: i32) -> (i32, i32) {
    %c0_i32 = arith.constant 0 : i32
    %c0_i32_0 = arith.constant 0 : i32
    %c0_i32_1 = arith.constant 0 : i32
    return %c0_i32, %c0_i32_0 : i32, i32
  }
}

</mosaic_0001>

<bundles_post_ra>
// kernel: heatmap_decoder_forward.6
= control target key start
LH: loop header
LB: loop body
LE: loop exit
PB: predicated region body
PF: predicated region fallthrough
CT: control target
= control target key end

     0   :  { %7 = vsyncpa [#allocation3], 0  ;;  %s4284_s0 = inlined_call_operand.vmem [shape: bf16[32,512], index: 0, kind: input, shape index: {}]   ;;  %s4285_s1 = inlined_call_operand.hbm [shape: bf16[512,2304], index: 1, kind: input, shape index: {}]   ;;  %s4286_s2 = inlined_call_operand.vmem [shape: f32[32,2304], index: 2, kind: output, shape index: {}]  }
   0x1   :  { %9 = vsyncpa [#allocation3 + $0x1], 0  ;;  %s3675_s9 = smov 0   ;;  %s3677_s10 = smov 0  }
   0x2   :  { %s3679_s11 = smov 0   ;;  %s3681_s12 = smov 0  }
   0x3 LB: > { %s3694_s13 = sadd.s32 4294967295, %s3654_s12   ;;  %s3697_s14 = sadd.s32 1, %s3654_s12   ;;  %s3654_s12 = sphi %s3681_s12, %s4294_s12   ;;  %s3650_s11 = sphi %s3679_s11, %s4293_s11   ;;  %s3646_s10 = sphi %s3677_s10, %s4292_s10   ;;  %s3642_s9 = sphi %s3675_s9, %s4291_s9  }
   0x4   : > { %s40_s15 = ssub.s32 %s3654_s12, %s3697_s14  ;;  %s43_s16 = sadd.s32 1, %s3650_s11 }
   0x5   : > { %p41_p0 = scmp.eq.s32.totalorder %s40_s15, 0  ;;  %p50_p1 = scmp.ne.s32.totalorder %s3650_s11, %s3646_s10 }
   0x6   : > { %p51_p2 = scmp.eq.s32.totalorder %s3654_s12, 0  ;;  %p56_p3 = scmp.ne.s32.totalorder %s3646_s10, %s3642_s9 }
   0x7   : > { %s3707_s17 = scalar_select %p41_p0, %s3650_s11, %s43_s16  }
   0x8   : > { %p52_p4 = por %p51_p2, %p50_p1  ;;  %p57_p5 = scmp.eq.s32.totalorder %s3694_s13, 0 }
   0x9   : > { %p80_p6 = scmp.eq.s32.totalorder %s3694_s13, 1  ;;  %p3121_p8 = scmp.lt.s32.totalorder %s3654_s12, 2 }
   0xa   : > { %p3711_p7 = por %p57_p5, %p56_p3  ;;  %s109_s20 = sand.u32 1, %s3650_s11  }
   0xb   : > { %p3716_p9 = por %p80_p6, %p50_p1  ;;  %s3112_s21 = smul.u32 2304, %s109_s20 }
   0xc   : > { %s3022_s22 = smul.u32 576, %s3654_s12  ;;  %p3722_p10 = pnand %p3121_p8, %p52_p4 }
   0xd   : > { %s4288_s19 = scalar_select %p3716_p9, 1, 0 }
   0xe   : > { %s3729_s26 = scalar_lea.hbm %s4285_s1, %s3022_s22  ;;  %s113_s27 = scalar_lea.vmem [#allocation2], %s3112_s21 }
   0xf   : > { %s120_s28 = sshll.u32 %s113_s27, 4  ;;  %s3733_s29 = scalar_lea.sflag [#allocation3], %s109_s20  ;;  %s3731_s28 = int_to_ptr.vmem [resolvable:$true] %s120_s28 }
  0x10   : > { %s3590_s30 = scalar_lea.hbm %s3729_s26, 36864  ;;  %p3592_p12 = pneg %p3722_p10 }
  0x11   : > { %p3591_p11 = scmp.ne.s32.totalorder %s3729_s26, %s3590_s30  ;;  %s3595_s5 = scalar_lea.hbm %s4285_s1, 73728 }
  0x12   : > { %p3596_p1 = scmp.lt.u32.totalorder %s3729_s26, %s4285_s1  ;;  %p3597_p2 = scmp.lt.u32.totalorder %s3595_s5, %s3590_s30 }
  0x13   : > { %p3593_p13 = pnand %p3592_p12, %p3591_p11  ;;  %p3599_p4 = scmp.lt.u32.totalorder %s3590_s30, %s3729_s26 }
  0x14   : > { %p3598_p3 = por %p3597_p2, %p3596_p1 }
  0x15   : > { %p3594_p0 = pneg %p3593_p13 }
  0x16   : > { %p3600_p5 = por %p3599_p4, %p3598_p3 }
  0x18   : > { %p3601_p6 = pnand %p3600_p5, %p3594_p0 }
  0x1a   : > { %3604 = shalt.err (!%p3601_p6)
}
  0x1b   : > { %s3605_s8 = scalar_lea.vmem %s3731_s28, 36864  ;;  %s3656_s9 = smov [#allocation2]  }
  0x1c   : > { %p3606_p8 = scmp.ne.s32.totalorder %s3731_s28, %s3605_s8  ;;  %s3610_s15 = sshll.u32 %s3656_s9, 4  ;;  %s3611_s15 = int_to_ptr.vmem [resolvable:$false] %s3610_s15 }
  0x1d   : > { %s3612_s16 = scalar_lea.vmem %s3611_s15, 73728  ;;  %p3613_p9 = scmp.lt.s32.totalorder %s3731_s28, %s3611_s15 }
  0x1e   : > { %p3608_p11 = pnand %p3606_p8, %p3592_p12  ;;  %p3614_p1 = scmp.lt.s32.totalorder %s3612_s16, %s3605_s8 }
  0x20   : > { %p3609_p13 = pneg %p3608_p11  ;;  %p3615_p2 = por %p3614_p1, %p3613_p9 }
  0x22   : > { %p3616_p3 = pnand %p3615_p2, %p3609_p13 }
  0x24   : > { %3619 = shalt.err (!%p3616_p3)
}
  0x25   : > { %s3657_s20 = smov 1152   ;;  %s3658_s21 = smov 576  }
  0x26   : > { %s3659_s22 = smov 36   ;;  %p2722_p12 = scmp.ge.s32.totalorder %s3654_s12, 1 }
  0x27   : > { %3120 = dma.hbm_to_vmem [thread:$0]  (!%p3722_p10), %s3729_s26, 36864, %s3731_s28, %s3733_s29, %s3657_s20, %s3658_s21, %s3659_s22  }
  0x28   : > { %p128_p0 = scmp.lt.s32.totalorder %s3654_s12, 3 }
  0x2a   : > { %p129_p4 = pnand %p2722_p12, %p128_p0 }
  0x2b   : > { %s3764_s24 = sand.u32 (!%p129_p4), 1, %s3646_s10  }
  0x2c   : > { %132 = sbr.rel (%p129_p4) target bundleno = 577 (0x241), region = 28  ;;  %s135_s27 = scalar_lea.sflag (!%p129_p4), [#allocation3], %s3764_s24 }
  0x2d   : > { %s3113_s25 = smul.u32 (!%p129_p4), 2304, %s3764_s24 }
  0x2f   : > { %s3768_s30 = scalar_lea.vmem (!%p129_p4), [#allocation2], %s3113_s25 }
  0x33   : > { %3637 = dma.done.wait (%p3711_p7), %s135_s27, 36864  }
  0x34   : > { %3639 = vsyncadd (%p3711_p7), %s135_s27, 4294930432  ;;  %v3157_v0 = vld [vmem:[%s3768_s30 + $0x4] ss:$36 sps:$4 sm:$0xff]   ;;  %v3159_v1 = vld [vmem:[%s3768_s30 + $0xc] ss:$36 sps:$4 sm:$0xff]   ;;  %s3114_s29 = smul.u32 288, %s3764_s24 }
  0x35   : > { %2001 = vmatprep.subr.bf16.mxu0 %v3157_v0  ;;  %v3161_v2 = vld [vmem:[%s3768_s30] ss:$36 sps:$4 sm:$0xff]   ;;  %v3162_v3 = vld [vmem:[%s3768_s30 + $0x8] ss:$36 sps:$4 sm:$0xff]   ;;  %2107 = vmatprep.subr.bf16.mxu1 %v3159_v1  ;;  %v3165_v5 = vld [vmem:[%s3768_s30 + $0x54] ss:$36 sps:$4 sm:$0xff]  }
  0x36   : > { %v3163_v4 = vld [vmem:[%s3768_s30 + $0x4c] ss:$36 sps:$4 sm:$0xff]   ;;  %2002 = vmatpush1.bf16.msra.mxu0 %v3161_v2  ;;  %2108 = vmatpush1.bf16.msra.mxu1 %v3162_v3  ;;  %v3169_v8 = vld [vmem:[%s3768_s30 + $0x94] ss:$36 sps:$4 sm:$0xff]   ;;  %v3171_v9 = vld [vmem:[%s3768_s30 + $0x9c] ss:$36 sps:$4 sm:$0xff]  }
  0x37   : > { %v3167_v6 = vld [vmem:[%s3768_s30 + $0x48] ss:$36 sps:$4 sm:$0xff]   ;;  %2003 = vmatprep.subr.bf16.mxu0 %v3163_v4  ;;  %v3168_v7 = vld [vmem:[%s3768_s30 + $0x50] ss:$36 sps:$4 sm:$0xff]   ;;  %2109 = vmatprep.subr.bf16.mxu1 %v3165_v5  ;;  %v3174_v11 = vld [vmem:[%s3768_s30 + $0x98] ss:$36 sps:$4 sm:$0xff]  }
  0x38   : > { %v3173_v10 = vld [vmem:[%s3768_s30 + $0x90] ss:$36 sps:$4 sm:$0xff]   ;;  %v3175_v12 = vld [vmem:[%s3768_s30 + $0xdc] ss:$36 sps:$4 sm:$0xff]   ;;  %v3177_v13 = vld [vmem:[%s3768_s30 + $0xe4] ss:$36 sps:$4 sm:$0xff]  }
  0x39   : > { %v3179_v14 = vld [vmem:[%s3768_s30 + $0xd8] ss:$36 sps:$4 sm:$0xff]   ;;  %v3180_v15 = vld [vmem:[%s3768_s30 + $0xe0] ss:$36 sps:$4 sm:$0xff]   ;;  %v3183_v17 = vld [vmem:[%s3768_s30 + $0x12c] ss:$36 sps:$4 sm:$0xff]  }
  0x3a   : > { %2004 = vmatpush1.bf16.msra.mxu0 %v3167_v6  ;;  %2110 = vmatpush1.bf16.msra.mxu1 %v3168_v7  ;;  %v3181_v16 = vld [vmem:[%s3768_s30 + $0x124] ss:$36 sps:$4 sm:$0xff]   ;;  %v3187_v20 = vld [vmem:[%s3768_s30 + $0x16c] ss:$36 sps:$4 sm:$0xff]   ;;  %v3189_v21 = vld [vmem:[%s3768_s30 + $0x174] ss:$36 sps:$4 sm:$0xff]  }
  0x3b   : > { %2005 = vmatprep.subr.bf16.mxu0 %v3169_v8  ;;  %2111 = vmatprep.subr.bf16.mxu1 %v3171_v9  ;;  %v3185_v18 = vld [vmem:[%s3768_s30 + $0x120] ss:$36 sps:$4 sm:$0xff]   ;;  %v3186_v19 = vld [vmem:[%s3768_s30 + $0x128] ss:$36 sps:$4 sm:$0xff]   ;;  %v3192_v23 = vld [vmem:[%s3768_s30 + $0x170] ss:$36 sps:$4 sm:$0xff]  }
  0x3c   : > { %v3191_v22 = vld [vmem:[%s3768_s30 + $0x168] ss:$36 sps:$4 sm:$0xff]   ;;  %v3193_v24 = vld [vmem:[%s3768_s30 + $0x1b4] ss:$36 sps:$4 sm:$0xff]   ;;  %v3195_v25 = vld [vmem:[%s3768_s30 + $0x1bc] ss:$36 sps:$4 sm:$0xff]  }
  0x3d   : > { %v3197_v26 = vld [vmem:[%s3768_s30 + $0x1b0] ss:$36 sps:$4 sm:$0xff]   ;;  %v3198_v27 = vld [vmem:[%s3768_s30 + $0x1b8] ss:$36 sps:$4 sm:$0xff]   ;;  %v3201_v29 = vld [vmem:[%s3768_s30 + $0x204] ss:$36 sps:$4 sm:$0xff]  }
  0x3e   : > { %2006 = vmatpush1.bf16.msra.mxu0 %v3173_v10  ;;  %2112 = vmatpush1.bf16.msra.mxu1 %v3174_v11  ;;  %v3199_v28 = vld [vmem:[%s3768_s30 + $0x1fc] ss:$36 sps:$4 sm:$0xff]   ;;  %v3205_v32 = vld [vmem:[%s3768_s30 + $0x244] ss:$36 sps:$4 sm:$0xff]   ;;  %v3207_v33 = vld [vmem:[%s3768_s30 + $0x24c] ss:$36 sps:$4 sm:$0xff]  }
  0x3f   : > { %2007 = vmatprep.subr.bf16.mxu0 %v3175_v12  ;;  %2113 = vmatprep.subr.bf16.mxu1 %v3177_v13  ;;  %v3203_v30 = vld [vmem:[%s3768_s30 + $0x1f8] ss:$36 sps:$4 sm:$0xff]   ;;  %v3204_v31 = vld [vmem:[%s3768_s30 + $0x200] ss:$36 sps:$4 sm:$0xff]   ;;  %v3210_v35 = vld [vmem:[%s3768_s30 + $0x248] ss:$36 sps:$4 sm:$0xff]  }
  0x40   : > { %v3209_v34 = vld [vmem:[%s3768_s30 + $0x240] ss:$36 sps:$4 sm:$0xff]   ;;  %v3211_v36 = vld [vmem:[%s3768_s30 + $0x28c] ss:$36 sps:$4 sm:$0xff]   ;;  %v3213_v37 = vld [vmem:[%s3768_s30 + $0x294] ss:$36 sps:$4 sm:$0xff]  }
  0x41   : > { %v3215_v38 = vld [vmem:[%s3768_s30 + $0x288] ss:$36 sps:$4 sm:$0xff]   ;;  %v3216_v39 = vld [vmem:[%s3768_s30 + $0x290] ss:$36 sps:$4 sm:$0xff]   ;;  %v3219_v41 = vld [vmem:[%s3768_s30 + $0x2dc] ss:$36 sps:$4 sm:$0xff]  }
  0x42   : > { %2008 = vmatpush1.bf16.msra.mxu0 %v3179_v14  ;;  %2114 = vmatpush1.bf16.msra.mxu1 %v3180_v15  ;;  %v3217_v40 = vld [vmem:[%s3768_s30 + $0x2d4] ss:$36 sps:$4 sm:$0xff]   ;;  %v3223_v44 = vld [vmem:[%s3768_s30 + $0x31c] ss:$36 sps:$4 sm:$0xff]   ;;  %v3225_v45 = vld [vmem:[%s3768_s30 + $0x324] ss:$36 sps:$4 sm:$0xff]  }
  0x43   : > { %2009 = vmatprep.subr.bf16.mxu0 %v3181_v16  ;;  %2115 = vmatprep.subr.bf16.mxu1 %v3183_v17  ;;  %v3221_v42 = vld [vmem:[%s3768_s30 + $0x2d0] ss:$36 sps:$4 sm:$0xff]   ;;  %v3222_v43 = vld [vmem:[%s3768_s30 + $0x2d8] ss:$36 sps:$4 sm:$0xff]   ;;  %v3228_v48 = vld [vmem:[%s3768_s30 + $0x320] ss:$36 sps:$4 sm:$0xff]  }
  0x44   : > { %v3227_v46 = vld [vmem:[%s3768_s30 + $0x318] ss:$36 sps:$4 sm:$0xff]   ;;  %v3824_v47 = vld [vmem:[%s4284_s0 + $0x4] ss:$16 sps:$4 sm:$0xff]   ;;  %v3231_v50 = vld [vmem:[%s3768_s30 + $0x36c] ss:$36 sps:$4 sm:$0xff]  }
  0x45   : > { %v3229_v49 = vld [vmem:[%s3768_s30 + $0x364] ss:$36 sps:$4 sm:$0xff]   ;;  %2033 = vmatprep.mubr.bf16.mxu0 %v3824_v47  ;;  %2139 = vmatprep.mubr.bf16.mxu1 %v3824_v47  ;;  %v3235_v53 = vld [vmem:[%s3768_s30 + $0x3ac] ss:$36 sps:$4 sm:$0xff]   ;;  %v3237_v54 = vld [vmem:[%s3768_s30 + $0x3b4] ss:$36 sps:$4 sm:$0xff]  }
  0x46   : > { %2010 = vmatpush1.bf16.msra.mxu0 %v3185_v18  ;;  %2116 = vmatpush1.bf16.msra.mxu1 %v3186_v19  ;;  %v3233_v51 = vld [vmem:[%s3768_s30 + $0x360] ss:$36 sps:$4 sm:$0xff]   ;;  %v3234_v52 = vld [vmem:[%s3768_s30 + $0x368] ss:$36 sps:$4 sm:$0xff]   ;;  %v3240_v56 = vld [vmem:[%s3768_s30 + $0x3b0] ss:$36 sps:$4 sm:$0xff]  }
  0x47   : > { %2011 = vmatprep.subr.bf16.mxu0 %v3187_v20  ;;  %2117 = vmatprep.subr.bf16.mxu1 %v3189_v21  ;;  %v3239_v55 = vld [vmem:[%s3768_s30 + $0x3a8] ss:$36 sps:$4 sm:$0xff]   ;;  %v3241_v57 = vld [vmem:[%s3768_s30 + $0x3f4] ss:$36 sps:$4 sm:$0xff]   ;;  %v3243_v58 = vld [vmem:[%s3768_s30 + $0x3fc] ss:$36 sps:$4 sm:$0xff]  }
  0x48   : > { %v3245_v59 = vld [vmem:[%s3768_s30 + $0x3f0] ss:$36 sps:$4 sm:$0xff]   ;;  %v3246_v60 = vld [vmem:[%s3768_s30 + $0x3f8] ss:$36 sps:$4 sm:$0xff]   ;;  %v3249_v62 = vld [vmem:[%s3768_s30 + $0x444] ss:$36 sps:$4 sm:$0xff]  }
  0x49   : > { %v3247_v61 = vld [vmem:[%s3768_s30 + $0x43c] ss:$36 sps:$4 sm:$0xff]   ;;  %v3257_v1 = vld [vmem:[%s3768_s30 + $0x484] ss:$36 sps:$4 sm:$0xff]   ;;  %v3260_v2 = vld [vmem:[%s3768_s30 + $0x48c] ss:$36 sps:$4 sm:$0xff]  }
  0x4a   : > { %2012 = vmatpush1.bf16.msra.mxu0 %v3191_v22  ;;  %2118 = vmatpush1.bf16.msra.mxu1 %v3192_v23  ;;  %v3251_v63 = vld [vmem:[%s3768_s30 + $0x438] ss:$36 sps:$4 sm:$0xff]   ;;  %v3252_v0 = vld [vmem:[%s3768_s30 + $0x440] ss:$36 sps:$4 sm:$0xff]   ;;  %v3258_v4 = vld [vmem:[%s3768_s30 + $0x488] ss:$36 sps:$4 sm:$0xff]  }
  0x4b   : > { %2013 = vmatprep.subr.bf16.mxu0 %v3193_v24  ;;  %2119 = vmatprep.subr.bf16.mxu1 %v3195_v25  ;;  %v3255_v3 = vld [vmem:[%s3768_s30 + $0x480] ss:$36 sps:$4 sm:$0xff]   ;;  %v3264_v6 = vld [vmem:[%s3768_s30 + $0x4cc] ss:$36 sps:$4 sm:$0xff]   ;;  %v3267_v7 = vld [vmem:[%s3768_s30 + $0x4d4] ss:$36 sps:$4 sm:$0xff]  }
  0x4c   : > { %v3852_v5 = vld [vmem:[%s4284_s0] ss:$16 sps:$4 sm:$0xff]   ;;  %v3262_v8 = vld [vmem:[%s3768_s30 + $0x4c8] ss:$36 sps:$4 sm:$0xff]   ;;  %v3270_v10 = vld [vmem:[%s3768_s30 + $0x514] ss:$36 sps:$4 sm:$0xff]  }
  0x4d   : > { %v3265_v9 = vld [vmem:[%s3768_s30 + $0x4d0] ss:$36 sps:$4 sm:$0xff]   ;;  %v3273_v11 = vld [vmem:[%s3768_s30 + $0x51c] ss:$36 sps:$4 sm:$0xff]   ;;  %v3279_v15 = vld [vmem:[%s3768_s30 + $0x564] ss:$36 sps:$4 sm:$0xff]  }
  0x4e   : > { %2014 = vmatpush1.bf16.msra.mxu0 %v3197_v26  ;;  %2120 = vmatpush1.bf16.msra.mxu1 %v3198_v27  ;;  %v3268_v12 = vld [vmem:[%s3768_s30 + $0x510] ss:$36 sps:$4 sm:$0xff]   ;;  %v3271_v13 = vld [vmem:[%s3768_s30 + $0x518] ss:$36 sps:$4 sm:$0xff]   ;;  %v3277_v17 = vld [vmem:[%s3768_s30 + $0x560] ss:$36 sps:$4 sm:$0xff]  }
  0x4f   : > { %2015 = vmatprep.subr.bf16.mxu0 %v3199_v28  ;;  %2121 = vmatprep.subr.bf16.mxu1 %v3201_v29  ;;  %v3276_v14 = vld [vmem:[%s3768_s30 + $0x55c] ss:$36 sps:$4 sm:$0xff]   ;;  %v3282_v18 = vld [vmem:[%s3768_s30 + $0x5a4] ss:$36 sps:$4 sm:$0xff]   ;;  %v3285_v19 = vld [vmem:[%s3768_s30 + $0x5ac] ss:$36 sps:$4 sm:$0xff]  }
  0x50   : > { %v3274_v16 = vld [vmem:[%s3768_s30 + $0x558] ss:$36 sps:$4 sm:$0xff]   ;;  %v3280_v20 = vld [vmem:[%s3768_s30 + $0x5a0] ss:$36 sps:$4 sm:$0xff]   ;;  %v3283_v21 = vld [vmem:[%s3768_s30 + $0x5a8] ss:$36 sps:$4 sm:$0xff]  }
  0x51   : > { %v3288_v22 = vld [vmem:[%s3768_s30 + $0x5ec] ss:$36 sps:$4 sm:$0xff]   ;;  %v3291_v23 = vld [vmem:[%s3768_s30 + $0x5f4] ss:$36 sps:$4 sm:$0xff]   ;;  %v3297_v29 = vld [vmem:[%s3768_s30 + $0x63c] ss:$36 sps:$4 sm:$0xff]  }
  0x52   : > { %2016 = vmatpush1.bf16.msra.mxu0 %v3203_v30  ;;  %2122 = vmatpush1.bf16.msra.mxu1 %v3204_v31  ;;  %v3286_v24 = vld [vmem:[%s3768_s30 + $0x5e8] ss:$36 sps:$4 sm:$0xff]   ;;  %v3878_v25 = vld [vmem:[%s4284_s0 + $0x24] ss:$16 sps:$4 sm:$0xff]   ;;  %v3884_v27 = vld [vmem:[%s4284_s0 + $0x20] ss:$16 sps:$4 sm:$0xff]  }
  0x53   : > { %2017 = vmatprep.subr.bf16.mxu0 %v3205_v32  ;;  %2123 = vmatprep.subr.bf16.mxu1 %v3207_v33  ;;  %v3289_v26 = vld [vmem:[%s3768_s30 + $0x5f0] ss:$36 sps:$4 sm:$0xff]   ;;  %v3295_v31 = vld [vmem:[%s3768_s30 + $0x638] ss:$36 sps:$4 sm:$0xff]   ;;  %s4153_s3 = scalar_lea.vmem [#allocation4], %s3114_s29  ;;  %p4290_p7 = scmp.ne.s32.totalorder %s4288_s19, 0 }
  0x54   : > { %v3294_v28 = vld [vmem:[%s3768_s30 + $0x634] ss:$36 sps:$4 sm:$0xff]   ;;  %v3300_v32 = vld [vmem:[%s3768_s30 + $0x67c] ss:$36 sps:$4 sm:$0xff]   ;;  %s3023_s24 = smul.u32 (%p4290_p7), 72, %s3694_s13 }
  0x55   : > { %v3292_v30 = vld [vmem:[%s3768_s30 + $0x630] ss:$36 sps:$4 sm:$0xff]   ;;  %v3898_v33 = vld [vmem:[%s4284_s0 + $0xc] ss:$16 sps:$4 sm:$0xff]  }
  0x56   : > { %2018 = vmatpush1.bf16.msra.mxu0 %v3209_v34  ;;  %2124 = vmatpush1.bf16.msra.mxu1 %v3210_v35  ;;  %v3303_v34 = vld [vmem:[%s3768_s30 + $0x684] ss:$36 sps:$4 sm:$0xff]   ;;  %v3298_v35 = vld [vmem:[%s3768_s30 + $0x678] ss:$36 sps:$4 sm:$0xff]   ;;  %s4203_s5 = scalar_lea.vmem (%p4290_p7), %s4286_s2, %s3023_s24 }
  0x57   : > { %2019 = vmatprep.subr.bf16.mxu0 %v3211_v36  ;;  %2125 = vmatprep.subr.bf16.mxu1 %v3213_v37  ;;  %v3301_v36 = vld [vmem:[%s3768_s30 + $0x680] ss:$36 sps:$4 sm:$0xff]  }
  0x58   : > { %v3306_v37 = vld [vmem:[%s3768_s30 + $0x6c4] ss:$36 sps:$4 sm:$0xff]  }
  0x5a   : > { %2020 = vmatpush1.bf16.msra.mxu0 %v3215_v38  ;;  %2126 = vmatpush1.bf16.msra.mxu1 %v3216_v39  ;;  %v3309_v38 = vld [vmem:[%s3768_s30 + $0x6cc] ss:$36 sps:$4 sm:$0xff]   ;;  %v3304_v39 = vld [vmem:[%s3768_s30 + $0x6c0] ss:$36 sps:$4 sm:$0xff]  }
  0x5b   : > { %2021 = vmatprep.subr.bf16.mxu0 %v3217_v40  ;;  %2127 = vmatprep.subr.bf16.mxu1 %v3219_v41  ;;  %v3307_v40 = vld [vmem:[%s3768_s30 + $0x6c8] ss:$36 sps:$4 sm:$0xff]  }
  0x5c   : > { %v3312_v41 = vld [vmem:[%s3768_s30 + $0x70c] ss:$36 sps:$4 sm:$0xff]  }
  0x5e   : > { %2022 = vmatpush1.bf16.msra.mxu0 %v3221_v42  ;;  %2128 = vmatpush1.bf16.msra.mxu1 %v3222_v43  ;;  %v3315_v42 = vld [vmem:[%s3768_s30 + $0x714] ss:$36 sps:$4 sm:$0xff]   ;;  %v3310_v43 = vld [vmem:[%s3768_s30 + $0x708] ss:$36 sps:$4 sm:$0xff]  }
  0x5f   : > { %2023 = vmatprep.subr.bf16.mxu0 %v3223_v44  ;;  %2129 = vmatprep.subr.bf16.mxu1 %v3225_v45  ;;  %v3313_v44 = vld [vmem:[%s3768_s30 + $0x710] ss:$36 sps:$4 sm:$0xff]  }
  0x60   : > { %v3318_v45 = vld [vmem:[%s3768_s30 + $0x754] ss:$36 sps:$4 sm:$0xff]  }
  0x62   : > { %2024 = vmatpush1.bf16.msra.mxu0 %v3227_v46  ;;  %2130 = vmatpush1.bf16.msra.mxu1 %v3228_v48  ;;  %v3321_v46 = vld [vmem:[%s3768_s30 + $0x75c] ss:$36 sps:$4 sm:$0xff]   ;;  %v3316_v48 = vld [vmem:[%s3768_s30 + $0x750] ss:$36 sps:$4 sm:$0xff]  }
  0x63   : > { %2025 = vmatprep.subr.bf16.mxu0 %v3229_v49  ;;  %2131 = vmatprep.subr.bf16.mxu1 %v3231_v50  ;;  %v3319_v49 = vld [vmem:[%s3768_s30 + $0x758] ss:$36 sps:$4 sm:$0xff]  }
  0x64   : > { %v3324_v50 = vld [vmem:[%s3768_s30 + $0x79c] ss:$36 sps:$4 sm:$0xff]  }
  0x66   : > { %2026 = vmatpush1.bf16.msra.mxu0 %v3233_v51  ;;  %2132 = vmatpush1.bf16.msra.mxu1 %v3234_v52  ;;  %v3327_v51 = vld [vmem:[%s3768_s30 + $0x7a4] ss:$36 sps:$4 sm:$0xff]   ;;  %v3322_v52 = vld [vmem:[%s3768_s30 + $0x798] ss:$36 sps:$4 sm:$0xff]  }
  0x67   : > { %2027 = vmatprep.subr.bf16.mxu0 %v3235_v53  ;;  %2133 = vmatprep.subr.bf16.mxu1 %v3237_v54  ;;  %v3325_v53 = vld [vmem:[%s3768_s30 + $0x7a0] ss:$36 sps:$4 sm:$0xff]  }
  0x68   : > { %v3330_v54 = vld [vmem:[%s3768_s30 + $0x7e4] ss:$36 sps:$4 sm:$0xff]  }
  0x6a   : > { %2028 = vmatpush1.bf16.msra.mxu0 %v3239_v55  ;;  %2134 = vmatpush1.bf16.msra.mxu1 %v3240_v56  ;;  %v3333_v55 = vld [vmem:[%s3768_s30 + $0x7ec] ss:$36 sps:$4 sm:$0xff]   ;;  %v3328_v56 = vld [vmem:[%s3768_s30 + $0x7e0] ss:$36 sps:$4 sm:$0xff]  }
  0x6b   : > { %2029 = vmatprep.subr.bf16.mxu0 %v3241_v57  ;;  %2135 = vmatprep.subr.bf16.mxu1 %v3243_v58  ;;  %v3331_v57 = vld [vmem:[%s3768_s30 + $0x7e8] ss:$36 sps:$4 sm:$0xff]  }
  0x6c   : > { %v3336_v58 = vld [vmem:[%s3768_s30 + $0x82c] ss:$36 sps:$4 sm:$0xff]  }
  0x6e   : > { %2030 = vmatpush1.bf16.msra.mxu0 %v3245_v59  ;;  %2136 = vmatpush1.bf16.msra.mxu1 %v3246_v60  ;;  %v3339_v59 = vld [vmem:[%s3768_s30 + $0x834] ss:$36 sps:$4 sm:$0xff]   ;;  %v3334_v60 = vld [vmem:[%s3768_s30 + $0x828] ss:$36 sps:$4 sm:$0xff]  }
  0x6f   : > { %2031 = vmatprep.subr.bf16.mxu0 %v3247_v61  ;;  %2137 = vmatprep.subr.bf16.mxu1 %v3249_v62  ;;  %v3337_v61 = vld [vmem:[%s3768_s30 + $0x830] ss:$36 sps:$4 sm:$0xff]  }
  0x70   : > { %v3345_v62 = vld [vmem:[%s3768_s30 + $0x874] ss:$36 sps:$4 sm:$0xff]  }
  0x72   : > { %2032 = vmatpush1.bf16.msra.mxu0 %v3251_v63  ;;  %2138 = vmatpush1.bf16.msra.mxu1 %v3252_v0  ;;  %v3348_v63 = vld [vmem:[%s3768_s30 + $0x87c] ss:$36 sps:$4 sm:$0xff]   ;;  %v3343_v0 = vld [vmem:[%s3768_s30 + $0x870] ss:$36 sps:$4 sm:$0xff]  }
  0x73   : > { %2054 = vmatprep.subr.bf16.mxu0 %v3257_v1  ;;  %2160 = vmatprep.subr.bf16.mxu1 %v3260_v2  ;;  %v3346_v1 = vld [vmem:[%s3768_s30 + $0x878] ss:$36 sps:$4 sm:$0xff]  }
  0x74   : > { %v3351_v2 = vld [vmem:[%s3768_s30 + $0x8bc] ss:$36 sps:$4 sm:$0xff]  }
  0x75   : > { %2034 = vmatmul.mubr.bf16.vlgmr.msra.gmra.mrb[0].mxu0 %v3852_v5  ;;  %2140 = vmatmul.mubr.bf16.vlgmr.msra.gmra.mrb[0].mxu1 %v3852_v5 }
  0x76   : > { %2055 = vmatpush1.bf16.msra.mxu0 %v3255_v3  ;;  %2161 = vmatpush1.bf16.msra.mxu1 %v3258_v4  ;;  %v3354_v3 = vld [vmem:[%s3768_s30 + $0x8c4] ss:$36 sps:$4 sm:$0xff]   ;;  %v3349_v4 = vld [vmem:[%s3768_s30 + $0x8b8] ss:$36 sps:$4 sm:$0xff]  }
  0x77   : > { %2056 = vmatprep.subr.bf16.mxu0 %v3264_v6  ;;  %2162 = vmatprep.subr.bf16.mxu1 %v3267_v7  ;;  %v3352_v6 = vld [vmem:[%s3768_s30 + $0x8c0] ss:$36 sps:$4 sm:$0xff]   ;;  %v3360_v7 = vld [vmem:[%s3768_s30 + $0x14] ss:$36 sps:$4 sm:$0xff]  }
  0x78   : > { %2043 = vmatprep.mubr.bf16.mxu0 %v3878_v25  ;;  %2149 = vmatprep.mubr.bf16.mxu1 %v3878_v25 }
  0x7a   : > { %2057 = vmatpush1.bf16.msra.mxu0 %v3262_v8  ;;  %2163 = vmatpush1.bf16.msra.mxu1 %v3265_v9  ;;  %v3363_v8 = vld [vmem:[%s3768_s30 + $0x1c] ss:$36 sps:$4 sm:$0xff]   ;;  %v3942_v9 = vld [vmem:[%s4284_s0 + $0x8] ss:$16 sps:$4 sm:$0xff]  }
  0x7b   : > { %2058 = vmatprep.subr.bf16.mxu0 %v3270_v10  ;;  %2164 = vmatprep.subr.bf16.mxu1 %v3273_v11  ;;  %v3358_v10 = vld [vmem:[%s3768_s30 + $0x10] ss:$36 sps:$4 sm:$0xff]   ;;  %v3361_v11 = vld [vmem:[%s3768_s30 + $0x18] ss:$36 sps:$4 sm:$0xff]  }
  0x7d   : > { %2044 = vmatmul.mubr.bf16.gmra.mrb[4].mxu0 %v3884_v27  ;;  %2150 = vmatmul.mubr.bf16.gmra.mrb[4].mxu1 %v3884_v27 }
  0x7e   : > { %2059 = vmatpush1.bf16.msra.mxu0 %v3268_v12  ;;  %2165 = vmatpush1.bf16.msra.mxu1 %v3271_v13  ;;  %v3366_v12 = vld [vmem:[%s3768_s30 + $0x5c] ss:$36 sps:$4 sm:$0xff]   ;;  %v3369_v13 = vld [vmem:[%s3768_s30 + $0x64] ss:$36 sps:$4 sm:$0xff]  }
  0x7f   : > { %2060 = vmatprep.subr.bf16.mxu0 %v3276_v14  ;;  %2166 = vmatprep.subr.bf16.mxu1 %v3279_v15  ;;  %v3951_v14 = vld [vmem:[%s4284_s0 + $0x2c] ss:$16 sps:$4 sm:$0xff]  }
  0x80   : > { %2086 = vmatprep.mubr.bf16.mxu0 %v3898_v33  ;;  %2192 = vmatprep.mubr.bf16.mxu1 %v3898_v33  ;;  %v3364_v15 = vld [vmem:[%s3768_s30 + $0x58] ss:$36 sps:$4 sm:$0xff]  }
  0x82   : > { %2061 = vmatpush1.bf16.msra.mxu0 %v3274_v16  ;;  %2167 = vmatpush1.bf16.msra.mxu1 %v3277_v17  ;;  %v3367_v16 = vld [vmem:[%s3768_s30 + $0x60] ss:$36 sps:$4 sm:$0xff]  }
  0x83   : > { %2062 = vmatprep.subr.bf16.mxu0 %v3282_v18  ;;  %2168 = vmatprep.subr.bf16.mxu1 %v3285_v19  ;;  %v3375_v17 = vld [vmem:[%s3768_s30 + $0xa4] ss:$36 sps:$4 sm:$0xff]   ;;  %v3378_v18 = vld [vmem:[%s3768_s30 + $0xac] ss:$36 sps:$4 sm:$0xff]  }
  0x84   : > { %v3964_v19 = vld [vmem:[%s4284_s0 + $0x28] ss:$16 sps:$4 sm:$0xff]  }
  0x86   : > { %2063 = vmatpush1.bf16.msra.mxu0 %v3280_v20  ;;  %2169 = vmatpush1.bf16.msra.mxu1 %v3283_v21  ;;  %v3373_v20 = vld [vmem:[%s3768_s30 + $0xa0] ss:$36 sps:$4 sm:$0xff]   ;;  %v3376_v21 = vld [vmem:[%s3768_s30 + $0xa8] ss:$36 sps:$4 sm:$0xff]  }
  0x87   : > { %2064 = vmatprep.subr.bf16.mxu0 %v3288_v22  ;;  %2170 = vmatprep.subr.bf16.mxu1 %v3291_v23  ;;  %v3381_v22 = vld [vmem:[%s3768_s30 + $0xec] ss:$36 sps:$4 sm:$0xff]   ;;  %v3384_v23 = vld [vmem:[%s3768_s30 + $0xf4] ss:$36 sps:$4 sm:$0xff]  }
  0x8a   : > { %2065 = vmatpush1.bf16.msra.mxu0 %v3286_v24  ;;  %2171 = vmatpush1.bf16.msra.mxu1 %v3289_v26  ;;  %v3379_v24 = vld [vmem:[%s3768_s30 + $0xe8] ss:$36 sps:$4 sm:$0xff]   ;;  %v3382_v26 = vld [vmem:[%s3768_s30 + $0xf0] ss:$36 sps:$4 sm:$0xff]  }
  0x8b   : > { %2066 = vmatprep.subr.bf16.mxu0 %v3294_v28  ;;  %2172 = vmatprep.subr.bf16.mxu1 %v3297_v29  ;;  %v3387_v28 = vld [vmem:[%s3768_s30 + $0x134] ss:$36 sps:$4 sm:$0xff]   ;;  %v3390_v29 = vld [vmem:[%s3768_s30 + $0x13c] ss:$36 sps:$4 sm:$0xff]  }
  0x8e   : > { %2067 = vmatpush1.bf16.msra.mxu0 %v3292_v30  ;;  %2173 = vmatpush1.bf16.msra.mxu1 %v3295_v31  ;;  %v3385_v30 = vld [vmem:[%s3768_s30 + $0x130] ss:$36 sps:$4 sm:$0xff]   ;;  %v3388_v31 = vld [vmem:[%s3768_s30 + $0x138] ss:$36 sps:$4 sm:$0xff]  }
  0x8f   : > { %2068 = vmatprep.subr.bf16.mxu0 %v3300_v32  ;;  %2174 = vmatprep.subr.bf16.mxu1 %v3303_v34  ;;  %v3393_v32 = vld [vmem:[%s3768_s30 + $0x17c] ss:$36 sps:$4 sm:$0xff]   ;;  %v3396_v34 = vld [vmem:[%s3768_s30 + $0x184] ss:$36 sps:$4 sm:$0xff]  }
  0x92   : > { %2069 = vmatpush1.bf16.msra.mxu0 %v3298_v35  ;;  %2175 = vmatpush1.bf16.msra.mxu1 %v3301_v36  ;;  %v3391_v35 = vld [vmem:[%s3768_s30 + $0x178] ss:$36 sps:$4 sm:$0xff]   ;;  %v3394_v36 = vld [vmem:[%s3768_s30 + $0x180] ss:$36 sps:$4 sm:$0xff]  }
  0x93   : > { %2070 = vmatprep.subr.bf16.mxu0 %v3306_v37  ;;  %2176 = vmatprep.subr.bf16.mxu1 %v3309_v38  ;;  %v3402_v37 = vld [vmem:[%s3768_s30 + $0x1cc] ss:$36 sps:$4 sm:$0xff]   ;;  %v3397_v38 = vld [vmem:[%s3768_s30 + $0x1c0] ss:$36 sps:$4 sm:$0xff]  }
  0x96   : > { %2071 = vmatpush1.bf16.msra.mxu0 %v3304_v39  ;;  %2177 = vmatpush1.bf16.msra.mxu1 %v3307_v40  ;;  %v3400_v39 = vld [vmem:[%s3768_s30 + $0x1c8] ss:$36 sps:$4 sm:$0xff]  }
  0x97   : > { %2072 = vmatprep.subr.bf16.mxu0 %v3312_v41  ;;  %2178 = vmatprep.subr.bf16.mxu1 %v3315_v42  ;;  %v3405_v40 = vld [vmem:[%s3768_s30 + $0x20c] ss:$36 sps:$4 sm:$0xff]   ;;  %v3408_v41 = vld [vmem:[%s3768_s30 + $0x214] ss:$36 sps:$4 sm:$0xff]  }
  0x98   : > { %v3403_v42 = vld [vmem:[%s3768_s30 + $0x208] ss:$36 sps:$4 sm:$0xff]  }
  0x9a   : > { %2073 = vmatpush1.bf16.msra.mxu0 %v3310_v43  ;;  %2179 = vmatpush1.bf16.msra.mxu1 %v3313_v44  ;;  %v3406_v43 = vld [vmem:[%s3768_s30 + $0x210] ss:$36 sps:$4 sm:$0xff]  }
  0x9b   : > { %2074 = vmatprep.subr.bf16.mxu0 %v3318_v45  ;;  %2180 = vmatprep.subr.bf16.mxu1 %v3321_v46  ;;  %v3411_v44 = vld [vmem:[%s3768_s30 + $0x254] ss:$36 sps:$4 sm:$0xff]   ;;  %v3414_v45 = vld [vmem:[%s3768_s30 + $0x25c] ss:$36 sps:$4 sm:$0xff]  }
  0x9c   : > { %v3409_v46 = vld [vmem:[%s3768_s30 + $0x250] ss:$36 sps:$4 sm:$0xff]  }
  0x9e   : > { %2075 = vmatpush1.bf16.msra.mxu0 %v3316_v48  ;;  %2181 = vmatpush1.bf16.msra.mxu1 %v3319_v49  ;;  %v3412_v48 = vld [vmem:[%s3768_s30 + $0x258] ss:$36 sps:$4 sm:$0xff]  }
  0x9f   : > { %2076 = vmatprep.subr.bf16.mxu0 %v3324_v50  ;;  %2182 = vmatprep.subr.bf16.mxu1 %v3327_v51  ;;  %v3417_v49 = vld [vmem:[%s3768_s30 + $0x29c] ss:$36 sps:$4 sm:$0xff]   ;;  %v3420_v50 = vld [vmem:[%s3768_s30 + $0x2a4] ss:$36 sps:$4 sm:$0xff]  }
  0xa0   : > { %v3415_v51 = vld [vmem:[%s3768_s30 + $0x298] ss:$36 sps:$4 sm:$0xff]  }
  0xa2   : > { %2077 = vmatpush1.bf16.msra.mxu0 %v3322_v52  ;;  %2183 = vmatpush1.bf16.msra.mxu1 %v3325_v53  ;;  %v3418_v52 = vld [vmem:[%s3768_s30 + $0x2a0] ss:$36 sps:$4 sm:$0xff]  }
  0xa3   : > { %2078 = vmatprep.subr.bf16.mxu0 %v3330_v54  ;;  %2184 = vmatprep.subr.bf16.mxu1 %v3333_v55  ;;  %v3423_v53 = vld [vmem:[%s3768_s30 + $0x2e4] ss:$36 sps:$4 sm:$0xff]   ;;  %v3426_v54 = vld [vmem:[%s3768_s30 + $0x2ec] ss:$36 sps:$4 sm:$0xff]  }
  0xa4   : > { %v3421_v55 = vld [vmem:[%s3768_s30 + $0x2e0] ss:$36 sps:$4 sm:$0xff]  }
  0xa6   : > { %2079 = vmatpush1.bf16.msra.mxu0 %v3328_v56  ;;  %2185 = vmatpush1.bf16.msra.mxu1 %v3331_v57  ;;  %v3424_v56 = vld [vmem:[%s3768_s30 + $0x2e8] ss:$36 sps:$4 sm:$0xff]  }
  0xa7   : > { %2080 = vmatprep.subr.bf16.mxu0 %v3336_v58  ;;  %2186 = vmatprep.subr.bf16.mxu1 %v3339_v59  ;;  %v3429_v57 = vld [vmem:[%s3768_s30 + $0x32c] ss:$36 sps:$4 sm:$0xff]   ;;  %v3432_v58 = vld [vmem:[%s3768_s30 + $0x334] ss:$36 sps:$4 sm:$0xff]  }
  0xa8   : > { %v3427_v59 = vld [vmem:[%s3768_s30 + $0x328] ss:$36 sps:$4 sm:$0xff]  }
  0xaa   : > { %2081 = vmatpush1.bf16.msra.mxu0 %v3334_v60  ;;  %2187 = vmatpush1.bf16.msra.mxu1 %v3337_v61  ;;  %v3430_v60 = vld [vmem:[%s3768_s30 + $0x330] ss:$36 sps:$4 sm:$0xff]  }
  0xab   : > { %2082 = vmatprep.subr.bf16.mxu0 %v3345_v62  ;;  %2188 = vmatprep.subr.bf16.mxu1 %v3348_v63  ;;  %v3435_v61 = vld [vmem:[%s3768_s30 + $0x374] ss:$36 sps:$4 sm:$0xff]   ;;  %v3438_v62 = vld [vmem:[%s3768_s30 + $0x37c] ss:$36 sps:$4 sm:$0xff]  }
  0xac   : > { %v3433_v63 = vld [vmem:[%s3768_s30 + $0x370] ss:$36 sps:$4 sm:$0xff]  }
  0xae   : > { %2083 = vmatpush1.bf16.msra.mxu0 %v3343_v0  ;;  %2189 = vmatpush1.bf16.msra.mxu1 %v3346_v1  ;;  %v3436_v0 = vld [vmem:[%s3768_s30 + $0x378] ss:$36 sps:$4 sm:$0xff]  }
  0xaf   : > { %2084 = vmatprep.subr.bf16.mxu0 %v3351_v2  ;;  %2190 = vmatprep.subr.bf16.mxu1 %v3354_v3  ;;  %v3441_v1 = vld [vmem:[%s3768_s30 + $0x3bc] ss:$36 sps:$4 sm:$0xff]   ;;  %v3444_v2 = vld [vmem:[%s3768_s30 + $0x3c4] ss:$36 sps:$4 sm:$0xff]  }
  0xb0   : > { %v3439_v3 = vld [vmem:[%s3768_s30 + $0x3b8] ss:$36 sps:$4 sm:$0xff]  }
  0xb2   : > { %2085 = vmatpush1.bf16.msra.mxu0 %v3349_v4  ;;  %2191 = vmatpush1.bf16.msra.mxu1 %v3352_v6  ;;  %v3442_v4 = vld [vmem:[%s3768_s30 + $0x3c0] ss:$36 sps:$4 sm:$0xff]  }
  0xb3   : > { %2213 = vmatprep.subr.bf16.mxu0 %v3360_v7  ;;  %2319 = vmatprep.subr.bf16.mxu1 %v3363_v8  ;;  %v3447_v6 = vld [vmem:[%s3768_s30 + $0x404] ss:$36 sps:$4 sm:$0xff]   ;;  %v3450_v7 = vld [vmem:[%s3768_s30 + $0x40c] ss:$36 sps:$4 sm:$0xff]  }
  0xb4   : > { %v3445_v8 = vld [vmem:[%s3768_s30 + $0x400] ss:$36 sps:$4 sm:$0xff]  }
  0xb5   : > { %2087 = vmatmul.mubr.bf16.vlgmr.msra.gmra.mrb[0].mxu0 %v3942_v9  ;;  %2193 = vmatmul.mubr.bf16.vlgmr.msra.gmra.mrb[0].mxu1 %v3942_v9 }
  0xb6   : > { %2214 = vmatpush1.bf16.msra.mxu0 %v3358_v10  ;;  %2320 = vmatpush1.bf16.msra.mxu1 %v3361_v11  ;;  %v3448_v10 = vld [vmem:[%s3768_s30 + $0x408] ss:$36 sps:$4 sm:$0xff]  }
  0xb7   : > { %2215 = vmatprep.subr.bf16.mxu0 %v3366_v12  ;;  %2321 = vmatprep.subr.bf16.mxu1 %v3369_v13  ;;  %v3453_v11 = vld [vmem:[%s3768_s30 + $0x44c] ss:$36 sps:$4 sm:$0xff]   ;;  %v3456_v12 = vld [vmem:[%s3768_s30 + $0x454] ss:$36 sps:$4 sm:$0xff]  }
  0xb8   : > { %2096 = vmatprep.mubr.bf16.mxu0 %v3951_v14  ;;  %2202 = vmatprep.mubr.bf16.mxu1 %v3951_v14  ;;  %v3451_v13 = vld [vmem:[%s3768_s30 + $0x448] ss:$36 sps:$4 sm:$0xff]  }
  0xba   : > { %2216 = vmatpush1.bf16.msra.mxu0 %v3364_v15  ;;  %2322 = vmatpush1.bf16.msra.mxu1 %v3367_v16  ;;  %v3454_v15 = vld [vmem:[%s3768_s30 + $0x450] ss:$36 sps:$4 sm:$0xff]  }
  0xbb   : > { %2217 = vmatprep.subr.bf16.mxu0 %v3375_v17  ;;  %2323 = vmatprep.subr.bf16.mxu1 %v3378_v18  ;;  %v3459_v16 = vld [vmem:[%s3768_s30 + $0x494] ss:$36 sps:$4 sm:$0xff]   ;;  %v3462_v17 = vld [vmem:[%s3768_s30 + $0x49c] ss:$36 sps:$4 sm:$0xff]  }
  0xbc   : > { %v3457_v18 = vld [vmem:[%s3768_s30 + $0x490] ss:$36 sps:$4 sm:$0xff]  }
  0xbd   : > { %2097 = vmatmul.mubr.bf16.gmra.mrb[4].mxu0 %v3964_v19  ;;  %2203 = vmatmul.mubr.bf16.gmra.mrb[4].mxu1 %v3964_v19 }
  0xbe   : > { %2218 = vmatpush1.bf16.msra.mxu0 %v3373_v20  ;;  %2324 = vmatpush1.bf16.msra.mxu1 %v3376_v21  ;;  %v3460_v20 = vld [vmem:[%s3768_s30 + $0x498] ss:$36 sps:$4 sm:$0xff]  }
  0xbf   : > { %2219 = vmatprep.subr.bf16.mxu0 %v3381_v22  ;;  %2325 = vmatprep.subr.bf16.mxu1 %v3384_v23  ;;  %v3465_v21 = vld [vmem:[%s3768_s30 + $0x4dc] ss:$36 sps:$4 sm:$0xff]   ;;  %v3468_v22 = vld [vmem:[%s3768_s30 + $0x4e4] ss:$36 sps:$4 sm:$0xff]  }
  0xc0   : > { %2245 = vmatprep.mubr.bf16.mxu0 %v3824_v47  ;;  %2351 = vmatprep.mubr.bf16.mxu1 %v3824_v47  ;;  %v3399_v47 = vld [vmem:[%s3768_s30 + $0x1c4] ss:$36 sps:$4 sm:$0xff]   ;;  %v3463_v23 = vld [vmem:[%s3768_s30 + $0x4d8] ss:$36 sps:$4 sm:$0xff]  }
  0xc2   : > { %2220 = vmatpush1.bf16.msra.mxu0 %v3379_v24  ;;  %2326 = vmatpush1.bf16.msra.mxu1 %v3382_v26  ;;  %v3466_v24 = vld [vmem:[%s3768_s30 + $0x4e0] ss:$36 sps:$4 sm:$0xff]  }
  0xc3   : > { %2221 = vmatprep.subr.bf16.mxu0 %v3387_v28  ;;  %2327 = vmatprep.subr.bf16.mxu1 %v3390_v29  ;;  %v3471_v26 = vld [vmem:[%s3768_s30 + $0x524] ss:$36 sps:$4 sm:$0xff]   ;;  %v3474_v28 = vld [vmem:[%s3768_s30 + $0x52c] ss:$36 sps:$4 sm:$0xff]  }
  0xc4   : > { %v3469_v29 = vld [vmem:[%s3768_s30 + $0x520] ss:$36 sps:$4 sm:$0xff]  }
  0xc6   : > { %2222 = vmatpush1.bf16.msra.mxu0 %v3385_v30  ;;  %2328 = vmatpush1.bf16.msra.mxu1 %v3388_v31  ;;  %v3472_v30 = vld [vmem:[%s3768_s30 + $0x528] ss:$36 sps:$4 sm:$0xff]   ;;  %v3480_v31 = vld [vmem:[%s3768_s30 + $0x574] ss:$36 sps:$4 sm:$0xff]  }
  0xc7   : > { %2223 = vmatprep.subr.bf16.mxu0 %v3393_v32  ;;  %2329 = vmatprep.subr.bf16.mxu1 %v3396_v34  ;;  %v3475_v32 = vld [vmem:[%s3768_s30 + $0x568] ss:$36 sps:$4 sm:$0xff]   ;;  %v3478_v34 = vld [vmem:[%s3768_s30 + $0x570] ss:$36 sps:$4 sm:$0xff]  }
  0xca   : > { %2224 = vmatpush1.bf16.msra.mxu0 %v3391_v35  ;;  %2330 = vmatpush1.bf16.msra.mxu1 %v3394_v36  ;;  %v3486_v35 = vld [vmem:[%s3768_s30 + $0x5bc] ss:$36 sps:$4 sm:$0xff]   ;;  %v3481_v36 = vld [vmem:[%s3768_s30 + $0x5b0] ss:$36 sps:$4 sm:$0xff]  }
  0xcb   : > { %2225 = vmatprep.subr.bf16.mxu0 %v3399_v47  ;;  %2331 = vmatprep.subr.bf16.mxu1 %v3402_v37  ;;  %v3489_v47 = vld [vmem:[%s3768_s30 + $0x5fc] ss:$36 sps:$4 sm:$0xff]   ;;  %v3492_v37 = vld [vmem:[%s3768_s30 + $0x604] ss:$36 sps:$4 sm:$0xff]  }
  0xce   : > { %2226 = vmatpush1.bf16.msra.mxu0 %v3397_v38  ;;  %2332 = vmatpush1.bf16.msra.mxu1 %v3400_v39  ;;  %v3487_v38 = vld [vmem:[%s3768_s30 + $0x5f8] ss:$36 sps:$4 sm:$0xff]   ;;  %v3490_v39 = vld [vmem:[%s3768_s30 + $0x600] ss:$36 sps:$4 sm:$0xff]  }
  0xcf   : > { %2227 = vmatprep.subr.bf16.mxu0 %v3405_v40  ;;  %2333 = vmatprep.subr.bf16.mxu1 %v3408_v41  ;;  %v3498_v40 = vld [vmem:[%s3768_s30 + $0x64c] ss:$36 sps:$4 sm:$0xff]   ;;  %v3493_v41 = vld [vmem:[%s3768_s30 + $0x640] ss:$36 sps:$4 sm:$0xff]  }
  0xd2   : > { %2228 = vmatpush1.bf16.msra.mxu0 %v3403_v42  ;;  %2334 = vmatpush1.bf16.msra.mxu1 %v3406_v43  ;;  %v3496_v42 = vld [vmem:[%s3768_s30 + $0x648] ss:$36 sps:$4 sm:$0xff]  }
  0xd3   : > { %2229 = vmatprep.subr.bf16.mxu0 %v3411_v44  ;;  %2335 = vmatprep.subr.bf16.mxu1 %v3414_v45  ;;  %v3501_v43 = vld [vmem:[%s3768_s30 + $0x68c] ss:$36 sps:$4 sm:$0xff]   ;;  %v3504_v44 = vld [vmem:[%s3768_s30 + $0x694] ss:$36 sps:$4 sm:$0xff]  }
  0xd4   : > { %v3499_v45 = vld [vmem:[%s3768_s30 + $0x688] ss:$36 sps:$4 sm:$0xff]  }
  0xd6   : > { %2230 = vmatpush1.bf16.msra.mxu0 %v3409_v46  ;;  %2336 = vmatpush1.bf16.msra.mxu1 %v3412_v48  ;;  %v3502_v46 = vld [vmem:[%s3768_s30 + $0x690] ss:$36 sps:$4 sm:$0xff]  }
  0xd7   : > { %2231 = vmatprep.subr.bf16.mxu0 %v3417_v49  ;;  %2337 = vmatprep.subr.bf16.mxu1 %v3420_v50  ;;  %v3507_v48 = vld [vmem:[%s3768_s30 + $0x6d4] ss:$36 sps:$4 sm:$0xff]   ;;  %v3510_v49 = vld [vmem:[%s3768_s30 + $0x6dc] ss:$36 sps:$4 sm:$0xff]  }
  0xd8   : > { %v3505_v50 = vld [vmem:[%s3768_s30 + $0x6d0] ss:$36 sps:$4 sm:$0xff]  }
  0xda   : > { %2232 = vmatpush1.bf16.msra.mxu0 %v3415_v51  ;;  %2338 = vmatpush1.bf16.msra.mxu1 %v3418_v52  ;;  %v3508_v51 = vld [vmem:[%s3768_s30 + $0x6d8] ss:$36 sps:$4 sm:$0xff]  }
  0xdb   : > { %2233 = vmatprep.subr.bf16.mxu0 %v3423_v53  ;;  %2339 = vmatprep.subr.bf16.mxu1 %v3426_v54  ;;  %v3513_v52 = vld [vmem:[%s3768_s30 + $0x71c] ss:$36 sps:$4 sm:$0xff]   ;;  %v3516_v53 = vld [vmem:[%s3768_s30 + $0x724] ss:$36 sps:$4 sm:$0xff]  }
  0xdc   : > { %v3511_v54 = vld [vmem:[%s3768_s30 + $0x718] ss:$36 sps:$4 sm:$0xff]  }
  0xde   : > { %2234 = vmatpush1.bf16.msra.mxu0 %v3421_v55  ;;  %2340 = vmatpush1.bf16.msra.mxu1 %v3424_v56  ;;  %v3514_v55 = vld [vmem:[%s3768_s30 + $0x720] ss:$36 sps:$4 sm:$0xff]  }
  0xdf   : > { %2235 = vmatprep.subr.bf16.mxu0 %v3429_v57  ;;  %2341 = vmatprep.subr.bf16.mxu1 %v3432_v58  ;;  %v3519_v56 = vld [vmem:[%s3768_s30 + $0x764] ss:$36 sps:$4 sm:$0xff]   ;;  %v3522_v57 = vld [vmem:[%s3768_s30 + $0x76c] ss:$36 sps:$4 sm:$0xff]  }
  0xe0   : > { %v3517_v58 = vld [vmem:[%s3768_s30 + $0x760] ss:$36 sps:$4 sm:$0xff]  }
  0xe2   : > { %2236 = vmatpush1.bf16.msra.mxu0 %v3427_v59  ;;  %2342 = vmatpush1.bf16.msra.mxu1 %v3430_v60  ;;  %v3520_v59 = vld [vmem:[%s3768_s30 + $0x768] ss:$36 sps:$4 sm:$0xff]  }
  0xe3   : > { %2237 = vmatprep.subr.bf16.mxu0 %v3435_v61  ;;  %2343 = vmatprep.subr.bf16.mxu1 %v3438_v62  ;;  %v3525_v60 = vld [vmem:[%s3768_s30 + $0x7ac] ss:$36 sps:$4 sm:$0xff]   ;;  %v3528_v61 = vld [vmem:[%s3768_s30 + $0x7b4] ss:$36 sps:$4 sm:$0xff]  }
  0xe4   : > { %v3523_v62 = vld [vmem:[%s3768_s30 + $0x7a8] ss:$36 sps:$4 sm:$0xff]  }
  0xe6   : > { %2238 = vmatpush1.bf16.msra.mxu0 %v3433_v63  ;;  %2344 = vmatpush1.bf16.msra.mxu1 %v3436_v0  ;;  %v3526_v63 = vld [vmem:[%s3768_s30 + $0x7b0] ss:$36 sps:$4 sm:$0xff]  }
  0xe7   : > { %2239 = vmatprep.subr.bf16.mxu0 %v3441_v1  ;;  %2345 = vmatprep.subr.bf16.mxu1 %v3444_v2  ;;  %v3531_v0 = vld [vmem:[%s3768_s30 + $0x7f4] ss:$36 sps:$4 sm:$0xff]   ;;  %v3534_v1 = vld [vmem:[%s3768_s30 + $0x7fc] ss:$36 sps:$4 sm:$0xff]  }
  0xe8   : > { %v3529_v2 = vld [vmem:[%s3768_s30 + $0x7f0] ss:$36 sps:$4 sm:$0xff]  }
  0xea   : > { %2240 = vmatpush1.bf16.msra.mxu0 %v3439_v3  ;;  %2346 = vmatpush1.bf16.msra.mxu1 %v3442_v4  ;;  %v3532_v3 = vld [vmem:[%s3768_s30 + $0x7f8] ss:$36 sps:$4 sm:$0xff]  }
  0xeb   : > { %2241 = vmatprep.subr.bf16.mxu0 %v3447_v6  ;;  %2347 = vmatprep.subr.bf16.mxu1 %v3450_v7  ;;  %v3537_v4 = vld [vmem:[%s3768_s30 + $0x83c] ss:$36 sps:$4 sm:$0xff]   ;;  %v3540_v6 = vld [vmem:[%s3768_s30 + $0x844] ss:$36 sps:$4 sm:$0xff]  }
  0xec   : > { %v3535_v7 = vld [vmem:[%s3768_s30 + $0x838] ss:$36 sps:$4 sm:$0xff]  }
  0xee   : > { %2242 = vmatpush1.bf16.msra.mxu0 %v3445_v8  ;;  %2348 = vmatpush1.bf16.msra.mxu1 %v3448_v10  ;;  %v3538_v8 = vld [vmem:[%s3768_s30 + $0x840] ss:$36 sps:$4 sm:$0xff]  }
  0xef   : > { %2243 = vmatprep.subr.bf16.mxu0 %v3453_v11  ;;  %2349 = vmatprep.subr.bf16.mxu1 %v3456_v12  ;;  %v3543_v10 = vld [vmem:[%s3768_s30 + $0x884] ss:$36 sps:$4 sm:$0xff]   ;;  %v3546_v11 = vld [vmem:[%s3768_s30 + $0x88c] ss:$36 sps:$4 sm:$0xff]  }
  0xf0   : > { %v3541_v12 = vld [vmem:[%s3768_s30 + $0x880] ss:$36 sps:$4 sm:$0xff]  }
  0xf2   : > { %2244 = vmatpush1.bf16.msra.mxu0 %v3451_v13  ;;  %2350 = vmatpush1.bf16.msra.mxu1 %v3454_v15  ;;  %v3544_v13 = vld [vmem:[%s3768_s30 + $0x888] ss:$36 sps:$4 sm:$0xff]  }
  0xf3   : > { %2266 = vmatprep.subr.bf16.mxu0 %v3459_v16  ;;  %2372 = vmatprep.subr.bf16.mxu1 %v3462_v17  ;;  %v3549_v15 = vld [vmem:[%s3768_s30 + $0x8cc] ss:$36 sps:$4 sm:$0xff]   ;;  %v3552_v16 = vld [vmem:[%s3768_s30 + $0x8d4] ss:$36 sps:$4 sm:$0xff]  }
  0xf4   : > { %v3547_v17 = vld [vmem:[%s3768_s30 + $0x8c8] ss:$36 sps:$4 sm:$0xff]  }
  0xf5   : > { %2246 = vmatmul.mubr.bf16.vlgmr.msra.gmra.mrb[8].mxu0 %v3852_v5  ;;  %2352 = vmatmul.mubr.bf16.vlgmr.msra.gmra.mrb[8].mxu1 %v3852_v5  ;;  %v3477_v5 = vld [vmem:[%s3768_s30 + $0x56c] ss:$36 sps:$4 sm:$0xff]  }
  0xf6   : > { %2267 = vmatpush1.bf16.msra.mxu0 %v3457_v18  ;;  %2373 = vmatpush1.bf16.msra.mxu1 %v3460_v20  ;;  %v3550_v18 = vld [vmem:[%s3768_s30 + $0x8d0] ss:$36 sps:$4 sm:$0xff]   ;;  %v3553_v20 = vld [vmem:[%s3768_s30 + $0x260] ss:$36 sps:$4 sm:$0xff]  }
  0xf7   : > { %2268 = vmatprep.subr.bf16.mxu0 %v3465_v21  ;;  %2374 = vmatprep.subr.bf16.mxu1 %v3468_v22  ;;  %v3554_v21 = vld [vmem:[%s3768_s30 + $0x6e0] ss:$36 sps:$4 sm:$0xff]  }
  0xf8   : > { %2255 = vmatprep.mubr.bf16.mxu0 %v3878_v25  ;;  %2361 = vmatprep.mubr.bf16.mxu1 %v3878_v25  ;;  %v3483_v25 = vld [vmem:[%s3768_s30 + $0x5b4] ss:$36 sps:$4 sm:$0xff]   ;;  %v3555_v22 = vld [vmem:[%s3768_s30 + $0x20] ss:$36 sps:$4 sm:$0xff]  }
  0xfa   : > { %2269 = vmatpush1.bf16.msra.mxu0 %v3463_v23  ;;  %2375 = vmatpush1.bf16.msra.mxu1 %v3466_v24  ;;  %v3556_v23 = vld [vmem:[%s3768_s30 + $0x4a0] ss:$36 sps:$4 sm:$0xff]   ;;  %v3557_v24 = vld [vmem:[%s3768_s30 + $0x2a8] ss:$36 sps:$4 sm:$0xff]  }
  0xfb   : > { %2270 = vmatprep.subr.bf16.mxu0 %v3471_v26  ;;  %2376 = vmatprep.subr.bf16.mxu1 %v3474_v28  ;;  %v3558_v26 = vld [vmem:[%s3768_s30 + $0x728] ss:$36 sps:$4 sm:$0xff]  }
  0xfc   : > { %v3559_v28 = vld [vmem:[%s3768_s30 + $0x68] ss:$36 sps:$4 sm:$0xff]  }
  0xfd   : > { %2256 = vmatmul.mubr.bf16.gmra.mrb[12].mxu0 %v3884_v27  ;;  %2362 = vmatmul.mubr.bf16.gmra.mrb[12].mxu1 %v3884_v27  ;;  %v3484_v27 = vld [vmem:[%s3768_s30 + $0x5b8] ss:$36 sps:$4 sm:$0xff]  }
  0xfe   : > { %2271 = vmatpush1.bf16.msra.mxu0 %v3469_v29  ;;  %2377 = vmatpush1.bf16.msra.mxu1 %v3472_v30  ;;  %v3560_v29 = vld [vmem:[%s3768_s30 + $0x4e8] ss:$36 sps:$4 sm:$0xff]   ;;  %v3561_v30 = vld [vmem:[%s3768_s30 + $0x2f0] ss:$36 sps:$4 sm:$0xff]  }
  0xff   : > { %2272 = vmatprep.subr.bf16.mxu0 %v3477_v5  ;;  %2378 = vmatprep.subr.bf16.mxu1 %v3480_v31  ;;  %v3562_v5 = vld [vmem:[%s3768_s30 + $0x770] ss:$36 sps:$4 sm:$0xff]  }
 0x100   : > { %2298 = vmatprep.mubr.bf16.mxu0 %v3898_v33  ;;  %2404 = vmatprep.mubr.bf16.mxu1 %v3898_v33  ;;  %v3495_v33 = vld [vmem:[%s3768_s30 + $0x644] ss:$36 sps:$4 sm:$0xff]   ;;  %v3563_v31 = vld [vmem:[%s3768_s30 + $0xb0] ss:$36 sps:$4 sm:$0xff]  }
 0x102   : > { %2273 = vmatpush1.bf16.msra.mxu0 %v3475_v32  ;;  %2379 = vmatpush1.bf16.msra.mxu1 %v3478_v34  ;;  %v3564_v32 = vld [vmem:[%s3768_s30 + $0x530] ss:$36 sps:$4 sm:$0xff]   ;;  %v3565_v34 = vld [vmem:[%s3768_s30 + $0x338] ss:$36 sps:$4 sm:$0xff]  }
 0x103   : > { %2274 = vmatprep.subr.bf16.mxu0 %v3483_v25  ;;  %2380 = vmatprep.subr.bf16.mxu1 %v3486_v35  ;;  %v3566_v25 = vld [vmem:[%s3768_s30 + $0x7b8] ss:$36 sps:$4 sm:$0xff]  }
 0x104   : > { %v3567_v35 = vld [vmem:[%s3768_s30 + $0xf8] ss:$36 sps:$4 sm:$0xff]  }
 0x106   : > { %2275 = vmatpush1.bf16.msra.mxu0 %v3481_v36  ;;  %2381 = vmatpush1.bf16.msra.mxu1 %v3484_v27  ;;  %v3568_v36 = vld [vmem:[%s3768_s30 + $0x578] ss:$36 sps:$4 sm:$0xff]   ;;  %v3569_v27 = vld [vmem:[%s3768_s30 + $0x380] ss:$36 sps:$4 sm:$0xff]  }
 0x107   : > { %2276 = vmatprep.subr.bf16.mxu0 %v3489_v47  ;;  %2382 = vmatprep.subr.bf16.mxu1 %v3492_v37  ;;  %v3570_v47 = vld [vmem:[%s3768_s30 + $0x800] ss:$36 sps:$4 sm:$0xff]  }
 0x108   : > { %v3585_v37 = vld [vmem:[%s4284_s0 + $0x4] ss:$16 sps:$4 sm:$0xff]  }
 0x10a   : > { %2277 = vmatpush1.bf16.msra.mxu0 %v3487_v38  ;;  %2383 = vmatpush1.bf16.msra.mxu1 %v3490_v39  ;;  %v3586_v38 = vld [vmem:[%s4284_s0 + $0xc] ss:$16 sps:$4 sm:$0xff]   ;;  %v3571_v39 = vld [vmem:[%s3768_s30 + $0x140] ss:$36 sps:$4 sm:$0xff]  }
 0x10b   : > { %2278 = vmatprep.subr.bf16.mxu0 %v3495_v33  ;;  %2384 = vmatprep.subr.bf16.mxu1 %v3498_v40  ;;  %v3572_v33 = vld [vmem:[%s3768_s30 + $0x5c0] ss:$36 sps:$4 sm:$0xff]   ;;  %v3573_v40 = vld [vmem:[%s3768_s30 + $0x3c8] ss:$36 sps:$4 sm:$0xff]  }
 0x10e   : > { %2279 = vmatpush1.bf16.msra.mxu0 %v3493_v41  ;;  %2385 = vmatpush1.bf16.msra.mxu1 %v3496_v42  ;;  %v3574_v41 = vld [vmem:[%s3768_s30 + $0x848] ss:$36 sps:$4 sm:$0xff]  }
 0x10f   : > { %2280 = vmatprep.subr.bf16.mxu0 %v3501_v43  ;;  %2386 = vmatprep.subr.bf16.mxu1 %v3504_v44  ;;  %v3575_v42 = vld [vmem:[%s3768_s30 + $0x188] ss:$36 sps:$4 sm:$0xff]   ;;  %v3577_v44 = vld [vmem:[%s3768_s30 + $0x410] ss:$36 sps:$4 sm:$0xff]  }
 0x110   : > { %v3576_v43 = vld [vmem:[%s3768_s30 + $0x608] ss:$36 sps:$4 sm:$0xff]  }
 0x112   : > { %2281 = vmatpush1.bf16.msra.mxu0 %v3499_v45  ;;  %2387 = vmatpush1.bf16.msra.mxu1 %v3502_v46  ;;  %v3578_v45 = vld [vmem:[%s3768_s30 + $0x890] ss:$36 sps:$4 sm:$0xff]  }
 0x113   : > { %2282 = vmatprep.subr.bf16.mxu0 %v3507_v48  ;;  %2388 = vmatprep.subr.bf16.mxu1 %v3510_v49  ;;  %v3579_v46 = vld [vmem:[%s3768_s30 + $0x1d0] ss:$36 sps:$4 sm:$0xff]   ;;  %v3581_v49 = vld [vmem:[%s3768_s30 + $0x458] ss:$36 sps:$4 sm:$0xff]  }
 0x114   : > { %v3580_v48 = vld [vmem:[%s3768_s30 + $0x650] ss:$36 sps:$4 sm:$0xff]  }
 0x116   : > { %2283 = vmatpush1.bf16.msra.mxu0 %v3505_v50  ;;  %2389 = vmatpush1.bf16.msra.mxu1 %v3508_v51  ;;  %v3582_v50 = vld [vmem:[%s3768_s30 + $0x8d8] ss:$36 sps:$4 sm:$0xff]  }
 0x117   : > { %2284 = vmatprep.subr.bf16.mxu0 %v3513_v52  ;;  %2390 = vmatprep.subr.bf16.mxu1 %v3516_v53  ;;  %v3583_v51 = vld [vmem:[%s3768_s30 + $0x218] ss:$36 sps:$4 sm:$0xff]   ;;  %v3587_v53 = vld [vmem:[%s4284_s0] ss:$16 sps:$4 sm:$0xff]  }
 0x118   : > { %v3584_v52 = vld [vmem:[%s3768_s30 + $0x698] ss:$36 sps:$4 sm:$0xff]  }
 0x11a   : > { %2285 = vmatpush1.bf16.msra.mxu0 %v3511_v54  ;;  %2391 = vmatpush1.bf16.msra.mxu1 %v3514_v55  ;;  %v3588_v54 = vld [vmem:[%s4284_s0 + $0x24] ss:$16 sps:$4 sm:$0xff]   ;;  %v3589_v55 = vld [vmem:[%s4284_s0 + $0x20] ss:$16 sps:$4 sm:$0xff]  }
 0x11b   : > { %2286 = vmatprep.subr.bf16.mxu0 %v3519_v56  ;;  %2392 = vmatprep.subr.bf16.mxu1 %v3522_v57 }
 0x11e   : > { %2287 = vmatpush1.bf16.msra.mxu0 %v3517_v58  ;;  %2393 = vmatpush1.bf16.msra.mxu1 %v3520_v59 }
 0x11f   : > { %2288 = vmatprep.subr.bf16.mxu0 %v3525_v60  ;;  %2394 = vmatprep.subr.bf16.mxu1 %v3528_v61 }
 0x122   : > { %2289 = vmatpush1.bf16.msra.mxu0 %v3523_v62  ;;  %2395 = vmatpush1.bf16.msra.mxu1 %v3526_v63 }
 0x123   : > { %2290 = vmatprep.subr.bf16.mxu0 %v3531_v0  ;;  %2396 = vmatprep.subr.bf16.mxu1 %v3534_v1 }
 0x126   : > { %2291 = vmatpush1.bf16.msra.mxu0 %v3529_v2  ;;  %2397 = vmatpush1.bf16.msra.mxu1 %v3532_v3 }
 0x127   : > { %2292 = vmatprep.subr.bf16.mxu0 %v3537_v4  ;;  %2398 = vmatprep.subr.bf16.mxu1 %v3540_v6 }
 0x12a   : > { %2293 = vmatpush1.bf16.msra.mxu0 %v3535_v7  ;;  %2399 = vmatpush1.bf16.msra.mxu1 %v3538_v8 }
 0x12b   : > { %2294 = vmatprep.subr.bf16.mxu0 %v3543_v10  ;;  %2400 = vmatprep.subr.bf16.mxu1 %v3546_v11 }
 0x12e   : > { %2295 = vmatpush1.bf16.msra.mxu0 %v3541_v12  ;;  %2401 = vmatpush1.bf16.msra.mxu1 %v3544_v13 }
 0x12f   : > { %2296 = vmatprep.subr.bf16.mxu0 %v3549_v15  ;;  %2402 = vmatprep.subr.bf16.mxu1 %v3552_v16 }
 0x132   : > { %2297 = vmatpush1.bf16.msra.mxu0 %v3547_v17  ;;  %2403 = vmatpush1.bf16.msra.mxu1 %v3550_v18 }
 0x133   : > { %3024 = vmatprep.subr.bf16.mxu0 %v3553_v20  ;;  %3052 = vmatprep.subr.bf16.mxu1 %v3554_v21 }
 0x135   : > { %2299 = vmatmul.mubr.bf16.vlgmr.msra.gmra.mrb[8].mxu0 %v3942_v9  ;;  %2405 = vmatmul.mubr.bf16.vlgmr.msra.gmra.mrb[8].mxu1 %v3942_v9 }
 0x136   : > { %3025 = vmatpush3.bf16.msra.mxu0 %v3555_v22  ;;  %3053 = vmatpush3.bf16.msra.mxu1 %v3556_v23 }
 0x137   : > { %3026 = vmatprep.subr.bf16.mxu0 %v3557_v24  ;;  %3054 = vmatprep.subr.bf16.mxu1 %v3558_v26 }
 0x138   : > { %2308 = vmatprep.mubr.bf16.mxu0 %v3951_v14  ;;  %2414 = vmatprep.mubr.bf16.mxu1 %v3951_v14 }
 0x13a   : > { %3027 = vmatpush3.bf16.msra.mxu0 %v3559_v28  ;;  %3055 = vmatpush3.bf16.msra.mxu1 %v3560_v29 }
 0x13b   : > { %3028 = vmatprep.subr.bf16.mxu0 %v3561_v30  ;;  %3056 = vmatprep.subr.bf16.mxu1 %v3562_v5 }
 0x13d   : > { %2309 = vmatmul.mubr.bf16.gmra.mrb[12].mxu0 %v3964_v19  ;;  %2415 = vmatmul.mubr.bf16.gmra.mrb[12].mxu1 %v3964_v19 }
 0x13e   : > { %3029 = vmatpush3.bf16.msra.mxu0 %v3563_v31  ;;  %3057 = vmatpush3.bf16.msra.mxu1 %v3564_v32 }
 0x13f   : > { %3030 = vmatprep.subr.bf16.mxu0 %v3565_v34  ;;  %3058 = vmatprep.subr.bf16.mxu1 %v3566_v25 }
 0x140   : > { %2457 = vmatprep.mubr.bf16.mxu0 %v3585_v37  ;;  %2506 = vmatprep.mubr.bf16.mxu1 %v3586_v38 }
 0x142   : > { %3031 = vmatpush3.bf16.msra.mxu0 %v3567_v35  ;;  %3059 = vmatpush3.bf16.msra.mxu1 %v3568_v36 }
 0x143   : > { %3032 = vmatprep.subr.bf16.mxu0 %v3569_v27  ;;  %3060 = vmatprep.subr.bf16.mxu1 %v3570_v47 }
 0x146   : > { %3033 = vmatpush3.bf16.msra.mxu0 %v3571_v39  ;;  %3061 = vmatpush3.bf16.msra.mxu1 %v3572_v33 }
 0x147   : > { %3034 = vmatprep.subr.bf16.mxu0 %v3573_v40  ;;  %3062 = vmatprep.subr.bf16.mxu1 %v3574_v41 }
 0x14a   : > { %3035 = vmatpush3.bf16.msra.mxu0 %v3575_v42  ;;  %3063 = vmatpush3.bf16.msra.mxu1 %v3576_v43 }
 0x14b   : > { %3036 = vmatprep.subr.bf16.mxu0 %v3577_v44  ;;  %3064 = vmatprep.subr.bf16.mxu1 %v3578_v45 }
 0x14e   : > { %3037 = vmatpush3.bf16.msra.mxu0 %v3579_v46  ;;  %3065 = vmatpush3.bf16.msra.mxu1 %v3580_v48 }
 0x14f   : > { %3038 = vmatprep.subr.bf16.mxu0 %v3581_v49  ;;  %3066 = vmatprep.subr.bf16.mxu1 %v3582_v50 }
 0x152   : > { %3039 = vmatpush3.bf16.msra.mxu0 %v3583_v51  ;;  %3067 = vmatpush3.bf16.msra.mxu1 %v3584_v52 }
 0x155   : > { %2458 = vmatmul.mubr.bf16.vlgmr.msra.gmra.mrb[16].mxu0 %v3587_v53  ;;  %2507 = vmatmul.mubr.bf16.vlgmr.msra.gmra.mrb[16].mxu1 %v3942_v9 }
 0x156   : > { %2465 = vmatprep.mubr.bf16.mxu0 %v3588_v54  ;;  %2514 = vmatprep.mubr.bf16.mxu1 %v3951_v14 }
 0x15d   : > { %2466 = vmatmul.mubr.bf16.gmra.mrb[20].mxu0 %v3589_v55  ;;  %2515 = vmatmul.mubr.bf16.gmra.mrb[20].mxu1 %v3964_v19 }
 0x188   : > { %v2088_v56 = vpop.f32.mrb[0].mxu0  ;;  %v2194_v57 = vpop.f32.mrb[0].mxu1 }
 0x189   : > { %2523 = vst [vmem:[%s4153_s3] sm:$0xff] %v2088_v56  ;;  %2525 = vst [vmem:[%s4153_s3 + $0x10] sm:$0xff] %v2194_v57  ;;  %v2090_v9 = vpop.f32.mrb[1].mxu0  ;;  %v2196_v14 = vpop.f32.mrb[1].mxu1 }
 0x18a   : > { %2524 = vst [vmem:[%s4153_s3 + $0x8] sm:$0xff] %v2090_v9  ;;  %2526 = vst [vmem:[%s4153_s3 + $0x18] sm:$0xff] %v2196_v14  ;;  %v2092_v19 = vpop.f32.mrb[2].mxu0  ;;  %v2198_v58 = vpop.f32.mrb[2].mxu1 }
 0x18b   : > { %2532 = vst [vmem:[%s4153_s3 + $0x48] sm:$0xff] %v2092_v19  ;;  %2534 = vst [vmem:[%s4153_s3 + $0x58] sm:$0xff] %v2198_v58  ;;  %v2094_v59 = vpop.f32.mrb[3].mxu0  ;;  %v2200_v60 = vpop.f32.mrb[3].mxu1 }
 0x18c   : > { %2533 = vst [vmem:[%s4153_s3 + $0x50] sm:$0xff] %v2094_v59  ;;  %2535 = vst [vmem:[%s4153_s3 + $0x60] sm:$0xff] %v2200_v60 }
 0x190   : > { %v2098_v61 = vpop.f32.mrb[4].mxu0  ;;  %v2204_v62 = vpop.f32.mrb[4].mxu1  ;;  %v2581_v52 = vld [vmem:[%s4153_s3] sm:$0xff] (%p4290_p7)  ;;  %v2585_v54 = vld [vmem:[%s4153_s3 + $0x10] sm:$0xff] (%p4290_p7) }
 0x191   : > { %2541 = vst [vmem:[%s4153_s3 + $0x90] sm:$0xff] %v2098_v61  ;;  %2543 = vst [vmem:[%s4153_s3 + $0xa0] sm:$0xff] %v2204_v62  ;;  %v2100_v63 = vpop.f32.mrb[5].mxu0  ;;  %v2206_v0 = vpop.f32.mrb[5].mxu1  ;;  %v2583_v53 = vld [vmem:[%s4153_s3 + $0x8] sm:$0xff] (%p4290_p7)  ;;  %v2587_v55 = vld [vmem:[%s4153_s3 + $0x18] sm:$0xff] (%p4290_p7) }
 0x192   : > { %2542 = vst [vmem:[%s4153_s3 + $0x98] sm:$0xff] %v2100_v63  ;;  %2544 = vst [vmem:[%s4153_s3 + $0xa8] sm:$0xff] %v2206_v0  ;;  %v2102_v1 = vpop.f32.mrb[6].mxu0  ;;  %v2208_v2 = vpop.f32.mrb[6].mxu1  ;;  %v2599_v58 = vld [vmem:[%s4153_s3 + $0x48] sm:$0xff] (%p4290_p7)  ;;  %v2603_v60 = vld [vmem:[%s4153_s3 + $0x58] sm:$0xff] (%p4290_p7) }
 0x193   : > { %2550 = vst [vmem:[%s4153_s3 + $0xd8] sm:$0xff] %v2102_v1  ;;  %2552 = vst [vmem:[%s4153_s3 + $0xe8] sm:$0xff] %v2208_v2  ;;  %v2104_v3 = vpop.f32.mrb[7].mxu0  ;;  %v2210_v4 = vpop.f32.mrb[7].mxu1  ;;  %v2601_v59 = vld [vmem:[%s4153_s3 + $0x50] sm:$0xff] (%p4290_p7)  ;;  %v2605_v61 = vld [vmem:[%s4153_s3 + $0x60] sm:$0xff] (%p4290_p7) }
 0x194   : > { %2551 = vst [vmem:[%s4153_s3 + $0xe0] sm:$0xff] %v2104_v3  ;;  %2553 = vst [vmem:[%s4153_s3 + $0xf0] sm:$0xff] %v2210_v4 }
 0x195   : > { %2582 = vst [vmem:[%s4203_s5] sm:$0xff] (%p4290_p7), %v2581_v52  ;;  %2584 = vst [vmem:[%s4203_s5 + $0x8] sm:$0xff] (%p4290_p7), %v2583_v53 }
 0x196   : > { %2586 = vst [vmem:[%s4203_s5 + $0x10] sm:$0xff] (%p4290_p7), %v2585_v54  ;;  %2588 = vst [vmem:[%s4203_s5 + $0x18] sm:$0xff] (%p4290_p7), %v2587_v55 }
 0x197   : > { %2600 = vst [vmem:[%s4203_s5 + $0x90] sm:$0xff] (%p4290_p7), %v2599_v58  ;;  %2602 = vst [vmem:[%s4203_s5 + $0x98] sm:$0xff] (%p4290_p7), %v2601_v59 }
 0x198   : > { %2604 = vst [vmem:[%s4203_s5 + $0xa0] sm:$0xff] (%p4290_p7), %v2603_v60  ;;  %2606 = vst [vmem:[%s4203_s5 + $0xa8] sm:$0xff] (%p4290_p7), %v2605_v61  ;;  %v2617_v3 = vld [vmem:[%s4153_s3 + $0x90] sm:$0xff] (%p4290_p7) }
 0x199   : > { %v2619_v4 = vld [vmem:[%s4153_s3 + $0x98] sm:$0xff] (%p4290_p7)  ;;  %2618 = vst [vmem:[%s4203_s5 + $0x120] sm:$0xff] (%p4290_p7), %v2617_v3 }
 0x19a   : > { %2620 = vst [vmem:[%s4203_s5 + $0x128] sm:$0xff] (%p4290_p7), %v2619_v4 }
 0x208   : > { %v2300_v6 = vpop.f32.mrb[8].mxu0  ;;  %v2406_v7 = vpop.f32.mrb[8].mxu1 }
 0x209   : > { %2527 = vst [vmem:[%s4153_s3 + $0x20] sm:$0xff] %v2300_v6  ;;  %2529 = vst [vmem:[%s4153_s3 + $0x30] sm:$0xff] %v2406_v7  ;;  %v2302_v8 = vpop.f32.mrb[9].mxu0  ;;  %v2408_v10 = vpop.f32.mrb[9].mxu1  ;;  %v2621_v6 = vld [vmem:[%s4153_s3 + $0xa0] sm:$0xff] (%p4290_p7)  ;;  %v2623_v7 = vld [vmem:[%s4153_s3 + $0xa8] sm:$0xff] (%p4290_p7) }
 0x20a   : > { %2528 = vst [vmem:[%s4153_s3 + $0x28] sm:$0xff] %v2302_v8  ;;  %2530 = vst [vmem:[%s4153_s3 + $0x38] sm:$0xff] %v2408_v10  ;;  %v2304_v11 = vpop.f32.mrb[10].mxu0  ;;  %v2410_v12 = vpop.f32.mrb[10].mxu1 }
 0x20b   : > { %2536 = vst [vmem:[%s4153_s3 + $0x68] sm:$0xff] %v2304_v11  ;;  %2538 = vst [vmem:[%s4153_s3 + $0x78] sm:$0xff] %v2410_v12  ;;  %v2306_v13 = vpop.f32.mrb[11].mxu0  ;;  %v2412_v15 = vpop.f32.mrb[11].mxu1 }
 0x20c   : > { %2537 = vst [vmem:[%s4153_s3 + $0x70] sm:$0xff] %v2306_v13  ;;  %2539 = vst [vmem:[%s4153_s3 + $0x80] sm:$0xff] %v2412_v15  ;;  %v2635_v15 = vld [vmem:[%s4153_s3 + $0xd8] sm:$0xff] (%p4290_p7) }
 0x20d   : > { %2622 = vst [vmem:[%s4203_s5 + $0x130] sm:$0xff] (%p4290_p7), %v2621_v6  ;;  %2624 = vst [vmem:[%s4203_s5 + $0x138] sm:$0xff] (%p4290_p7), %v2623_v7 }
 0x20e   : > { %2636 = vst [vmem:[%s4203_s5 + $0x1b0] sm:$0xff] (%p4290_p7), %v2635_v15 }
 0x210   : > { %v2310_v16 = vpop.f32.mrb[12].mxu0  ;;  %v2416_v17 = vpop.f32.mrb[12].mxu1  ;;  %v2589_v56 = vld [vmem:[%s4153_s3 + $0x20] sm:$0xff] (%p4290_p7)  ;;  %v2593_v9 = vld [vmem:[%s4153_s3 + $0x30] sm:$0xff] (%p4290_p7) }
 0x211   : > { %2545 = vst [vmem:[%s4153_s3 + $0xb0] sm:$0xff] %v2310_v16  ;;  %2547 = vst [vmem:[%s4153_s3 + $0xc0] sm:$0xff] %v2416_v17  ;;  %v2312_v18 = vpop.f32.mrb[13].mxu0  ;;  %v2418_v20 = vpop.f32.mrb[13].mxu1  ;;  %v2591_v57 = vld [vmem:[%s4153_s3 + $0x28] sm:$0xff] (%p4290_p7)  ;;  %v2595_v14 = vld [vmem:[%s4153_s3 + $0x38] sm:$0xff] (%p4290_p7) }
 0x212   : > { %2546 = vst [vmem:[%s4153_s3 + $0xb8] sm:$0xff] %v2312_v18  ;;  %2548 = vst [vmem:[%s4153_s3 + $0xc8] sm:$0xff] %v2418_v20  ;;  %v2314_v21 = vpop.f32.mrb[14].mxu0  ;;  %v2420_v22 = vpop.f32.mrb[14].mxu1  ;;  %v2607_v62 = vld [vmem:[%s4153_s3 + $0x68] sm:$0xff] (%p4290_p7)  ;;  %v2611_v0 = vld [vmem:[%s4153_s3 + $0x78] sm:$0xff] (%p4290_p7) }
 0x213   : > { %2554 = vst [vmem:[%s4153_s3 + $0xf8] sm:$0xff] %v2314_v21  ;;  %2556 = vst [vmem:[%s4153_s3 + $0x108] sm:$0xff] %v2420_v22  ;;  %v2316_v23 = vpop.f32.mrb[15].mxu0  ;;  %v2422_v24 = vpop.f32.mrb[15].mxu1  ;;  %v2609_v63 = vld [vmem:[%s4153_s3 + $0x70] sm:$0xff] (%p4290_p7)  ;;  %v2613_v1 = vld [vmem:[%s4153_s3 + $0x80] sm:$0xff] (%p4290_p7) }
 0x214   : > { %2555 = vst [vmem:[%s4153_s3 + $0x100] sm:$0xff] %v2316_v23  ;;  %2557 = vst [vmem:[%s4153_s3 + $0x110] sm:$0xff] %v2422_v24  ;;  %v2637_v16 = vld [vmem:[%s4153_s3 + $0xe0] sm:$0xff] (%p4290_p7)  ;;  %v2639_v17 = vld [vmem:[%s4153_s3 + $0xe8] sm:$0xff] (%p4290_p7) }
 0x215   : > { %2590 = vst [vmem:[%s4203_s5 + $0x20] sm:$0xff] (%p4290_p7), %v2589_v56  ;;  %2592 = vst [vmem:[%s4203_s5 + $0x28] sm:$0xff] (%p4290_p7), %v2591_v57  ;;  %v2641_v18 = vld [vmem:[%s4153_s3 + $0xf0] sm:$0xff] (%p4290_p7) }
 0x216   : > { %2594 = vst [vmem:[%s4203_s5 + $0x30] sm:$0xff] (%p4290_p7), %v2593_v9  ;;  %2596 = vst [vmem:[%s4203_s5 + $0x38] sm:$0xff] (%p4290_p7), %v2595_v14 }
 0x217   : > { %2608 = vst [vmem:[%s4203_s5 + $0xb0] sm:$0xff] (%p4290_p7), %v2607_v62  ;;  %2610 = vst [vmem:[%s4203_s5 + $0xb8] sm:$0xff] (%p4290_p7), %v2609_v63 }
 0x218   : > { %2612 = vst [vmem:[%s4203_s5 + $0xc0] sm:$0xff] (%p4290_p7), %v2611_v0  ;;  %2614 = vst [vmem:[%s4203_s5 + $0xc8] sm:$0xff] (%p4290_p7), %v2613_v1  ;;  %v2625_v8 = vld [vmem:[%s4153_s3 + $0xb0] sm:$0xff] (%p4290_p7)  ;;  %v2629_v11 = vld [vmem:[%s4153_s3 + $0xc0] sm:$0xff] (%p4290_p7) }
 0x219   : > { %v2627_v10 = vld [vmem:[%s4153_s3 + $0xb8] sm:$0xff] (%p4290_p7)  ;;  %2626 = vst [vmem:[%s4203_s5 + $0x140] sm:$0xff] (%p4290_p7), %v2625_v8  ;;  %v2631_v12 = vld [vmem:[%s4153_s3 + $0xc8] sm:$0xff] (%p4290_p7)  ;;  %2630 = vst [vmem:[%s4203_s5 + $0x150] sm:$0xff] (%p4290_p7), %v2629_v11 }
 0x21a   : > { %2628 = vst [vmem:[%s4203_s5 + $0x148] sm:$0xff] (%p4290_p7), %v2627_v10  ;;  %2632 = vst [vmem:[%s4203_s5 + $0x158] sm:$0xff] (%p4290_p7), %v2631_v12  ;;  %v2643_v20 = vld [vmem:[%s4153_s3 + $0xf8] sm:$0xff] (%p4290_p7)  ;;  %v2647_v22 = vld [vmem:[%s4153_s3 + $0x108] sm:$0xff] (%p4290_p7) }
 0x21b   : > { %2638 = vst [vmem:[%s4203_s5 + $0x1b8] sm:$0xff] (%p4290_p7), %v2637_v16  ;;  %2640 = vst [vmem:[%s4203_s5 + $0x1c0] sm:$0xff] (%p4290_p7), %v2639_v17  ;;  %v2645_v21 = vld [vmem:[%s4153_s3 + $0x100] sm:$0xff] (%p4290_p7)  ;;  %v2649_v23 = vld [vmem:[%s4153_s3 + $0x110] sm:$0xff] (%p4290_p7) }
 0x21c   : > { %2642 = vst [vmem:[%s4203_s5 + $0x1c8] sm:$0xff] (%p4290_p7), %v2641_v18  ;;  %2644 = vst [vmem:[%s4203_s5 + $0x1d0] sm:$0xff] (%p4290_p7), %v2643_v20 }
 0x21d   : > { %2646 = vst [vmem:[%s4203_s5 + $0x1d8] sm:$0xff] (%p4290_p7), %v2645_v21  ;;  %2648 = vst [vmem:[%s4203_s5 + $0x1e0] sm:$0xff] (%p4290_p7), %v2647_v22 }
 0x21e   : > { %2650 = vst [vmem:[%s4203_s5 + $0x1e8] sm:$0xff] (%p4290_p7), %v2649_v23 }
 0x228   : > { %v3040_v26 = vpop.f32.mrb[16].mxu0  ;;  %v3068_v28 = vpop.f32.mrb[16].mxu1 }
 0x229   : > { %v3041_v29 = vpop.f32.mrb[17].mxu0  ;;  %v3069_v30 = vpop.f32.mrb[17].mxu1 }
 0x22a   : > { %v3042_v5 = vadd.f32 %v3041_v29, %v3040_v26  ;;  %v3070_v31 = vadd.f32 %v3069_v30, %v3068_v28  ;;  %v3043_v32 = vpop.f32.mrb[18].mxu0  ;;  %v3071_v34 = vpop.f32.mrb[18].mxu1 }
 0x22b   : > { %v3044_v25 = vpop.f32.mrb[19].mxu0  ;;  %v3072_v35 = vpop.f32.mrb[19].mxu1 }
 0x22c   : > { %v2509_v36 = vadd.f32 %v3070_v31, %v3042_v5  ;;  %v3045_v27 = vadd.f32 %v3044_v25, %v3043_v32  ;;  %v3073_v47 = vadd.f32 %v3072_v35, %v3071_v34 }
 0x22e   : > { %2531 = vst [vmem:[%s4153_s3 + $0x40] sm:$0xff] %v2509_v36  ;;  %v2512_v37 = vadd.f32 %v3073_v47, %v3045_v27 }
 0x230   : > { %2540 = vst [vmem:[%s4153_s3 + $0x88] sm:$0xff] %v2512_v37  ;;  %v3046_v38 = vpop.f32.mrb[20].mxu0  ;;  %v3074_v39 = vpop.f32.mrb[20].mxu1 }
 0x231   : > { %v3047_v33 = vpop.f32.mrb[21].mxu0  ;;  %v3075_v40 = vpop.f32.mrb[21].mxu1 }
 0x232   : > { %v3048_v41 = vadd.f32 %v3047_v33, %v3046_v38  ;;  %v3076_v42 = vadd.f32 %v3075_v40, %v3074_v39  ;;  %v3049_v43 = vpop.f32.mrb[22].mxu0  ;;  %v3077_v44 = vpop.f32.mrb[22].mxu1  ;;  %2565 = sbr.rel (!%p4290_p7) target bundleno = 577 (0x241), region = 36 }
 0x233   : > { %v3050_v45 = vpop.f32.mrb[23].mxu0  ;;  %v3078_v46 = vpop.f32.mrb[23].mxu1 }
 0x234   : > { %v2517_v48 = vadd.f32 %v3076_v42, %v3048_v41  ;;  %v3051_v49 = vadd.f32 %v3050_v45, %v3049_v43  ;;  %v3079_v50 = vadd.f32 %v3078_v46, %v3077_v44 }
 0x235   : > { %v2597_v19 = vld [vmem:[%s4153_s3 + $0x40] sm:$0xff] (%p4290_p7) }
 0x236   : > { %2549 = vst [vmem:[%s4153_s3 + $0xd0] sm:$0xff] %v2517_v48  ;;  %v2520_v51 = vadd.f32 %v3079_v50, %v3051_v49  ;;  %2598 = vst [vmem:[%s4203_s5 + $0x40] sm:$0xff] (%p4290_p7), %v2597_v19 }
 0x237   : > { %v2615_v2 = vld [vmem:[%s4153_s3 + $0x88] sm:$0xff] (%p4290_p7) }
 0x238   : > { %2558 = vst [vmem:[%s4153_s3 + $0x118] sm:$0xff] %v2520_v51  ;;  %2616 = vst [vmem:[%s4203_s5 + $0xd0] sm:$0xff] (%p4290_p7), %v2615_v2 }
 0x23d   : > { %v2633_v13 = vld [vmem:[%s4153_s3 + $0xd0] sm:$0xff] }
 0x23e   : > { %2634 = vst [vmem:[%s4203_s5 + $0x160] sm:$0xff] %v2633_v13 }
 0x23f   : > { %v2651_v24 = vld [vmem:[%s4153_s3 + $0x118] sm:$0xff] }
 0x240   : > { %2652 = vst [vmem:[%s4203_s5 + $0x1f0] sm:$0xff] %v2651_v24 }
 0x241 PF: > { %p12_p9 = scmp.ge.s32.totalorder %s3697_s14, 4   ;;  %s4291_s9 = smov %s3646_s10 }
 0x242   : > { %s4292_s10 = smov %s3650_s11  ;;  %s4293_s11 = smov %s3707_s17 }
 0x243   : > { %s4294_s12 = smov %s3697_s14  ;;  %14 = sbr.rel (!%p12_p9) target bundleno = 3 (0x3), region = 91 }
 0x24a   :  { %2668 = vsyncpa [#allocation3], 1 }
 0x24b   :  { %2670 = vsyncpa [#allocation3 + $0x1], 1 }

// kernel: heatmap_decoder_forward.7
= control target key start
LH: loop header
LB: loop body
LE: loop exit
PB: predicated region body
PF: predicated region fallthrough
CT: control target
= control target key end

     0   :  { %v55_v0 = vlaneseq  ;;  %vm124_vm0 = vcmask 1041408   ;;  %s1638_s1 = inlined_call_operand.vmem [shape: f32[8,256], index: 1, kind: input, shape index: {}]   ;;  %s1639_s0 = inlined_call_operand.vmem [shape: f32[162,256], index: 0, kind: input, shape index: {}]   ;;  %s1640_s2 = inlined_call_operand.vmem [shape: bf16[162,256], index: 2, kind: output, shape index: {}]  }
   0x1   :  { %v770_v3 = vld [vmem:[%s1638_s1] sm:$0xff]  ;;  %v775_v4 = vld [vmem:[%s1638_s1 + $0x8] sm:$0xff]  ;;  %v15_v9 = vld [vmem:[%s1639_s0 + $0x10] sm:$0xff] }
   0x2   :  { %v764_v1 = vshrl.u32 %v55_v0, 7  ;;  %1654 = vst [vmem:[#allocation3_spill] sm:$0xff] %v770_v3  ;;  %1655 = vst [vmem:[#allocation4_spill] sm:$0xff] %v775_v4  ;;  %v13_v5 = vld [vmem:[%s1639_s0] sm:$0xff]  ;;  %v14_v8 = vld [vmem:[%s1639_s0 + $0x8] sm:$0xff] }
   0x3   :  { %v16_v10 = vld [vmem:[%s1639_s0 + $0x18] sm:$0xff]  ;;  %v17_v11 = vld [vmem:[%s1639_s0 + $0x20] sm:$0xff]  ;;  %v18_v12 = vld [vmem:[%s1639_s0 + $0x28] sm:$0xff] }
   0x4   :  { %1653 = vst [vmem:[#allocation2_spill] sm:$0xff] %v764_v1  ;;  %v57_v2 = vsub.s32 0, %v764_v1  ;;  %v19_v17 = vld [vmem:[%s1639_s0 + $0x30] sm:$0xff]  ;;  %v20_v18 = vld [vmem:[%s1639_s0 + $0x38] sm:$0xff]  ;;  %v21_v21 = vld [vmem:[%s1639_s0 + $0x40] sm:$0xff] }
   0x5   :  { %v22_v22 = vld [vmem:[%s1639_s0 + $0x48] sm:$0xff]  ;;  %v23_v27 = vld [vmem:[%s1639_s0 + $0x50] sm:$0xff]  ;;  %v24_v28 = vld [vmem:[%s1639_s0 + $0x58] sm:$0xff] }
   0x6   :  { %v781_v6 = vrot.slane %v770_v3, %v57_v2  ;;  %v784_v7 = vrot.slane %v775_v4, %v57_v2  ;;  %v25_v33 = vld [vmem:[%s1639_s0 + $0x60] sm:$0xff]  ;;  %v26_v34 = vld [vmem:[%s1639_s0 + $0x68] sm:$0xff]  ;;  %v27_v39 = vld [vmem:[%s1639_s0 + $0x70] sm:$0xff] }
   0x7   :  { %v28_v40 = vld [vmem:[%s1639_s0 + $0x78] sm:$0xff]  ;;  %v29_v45 = vld [vmem:[%s1639_s0 + $0x80] sm:$0xff]  ;;  %v30_v46 = vld [vmem:[%s1639_s0 + $0x88] sm:$0xff] }
   0x8   :  { %v802_v13 = vadd.f32 %v781_v6, %v13_v5  ;;  %v805_v14 = vadd.f32 %v784_v7, %v14_v8  ;;  %v808_v15 = vadd.f32 %v781_v6, %v15_v9  ;;  %v811_v16 = vadd.f32 %v784_v7, %v16_v10  ;;  %v31_v51 = vld [vmem:[%s1639_s0 + $0x90] sm:$0xff]  ;;  %v32_v52 = vld [vmem:[%s1639_s0 + $0x98] sm:$0xff]  ;;  %v33_v57 = vld [vmem:[%s1639_s0 + $0xa0] sm:$0xff] }
   0x9   :  { %v820_v19 = vadd.f32 %v781_v6, %v17_v11  ;;  %v823_v20 = vadd.f32 %v784_v7, %v18_v12  ;;  %v832_v23 = vadd.f32 %v781_v6, %v19_v17  ;;  %v835_v24 = vadd.f32 %v784_v7, %v20_v18  ;;  %v34_v58 = vld [vmem:[%s1639_s0 + $0xa8] sm:$0xff]  ;;  %v35_v63 = vld [vmem:[%s1639_s0 + $0xb0] sm:$0xff]  ;;  %v36_v0 = vld [vmem:[%s1639_s0 + $0xb8] sm:$0xff] }
   0xa   :  { %v105_v25 = vadd.f32 %v808_v15, %v802_v13  ;;  %v133_v26 = vadd.f32 %v811_v16, %v805_v14  ;;  %v848_v29 = vadd.f32 %v781_v6, %v21_v21  ;;  %v851_v30 = vadd.f32 %v784_v7, %v22_v22  ;;  %v37_v10 = vld [vmem:[%s1639_s0 + $0xc0] sm:$0xff]  ;;  %v38_v11 = vld [vmem:[%s1639_s0 + $0xc8] sm:$0xff]  ;;  %v39_v22 = vld [vmem:[%s1639_s0 + $0xd0] sm:$0xff] }
   0xb   :  { %v862_v35 = vadd.f32 %v781_v6, %v23_v27  ;;  %v865_v36 = vadd.f32 %v784_v7, %v24_v28  ;;  %v876_v41 = vadd.f32 %v781_v6, %v25_v33  ;;  %v879_v42 = vadd.f32 %v784_v7, %v26_v34  ;;  %v42_v33 = vld [vmem:[%s1639_s0 + $0xe8] sm:$0xff] }
   0xc   :  { %v106_v31 = vadd.f32 %v105_v25, %v820_v19  ;;  %v134_v32 = vadd.f32 %v133_v26, %v823_v20  ;;  %v890_v47 = vadd.f32 %v781_v6, %v27_v39  ;;  %v893_v48 = vadd.f32 %v784_v7, %v28_v40  ;;  %v40_v25 = vld [vmem:[%s1639_s0 + $0xd8] sm:$0xff]  ;;  %v43_v40 = vld [vmem:[%s1639_s0 + $0xf0] sm:$0xff] }
   0xd   :  { %v904_v53 = vadd.f32 %v781_v6, %v29_v45  ;;  %v907_v54 = vadd.f32 %v784_v7, %v30_v46  ;;  %v918_v59 = vadd.f32 %v781_v6, %v31_v51  ;;  %v921_v60 = vadd.f32 %v784_v7, %v32_v52  ;;  %v46_v51 = vld [vmem:[%s1639_s0 + $0x108] sm:$0xff] }
   0xe   :  { %v107_v37 = vadd.f32 %v106_v31, %v832_v23  ;;  %v135_v38 = vadd.f32 %v134_v32, %v835_v24  ;;  %v932_v2 = vadd.f32 %v781_v6, %v33_v57  ;;  %v935_v5 = vadd.f32 %v784_v7, %v34_v58  ;;  %v41_v32 = vld [vmem:[%s1639_s0 + $0xe0] sm:$0xff]  ;;  %v47_v58 = vld [vmem:[%s1639_s0 + $0x110] sm:$0xff] }
   0xf   :  { %v946_v12 = vadd.f32 %v781_v6, %v35_v63  ;;  %v949_v17 = vadd.f32 %v784_v7, %v36_v0  ;;  %v960_v26 = vadd.f32 %v781_v6, %v37_v10  ;;  %v963_v27 = vadd.f32 %v784_v7, %v38_v11  ;;  %v50_v10 = vld [vmem:[%s1639_s0 + $0x128] sm:$0xff]  ;;  %v53_v11 = vld [vmem:[%s1639_s0 + $0x140] sm:$0x3] }
  0x10   :  { %v108_v43 = vadd.f32 %v107_v37, %v848_v29  ;;  %v136_v44 = vadd.f32 %v135_v38, %v851_v30  ;;  %v974_v34 = vadd.f32 %v781_v6, %v39_v22  ;;  %v977_v37 = vadd.f32 %v784_v7, %v40_v25 }
  0x11   :  { %v991_v45 = vadd.f32 %v784_v7, %v42_v33  ;;  %v1002_v52 = vadd.f32 %v781_v6, %v43_v40  ;;  %v1019_v63 = vadd.f32 %v784_v7, %v46_v51 }
  0x12   :  { %v109_v49 = vadd.f32 %v108_v43, %v862_v35  ;;  %v137_v50 = vadd.f32 %v136_v44, %v865_v36  ;;  %v44_v43 = vld [vmem:[%s1639_s0 + $0xf8] sm:$0xff]  ;;  %v988_v44 = vadd.f32 %v781_v6, %v41_v32 }
  0x13   :  { %v52_v32 = vld [vmem:[%s1639_s0 + $0x138] sm:$0xff] }
  0x14   :  { %v110_v55 = vadd.f32 %v109_v49, %v876_v41  ;;  %v138_v56 = vadd.f32 %v137_v50, %v879_v42  ;;  %v45_v50 = vld [vmem:[%s1639_s0 + $0x100] sm:$0xff] }
  0x16   :  { %v111_v61 = vadd.f32 %v110_v55, %v890_v47  ;;  %v139_v62 = vadd.f32 %v138_v56, %v893_v48  ;;  %v1005_v55 = vadd.f32 %v784_v7, %v44_v43  ;;  %v1058_v43 = vadd.f32 %v781_v6, %v53_v11 }
  0x18   :  { %v112_v8 = vadd.f32 %v111_v61, %v904_v53  ;;  %v140_v9 = vadd.f32 %v139_v62, %v907_v54  ;;  %v48_v61 = vld [vmem:[%s1639_s0 + $0x118] sm:$0xff]  ;;  %v1016_v62 = vadd.f32 %v781_v6, %v45_v50  ;;  %v1067_v50 = vadd.f32 %v784_v7, %v52_v32 }
  0x19   :  { %v1039_v22 = vadd.f32 %v784_v7, %v48_v61  ;;  %v125_v61 = vsel %vm124_vm0, %v1058_v43, 0.0 }
  0x1a   :  { %v113_v18 = vadd.f32 %v112_v8, %v918_v59  ;;  %v141_v21 = vadd.f32 %v140_v9, %v921_v60  ;;  %v49_v9 = vld [vmem:[%s1639_s0 + $0x120] sm:$0xff] }
  0x1b   :  { %v1050_v33 = vadd.f32 %v781_v6, %v49_v9 }
  0x1c   :  { %v114_v28 = vadd.f32 %v113_v18, %v932_v2  ;;  %v142_v31 = vadd.f32 %v141_v21, %v935_v5  ;;  %v54_v18 = vld [vmem:[%s1639_s0 + $0x148] sm:$0x3]  ;;  %v1036_v21 = vadd.f32 %v781_v6, %v47_v58 }
  0x1e   :  { %v115_v38 = vadd.f32 %v114_v28, %v946_v12  ;;  %v143_v39 = vadd.f32 %v142_v31, %v949_v17  ;;  %v51_v31 = vld [vmem:[%s1639_s0 + $0x130] sm:$0xff] }
  0x20   :  { %v116_v46 = vadd.f32 %v115_v38, %v960_v26  ;;  %v144_v49 = vadd.f32 %v143_v39, %v963_v27  ;;  %v1053_v38 = vadd.f32 %v784_v7, %v50_v10 }
  0x22   :  { %v117_v56 = vadd.f32 %v116_v46, %v974_v34  ;;  %v145_v57 = vadd.f32 %v144_v49, %v977_v37  ;;  %v1061_v46 = vadd.f32 %v784_v7, %v54_v18  ;;  %v1064_v49 = vadd.f32 %v781_v6, %v51_v31 }
  0x24   :  { %v118_v0 = vadd.f32 %v117_v56, %v988_v44  ;;  %v146_v8 = vadd.f32 %v145_v57, %v991_v45 }
  0x26   :  { %v119_v25 = vadd.f32 %v118_v0, %v1002_v52  ;;  %v147_v28 = vadd.f32 %v146_v8, %v1005_v55  ;;  %v152_v0 = vsel %vm124_vm0, %v1061_v46, 0.0 }
  0x28   :  { %v120_v39 = vadd.f32 %v119_v25, %v1016_v62  ;;  %v148_v40 = vadd.f32 %v147_v28, %v1019_v63 }
  0x2a   :  { %v121_v51 = vadd.f32 %v120_v39, %v1036_v21  ;;  %v149_v56 = vadd.f32 %v148_v40, %v1039_v22 }
  0x2c   :  { %v122_v57 = vadd.f32 %v121_v51, %v1050_v33  ;;  %v150_v58 = vadd.f32 %v149_v56, %v1053_v38 }
  0x2e   :  { %v123_v6 = vadd.f32 %v122_v57, %v1064_v49  ;;  %v151_v8 = vadd.f32 %v150_v58, %v1067_v50 }
  0x30   :  { %v126_v7 = vadd.f32 %v125_v61, %v123_v6  ;;  %v153_v9 = vadd.f32 %v152_v0, %v151_v8 }
  0x32   :  { %v127_v10 = vrot.slane %v126_v7, 4  ;;  %v154_v11 = vrot.slane %v153_v9, 4 }
  0x34   :  { %v128_v18 = vadd.f32 %v127_v10, %v126_v7  ;;  %v155_v25 = vadd.f32 %v154_v11, %v153_v9 }
  0x36   :  { %v129_v28 = vrot.slane %v128_v18, 2  ;;  %v156_v31 = vrot.slane %v155_v25, 2 }
  0x38   :  { %v130_v32 = vadd.f32 %v129_v28, %v128_v18  ;;  %v157_v39 = vadd.f32 %v156_v31, %v155_v25 }
  0x3a   :  { %v131_v40 = vrot.slane %v130_v32, 1  ;;  %v158_v51 = vrot.slane %v157_v39, 1 }
  0x3c   :  { %v132_v56 = vadd.f32 %v131_v40, %v130_v32  ;;  %v159_v4 = vadd.f32 %v158_v51, %v157_v39 }
  0x3e   :  { %v1079_v3 = vmul.f32 0.0061728396, %v132_v56  ;;  %v1081_v1 = vmul.f32 0.0061728396, %v159_v4 }
  0x40   :  { %v1085_v57 = vsub.f32 %v802_v13, %v1079_v3  ;;  %v1089_v58 = vsub.f32 %v805_v14, %v1081_v1  ;;  %v1093_v61 = vsub.f32 %v808_v15, %v1079_v3  ;;  %v1097_v0 = vsub.f32 %v811_v16, %v1081_v1 }
  0x41   :  { %v1101_v4 = vsub.f32 %v820_v19, %v1079_v3  ;;  %v1105_v13 = vsub.f32 %v823_v20, %v1081_v1  ;;  %v1109_v14 = vsub.f32 %v832_v23, %v1079_v3  ;;  %v1113_v15 = vsub.f32 %v835_v24, %v1081_v1 }
  0x42   :  { %v204_v16 = vmul.f32 %v1085_v57, %v1085_v57  ;;  %v205_v6 = vmul.f32 %v1089_v58, %v1089_v58  ;;  %v206_v19 = vmul.f32 %v1093_v61, %v1093_v61  ;;  %v207_v20 = vmul.f32 %v1097_v0, %v1097_v0 }
  0x43   :  { %v1125_v23 = vsub.f32 %v848_v29, %v1079_v3  ;;  %v1129_v24 = vsub.f32 %v851_v30, %v1081_v1  ;;  %v208_v8 = vmul.f32 %v1101_v4, %v1101_v4  ;;  %v209_v7 = vmul.f32 %v1105_v13, %v1105_v13 }
  0x44   :  { %v1137_v9 = vsub.f32 %v862_v35, %v1079_v3  ;;  %v1141_v10 = vsub.f32 %v865_v36, %v1081_v1  ;;  %v210_v29 = vmul.f32 %v1109_v14, %v1109_v14  ;;  %v211_v30 = vmul.f32 %v1113_v15, %v1113_v15 }
  0x45   :  { %v246_v11 = vadd.f32 %v206_v19, %v204_v16  ;;  %v273_v18 = vadd.f32 %v207_v20, %v205_v6  ;;  %v1149_v25 = vsub.f32 %v876_v41, %v1079_v3  ;;  %v1153_v35 = vsub.f32 %v879_v42, %v1081_v1 }
  0x46   :  { %v212_v36 = vmul.f32 %v1125_v23, %v1125_v23  ;;  %v213_v28 = vmul.f32 %v1129_v24, %v1129_v24  ;;  %v1161_v39 = vsub.f32 %v890_v47, %v1079_v3  ;;  %v1165_v41 = vsub.f32 %v893_v48, %v1081_v1 }
  0x47   :  { %v247_v31 = vadd.f32 %v246_v11, %v208_v8  ;;  %v274_v32 = vadd.f32 %v273_v18, %v209_v7  ;;  %v214_v42 = vmul.f32 %v1137_v9, %v1137_v9  ;;  %v215_v40 = vmul.f32 %v1141_v10, %v1141_v10 }
  0x48   :  { %v1173_v16 = vsub.f32 %v904_v53, %v1079_v3  ;;  %v1177_v47 = vsub.f32 %v907_v54, %v1081_v1  ;;  %v216_v48 = vmul.f32 %v1149_v25, %v1149_v25  ;;  %v217_v6 = vmul.f32 %v1153_v35, %v1153_v35 }
  0x49   :  { %v248_v51 = vadd.f32 %v247_v31, %v210_v29  ;;  %v275_v56 = vadd.f32 %v274_v32, %v211_v30  ;;  %v1185_v8 = vsub.f32 %v918_v59, %v1079_v3  ;;  %v1189_v53 = vsub.f32 %v921_v60, %v1081_v1 }
  0x4a   :  { %v218_v54 = vmul.f32 %v1161_v39, %v1161_v39  ;;  %v219_v7 = vmul.f32 %v1165_v41, %v1165_v41  ;;  %v1197_v11 = vsub.f32 %v932_v2, %v1079_v3  ;;  %v1201_v59 = vsub.f32 %v935_v5, %v1081_v1 }
  0x4b   :  { %v249_v19 = vadd.f32 %v248_v51, %v212_v36  ;;  %v276_v20 = vadd.f32 %v275_v56, %v213_v28  ;;  %v220_v60 = vmul.f32 %v1173_v16, %v1173_v16  ;;  %v221_v18 = vmul.f32 %v1177_v47, %v1177_v47 }
  0x4c   :  { %v1209_v31 = vsub.f32 %v946_v12, %v1079_v3  ;;  %v1213_v2 = vsub.f32 %v949_v17, %v1081_v1  ;;  %v222_v5 = vmul.f32 %v1185_v8, %v1185_v8  ;;  %v223_v32 = vmul.f32 %v1189_v53, %v1189_v53 }
  0x4d   :  { %v250_v29 = vadd.f32 %v249_v19, %v214_v42  ;;  %v277_v30 = vadd.f32 %v276_v20, %v215_v40  ;;  %v1221_v51 = vsub.f32 %v960_v26, %v1079_v3  ;;  %v1225_v12 = vsub.f32 %v963_v27, %v1081_v1 }
  0x4e   :  { %v224_v17 = vmul.f32 %v1197_v11, %v1197_v11  ;;  %v225_v56 = vmul.f32 %v1201_v59, %v1201_v59  ;;  %v1233_v19 = vsub.f32 %v974_v34, %v1079_v3  ;;  %v1237_v26 = vsub.f32 %v977_v37, %v1081_v1 }
  0x4f   :  { %v251_v36 = vadd.f32 %v250_v29, %v216_v48  ;;  %v278_v28 = vadd.f32 %v277_v30, %v217_v6  ;;  %v226_v27 = vmul.f32 %v1209_v31, %v1209_v31  ;;  %v227_v20 = vmul.f32 %v1213_v2, %v1213_v2 }
  0x50   :  { %v1245_v29 = vsub.f32 %v988_v44, %v1079_v3  ;;  %v1249_v34 = vsub.f32 %v991_v45, %v1081_v1  ;;  %v228_v37 = vmul.f32 %v1221_v51, %v1221_v51  ;;  %v229_v30 = vmul.f32 %v1225_v12, %v1225_v12 }
  0x51   :  { %v252_v42 = vadd.f32 %v251_v36, %v218_v54  ;;  %v279_v40 = vadd.f32 %v278_v28, %v219_v7  ;;  %v1257_v36 = vsub.f32 %v1002_v52, %v1079_v3  ;;  %v1261_v44 = vsub.f32 %v1005_v55, %v1081_v1 }
  0x52   :  { %v230_v45 = vmul.f32 %v1233_v19, %v1233_v19  ;;  %v231_v28 = vmul.f32 %v1237_v26, %v1237_v26  ;;  %v1273_v52 = vsub.f32 %v1019_v63, %v1081_v1  ;;  %v232_v55 = vmul.f32 %v1245_v29, %v1245_v29 }
  0x53   :  { %v253_v48 = vadd.f32 %v252_v42, %v220_v60  ;;  %v280_v6 = vadd.f32 %v279_v40, %v221_v18  ;;  %v1269_v42 = vsub.f32 %v1016_v62, %v1079_v3  ;;  %v233_v40 = vmul.f32 %v1249_v34, %v1249_v34 }
  0x54   :  { %v1285_v62 = vsub.f32 %v1039_v22, %v1081_v1  ;;  %v234_v63 = vmul.f32 %v1257_v36, %v1257_v36 }
  0x55   :  { %v254_v54 = vadd.f32 %v253_v48, %v222_v5  ;;  %v281_v7 = vadd.f32 %v280_v6, %v223_v32  ;;  %v1281_v48 = vsub.f32 %v1036_v21, %v1079_v3  ;;  %v235_v6 = vmul.f32 %v1261_v44, %v1261_v44 }
  0x56   :  { %v1297_v21 = vsub.f32 %v1053_v38, %v1081_v1  ;;  %v236_v22 = vmul.f32 %v1269_v42, %v1269_v42  ;;  %v1313_v38 = vsub.f32 %v1058_v43, %v1079_v3 }
  0x57   :  { %v255_v60 = vadd.f32 %v254_v54, %v224_v17  ;;  %v282_v18 = vadd.f32 %v281_v7, %v225_v56  ;;  %v1293_v54 = vsub.f32 %v1050_v33, %v1079_v3  ;;  %v237_v7 = vmul.f32 %v1273_v52, %v1273_v52 }
  0x58   :  { %1657 = vst [vmem:[#allocation6_spill] sm:$0xff] %v1297_v21  ;;  %v1309_v33 = vsub.f32 %v1067_v50, %v1081_v1  ;;  %1660 = vst [vmem:[#allocation9_spill] sm:$0xff] %v1313_v38 }
  0x59   :  { %v256_v5 = vadd.f32 %v255_v60, %v226_v27  ;;  %v283_v32 = vadd.f32 %v282_v18, %v227_v20  ;;  %1656 = vst [vmem:[#allocation5_spill] sm:$0xff] %v1293_v54  ;;  %v1305_v60 = vsub.f32 %v1064_v49, %v1079_v3  ;;  %v1317_v18 = vsub.f32 %v1061_v46, %v1081_v1 }
  0x5a   :  { %1659 = vst [vmem:[#allocation8_spill] sm:$0xff] %v1309_v33  ;;  %v240_v50 = vmul.f32 %v1293_v54, %v1293_v54  ;;  %v244_v1 = vmul.f32 %v1313_v38, %v1313_v38 }
  0x5b   :  { %v257_v17 = vadd.f32 %v256_v5, %v228_v37  ;;  %v284_v56 = vadd.f32 %v283_v32, %v229_v30  ;;  %1658 = vst [vmem:[#allocation7_spill] sm:$0xff] %v1305_v60  ;;  %1661 = vst [vmem:[#allocation10_spill] sm:$0xff] %v1317_v18  ;;  %v241_v32 = vmul.f32 %v1297_v21, %v1297_v21 }
  0x5c   :  { %v245_v46 = vmul.f32 %v1317_v18, %v1317_v18 }
  0x5d   :  { %v258_v27 = vadd.f32 %v257_v17, %v230_v45  ;;  %v285_v20 = vadd.f32 %v284_v56, %v231_v28  ;;  %v238_v45 = vmul.f32 %v1281_v48, %v1281_v48  ;;  %v239_v28 = vmul.f32 %v1285_v62, %v1285_v62 }
  0x5f   :  { %v259_v37 = vadd.f32 %v258_v27, %v232_v55  ;;  %v286_v30 = vadd.f32 %v285_v20, %v233_v40  ;;  %v242_v55 = vmul.f32 %v1305_v60, %v1305_v60  ;;  %v243_v40 = vmul.f32 %v1309_v33, %v1309_v33 }
  0x60   :  { %v265_v27 = vsel %vm124_vm0, %v244_v1, 0.0  ;;  %v292_v20 = vsel %vm124_vm0, %v245_v46, 0.0 }
  0x61   :  { %v260_v49 = vadd.f32 %v259_v37, %v234_v63  ;;  %v287_v5 = vadd.f32 %v286_v30, %v235_v6 }
  0x63   :  { %v261_v3 = vadd.f32 %v260_v49, %v236_v22  ;;  %v288_v43 = vadd.f32 %v287_v5, %v237_v7 }
  0x65   :  { %v262_v17 = vadd.f32 %v261_v3, %v238_v45  ;;  %v289_v56 = vadd.f32 %v288_v43, %v239_v28 }
  0x67   :  { %v263_v63 = vadd.f32 %v262_v17, %v240_v50  ;;  %v290_v6 = vadd.f32 %v289_v56, %v241_v32 }
  0x69   :  { %v264_v22 = vadd.f32 %v263_v63, %v242_v55  ;;  %v291_v7 = vadd.f32 %v290_v6, %v243_v40  ;;  %v1662_v55 = vld [vmem:[#allocation2_spill] sm:$0xff] }
  0x6a   :  { %v310_v40 = vsub.s32 1, %v1662_v55  ;;  %v360_v17 = vsub.s32 2, %v1662_v55  ;;  %v452_v56 = vsub.s32 3, %v1662_v55 }
  0x6b   :  { %v266_v37 = vadd.f32 %v265_v27, %v264_v22  ;;  %v293_v30 = vadd.f32 %v292_v20, %v291_v7 }
  0x6d   :  { %v267_v49 = vrot.slane %v266_v37, 4  ;;  %v294_v5 = vrot.slane %v293_v30, 4 }
  0x6f   :  { %v268_v18 = vadd.f32 %v267_v49, %v266_v37  ;;  %v295_v38 = vadd.f32 %v294_v5, %v293_v30 }
  0x71   :  { %v269_v60 = vrot.slane %v268_v18, 2  ;;  %v296_v21 = vrot.slane %v295_v38, 2 }
  0x73   :  { %v270_v54 = vadd.f32 %v269_v60, %v268_v18  ;;  %v297_v33 = vadd.f32 %v296_v21, %v295_v38  ;;  %v502_v60 = vsub.s32 4, %v1662_v55  ;;  %v1663_v38 = vld [vmem:[#allocation3_spill] sm:$0xff] }
  0x74   :  { %v1346_v27 = vrot.slane %v1663_v38, %v360_v17  ;;  %v1352_v22 = vrot.slane %v1663_v38, %v452_v56 }
  0x75   :  { %v271_v45 = vrot.slane %v270_v54, 1  ;;  %v298_v28 = vrot.slane %v297_v33, 1  ;;  %v1360_v30 = vrot.slane %v1663_v38, %v502_v60 }
  0x77   :  { %v272_v50 = vadd.f32 %v271_v45, %v270_v54  ;;  %v299_v32 = vadd.f32 %v298_v28, %v297_v33  ;;  %v1664_v54 = vld [vmem:[#allocation4_spill] sm:$0xff] }
  0x78   :  { %v1349_v20 = vrot.slane %v1664_v54, %v360_v17  ;;  %v1357_v37 = vrot.slane %v1664_v54, %v452_v56  ;;  %v1363_v49 = vrot.slane %v1664_v54, %v502_v60 }
  0x79   :  { %v300_v3 = vmul.f32 0.0061728396, %v272_v50  ;;  %v301_v43 = vmul.f32 0.0061728396, %v299_v32 }
  0x7b   :  { %v302_v1 = vadd.f32 1e-05, %v300_v3  ;;  %v303_v46 = vadd.f32 1e-05, %v301_v43 }
  0x7d   :  { %745 = vrsqrt.f32 %v302_v1 }
  0x7e   :  { %747 = vrsqrt.f32 %v303_v46 }
  0x87   :  { %v746_v63 = vpop.eup %745 }
  0x88   :  { %v748_v21 = vpop.eup %747  ;;  %v306_v18 = vmul.f32 %v746_v63, %v1663_v38 }
  0x89   :  { %v307_v33 = vmul.f32 %v748_v21, %v1664_v54 }
  0x8a   :  { %v1343_v6 = vrot.slane %v306_v18, %v310_v40 }
  0x8b   :  { %v1354_v7 = vrot.slane %v307_v33, %v310_v40 }
  0x8c   :  { %v316_v5 = vmul.f32 %v1343_v6, %v1085_v57  ;;  %v318_v45 = vmul.f32 %v1343_v6, %v1093_v61  ;;  %v320_v28 = vmul.f32 %v1343_v6, %v1101_v4  ;;  %v322_v50 = vmul.f32 %v1343_v6, %v1109_v14 }
  0x8d   :  { %v317_v32 = vmul.f32 %v1354_v7, %v1089_v58  ;;  %v319_v3 = vmul.f32 %v1354_v7, %v1097_v0  ;;  %v321_v43 = vmul.f32 %v1354_v7, %v1105_v13  ;;  %v323_v57 = vmul.f32 %v1354_v7, %v1113_v15 }
  0x8e   :  { %v366_v61 = vadd.f32 %v1346_v27, %v316_v5  ;;  %v368_v1 = vadd.f32 %v1346_v27, %v318_v45  ;;  %v370_v4 = vadd.f32 %v1346_v27, %v320_v28  ;;  %v372_v14 = vadd.f32 %v1346_v27, %v322_v50 }
  0x8f   :  { %v367_v46 = vadd.f32 %v1349_v20, %v317_v32  ;;  %v369_v58 = vadd.f32 %v1349_v20, %v319_v3  ;;  %v371_v0 = vadd.f32 %v1349_v20, %v321_v43  ;;  %v373_v55 = vadd.f32 %v1349_v20, %v323_v57 }
  0x90   :  { %v408_v13 = vmax.f32 %v366_v61, 0.0  ;;  %v410_v40 = vmax.f32 %v368_v1, 0.0  ;;  %v412_v17 = vmax.f32 %v370_v4, 0.0  ;;  %v414_v15 = vmax.f32 %v372_v14, 0.0 }
  0x91   :  { %v409_v56 = vmax.f32 %v367_v46, 0.0  ;;  %v411_v63 = vmax.f32 %v369_v58, 0.0  ;;  %v413_v60 = vmax.f32 %v371_v0, 0.0  ;;  %v415_v21 = vmax.f32 %v373_v55, 0.0 }
  0x92   :  { %v458_v38 = vmul.f32 %v1352_v22, %v408_v13  ;;  %v460_v18 = vmul.f32 %v1352_v22, %v410_v40  ;;  %v462_v54 = vmul.f32 %v1352_v22, %v412_v17  ;;  %v464_v33 = vmul.f32 %v1352_v22, %v414_v15 }
  0x93   :  { %v459_v5 = vmul.f32 %v1357_v37, %v409_v56  ;;  %v461_v45 = vmul.f32 %v1357_v37, %v411_v63  ;;  %v463_v28 = vmul.f32 %v1357_v37, %v413_v60  ;;  %v465_v50 = vmul.f32 %v1357_v37, %v415_v21 }
  0x94   :  { %v508_v32 = vadd.f32 %v1360_v30, %v458_v38  ;;  %v510_v3 = vadd.f32 %v1360_v30, %v460_v18  ;;  %v512_v43 = vadd.f32 %v1360_v30, %v462_v54  ;;  %v514_v57 = vadd.f32 %v1360_v30, %v464_v33 }
  0x95   :  { %v509_v61 = vadd.f32 %v1363_v49, %v459_v5  ;;  %v511_v1 = vadd.f32 %v1363_v49, %v461_v45  ;;  %v513_v4 = vadd.f32 %v1363_v49, %v463_v28  ;;  %v515_v14 = vadd.f32 %v1363_v49, %v465_v50 }
  0x96   :  { %v324_v46 = vmul.f32 %v1343_v6, %v1125_v23  ;;  %v325_v58 = vmul.f32 %v1354_v7, %v1129_v24  ;;  %v326_v0 = vmul.f32 %v1343_v6, %v1137_v9  ;;  %v327_v55 = vmul.f32 %v1354_v7, %v1141_v10 }
  0x97   :  { %v724_v13 = vpack.c.bf16 %v509_v61, %v508_v32  ;;  %v725_v40 = vpack.c.bf16 %v511_v1, %v510_v3  ;;  %v726_v17 = vpack.c.bf16 %v513_v4, %v512_v43  ;;  %v727_v15 = vpack.c.bf16 %v515_v14, %v514_v57 }
  0x98   :  { %v374_v56 = vadd.f32 %v1346_v27, %v324_v46  ;;  %v375_v63 = vadd.f32 %v1349_v20, %v325_v58  ;;  %v376_v60 = vadd.f32 %v1346_v27, %v326_v0  ;;  %v377_v23 = vadd.f32 %v1349_v20, %v327_v55 }
  0x99   :  { %678 = vst [vmem:[%s1640_s2] sm:$0xff] %v724_v13  ;;  %679 = vst [vmem:[%s1640_s2 + $0x8] sm:$0xff] %v725_v40  ;;  %v328_v24 = vmul.f32 %v1343_v6, %v1149_v25  ;;  %v329_v9 = vmul.f32 %v1354_v7, %v1153_v35  ;;  %v330_v10 = vmul.f32 %v1343_v6, %v1161_v39 }
  0x9a   :  { %680 = vst [vmem:[%s1640_s2 + $0x10] sm:$0xff] %v726_v17  ;;  %681 = vst [vmem:[%s1640_s2 + $0x18] sm:$0xff] %v727_v15  ;;  %v331_v21 = vmul.f32 %v1354_v7, %v1165_v41  ;;  %v416_v38 = vmax.f32 %v374_v56, 0.0  ;;  %v417_v18 = vmax.f32 %v375_v63, 0.0  ;;  %v418_v54 = vmax.f32 %v376_v60, 0.0 }
  0x9b   :  { %v419_v33 = vmax.f32 %v377_v23, 0.0  ;;  %v378_v5 = vadd.f32 %v1346_v27, %v328_v24  ;;  %v379_v45 = vadd.f32 %v1349_v20, %v329_v9  ;;  %v380_v28 = vadd.f32 %v1346_v27, %v330_v10 }
  0x9c   :  { %v381_v25 = vadd.f32 %v1349_v20, %v331_v21  ;;  %v466_v35 = vmul.f32 %v1352_v22, %v416_v38  ;;  %v467_v50 = vmul.f32 %v1357_v37, %v417_v18  ;;  %v468_v39 = vmul.f32 %v1352_v22, %v418_v54 }
  0x9d   :  { %v469_v41 = vmul.f32 %v1357_v37, %v419_v33  ;;  %v420_v32 = vmax.f32 %v378_v5, 0.0  ;;  %v421_v3 = vmax.f32 %v379_v45, 0.0  ;;  %v422_v43 = vmax.f32 %v380_v28, 0.0 }
  0x9e   :  { %v423_v57 = vmax.f32 %v381_v25, 0.0  ;;  %v516_v61 = vadd.f32 %v1360_v30, %v466_v35  ;;  %v517_v1 = vadd.f32 %v1363_v49, %v467_v50  ;;  %v518_v4 = vadd.f32 %v1360_v30, %v468_v39 }
  0x9f   :  { %v519_v14 = vadd.f32 %v1363_v49, %v469_v41  ;;  %v470_v46 = vmul.f32 %v1352_v22, %v420_v32  ;;  %v471_v58 = vmul.f32 %v1357_v37, %v421_v3  ;;  %v472_v0 = vmul.f32 %v1352_v22, %v422_v43 }
  0xa0   :  { %v473_v55 = vmul.f32 %v1357_v37, %v423_v57  ;;  %v728_v13 = vpack.c.bf16 %v517_v1, %v516_v61  ;;  %v332_v17 = vmul.f32 %v1343_v6, %v1173_v16  ;;  %v333_v15 = vmul.f32 %v1354_v7, %v1177_v47 }
  0xa1   :  { %v729_v40 = vpack.c.bf16 %v519_v14, %v518_v4  ;;  %v520_v56 = vadd.f32 %v1360_v30, %v470_v46  ;;  %v521_v63 = vadd.f32 %v1363_v49, %v471_v58  ;;  %v522_v60 = vadd.f32 %v1360_v30, %v472_v0 }
  0xa2   :  { %v523_v23 = vadd.f32 %v1363_v49, %v473_v55  ;;  %682 = vst [vmem:[%s1640_s2 + $0x20] sm:$0xff] %v728_v13  ;;  %v382_v16 = vadd.f32 %v1346_v27, %v332_v17  ;;  %v383_v47 = vadd.f32 %v1349_v20, %v333_v15  ;;  %v334_v24 = vmul.f32 %v1343_v6, %v1185_v8 }
  0xa3   :  { %683 = vst [vmem:[%s1640_s2 + $0x28] sm:$0xff] %v729_v40  ;;  %v335_v9 = vmul.f32 %v1354_v7, %v1189_v53  ;;  %v730_v10 = vpack.c.bf16 %v521_v63, %v520_v56  ;;  %v336_v38 = vmul.f32 %v1343_v6, %v1197_v11  ;;  %v337_v18 = vmul.f32 %v1354_v7, %v1201_v59 }
  0xa4   :  { %v731_v21 = vpack.c.bf16 %v523_v23, %v522_v60  ;;  %v424_v54 = vmax.f32 %v382_v16, 0.0  ;;  %v425_v33 = vmax.f32 %v383_v47, 0.0  ;;  %v384_v5 = vadd.f32 %v1346_v27, %v334_v24 }
  0xa5   :  { %v385_v45 = vadd.f32 %v1349_v20, %v335_v9  ;;  %684 = vst [vmem:[%s1640_s2 + $0x30] sm:$0xff] %v730_v10  ;;  %v386_v8 = vadd.f32 %v1346_v27, %v336_v38  ;;  %v387_v53 = vadd.f32 %v1349_v20, %v337_v18  ;;  %v338_v11 = vmul.f32 %v1343_v6, %v1209_v31 }
  0xa6   :  { %685 = vst [vmem:[%s1640_s2 + $0x38] sm:$0xff] %v731_v21  ;;  %v339_v59 = vmul.f32 %v1354_v7, %v1213_v2  ;;  %v474_v28 = vmul.f32 %v1352_v22, %v424_v54  ;;  %v475_v25 = vmul.f32 %v1357_v37, %v425_v33  ;;  %v426_v35 = vmax.f32 %v384_v5, 0.0 }
  0xa7   :  { %v427_v50 = vmax.f32 %v385_v45, 0.0  ;;  %v428_v39 = vmax.f32 %v386_v8, 0.0  ;;  %v429_v41 = vmax.f32 %v387_v53, 0.0  ;;  %v388_v32 = vadd.f32 %v1346_v27, %v338_v11 }
  0xa8   :  { %v389_v3 = vadd.f32 %v1349_v20, %v339_v59  ;;  %v524_v43 = vadd.f32 %v1360_v30, %v474_v28  ;;  %v525_v57 = vadd.f32 %v1363_v49, %v475_v25  ;;  %v476_v31 = vmul.f32 %v1352_v22, %v426_v35 }
  0xa9   :  { %v477_v2 = vmul.f32 %v1357_v37, %v427_v50  ;;  %v478_v61 = vmul.f32 %v1352_v22, %v428_v39  ;;  %v479_v1 = vmul.f32 %v1357_v37, %v429_v41  ;;  %v430_v4 = vmax.f32 %v388_v32, 0.0 }
  0xaa   :  { %v431_v14 = vmax.f32 %v389_v3, 0.0  ;;  %v732_v46 = vpack.c.bf16 %v525_v57, %v524_v43  ;;  %v526_v58 = vadd.f32 %v1360_v30, %v476_v31  ;;  %v340_v55 = vmul.f32 %v1343_v6, %v1221_v51 }
  0xab   :  { %v527_v0 = vadd.f32 %v1363_v49, %v477_v2  ;;  %v528_v13 = vadd.f32 %v1360_v30, %v478_v61  ;;  %v529_v40 = vadd.f32 %v1363_v49, %v479_v1  ;;  %v480_v17 = vmul.f32 %v1352_v22, %v430_v4 }
  0xac   :  { %v481_v15 = vmul.f32 %v1357_v37, %v431_v14  ;;  %686 = vst [vmem:[%s1640_s2 + $0x40] sm:$0xff] %v732_v46  ;;  %v341_v63 = vmul.f32 %v1354_v7, %v1225_v12  ;;  %v390_v60 = vadd.f32 %v1346_v27, %v340_v55  ;;  %v342_v51 = vmul.f32 %v1343_v6, %v1233_v19 }
  0xad   :  { %v733_v56 = vpack.c.bf16 %v527_v0, %v526_v58  ;;  %v734_v23 = vpack.c.bf16 %v529_v40, %v528_v13  ;;  %v530_v16 = vadd.f32 %v1360_v30, %v480_v17  ;;  %v343_v24 = vmul.f32 %v1354_v7, %v1237_v26 }
  0xae   :  { %v531_v47 = vadd.f32 %v1363_v49, %v481_v15  ;;  %v391_v9 = vadd.f32 %v1349_v20, %v341_v63  ;;  %v432_v12 = vmax.f32 %v390_v60, 0.0  ;;  %v392_v10 = vadd.f32 %v1346_v27, %v342_v51  ;;  %v1666_v60 = vld [vmem:[#allocation6_spill] sm:$0xff] }
  0xaf   :  { %687 = vst [vmem:[%s1640_s2 + $0x48] sm:$0xff] %v733_v56  ;;  %v344_v19 = vmul.f32 %v1343_v6, %v1245_v29  ;;  %688 = vst [vmem:[%s1640_s2 + $0x50] sm:$0xff] %v734_v23  ;;  %v393_v38 = vadd.f32 %v1349_v20, %v343_v24  ;;  %v345_v26 = vmul.f32 %v1354_v7, %v1249_v34  ;;  %v1665_v56 = vld [vmem:[#allocation5_spill] sm:$0xff] }
  0xb0   :  { %v735_v21 = vpack.c.bf16 %v531_v47, %v530_v16  ;;  %v346_v18 = vmul.f32 %v1343_v6, %v1257_v36  ;;  %v433_v54 = vmax.f32 %v391_v9, 0.0  ;;  %v482_v33 = vmul.f32 %v1352_v22, %v432_v12  ;;  %v1667_v12 = vld [vmem:[#allocation7_spill] sm:$0xff] }
  0xb1   :  { %v434_v5 = vmax.f32 %v392_v10, 0.0  ;;  %v394_v45 = vadd.f32 %v1346_v27, %v344_v19  ;;  %v435_v29 = vmax.f32 %v393_v38, 0.0  ;;  %v395_v8 = vadd.f32 %v1349_v20, %v345_v26 }
  0xb2   :  { %689 = vst [vmem:[%s1640_s2 + $0x58] sm:$0xff] %v735_v21  ;;  %v347_v53 = vmul.f32 %v1354_v7, %v1261_v44  ;;  %v396_v34 = vadd.f32 %v1346_v27, %v346_v18  ;;  %v483_v36 = vmul.f32 %v1357_v37, %v433_v54  ;;  %v532_v11 = vadd.f32 %v1360_v30, %v482_v33  ;;  %v1668_v33 = vld [vmem:[#allocation8_spill] sm:$0xff] }
  0xb3   :  { %v484_v59 = vmul.f32 %v1352_v22, %v434_v5  ;;  %v436_v28 = vmax.f32 %v394_v45, 0.0  ;;  %v485_v25 = vmul.f32 %v1357_v37, %v435_v29  ;;  %v437_v35 = vmax.f32 %v395_v8, 0.0 }
  0xb4   :  { %v397_v50 = vadd.f32 %v1349_v20, %v347_v53  ;;  %v438_v39 = vmax.f32 %v396_v34, 0.0  ;;  %v533_v41 = vadd.f32 %v1363_v49, %v483_v36  ;;  %v348_v3 = vmul.f32 %v1343_v6, %v1269_v42  ;;  %v1669_v34 = vld [vmem:[#allocation9_spill] sm:$0xff] }
  0xb5   :  { %v534_v32 = vadd.f32 %v1360_v30, %v484_v59  ;;  %v486_v44 = vmul.f32 %v1352_v22, %v436_v28  ;;  %v535_v43 = vadd.f32 %v1363_v49, %v485_v25  ;;  %v487_v57 = vmul.f32 %v1357_v37, %v437_v35 }
  0xb6   :  { %v439_v31 = vmax.f32 %v397_v50, 0.0  ;;  %v488_v2 = vmul.f32 %v1352_v22, %v438_v39  ;;  %v736_v61 = vpack.c.bf16 %v533_v41, %v532_v11  ;;  %v349_v4 = vmul.f32 %v1354_v7, %v1273_v52  ;;  %v1670_v41 = vld [vmem:[#allocation10_spill] sm:$0xff] }
  0xb7   :  { %v536_v1 = vadd.f32 %v1360_v30, %v486_v44  ;;  %v398_v14 = vadd.f32 %v1346_v27, %v348_v3  ;;  %v737_v46 = vpack.c.bf16 %v535_v43, %v534_v32  ;;  %v537_v58 = vadd.f32 %v1363_v49, %v487_v57 }
  0xb8   :  { %v489_v42 = vmul.f32 %v1357_v37, %v439_v31  ;;  %v538_v0 = vadd.f32 %v1360_v30, %v488_v2  ;;  %690 = vst [vmem:[%s1640_s2 + $0x60] sm:$0xff] %v736_v61  ;;  %v399_v55 = vadd.f32 %v1349_v20, %v349_v4  ;;  %v350_v40 = vmul.f32 %v1343_v6, %v1281_v48 }
  0xb9   :  { %v440_v13 = vmax.f32 %v398_v14, 0.0  ;;  %v351_v52 = vmul.f32 %v1354_v7, %v1285_v62  ;;  %691 = vst [vmem:[%s1640_s2 + $0x68] sm:$0xff] %v737_v46  ;;  %v738_v17 = vpack.c.bf16 %v537_v58, %v536_v1  ;;  %v352_v63 = vmul.f32 %v1343_v6, %v1665_v56 }
  0xba   :  { %v539_v15 = vadd.f32 %v1363_v49, %v489_v42  ;;  %v353_v51 = vmul.f32 %v1354_v7, %v1666_v60  ;;  %v441_v23 = vmax.f32 %v399_v55, 0.0  ;;  %v400_v48 = vadd.f32 %v1346_v27, %v350_v40 }
  0xbb   :  { %v490_v16 = vmul.f32 %v1352_v22, %v440_v13  ;;  %v401_v62 = vadd.f32 %v1349_v20, %v351_v52  ;;  %692 = vst [vmem:[%s1640_s2 + $0x70] sm:$0xff] %v738_v17  ;;  %v402_v24 = vadd.f32 %v1346_v27, %v352_v63  ;;  %v354_v10 = vmul.f32 %v1343_v6, %v1667_v12 }
  0xbc   :  { %v739_v47 = vpack.c.bf16 %v539_v15, %v538_v0  ;;  %v403_v9 = vadd.f32 %v1349_v20, %v353_v51  ;;  %v491_v19 = vmul.f32 %v1357_v37, %v441_v23  ;;  %v442_v38 = vmax.f32 %v400_v48, 0.0 }
  0xbd   :  { %v540_v21 = vadd.f32 %v1360_v30, %v490_v16  ;;  %v443_v26 = vmax.f32 %v401_v62, 0.0  ;;  %v444_v18 = vmax.f32 %v402_v24, 0.0  ;;  %v355_v5 = vmul.f32 %v1354_v7, %v1668_v33 }
  0xbe   :  { %693 = vst [vmem:[%s1640_s2 + $0x78] sm:$0xff] %v739_v47  ;;  %v445_v54 = vmax.f32 %v403_v9, 0.0  ;;  %v404_v45 = vadd.f32 %v1346_v27, %v354_v10  ;;  %v541_v29 = vadd.f32 %v1363_v49, %v491_v19  ;;  %v492_v8 = vmul.f32 %v1352_v22, %v442_v38 }
  0xbf   :  { %v493_v53 = vmul.f32 %v1357_v37, %v443_v26  ;;  %v356_v36 = vmul.f32 %v1343_v6, %v1669_v34  ;;  %v494_v11 = vmul.f32 %v1352_v22, %v444_v18  ;;  %v405_v28 = vadd.f32 %v1349_v20, %v355_v5 }
  0xc0   :  { %v495_v59 = vmul.f32 %v1357_v37, %v445_v54  ;;  %v446_v25 = vmax.f32 %v404_v45, 0.0  ;;  %v740_v35 = vpack.c.bf16 %v541_v29, %v540_v21  ;;  %v542_v50 = vadd.f32 %v1360_v30, %v492_v8 }
  0xc1   :  { %v543_v39 = vadd.f32 %v1363_v49, %v493_v53  ;;  %v357_v32 = vmul.f32 %v1354_v7, %v1670_v41  ;;  %v544_v44 = vadd.f32 %v1360_v30, %v494_v11  ;;  %v447_v6 = vmax.f32 %v405_v28, 0.0 }
  0xc2   :  { %v545_v3 = vadd.f32 %v1363_v49, %v495_v59  ;;  %v496_v43 = vmul.f32 %v1352_v22, %v446_v25  ;;  %694 = vst [vmem:[%s1640_s2 + $0x80] sm:$0xff] %v740_v35  ;;  %v406_v31 = vadd.f32 %v1346_v27, %v356_v36 }
  0xc3   :  { %v741_v57 = vpack.c.bf16 %v543_v39, %v542_v50  ;;  %v407_v2 = vadd.f32 %v1349_v20, %v357_v32  ;;  %v497_v1 = vmul.f32 %v1357_v37, %v447_v6 }
  0xc4   :  { %v742_v61 = vpack.c.bf16 %v545_v3, %v544_v44  ;;  %v546_v7 = vadd.f32 %v1360_v30, %v496_v43  ;;  %v448_v4 = vmax.f32 %v406_v31, 0.0 }
  0xc5   :  { %695 = vst [vmem:[%s1640_s2 + $0x88] sm:$0xff] %v741_v57  ;;  %v449_v14 = vmax.f32 %v407_v2, 0.0  ;;  %v547_v46 = vadd.f32 %v1363_v49, %v497_v1 }
  0xc6   :  { %696 = vst [vmem:[%s1640_s2 + $0x90] sm:$0xff] %v742_v61  ;;  %v498_v27 = vmul.f32 %v1352_v22, %v448_v4 }
  0xc7   :  { %v499_v20 = vmul.f32 %v1357_v37, %v449_v14  ;;  %v743_v58 = vpack.c.bf16 %v547_v46, %v546_v7 }
  0xc8   :  { %v548_v42 = vadd.f32 %v1360_v30, %v498_v27 }
  0xc9   :  { %v549_v0 = vadd.f32 %v1363_v49, %v499_v20  ;;  %697 = vst [vmem:[%s1640_s2 + $0x98] sm:$0xff] %v743_v58 }
  0xcb   :  { %v744_v55 = vpack.c.bf16 %v549_v0, %v548_v42 }
  0xcd   :  { %698 = vst [vmem:[%s1640_s2 + $0xa0] sm:$0x11] %v744_v55 }

// kernel: heatmap_decoder_forward.8
= control target key start
LH: loop header
LB: loop body
LE: loop exit
PB: predicated region body
PF: predicated region fallthrough
CT: control target
= control target key end

     0   :  { %s3648_s1 = inlined_call_operand.vmem [shape: bf16[256,1152], index: 1, kind: input, shape index: {}]   ;;  %s3649_s0 = inlined_call_operand.vmem [shape: bf16[162,256], index: 0, kind: input, shape index: {}]   ;;  %s3650_s2 = inlined_call_operand.vmem [shape: f32[162,1152], index: 2, kind: output, shape index: {}]  }
   0x1   :  { %v2177_v0 = vld [vmem:[%s3648_s1 + $0x4] ss:$36 sps:$4 sm:$0xff]   ;;  %v2180_v2 = vld [vmem:[%s3648_s1 + $0x4c] ss:$36 sps:$4 sm:$0xff]   ;;  %v2183_v4 = vld [vmem:[%s3648_s1 + $0x94] ss:$36 sps:$4 sm:$0xff]  }
   0x2   :  { %v2179_v1 = vld [vmem:[%s3648_s1] ss:$36 sps:$4 sm:$0xff]   ;;  %1036 = vmatprep.subr.bf16.mxu0 %v2177_v0  ;;  %v2182_v3 = vld [vmem:[%s3648_s1 + $0x48] ss:$36 sps:$4 sm:$0xff]   ;;  %v2187_v7 = vld [vmem:[%s3648_s1 + $0x90] ss:$36 sps:$4 sm:$0xff]  }
   0x3   :  { %1037 = vmatpush1.bf16.msra.mxu0 %v2179_v1  ;;  %v2185_v5 = vld [vmem:[%s3648_s1 + $0xc] ss:$36 sps:$4 sm:$0xff]   ;;  %v2191_v8 = vld [vmem:[%s3648_s1 + $0x54] ss:$36 sps:$4 sm:$0xff]   ;;  %v2189_v10 = vld [vmem:[%s3648_s1 + $0xdc] ss:$36 sps:$4 sm:$0xff]  }
   0x4   :  { %1038 = vmatprep.subr.bf16.mxu0 %v2180_v2  ;;  %v2188_v6 = vld [vmem:[%s3648_s1 + $0x8] ss:$36 sps:$4 sm:$0xff]   ;;  %1177 = vmatprep.subr.bf16.mxu1 %v2185_v5  ;;  %v2194_v9 = vld [vmem:[%s3648_s1 + $0x50] ss:$36 sps:$4 sm:$0xff]   ;;  %v2197_v11 = vld [vmem:[%s3648_s1 + $0x9c] ss:$36 sps:$4 sm:$0xff]  }
   0x5   :  { %1178 = vmatpush1.bf16.msra.mxu1 %v2188_v6  ;;  %v2193_v12 = vld [vmem:[%s3648_s1 + $0xd8] ss:$36 sps:$4 sm:$0xff]   ;;  %v2195_v14 = vld [vmem:[%s3648_s1 + $0x124] ss:$36 sps:$4 sm:$0xff]   ;;  %v2201_v17 = vld [vmem:[%s3648_s1 + $0x16c] ss:$36 sps:$4 sm:$0xff]  }
   0x6   :  { %1179 = vmatprep.subr.bf16.mxu1 %v2191_v8  ;;  %v2200_v13 = vld [vmem:[%s3648_s1 + $0x98] ss:$36 sps:$4 sm:$0xff]   ;;  %v2203_v15 = vld [vmem:[%s3648_s1 + $0xe4] ss:$36 sps:$4 sm:$0xff]   ;;  %v2209_v19 = vld [vmem:[%s3648_s1 + $0x12c] ss:$36 sps:$4 sm:$0xff]  }
   0x7   :  { %1039 = vmatpush1.bf16.msra.mxu0 %v2182_v3  ;;  %v2199_v16 = vld [vmem:[%s3648_s1 + $0x120] ss:$36 sps:$4 sm:$0xff]   ;;  %v2205_v20 = vld [vmem:[%s3648_s1 + $0x168] ss:$36 sps:$4 sm:$0xff]   ;;  %v2207_v22 = vld [vmem:[%s3648_s1 + $0x1b4] ss:$36 sps:$4 sm:$0xff]  }
   0x8   :  { %1040 = vmatprep.subr.bf16.mxu0 %v2183_v4  ;;  %v2206_v18 = vld [vmem:[%s3648_s1 + $0xe0] ss:$36 sps:$4 sm:$0xff]   ;;  %v2212_v21 = vld [vmem:[%s3648_s1 + $0x128] ss:$36 sps:$4 sm:$0xff]   ;;  %v2215_v23 = vld [vmem:[%s3648_s1 + $0x174] ss:$36 sps:$4 sm:$0xff]  }
   0x9   :  { %1180 = vmatpush1.bf16.msra.mxu1 %v2194_v9  ;;  %v2211_v24 = vld [vmem:[%s3648_s1 + $0x1b0] ss:$36 sps:$4 sm:$0xff]   ;;  %v2213_v25 = vld [vmem:[%s3648_s1 + $0x1fc] ss:$36 sps:$4 sm:$0xff]   ;;  %v2219_v30 = vld [vmem:[%s3648_s1 + $0x244] ss:$36 sps:$4 sm:$0xff]  }
   0xa   :  { %1181 = vmatprep.subr.bf16.mxu1 %v2197_v11  ;;  %v2218_v26 = vld [vmem:[%s3648_s1 + $0x170] ss:$36 sps:$4 sm:$0xff]   ;;  %v2221_v27 = vld [vmem:[%s3648_s1 + $0x1bc] ss:$36 sps:$4 sm:$0xff]   ;;  %v2227_v31 = vld [vmem:[%s3648_s1 + $0x204] ss:$36 sps:$4 sm:$0xff]  }
   0xb   :  { %1041 = vmatpush1.bf16.msra.mxu0 %v2187_v7  ;;  %v2217_v28 = vld [vmem:[%s3648_s1 + $0x1f8] ss:$36 sps:$4 sm:$0xff]   ;;  %v2223_v32 = vld [vmem:[%s3648_s1 + $0x240] ss:$36 sps:$4 sm:$0xff]   ;;  %v2225_v33 = vld [vmem:[%s3648_s1 + $0x28c] ss:$36 sps:$4 sm:$0xff]  }
   0xc   :  { %1042 = vmatprep.subr.bf16.mxu0 %v2189_v10  ;;  %v2224_v29 = vld [vmem:[%s3648_s1 + $0x1b8] ss:$36 sps:$4 sm:$0xff]   ;;  %v2230_v34 = vld [vmem:[%s3648_s1 + $0x200] ss:$36 sps:$4 sm:$0xff]   ;;  %v2233_v35 = vld [vmem:[%s3648_s1 + $0x24c] ss:$36 sps:$4 sm:$0xff]  }
   0xd   :  { %1182 = vmatpush1.bf16.msra.mxu1 %v2200_v13  ;;  %v2229_v36 = vld [vmem:[%s3648_s1 + $0x288] ss:$36 sps:$4 sm:$0xff]   ;;  %v2231_v38 = vld [vmem:[%s3648_s1 + $0x2d4] ss:$36 sps:$4 sm:$0xff]   ;;  %v2237_v41 = vld [vmem:[%s3648_s1 + $0x31c] ss:$36 sps:$4 sm:$0xff]  }
   0xe   :  { %1183 = vmatprep.subr.bf16.mxu1 %v2203_v15  ;;  %v2236_v37 = vld [vmem:[%s3648_s1 + $0x248] ss:$36 sps:$4 sm:$0xff]   ;;  %v2239_v39 = vld [vmem:[%s3648_s1 + $0x294] ss:$36 sps:$4 sm:$0xff]   ;;  %v2245_v43 = vld [vmem:[%s3648_s1 + $0x2dc] ss:$36 sps:$4 sm:$0xff]  }
   0xf   :  { %1043 = vmatpush1.bf16.msra.mxu0 %v2193_v12  ;;  %v2235_v40 = vld [vmem:[%s3648_s1 + $0x2d0] ss:$36 sps:$4 sm:$0xff]   ;;  %v2567_v44 = vld [vmem:[%s3649_s0 + $0x4] ss:$8 sps:$4 sm:$0xff]   ;;  %v2241_v45 = vld [vmem:[%s3648_s1 + $0x318] ss:$36 sps:$4 sm:$0xff]  }
  0x10   :  { %1044 = vmatprep.subr.bf16.mxu0 %v2195_v14  ;;  %v2242_v42 = vld [vmem:[%s3648_s1 + $0x290] ss:$36 sps:$4 sm:$0xff]   ;;  %1068 = vmatprep.mubr.bf16.mxu0 %v2567_v44  ;;  %v2243_v46 = vld [vmem:[%s3648_s1 + $0x364] ss:$36 sps:$4 sm:$0xff]   ;;  %v2248_v47 = vld [vmem:[%s3648_s1 + $0x2d8] ss:$36 sps:$4 sm:$0xff]  }
  0x11   :  { %1184 = vmatpush1.bf16.msra.mxu1 %v2206_v18  ;;  %1209 = vmatprep.mubr.bf16.mxu1 %v2567_v44  ;;  %v2251_v48 = vld [vmem:[%s3648_s1 + $0x324] ss:$36 sps:$4 sm:$0xff]   ;;  %v2249_v50 = vld [vmem:[%s3648_s1 + $0x3ac] ss:$36 sps:$4 sm:$0xff]   ;;  %v2255_v54 = vld [vmem:[%s3648_s1 + $0x3f4] ss:$36 sps:$4 sm:$0xff]  }
  0x12   :  { %1185 = vmatprep.subr.bf16.mxu1 %v2209_v19  ;;  %v2247_v49 = vld [vmem:[%s3648_s1 + $0x360] ss:$36 sps:$4 sm:$0xff]   ;;  %v2257_v52 = vld [vmem:[%s3648_s1 + $0x36c] ss:$36 sps:$4 sm:$0xff]   ;;  %v2263_v56 = vld [vmem:[%s3648_s1 + $0x3b4] ss:$36 sps:$4 sm:$0xff]  }
  0x13   :  { %1045 = vmatpush1.bf16.msra.mxu0 %v2199_v16  ;;  %v2254_v51 = vld [vmem:[%s3648_s1 + $0x320] ss:$36 sps:$4 sm:$0xff]   ;;  %v2253_v53 = vld [vmem:[%s3648_s1 + $0x3a8] ss:$36 sps:$4 sm:$0xff]   ;;  %v2259_v57 = vld [vmem:[%s3648_s1 + $0x3f0] ss:$36 sps:$4 sm:$0xff]  }
  0x14   :  { %1046 = vmatprep.subr.bf16.mxu0 %v2201_v17  ;;  %v2260_v55 = vld [vmem:[%s3648_s1 + $0x368] ss:$36 sps:$4 sm:$0xff]   ;;  %v2261_v58 = vld [vmem:[%s3648_s1 + $0x43c] ss:$36 sps:$4 sm:$0xff]   ;;  %v2266_v59 = vld [vmem:[%s3648_s1 + $0x3b0] ss:$36 sps:$4 sm:$0xff]  }
  0x15   :  { %1186 = vmatpush1.bf16.msra.mxu1 %v2212_v21  ;;  %v2270_v60 = vld [vmem:[%s3648_s1 + $0x3fc] ss:$36 sps:$4 sm:$0xff]   ;;  %v2274_v62 = vld [vmem:[%s3648_s1 + $0x14] ss:$36 sps:$4 sm:$0xff]   ;;  %v2276_v0 = vld [vmem:[%s3648_s1 + $0x444] ss:$36 sps:$4 sm:$0xff]  }
  0x16   :  { %1187 = vmatprep.subr.bf16.mxu1 %v2215_v23  ;;  %v2265_v61 = vld [vmem:[%s3648_s1 + $0x438] ss:$36 sps:$4 sm:$0xff]   ;;  %v2634_v1 = vld [vmem:[%s3649_s0] ss:$8 sps:$4 sm:$0xff]   ;;  %v2272_v2 = vld [vmem:[%s3648_s1 + $0x10] ss:$36 sps:$4 sm:$0xff]  }
  0x17   :  { %1047 = vmatpush1.bf16.msra.mxu0 %v2205_v20  ;;  %v2275_v63 = vld [vmem:[%s3648_s1 + $0x3f8] ss:$36 sps:$4 sm:$0xff]   ;;  %v2278_v3 = vld [vmem:[%s3648_s1 + $0x440] ss:$36 sps:$4 sm:$0xff]   ;;  %v2299_v15 = vld [vmem:[%s3648_s1 + $0xec] ss:$36 sps:$4 sm:$0xff]  }
  0x18   :  { %1048 = vmatprep.subr.bf16.mxu0 %v2207_v22  ;;  %v2281_v4 = vld [vmem:[%s3648_s1 + $0x5c] ss:$36 sps:$4 sm:$0xff]   ;;  %v2290_v9 = vld [vmem:[%s3648_s1 + $0xa4] ss:$36 sps:$4 sm:$0xff]   ;;  %v2670_v11 = vld [vmem:[%s3649_s0 + $0x10] ss:$8 sps:$4 sm:$0xff]  }
  0x19   :  { %1188 = vmatpush1.bf16.msra.mxu1 %v2218_v26  ;;  %v2648_v5 = vld [vmem:[%s3649_s0 + $0x14] ss:$8 sps:$4 sm:$0xff]   ;;  %v2296_v10 = vld [vmem:[%s3648_s1 + $0x64] ss:$36 sps:$4 sm:$0xff]   ;;  %v2302_v16 = vld [vmem:[%s3648_s1 + $0xac] ss:$36 sps:$4 sm:$0xff]  }
  0x1a   :  { %1189 = vmatprep.subr.bf16.mxu1 %v2221_v27  ;;  %v2287_v6 = vld [vmem:[%s3648_s1 + $0x1c] ss:$36 sps:$4 sm:$0xff]   ;;  %v2679_v13 = vld [vmem:[%s3649_s0 + $0x24] ss:$8 sps:$4 sm:$0xff]   ;;  %v2305_v19 = vld [vmem:[%s3648_s1 + $0x134] ss:$36 sps:$4 sm:$0xff]  }
  0x1b   :  { %1049 = vmatpush1.bf16.msra.mxu0 %v2211_v24  ;;  %v2279_v7 = vld [vmem:[%s3648_s1 + $0x58] ss:$36 sps:$4 sm:$0xff]   ;;  %v2288_v12 = vld [vmem:[%s3648_s1 + $0xa0] ss:$36 sps:$4 sm:$0xff]   ;;  %v2297_v17 = vld [vmem:[%s3648_s1 + $0xe8] ss:$36 sps:$4 sm:$0xff]  }
  0x1c   :  { %1050 = vmatprep.subr.bf16.mxu0 %v2213_v25  ;;  %v2285_v8 = vld [vmem:[%s3648_s1 + $0x18] ss:$36 sps:$4 sm:$0xff]   ;;  %v2294_v14 = vld [vmem:[%s3648_s1 + $0x60] ss:$36 sps:$4 sm:$0xff]   ;;  %v2300_v18 = vld [vmem:[%s3648_s1 + $0xa8] ss:$36 sps:$4 sm:$0xff]  }
  0x1d   :  { %1190 = vmatpush1.bf16.msra.mxu1 %v2224_v29  ;;  %v2311_v20 = vld [vmem:[%s3648_s1 + $0xf4] ss:$36 sps:$4 sm:$0xff]   ;;  %v2708_v21 = vld [vmem:[%s3649_s0 + $0x20] ss:$8 sps:$4 sm:$0xff]  }
  0x1e   :  { %1191 = vmatprep.subr.bf16.mxu1 %v2227_v31  ;;  %v2303_v22 = vld [vmem:[%s3648_s1 + $0x130] ss:$36 sps:$4 sm:$0xff]   ;;  %v2314_v25 = vld [vmem:[%s3648_s1 + $0x17c] ss:$36 sps:$4 sm:$0xff]   ;;  %v2323_v29 = vld [vmem:[%s3648_s1 + $0x1c4] ss:$36 sps:$4 sm:$0xff]  }
  0x1f   :  { %1051 = vmatpush1.bf16.msra.mxu0 %v2217_v28  ;;  %v2717_v23 = vld [vmem:[%s3649_s0 + $0x34] ss:$8 sps:$4 sm:$0xff]   ;;  %v2746_v31 = vld [vmem:[%s3649_s0 + $0x30] ss:$8 sps:$4 sm:$0xff]  }
  0x20   :  { %1052 = vmatprep.subr.bf16.mxu0 %v2219_v30  ;;  %v2309_v24 = vld [vmem:[%s3648_s1 + $0xf0] ss:$36 sps:$4 sm:$0xff]   ;;  %v2320_v26 = vld [vmem:[%s3648_s1 + $0x13c] ss:$36 sps:$4 sm:$0xff]   ;;  %v2326_v30 = vld [vmem:[%s3648_s1 + $0x184] ss:$36 sps:$4 sm:$0xff]  }
  0x21   :  { %1192 = vmatpush1.bf16.msra.mxu1 %v2230_v34  ;;  %v2312_v27 = vld [vmem:[%s3648_s1 + $0x178] ss:$36 sps:$4 sm:$0xff]   ;;  %v2324_v34 = vld [vmem:[%s3648_s1 + $0x180] ss:$36 sps:$4 sm:$0xff]  }
  0x22   :  { %1193 = vmatprep.subr.bf16.mxu1 %v2233_v35  ;;  %v2318_v28 = vld [vmem:[%s3648_s1 + $0x138] ss:$36 sps:$4 sm:$0xff]   ;;  %v2331_v35 = vld [vmem:[%s3648_s1 + $0x20c] ss:$36 sps:$4 sm:$0xff]  }
  0x23   :  { %1053 = vmatpush1.bf16.msra.mxu0 %v2223_v32  ;;  %v2752_v32 = vld [vmem:[%s3649_s0 + $0x44] ss:$8 sps:$4 sm:$0xff]  }
  0x24   :  { %1054 = vmatprep.subr.bf16.mxu0 %v2225_v33  ;;  %v2321_v33 = vld [vmem:[%s3648_s1 + $0x1c0] ss:$36 sps:$4 sm:$0xff]  }
  0x25   :  { %1194 = vmatpush1.bf16.msra.mxu1 %v2236_v37  ;;  %v2329_v37 = vld [vmem:[%s3648_s1 + $0x208] ss:$36 sps:$4 sm:$0xff]  }
  0x26   :  { %1195 = vmatprep.subr.bf16.mxu1 %v2239_v39  ;;  %v2338_v39 = vld [vmem:[%s3648_s1 + $0x254] ss:$36 sps:$4 sm:$0xff]  }
  0x27   :  { %1055 = vmatpush1.bf16.msra.mxu0 %v2229_v36  ;;  %v2335_v36 = vld [vmem:[%s3648_s1 + $0x1cc] ss:$36 sps:$4 sm:$0xff]  }
  0x28   :  { %1056 = vmatprep.subr.bf16.mxu0 %v2231_v38  ;;  %v2333_v38 = vld [vmem:[%s3648_s1 + $0x1c8] ss:$36 sps:$4 sm:$0xff]  }
  0x29   :  { %1196 = vmatpush1.bf16.msra.mxu1 %v2242_v42  ;;  %v2790_v42 = vld [vmem:[%s3649_s0 + $0x54] ss:$8 sps:$4 sm:$0xff]  }
  0x2a   :  { %1197 = vmatprep.subr.bf16.mxu1 %v2245_v43  ;;  %v2336_v43 = vld [vmem:[%s3648_s1 + $0x250] ss:$36 sps:$4 sm:$0xff]  }
  0x2b   :  { %1057 = vmatpush1.bf16.msra.mxu0 %v2235_v40  ;;  %v2781_v40 = vld [vmem:[%s3649_s0 + $0x40] ss:$8 sps:$4 sm:$0xff]  }
  0x2c   :  { %1058 = vmatprep.subr.bf16.mxu0 %v2237_v41  ;;  %v2344_v41 = vld [vmem:[%s3648_s1 + $0x214] ss:$36 sps:$4 sm:$0xff]  }
  0x2d   :  { %1198 = vmatpush1.bf16.msra.mxu1 %v2248_v47  ;;  %v2350_v47 = vld [vmem:[%s3648_s1 + $0x25c] ss:$36 sps:$4 sm:$0xff]  }
  0x2e   :  { %1199 = vmatprep.subr.bf16.mxu1 %v2251_v48  ;;  %v2345_v48 = vld [vmem:[%s3648_s1 + $0x298] ss:$36 sps:$4 sm:$0xff]  }
  0x2f   :  { %1059 = vmatpush1.bf16.msra.mxu0 %v2241_v45  ;;  %v2342_v45 = vld [vmem:[%s3648_s1 + $0x210] ss:$36 sps:$4 sm:$0xff]  }
  0x30   :  { %1060 = vmatprep.subr.bf16.mxu0 %v2243_v46  ;;  %v2347_v46 = vld [vmem:[%s3648_s1 + $0x29c] ss:$36 sps:$4 sm:$0xff]  }
  0x31   :  { %1200 = vmatpush1.bf16.msra.mxu1 %v2254_v51  ;;  %v2355_v51 = vld [vmem:[%s3648_s1 + $0x2e4] ss:$36 sps:$4 sm:$0xff]  }
  0x32   :  { %1201 = vmatprep.subr.bf16.mxu1 %v2257_v52  ;;  %v2824_v52 = vld [vmem:[%s3649_s0 + $0x64] ss:$8 sps:$4 sm:$0xff]  }
  0x33   :  { %1061 = vmatpush1.bf16.msra.mxu0 %v2247_v49  ;;  %v2813_v49 = vld [vmem:[%s3649_s0 + $0x50] ss:$8 sps:$4 sm:$0xff]  }
  0x34   :  { %1062 = vmatprep.subr.bf16.mxu0 %v2249_v50  ;;  %v2348_v50 = vld [vmem:[%s3648_s1 + $0x258] ss:$36 sps:$4 sm:$0xff]  }
  0x35   :  { %1202 = vmatpush1.bf16.msra.mxu1 %v2260_v55  ;;  %v2357_v55 = vld [vmem:[%s3648_s1 + $0x2a0] ss:$36 sps:$4 sm:$0xff]  }
  0x36   :  { %1203 = vmatprep.subr.bf16.mxu1 %v2263_v56  ;;  %v2362_v56 = vld [vmem:[%s3648_s1 + $0x32c] ss:$36 sps:$4 sm:$0xff]  }
  0x37   :  { %1063 = vmatpush1.bf16.msra.mxu0 %v2253_v53  ;;  %v2359_v53 = vld [vmem:[%s3648_s1 + $0x2a4] ss:$36 sps:$4 sm:$0xff]  }
  0x38   :  { %1064 = vmatprep.subr.bf16.mxu0 %v2255_v54  ;;  %v2353_v54 = vld [vmem:[%s3648_s1 + $0x2e0] ss:$36 sps:$4 sm:$0xff]  }
  0x39   :  { %1204 = vmatpush1.bf16.msra.mxu1 %v2266_v59  ;;  %v2366_v59 = vld [vmem:[%s3648_s1 + $0x2e8] ss:$36 sps:$4 sm:$0xff]  }
  0x3a   :  { %1205 = vmatprep.subr.bf16.mxu1 %v2270_v60  ;;  %v2854_v60 = vld [vmem:[%s3649_s0 + $0x60] ss:$8 sps:$4 sm:$0xff]  }
  0x3b   :  { %1065 = vmatpush1.bf16.msra.mxu0 %v2259_v57  ;;  %v2368_v57 = vld [vmem:[%s3648_s1 + $0x2ec] ss:$36 sps:$4 sm:$0xff]  }
  0x3c   :  { %1066 = vmatprep.subr.bf16.mxu0 %v2261_v58  ;;  %v2360_v58 = vld [vmem:[%s3648_s1 + $0x328] ss:$36 sps:$4 sm:$0xff]  }
  0x3d   :  { %1206 = vmatpush1.bf16.msra.mxu1 %v2275_v63  ;;  %v2376_v63 = vld [vmem:[%s3648_s1 + $0x334] ss:$36 sps:$4 sm:$0xff]  }
  0x3e   :  { %1207 = vmatprep.subr.bf16.mxu1 %v2276_v0  ;;  %v2369_v0 = vld [vmem:[%s3648_s1 + $0x370] ss:$36 sps:$4 sm:$0xff]  }
  0x3f   :  { %1067 = vmatpush1.bf16.msra.mxu0 %v2265_v61  ;;  %v2371_v61 = vld [vmem:[%s3648_s1 + $0x374] ss:$36 sps:$4 sm:$0xff]  }
  0x40   :  { %1318 = vmatprep.subr.bf16.mxu0 %v2274_v62  ;;  %v2862_v62 = vld [vmem:[%s3649_s0 + $0x74] ss:$8 sps:$4 sm:$0xff]  }
  0x41   :  { %1208 = vmatpush1.bf16.msra.mxu1 %v2278_v3  ;;  %v2380_v3 = vld [vmem:[%s3648_s1 + $0x3bc] ss:$36 sps:$4 sm:$0xff]  }
  0x42   :  { %1069 = vmatmul.mubr.bf16.vlgmr.msra.gmra.mrb[0].mxu0 %v2634_v1  ;;  %1459 = vmatprep.subr.bf16.mxu1 %v2287_v6  ;;  %v2378_v6 = vld [vmem:[%s3648_s1 + $0x3b8] ss:$36 sps:$4 sm:$0xff]  }
  0x43   :  { %1319 = vmatpush1.bf16.msra.mxu0 %v2272_v2  ;;  %1078 = vmatprep.mubr.bf16.mxu0 %v2648_v5  ;;  %v2374_v2 = vld [vmem:[%s3648_s1 + $0x330] ss:$36 sps:$4 sm:$0xff]  }
  0x44   :  { %1320 = vmatprep.subr.bf16.mxu0 %v2281_v4  ;;  %1210 = vmatmul.mubr.bf16.vlgmr.msra.gmra.mrb[0].mxu1 %v2634_v1  ;;  %v2383_v4 = vld [vmem:[%s3648_s1 + $0x37c] ss:$36 sps:$4 sm:$0xff]  }
  0x45   :  { %1460 = vmatpush1.bf16.msra.mxu1 %v2285_v8  ;;  %1219 = vmatprep.mubr.bf16.mxu1 %v2648_v5  ;;  %v2386_v8 = vld [vmem:[%s3648_s1 + $0x404] ss:$36 sps:$4 sm:$0xff]  }
  0x46   :  { %1461 = vmatprep.subr.bf16.mxu1 %v2296_v10  ;;  %v2898_v10 = vld [vmem:[%s3649_s0 + $0x70] ss:$8 sps:$4 sm:$0xff]  }
  0x47   :  { %1321 = vmatpush1.bf16.msra.mxu0 %v2279_v7  ;;  %v2381_v7 = vld [vmem:[%s3648_s1 + $0x378] ss:$36 sps:$4 sm:$0xff]  }
  0x48   :  { %1322 = vmatprep.subr.bf16.mxu0 %v2290_v9  ;;  %v2391_v9 = vld [vmem:[%s3648_s1 + $0x3c4] ss:$36 sps:$4 sm:$0xff]  }
  0x49   :  { %1462 = vmatpush1.bf16.msra.mxu1 %v2294_v14  ;;  %v2384_v14 = vld [vmem:[%s3648_s1 + $0x400] ss:$36 sps:$4 sm:$0xff]  }
  0x4a   :  { %1079 = vmatmul.mubr.bf16.gmra.mrb[4].mxu0 %v2670_v11  ;;  %1463 = vmatprep.subr.bf16.mxu1 %v2302_v16  ;;  %v2394_v16 = vld [vmem:[%s3648_s1 + $0x44c] ss:$36 sps:$4 sm:$0xff]  }
  0x4b   :  { %1323 = vmatpush1.bf16.msra.mxu0 %v2288_v12  ;;  %1088 = vmatprep.mubr.bf16.mxu0 %v2679_v13  ;;  %v2904_v12 = vld [vmem:[%s3649_s0 + $0x84] ss:$8 sps:$4 sm:$0xff]  }
  0x4c   :  { %1324 = vmatprep.subr.bf16.mxu0 %v2299_v15  ;;  %1220 = vmatmul.mubr.bf16.gmra.mrb[4].mxu1 %v2670_v11  ;;  %v2389_v15 = vld [vmem:[%s3648_s1 + $0x3c0] ss:$36 sps:$4 sm:$0xff]  }
  0x4d   :  { %1229 = vmatprep.mubr.bf16.mxu1 %v2679_v13  ;;  %1464 = vmatpush1.bf16.msra.mxu1 %v2300_v18  ;;  %v2392_v18 = vld [vmem:[%s3648_s1 + $0x448] ss:$36 sps:$4 sm:$0xff]  }
  0x4e   :  { %1465 = vmatprep.subr.bf16.mxu1 %v2311_v20  ;;  %v2398_v20 = vld [vmem:[%s3648_s1 + $0x260] ss:$36 sps:$4 sm:$0xff]  }
  0x4f   :  { %1325 = vmatpush1.bf16.msra.mxu0 %v2297_v17  ;;  %v2397_v17 = vld [vmem:[%s3648_s1 + $0x40c] ss:$36 sps:$4 sm:$0xff]  }
  0x50   :  { %1326 = vmatprep.subr.bf16.mxu0 %v2305_v19  ;;  %v2395_v19 = vld [vmem:[%s3648_s1 + $0x408] ss:$36 sps:$4 sm:$0xff]  }
  0x51   :  { %1466 = vmatpush1.bf16.msra.mxu1 %v2309_v24  ;;  %v2936_v24 = vld [vmem:[%s3649_s0 + $0x80] ss:$8 sps:$4 sm:$0xff]  }
  0x52   :  { %1089 = vmatmul.mubr.bf16.gmra.mrb[8].mxu0 %v2708_v21  ;;  %1467 = vmatprep.subr.bf16.mxu1 %v2320_v26  ;;  %v2400_v26 = vld [vmem:[%s3648_s1 + $0x450] ss:$36 sps:$4 sm:$0xff]  }
  0x53   :  { %1098 = vmatprep.mubr.bf16.mxu0 %v2717_v23  ;;  %1327 = vmatpush1.bf16.msra.mxu0 %v2303_v22  ;;  %v2402_v22 = vld [vmem:[%s3648_s1 + $0x454] ss:$36 sps:$4 sm:$0xff]  }
  0x54   :  { %1328 = vmatprep.subr.bf16.mxu0 %v2314_v25  ;;  %1230 = vmatmul.mubr.bf16.gmra.mrb[8].mxu1 %v2708_v21  ;;  %v2942_v25 = vld [vmem:[%s3649_s0 + $0x94] ss:$8 sps:$4 sm:$0xff]  }
  0x55   :  { %1239 = vmatprep.mubr.bf16.mxu1 %v2717_v23  ;;  %1468 = vmatpush1.bf16.msra.mxu1 %v2318_v28  ;;  %v2956_v28 = vld [vmem:[%s3649_s0 + $0x90] ss:$8 sps:$4 sm:$0xff]  }
  0x56   :  { %1469 = vmatprep.subr.bf16.mxu1 %v2326_v30 }
  0x57   :  { %1329 = vmatpush1.bf16.msra.mxu0 %v2312_v27  ;;  %v32_v27 = vld [vmem:[%s3649_s0 + $0xa0] sm:$0x11] }
  0x58   :  { %1330 = vmatprep.subr.bf16.mxu0 %v2323_v29  ;;  %v2959_v29 = vcombine.high %v32_v27, %v32_v27  ;;  %v2964_v30 = vcombine.low %v32_v27, %v32_v27 }
  0x59   :  { %1470 = vmatpush1.bf16.msra.mxu1 %v2324_v34  ;;  %v2403_v34 = vld [vmem:[%s3648_s1 + $0x2a8] ss:$36 sps:$4 sm:$0xff]  }
  0x5a   :  { %1099 = vmatmul.mubr.bf16.gmra.mrb[12].mxu0 %v2746_v31  ;;  %1471 = vmatprep.subr.bf16.mxu1 %v2335_v36  ;;  %v2405_v36 = vld [vmem:[%s3648_s1 + $0x2f0] ss:$36 sps:$4 sm:$0xff]  }
  0x5b   :  { %1108 = vmatprep.mubr.bf16.mxu0 %v2752_v32  ;;  %1331 = vmatpush1.bf16.msra.mxu0 %v2321_v33  ;;  %v2399_v33 = vld [vmem:[%s3648_s1 + $0x20] ss:$36 sps:$4 sm:$0xff]  }
  0x5c   :  { %1332 = vmatprep.subr.bf16.mxu0 %v2331_v35  ;;  %1240 = vmatmul.mubr.bf16.gmra.mrb[12].mxu1 %v2746_v31  ;;  %v2404_v35 = vld [vmem:[%s3648_s1 + $0x68] ss:$36 sps:$4 sm:$0xff]  }
  0x5d   :  { %1249 = vmatprep.mubr.bf16.mxu1 %v2752_v32  ;;  %1472 = vmatpush1.bf16.msra.mxu1 %v2333_v38  ;;  %v2407_v38 = vld [vmem:[%s3648_s1 + $0x338] ss:$36 sps:$4 sm:$0xff]  }
  0x5e   :  { %1473 = vmatprep.subr.bf16.mxu1 %v2344_v41  ;;  %v2409_v41 = vld [vmem:[%s3648_s1 + $0x380] ss:$36 sps:$4 sm:$0xff]  }
  0x5f   :  { %1333 = vmatpush1.bf16.msra.mxu0 %v2329_v37  ;;  %v2406_v37 = vld [vmem:[%s3648_s1 + $0xb0] ss:$36 sps:$4 sm:$0xff]  }
  0x60   :  { %1334 = vmatprep.subr.bf16.mxu0 %v2338_v39  ;;  %v2408_v39 = vld [vmem:[%s3648_s1 + $0xf8] ss:$36 sps:$4 sm:$0xff]  }
  0x61   :  { %1474 = vmatpush1.bf16.msra.mxu1 %v2342_v45  ;;  %v2411_v45 = vld [vmem:[%s3648_s1 + $0x3c8] ss:$36 sps:$4 sm:$0xff]  }
  0x62   :  { %1109 = vmatmul.mubr.bf16.gmra.mrb[16].mxu0 %v2781_v40  ;;  %1475 = vmatprep.subr.bf16.mxu1 %v2350_v47  ;;  %v2413_v47 = vld [vmem:[%s3648_s1 + $0x410] ss:$36 sps:$4 sm:$0xff]  }
  0x63   :  { %1118 = vmatprep.mubr.bf16.mxu0 %v2790_v42  ;;  %1335 = vmatpush1.bf16.msra.mxu0 %v2336_v43  ;;  %v2410_v43 = vld [vmem:[%s3648_s1 + $0x140] ss:$36 sps:$4 sm:$0xff]  }
  0x64   :  { %1336 = vmatprep.subr.bf16.mxu0 %v2347_v46  ;;  %1250 = vmatmul.mubr.bf16.gmra.mrb[16].mxu1 %v2781_v40  ;;  %v2412_v46 = vld [vmem:[%s3648_s1 + $0x188] ss:$36 sps:$4 sm:$0xff]  }
  0x65   :  { %1259 = vmatprep.mubr.bf16.mxu1 %v2790_v42  ;;  %1476 = vmatpush1.bf16.msra.mxu1 %v2348_v50  ;;  %v2415_v50 = vld [vmem:[%s3648_s1 + $0x458] ss:$36 sps:$4 sm:$0xff]  }
  0x66   :  { %1477 = vmatprep.subr.bf16.mxu1 %v2359_v53 }
  0x67   :  { %1337 = vmatpush1.bf16.msra.mxu0 %v2345_v48  ;;  %v2414_v48 = vld [vmem:[%s3648_s1 + $0x1d0] ss:$36 sps:$4 sm:$0xff]  }
  0x68   :  { %1338 = vmatprep.subr.bf16.mxu0 %v2355_v51  ;;  %v2416_v51 = vld [vmem:[%s3648_s1 + $0x218] ss:$36 sps:$4 sm:$0xff]  }
  0x69   :  { %1478 = vmatpush1.bf16.msra.mxu1 %v2357_v55 }
  0x6a   :  { %1119 = vmatmul.mubr.bf16.gmra.mrb[20].mxu0 %v2813_v49  ;;  %1479 = vmatprep.subr.bf16.mxu1 %v2368_v57 }
  0x6b   :  { %1128 = vmatprep.mubr.bf16.mxu0 %v2824_v52  ;;  %1339 = vmatpush1.bf16.msra.mxu0 %v2353_v54 }
  0x6c   :  { %1340 = vmatprep.subr.bf16.mxu0 %v2362_v56  ;;  %1260 = vmatmul.mubr.bf16.gmra.mrb[20].mxu1 %v2813_v49 }
  0x6d   :  { %1269 = vmatprep.mubr.bf16.mxu1 %v2824_v52  ;;  %1480 = vmatpush1.bf16.msra.mxu1 %v2366_v59 }
  0x6e   :  { %1481 = vmatprep.subr.bf16.mxu1 %v2376_v63 }
  0x6f   :  { %1341 = vmatpush1.bf16.msra.mxu0 %v2360_v58 }
  0x70   :  { %1342 = vmatprep.subr.bf16.mxu0 %v2371_v61 }
  0x71   :  { %1482 = vmatpush1.bf16.msra.mxu1 %v2374_v2 }
  0x72   :  { %1129 = vmatmul.mubr.bf16.gmra.mrb[24].mxu0 %v2854_v60  ;;  %1483 = vmatprep.subr.bf16.mxu1 %v2383_v4 }
  0x73   :  { %1138 = vmatprep.mubr.bf16.mxu0 %v2862_v62  ;;  %1343 = vmatpush1.bf16.msra.mxu0 %v2369_v0 }
  0x74   :  { %1344 = vmatprep.subr.bf16.mxu0 %v2380_v3  ;;  %1270 = vmatmul.mubr.bf16.gmra.mrb[24].mxu1 %v2854_v60 }
  0x75   :  { %1279 = vmatprep.mubr.bf16.mxu1 %v2862_v62  ;;  %1484 = vmatpush1.bf16.msra.mxu1 %v2381_v7 }
  0x76   :  { %1485 = vmatprep.subr.bf16.mxu1 %v2391_v9 }
  0x77   :  { %1345 = vmatpush1.bf16.msra.mxu0 %v2378_v6 }
  0x78   :  { %1346 = vmatprep.subr.bf16.mxu0 %v2386_v8 }
  0x79   :  { %1486 = vmatpush1.bf16.msra.mxu1 %v2389_v15 }
  0x7a   :  { %1139 = vmatmul.mubr.bf16.gmra.mrb[28].mxu0 %v2898_v10  ;;  %1487 = vmatprep.subr.bf16.mxu1 %v2397_v17 }
  0x7b   :  { %1148 = vmatprep.mubr.bf16.mxu0 %v2904_v12  ;;  %1347 = vmatpush1.bf16.msra.mxu0 %v2384_v14 }
  0x7c   :  { %1348 = vmatprep.subr.bf16.mxu0 %v2394_v16  ;;  %1280 = vmatmul.mubr.bf16.gmra.mrb[28].mxu1 %v2898_v10 }
  0x7d   :  { %1289 = vmatprep.mubr.bf16.mxu1 %v2904_v12  ;;  %1488 = vmatpush1.bf16.msra.mxu1 %v2395_v19 }
  0x7e   :  { %1489 = vmatprep.subr.bf16.mxu1 %v2402_v22 }
  0x7f   :  { %1349 = vmatpush1.bf16.msra.mxu0 %v2392_v18 }
  0x80   :  { %2079 = vmatprep.subr.bf16.mxu0 %v2398_v20 }
  0x81   :  { %1490 = vmatpush1.bf16.msra.mxu1 %v2400_v26 }
  0x82   :  { %1149 = vmatmul.mubr.bf16.gmra.mrb[32].mxu0 %v2936_v24  ;;  %2161 = vmatprep.subr.bf16.mxu1 %v2398_v20 }
  0x83   :  { %1158 = vmatprep.mubr.bf16.mxu0 %v2942_v25 }
  0x84   :  { %1290 = vmatmul.mubr.bf16.gmra.mrb[32].mxu1 %v2936_v24 }
  0x85   :  { %1299 = vmatprep.mubr.bf16.mxu1 %v2942_v25 }
  0x8a   :  { %1159 = vmatmul.mubr.bf16.gmra.mrb[36].mxu0 %v2956_v28 }
  0x8b   :  { %1168 = vmatprep.mubr.bf16.mxu0 %v2959_v29 }
  0x8c   :  { %1300 = vmatmul.mubr.bf16.gmra.mrb[36].mxu1 %v2956_v28 }
  0x8d   :  { %1309 = vmatprep.mubr.bf16.mxu1 %v2959_v29 }
  0x92   :  { %1169 = vmatmul.mubr.bf16.gmra.mrb[40].mxu0 %v2964_v30 }
  0x93   :  { %1350 = vmatprep.mubr.bf16.mxu0 %v2567_v44 }
  0x94   :  { %1310 = vmatmul.mubr.bf16.gmra.mrb[40].mxu1 %v2964_v30 }
  0x95   :  { %1491 = vmatprep.mubr.bf16.mxu1 %v2567_v44 }
  0x9a   :  { %1351 = vmatmul.mubr.bf16.vlgmr.msra.gmra.mrb[44].mxu0 %v2634_v1 }
  0x9b   :  { %2080 = vmatpush3.bf16.msra.mxu0 %v2399_v33  ;;  %1360 = vmatprep.mubr.bf16.mxu0 %v2648_v5 }
  0x9c   :  { %2081 = vmatprep.subr.bf16.mxu0 %v2403_v34  ;;  %1492 = vmatmul.mubr.bf16.vlgmr.msra.gmra.mrb[44].mxu1 %v2634_v1 }
  0x9d   :  { %2169 = vmatpush3.bf16.msra.mxu1 %v2399_v33  ;;  %1501 = vmatprep.mubr.bf16.mxu1 %v2648_v5 }
  0x9e   :  { %2162 = vmatprep.subr.bf16.mxu1 %v2403_v34 }
  0x9f   :  { %2082 = vmatpush3.bf16.msra.mxu0 %v2404_v35 }
  0xa0   :  { %2083 = vmatprep.subr.bf16.mxu0 %v2405_v36 }
  0xa1   :  { %2170 = vmatpush3.bf16.msra.mxu1 %v2404_v35 }
  0xa2   :  { %1361 = vmatmul.mubr.bf16.gmra.mrb[48].mxu0 %v2670_v11  ;;  %2163 = vmatprep.subr.bf16.mxu1 %v2405_v36 }
  0xa3   :  { %1370 = vmatprep.mubr.bf16.mxu0 %v2679_v13  ;;  %2084 = vmatpush3.bf16.msra.mxu0 %v2406_v37 }
  0xa4   :  { %2085 = vmatprep.subr.bf16.mxu0 %v2407_v38  ;;  %1502 = vmatmul.mubr.bf16.gmra.mrb[48].mxu1 %v2670_v11 }
  0xa5   :  { %1511 = vmatprep.mubr.bf16.mxu1 %v2679_v13  ;;  %2171 = vmatpush3.bf16.msra.mxu1 %v2406_v37 }
  0xa6   :  { %2164 = vmatprep.subr.bf16.mxu1 %v2407_v38 }
  0xa7   :  { %2086 = vmatpush3.bf16.msra.mxu0 %v2408_v39 }
  0xa8   :  { %2087 = vmatprep.subr.bf16.mxu0 %v2409_v41 }
  0xa9   :  { %2172 = vmatpush3.bf16.msra.mxu1 %v2408_v39 }
  0xaa   :  { %1371 = vmatmul.mubr.bf16.gmra.mrb[52].mxu0 %v2708_v21  ;;  %2165 = vmatprep.subr.bf16.mxu1 %v2409_v41 }
  0xab   :  { %1380 = vmatprep.mubr.bf16.mxu0 %v2717_v23  ;;  %2088 = vmatpush3.bf16.msra.mxu0 %v2410_v43 }
  0xac   :  { %2089 = vmatprep.subr.bf16.mxu0 %v2411_v45  ;;  %1512 = vmatmul.mubr.bf16.gmra.mrb[52].mxu1 %v2708_v21 }
  0xad   :  { %1521 = vmatprep.mubr.bf16.mxu1 %v2717_v23  ;;  %2173 = vmatpush3.bf16.msra.mxu1 %v2410_v43 }
  0xae   :  { %2166 = vmatprep.subr.bf16.mxu1 %v2411_v45 }
  0xaf   :  { %2090 = vmatpush3.bf16.msra.mxu0 %v2412_v46 }
  0xb0   :  { %2091 = vmatprep.subr.bf16.mxu0 %v2413_v47 }
  0xb1   :  { %2174 = vmatpush3.bf16.msra.mxu1 %v2412_v46 }
  0xb2   :  { %1381 = vmatmul.mubr.bf16.gmra.mrb[56].mxu0 %v2746_v31  ;;  %2167 = vmatprep.subr.bf16.mxu1 %v2413_v47 }
  0xb3   :  { %1390 = vmatprep.mubr.bf16.mxu0 %v2752_v32  ;;  %2092 = vmatpush3.bf16.msra.mxu0 %v2414_v48 }
  0xb4   :  { %2093 = vmatprep.subr.bf16.mxu0 %v2415_v50  ;;  %1522 = vmatmul.mubr.bf16.gmra.mrb[56].mxu1 %v2746_v31 }
  0xb5   :  { %1531 = vmatprep.mubr.bf16.mxu1 %v2752_v32  ;;  %2175 = vmatpush3.bf16.msra.mxu1 %v2414_v48 }
  0xb6   :  { %2168 = vmatprep.subr.bf16.mxu1 %v2415_v50 }
  0xb7   :  { %2094 = vmatpush3.bf16.msra.mxu0 %v2416_v51 }
  0xb9   :  { %2176 = vmatpush3.bf16.msra.mxu1 %v2416_v51 }
  0xba   :  { %1391 = vmatmul.mubr.bf16.gmra.mrb[60].mxu0 %v2781_v40 }
  0xbb   :  { %1400 = vmatprep.mubr.bf16.mxu0 %v2790_v42 }
  0xbc   :  { %1532 = vmatmul.mubr.bf16.gmra.mrb[60].mxu1 %v2781_v40 }
  0xbd   :  { %1541 = vmatprep.mubr.bf16.mxu1 %v2790_v42 }
  0xc2   :  { %1401 = vmatmul.mubr.bf16.gmra.mrb[64].mxu0 %v2813_v49 }
  0xc3   :  { %1410 = vmatprep.mubr.bf16.mxu0 %v2824_v52 }
  0xc4   :  { %1542 = vmatmul.mubr.bf16.gmra.mrb[64].mxu1 %v2813_v49 }
  0xc5   :  { %1551 = vmatprep.mubr.bf16.mxu1 %v2824_v52 }
  0xca   :  { %1411 = vmatmul.mubr.bf16.gmra.mrb[68].mxu0 %v2854_v60 }
  0xcb   :  { %1420 = vmatprep.mubr.bf16.mxu0 %v2862_v62 }
  0xcc   :  { %1552 = vmatmul.mubr.bf16.gmra.mrb[68].mxu1 %v2854_v60 }
  0xcd   :  { %1561 = vmatprep.mubr.bf16.mxu1 %v2862_v62 }
  0xd2   :  { %1421 = vmatmul.mubr.bf16.gmra.mrb[72].mxu0 %v2898_v10 }
  0xd3   :  { %1430 = vmatprep.mubr.bf16.mxu0 %v2904_v12 }
  0xd4   :  { %1562 = vmatmul.mubr.bf16.gmra.mrb[72].mxu1 %v2898_v10 }
  0xd5   :  { %1571 = vmatprep.mubr.bf16.mxu1 %v2904_v12 }
  0xda   :  { %1431 = vmatmul.mubr.bf16.gmra.mrb[76].mxu0 %v2936_v24 }
  0xdb   :  { %1440 = vmatprep.mubr.bf16.mxu0 %v2942_v25 }
  0xdc   :  { %1572 = vmatmul.mubr.bf16.gmra.mrb[76].mxu1 %v2936_v24 }
  0xdd   :  { %1581 = vmatprep.mubr.bf16.mxu1 %v2942_v25 }
  0xe2   :  { %1441 = vmatmul.mubr.bf16.gmra.mrb[80].mxu0 %v2956_v28 }
  0xe3   :  { %1450 = vmatprep.mubr.bf16.mxu0 %v2959_v29 }
  0xe4   :  { %1582 = vmatmul.mubr.bf16.gmra.mrb[80].mxu1 %v2956_v28 }
  0xe5   :  { %1591 = vmatprep.mubr.bf16.mxu1 %v2959_v29 }
  0xea   :  { %1451 = vmatmul.mubr.bf16.gmra.mrb[84].mxu0 %v2964_v30 }
  0xeb   :  { %1632 = vmatprep.mubr.bf16.mxu0 %v2567_v44 }
  0xec   :  { %1592 = vmatmul.mubr.bf16.gmra.mrb[84].mxu1 %v2964_v30 }
  0xed   :  { %1680 = vmatprep.mubr.bf16.mxu1 %v2824_v52 }
  0xf2   :  { %1633 = vmatmul.mubr.bf16.vlgmr.msra.gmra.mrb[88].mxu0 %v2634_v1 }
  0xf3   :  { %1640 = vmatprep.mubr.bf16.mxu0 %v2648_v5 }
  0xf4   :  { %1681 = vmatmul.mubr.bf16.vlgmr.msra.gmra.mrb[88].mxu1 %v2854_v60 }
  0xf5   :  { %1688 = vmatprep.mubr.bf16.mxu1 %v2862_v62 }
  0xfa   :  { %1641 = vmatmul.mubr.bf16.gmra.mrb[92].mxu0 %v2670_v11 }
  0xfb   :  { %1648 = vmatprep.mubr.bf16.mxu0 %v2679_v13 }
  0xfc   :  { %1689 = vmatmul.mubr.bf16.gmra.mrb[92].mxu1 %v2898_v10 }
  0xfd   :  { %1696 = vmatprep.mubr.bf16.mxu1 %v2904_v12 }
 0x102   :  { %1649 = vmatmul.mubr.bf16.gmra.mrb[96].mxu0 %v2708_v21 }
 0x103   :  { %1656 = vmatprep.mubr.bf16.mxu0 %v2717_v23 }
 0x104   :  { %1697 = vmatmul.mubr.bf16.gmra.mrb[96].mxu1 %v2936_v24 }
 0x105   :  { %1704 = vmatprep.mubr.bf16.mxu1 %v2942_v25 }
 0x10a   :  { %1657 = vmatmul.mubr.bf16.gmra.mrb[100].mxu0 %v2746_v31 }
 0x10b   :  { %1664 = vmatprep.mubr.bf16.mxu0 %v2752_v32 }
 0x10c   :  { %1705 = vmatmul.mubr.bf16.gmra.mrb[100].mxu1 %v2956_v28 }
 0x10d   :  { %1712 = vmatprep.mubr.bf16.mxu1 %v2959_v29 }
 0x112   :  { %1665 = vmatmul.mubr.bf16.gmra.mrb[104].mxu0 %v2781_v40 }
 0x113   :  { %1672 = vmatprep.mubr.bf16.mxu0 %v2790_v42 }
 0x114   :  { %1713 = vmatmul.mubr.bf16.gmra.mrb[104].mxu1 %v2964_v30 }
 0x115   :  { %v1070_v44 = vpop.f32.mrb[0].mxu0 }
 0x116   :  { %1720 = vst [vmem:[%s3650_s2] sm:$0xff] %v1070_v44  ;;  %v1072_v1 = vpop.f32.mrb[1].mxu0 }
 0x117   :  { %1721 = vst [vmem:[%s3650_s2 + $0x8] sm:$0xff] %v1072_v1  ;;  %v1074_v5 = vpop.f32.mrb[2].mxu0  ;;  %v1211_v13 = vpop.f32.mrb[0].mxu1 }
 0x118   :  { %1729 = vst [vmem:[%s3650_s2 + $0x48] sm:$0xff] %v1074_v5  ;;  %v1076_v11 = vpop.f32.mrb[3].mxu0  ;;  %1722 = vst [vmem:[%s3650_s2 + $0x10] sm:$0xff] %v1211_v13  ;;  %v1213_v21 = vpop.f32.mrb[1].mxu1 }
 0x119   :  { %1730 = vst [vmem:[%s3650_s2 + $0x50] sm:$0xff] %v1076_v11  ;;  %1723 = vst [vmem:[%s3650_s2 + $0x18] sm:$0xff] %v1213_v21  ;;  %v1215_v23 = vpop.f32.mrb[2].mxu1 }
 0x11a   :  { %1673 = vmatmul.mubr.bf16.gmra.mrb[108].mxu0 %v2813_v49  ;;  %1731 = vst [vmem:[%s3650_s2 + $0x58] sm:$0xff] %v1215_v23  ;;  %v1217_v31 = vpop.f32.mrb[3].mxu1 }
 0x11b   :  { %1732 = vst [vmem:[%s3650_s2 + $0x60] sm:$0xff] %v1217_v31 }
 0x11d   :  { %v1080_v32 = vpop.f32.mrb[4].mxu0 }
 0x11e   :  { %1738 = vst [vmem:[%s3650_s2 + $0x90] sm:$0xff] %v1080_v32  ;;  %v1082_v40 = vpop.f32.mrb[5].mxu0 }
 0x11f   :  { %1739 = vst [vmem:[%s3650_s2 + $0x98] sm:$0xff] %v1082_v40  ;;  %v1084_v42 = vpop.f32.mrb[6].mxu0  ;;  %v1221_v52 = vpop.f32.mrb[4].mxu1 }
 0x120   :  { %1747 = vst [vmem:[%s3650_s2 + $0xd8] sm:$0xff] %v1084_v42  ;;  %v1086_v49 = vpop.f32.mrb[7].mxu0  ;;  %1740 = vst [vmem:[%s3650_s2 + $0xa0] sm:$0xff] %v1221_v52  ;;  %v1223_v53 = vpop.f32.mrb[5].mxu1 }
 0x121   :  { %1748 = vst [vmem:[%s3650_s2 + $0xe0] sm:$0xff] %v1086_v49  ;;  %1741 = vst [vmem:[%s3650_s2 + $0xa8] sm:$0xff] %v1223_v53  ;;  %v1225_v54 = vpop.f32.mrb[6].mxu1 }
 0x122   :  { %1749 = vst [vmem:[%s3650_s2 + $0xe8] sm:$0xff] %v1225_v54  ;;  %v1227_v55 = vpop.f32.mrb[7].mxu1 }
 0x123   :  { %1750 = vst [vmem:[%s3650_s2 + $0xf0] sm:$0xff] %v1227_v55 }
 0x125   :  { %v1090_v56 = vpop.f32.mrb[8].mxu0 }
 0x126   :  { %1756 = vst [vmem:[%s3650_s2 + $0x120] sm:$0xff] %v1090_v56  ;;  %v1092_v57 = vpop.f32.mrb[9].mxu0 }
 0x127   :  { %1757 = vst [vmem:[%s3650_s2 + $0x128] sm:$0xff] %v1092_v57  ;;  %v1094_v58 = vpop.f32.mrb[10].mxu0  ;;  %v1231_v60 = vpop.f32.mrb[8].mxu1 }
 0x128   :  { %1765 = vst [vmem:[%s3650_s2 + $0x168] sm:$0xff] %v1094_v58  ;;  %v1096_v59 = vpop.f32.mrb[11].mxu0  ;;  %1758 = vst [vmem:[%s3650_s2 + $0x130] sm:$0xff] %v1231_v60  ;;  %v1233_v61 = vpop.f32.mrb[9].mxu1 }
 0x129   :  { %1766 = vst [vmem:[%s3650_s2 + $0x170] sm:$0xff] %v1096_v59  ;;  %1759 = vst [vmem:[%s3650_s2 + $0x138] sm:$0xff] %v1233_v61  ;;  %v1235_v62 = vpop.f32.mrb[10].mxu1 }
 0x12a   :  { %1767 = vst [vmem:[%s3650_s2 + $0x178] sm:$0xff] %v1235_v62  ;;  %v1237_v63 = vpop.f32.mrb[11].mxu1 }
 0x12b   :  { %1768 = vst [vmem:[%s3650_s2 + $0x180] sm:$0xff] %v1237_v63 }
 0x12d   :  { %v1100_v0 = vpop.f32.mrb[12].mxu0 }
 0x12e   :  { %1774 = vst [vmem:[%s3650_s2 + $0x1b0] sm:$0xff] %v1100_v0  ;;  %v1102_v2 = vpop.f32.mrb[13].mxu0 }
 0x12f   :  { %1775 = vst [vmem:[%s3650_s2 + $0x1b8] sm:$0xff] %v1102_v2  ;;  %v1104_v3 = vpop.f32.mrb[14].mxu0  ;;  %v1241_v6 = vpop.f32.mrb[12].mxu1 }
 0x130   :  { %1783 = vst [vmem:[%s3650_s2 + $0x1f8] sm:$0xff] %v1104_v3  ;;  %v1106_v4 = vpop.f32.mrb[15].mxu0  ;;  %1776 = vst [vmem:[%s3650_s2 + $0x1c0] sm:$0xff] %v1241_v6  ;;  %v1243_v7 = vpop.f32.mrb[13].mxu1 }
 0x131   :  { %1784 = vst [vmem:[%s3650_s2 + $0x200] sm:$0xff] %v1106_v4  ;;  %1777 = vst [vmem:[%s3650_s2 + $0x1c8] sm:$0xff] %v1243_v7  ;;  %v1245_v8 = vpop.f32.mrb[14].mxu1 }
 0x132   :  { %1785 = vst [vmem:[%s3650_s2 + $0x208] sm:$0xff] %v1245_v8  ;;  %v1247_v9 = vpop.f32.mrb[15].mxu1 }
 0x133   :  { %1786 = vst [vmem:[%s3650_s2 + $0x210] sm:$0xff] %v1247_v9 }
 0x135   :  { %v1110_v10 = vpop.f32.mrb[16].mxu0 }
 0x136   :  { %1792 = vst [vmem:[%s3650_s2 + $0x240] sm:$0xff] %v1110_v10  ;;  %v1112_v12 = vpop.f32.mrb[17].mxu0 }
 0x137   :  { %1793 = vst [vmem:[%s3650_s2 + $0x248] sm:$0xff] %v1112_v12  ;;  %v1114_v14 = vpop.f32.mrb[18].mxu0  ;;  %v1251_v16 = vpop.f32.mrb[16].mxu1 }
 0x138   :  { %1801 = vst [vmem:[%s3650_s2 + $0x288] sm:$0xff] %v1114_v14  ;;  %v1116_v15 = vpop.f32.mrb[19].mxu0  ;;  %1794 = vst [vmem:[%s3650_s2 + $0x250] sm:$0xff] %v1251_v16  ;;  %v1253_v17 = vpop.f32.mrb[17].mxu1 }
 0x139   :  { %1802 = vst [vmem:[%s3650_s2 + $0x290] sm:$0xff] %v1116_v15  ;;  %1795 = vst [vmem:[%s3650_s2 + $0x258] sm:$0xff] %v1253_v17  ;;  %v1255_v18 = vpop.f32.mrb[18].mxu1 }
 0x13a   :  { %1803 = vst [vmem:[%s3650_s2 + $0x298] sm:$0xff] %v1255_v18  ;;  %v1257_v19 = vpop.f32.mrb[19].mxu1 }
 0x13b   :  { %1804 = vst [vmem:[%s3650_s2 + $0x2a0] sm:$0xff] %v1257_v19 }
 0x13d   :  { %v1120_v20 = vpop.f32.mrb[20].mxu0 }
 0x13e   :  { %1810 = vst [vmem:[%s3650_s2 + $0x2d0] sm:$0xff] %v1120_v20  ;;  %v1122_v22 = vpop.f32.mrb[21].mxu0 }
 0x13f   :  { %1811 = vst [vmem:[%s3650_s2 + $0x2d8] sm:$0xff] %v1122_v22  ;;  %v1124_v24 = vpop.f32.mrb[22].mxu0  ;;  %v1261_v26 = vpop.f32.mrb[20].mxu1 }
 0x140   :  { %1819 = vst [vmem:[%s3650_s2 + $0x318] sm:$0xff] %v1124_v24  ;;  %v1126_v25 = vpop.f32.mrb[23].mxu0  ;;  %1812 = vst [vmem:[%s3650_s2 + $0x2e0] sm:$0xff] %v1261_v26  ;;  %v1263_v27 = vpop.f32.mrb[21].mxu1 }
 0x141   :  { %1820 = vst [vmem:[%s3650_s2 + $0x320] sm:$0xff] %v1126_v25  ;;  %1813 = vst [vmem:[%s3650_s2 + $0x2e8] sm:$0xff] %v1263_v27  ;;  %v1265_v28 = vpop.f32.mrb[22].mxu1 }
 0x142   :  { %1821 = vst [vmem:[%s3650_s2 + $0x328] sm:$0xff] %v1265_v28  ;;  %v1267_v29 = vpop.f32.mrb[23].mxu1 }
 0x143   :  { %1822 = vst [vmem:[%s3650_s2 + $0x330] sm:$0xff] %v1267_v29 }
 0x145   :  { %v1130_v30 = vpop.f32.mrb[24].mxu0 }
 0x146   :  { %1828 = vst [vmem:[%s3650_s2 + $0x360] sm:$0xff] %v1130_v30  ;;  %v1132_v33 = vpop.f32.mrb[25].mxu0 }
 0x147   :  { %1829 = vst [vmem:[%s3650_s2 + $0x368] sm:$0xff] %v1132_v33  ;;  %v1134_v34 = vpop.f32.mrb[26].mxu0  ;;  %v1271_v36 = vpop.f32.mrb[24].mxu1 }
 0x148   :  { %1837 = vst [vmem:[%s3650_s2 + $0x3a8] sm:$0xff] %v1134_v34  ;;  %v1136_v35 = vpop.f32.mrb[27].mxu0  ;;  %1830 = vst [vmem:[%s3650_s2 + $0x370] sm:$0xff] %v1271_v36  ;;  %v1273_v37 = vpop.f32.mrb[25].mxu1 }
 0x149   :  { %1838 = vst [vmem:[%s3650_s2 + $0x3b0] sm:$0xff] %v1136_v35  ;;  %1831 = vst [vmem:[%s3650_s2 + $0x378] sm:$0xff] %v1273_v37  ;;  %v1275_v38 = vpop.f32.mrb[26].mxu1 }
 0x14a   :  { %1839 = vst [vmem:[%s3650_s2 + $0x3b8] sm:$0xff] %v1275_v38  ;;  %v1277_v39 = vpop.f32.mrb[27].mxu1 }
 0x14b   :  { %1840 = vst [vmem:[%s3650_s2 + $0x3c0] sm:$0xff] %v1277_v39 }
 0x14d   :  { %v1140_v41 = vpop.f32.mrb[28].mxu0 }
 0x14e   :  { %1846 = vst [vmem:[%s3650_s2 + $0x3f0] sm:$0xff] %v1140_v41  ;;  %v1142_v43 = vpop.f32.mrb[29].mxu0 }
 0x14f   :  { %1847 = vst [vmem:[%s3650_s2 + $0x3f8] sm:$0xff] %v1142_v43  ;;  %v1144_v45 = vpop.f32.mrb[30].mxu0  ;;  %v1281_v47 = vpop.f32.mrb[28].mxu1 }
 0x150   :  { %1855 = vst [vmem:[%s3650_s2 + $0x438] sm:$0xff] %v1144_v45  ;;  %v1146_v46 = vpop.f32.mrb[31].mxu0  ;;  %1848 = vst [vmem:[%s3650_s2 + $0x400] sm:$0xff] %v1281_v47  ;;  %v1283_v48 = vpop.f32.mrb[29].mxu1 }
 0x151   :  { %1856 = vst [vmem:[%s3650_s2 + $0x440] sm:$0xff] %v1146_v46  ;;  %1849 = vst [vmem:[%s3650_s2 + $0x408] sm:$0xff] %v1283_v48  ;;  %v1285_v50 = vpop.f32.mrb[30].mxu1 }
 0x152   :  { %1857 = vst [vmem:[%s3650_s2 + $0x448] sm:$0xff] %v1285_v50  ;;  %v1287_v51 = vpop.f32.mrb[31].mxu1 }
 0x153   :  { %1858 = vst [vmem:[%s3650_s2 + $0x450] sm:$0xff] %v1287_v51 }
 0x155   :  { %v1150_v44 = vpop.f32.mrb[32].mxu0 }
 0x156   :  { %1864 = vst [vmem:[%s3650_s2 + $0x480] sm:$0xff] %v1150_v44  ;;  %v1152_v1 = vpop.f32.mrb[33].mxu0 }
 0x157   :  { %1865 = vst [vmem:[%s3650_s2 + $0x488] sm:$0xff] %v1152_v1  ;;  %v1154_v5 = vpop.f32.mrb[34].mxu0  ;;  %v1291_v13 = vpop.f32.mrb[32].mxu1 }
 0x158   :  { %1873 = vst [vmem:[%s3650_s2 + $0x4c8] sm:$0xff] %v1154_v5  ;;  %v1156_v11 = vpop.f32.mrb[35].mxu0  ;;  %1866 = vst [vmem:[%s3650_s2 + $0x490] sm:$0xff] %v1291_v13  ;;  %v1293_v21 = vpop.f32.mrb[33].mxu1 }
 0x159   :  { %1874 = vst [vmem:[%s3650_s2 + $0x4d0] sm:$0xff] %v1156_v11  ;;  %1867 = vst [vmem:[%s3650_s2 + $0x498] sm:$0xff] %v1293_v21  ;;  %v1295_v23 = vpop.f32.mrb[34].mxu1 }
 0x15a   :  { %1875 = vst [vmem:[%s3650_s2 + $0x4d8] sm:$0xff] %v1295_v23  ;;  %v1297_v31 = vpop.f32.mrb[35].mxu1 }
 0x15b   :  { %1876 = vst [vmem:[%s3650_s2 + $0x4e0] sm:$0xff] %v1297_v31 }
 0x15d   :  { %v1160_v32 = vpop.f32.mrb[36].mxu0 }
 0x15e   :  { %1882 = vst [vmem:[%s3650_s2 + $0x510] sm:$0xff] %v1160_v32  ;;  %v1162_v40 = vpop.f32.mrb[37].mxu0 }
 0x15f   :  { %1883 = vst [vmem:[%s3650_s2 + $0x518] sm:$0xff] %v1162_v40  ;;  %v1164_v42 = vpop.f32.mrb[38].mxu0  ;;  %v1301_v52 = vpop.f32.mrb[36].mxu1 }
 0x160   :  { %1891 = vst [vmem:[%s3650_s2 + $0x558] sm:$0xff] %v1164_v42  ;;  %v1166_v49 = vpop.f32.mrb[39].mxu0  ;;  %1884 = vst [vmem:[%s3650_s2 + $0x520] sm:$0xff] %v1301_v52  ;;  %v1303_v53 = vpop.f32.mrb[37].mxu1 }
 0x161   :  { %1892 = vst [vmem:[%s3650_s2 + $0x560] sm:$0xff] %v1166_v49  ;;  %1885 = vst [vmem:[%s3650_s2 + $0x528] sm:$0xff] %v1303_v53  ;;  %v1305_v54 = vpop.f32.mrb[38].mxu1 }
 0x162   :  { %1893 = vst [vmem:[%s3650_s2 + $0x568] sm:$0xff] %v1305_v54  ;;  %v1307_v55 = vpop.f32.mrb[39].mxu1 }
 0x163   :  { %1894 = vst [vmem:[%s3650_s2 + $0x570] sm:$0xff] %v1307_v55 }
 0x165   :  { %v1170_v56 = vpop.f32.mrb[40].mxu0 }
 0x166   :  { %1900 = vst [vmem:[%s3650_s2 + $0x5a0] sm:$0x3] %v1170_v56  ;;  %v1172_v57 = vpop.f32.mrb[41].mxu0 }
 0x167   :  { %1901 = vst [vmem:[%s3650_s2 + $0x5a8] sm:$0x3] %v1172_v57  ;;  %v1174_v58 = vpop.f32.mrb[42].mxu0  ;;  %v1311_v60 = vpop.f32.mrb[40].mxu1 }
 0x168   :  { %v1175_v59 = vpop.f32.mrb[43].mxu0  ;;  %1902 = vst [vmem:[%s3650_s2 + $0x5b0] sm:$0x3] %v1311_v60  ;;  %v1313_v61 = vpop.f32.mrb[41].mxu1 }
 0x169   :  { %1903 = vst [vmem:[%s3650_s2 + $0x5b8] sm:$0x3] %v1313_v61  ;;  %v1315_v62 = vpop.f32.mrb[42].mxu1 }
 0x16a   :  { %v1316_v63 = vpop.f32.mrb[43].mxu1 }
 0x16d   :  { %v1352_v0 = vpop.f32.mrb[44].mxu0 }
 0x16e   :  { %1724 = vst [vmem:[%s3650_s2 + $0x20] sm:$0xff] %v1352_v0  ;;  %v1354_v2 = vpop.f32.mrb[45].mxu0 }
 0x16f   :  { %1725 = vst [vmem:[%s3650_s2 + $0x28] sm:$0xff] %v1354_v2  ;;  %v1356_v3 = vpop.f32.mrb[46].mxu0  ;;  %v1493_v6 = vpop.f32.mrb[44].mxu1 }
 0x170   :  { %1733 = vst [vmem:[%s3650_s2 + $0x68] sm:$0xff] %v1356_v3  ;;  %v1358_v4 = vpop.f32.mrb[47].mxu0  ;;  %1726 = vst [vmem:[%s3650_s2 + $0x30] sm:$0xff] %v1493_v6  ;;  %v1495_v7 = vpop.f32.mrb[45].mxu1 }
 0x171   :  { %1734 = vst [vmem:[%s3650_s2 + $0x70] sm:$0xff] %v1358_v4  ;;  %1727 = vst [vmem:[%s3650_s2 + $0x38] sm:$0xff] %v1495_v7  ;;  %v1497_v8 = vpop.f32.mrb[46].mxu1 }
 0x172   :  { %1735 = vst [vmem:[%s3650_s2 + $0x78] sm:$0xff] %v1497_v8  ;;  %v1499_v9 = vpop.f32.mrb[47].mxu1 }
 0x173   :  { %1736 = vst [vmem:[%s3650_s2 + $0x80] sm:$0xff] %v1499_v9 }
 0x175   :  { %v1362_v10 = vpop.f32.mrb[48].mxu0 }
 0x176   :  { %1742 = vst [vmem:[%s3650_s2 + $0xb0] sm:$0xff] %v1362_v10  ;;  %v1364_v12 = vpop.f32.mrb[49].mxu0 }
 0x177   :  { %1743 = vst [vmem:[%s3650_s2 + $0xb8] sm:$0xff] %v1364_v12  ;;  %v1366_v14 = vpop.f32.mrb[50].mxu0  ;;  %v1503_v16 = vpop.f32.mrb[48].mxu1 }
 0x178   :  { %1751 = vst [vmem:[%s3650_s2 + $0xf8] sm:$0xff] %v1366_v14  ;;  %v1368_v15 = vpop.f32.mrb[51].mxu0  ;;  %1744 = vst [vmem:[%s3650_s2 + $0xc0] sm:$0xff] %v1503_v16  ;;  %v1505_v17 = vpop.f32.mrb[49].mxu1 }
 0x179   :  { %1752 = vst [vmem:[%s3650_s2 + $0x100] sm:$0xff] %v1368_v15  ;;  %1745 = vst [vmem:[%s3650_s2 + $0xc8] sm:$0xff] %v1505_v17  ;;  %v1507_v18 = vpop.f32.mrb[50].mxu1 }
 0x17a   :  { %1753 = vst [vmem:[%s3650_s2 + $0x108] sm:$0xff] %v1507_v18  ;;  %v1509_v19 = vpop.f32.mrb[51].mxu1 }
 0x17b   :  { %1754 = vst [vmem:[%s3650_s2 + $0x110] sm:$0xff] %v1509_v19 }
 0x17d   :  { %v1372_v20 = vpop.f32.mrb[52].mxu0 }
 0x17e   :  { %1760 = vst [vmem:[%s3650_s2 + $0x140] sm:$0xff] %v1372_v20  ;;  %v1374_v22 = vpop.f32.mrb[53].mxu0 }
 0x17f   :  { %1761 = vst [vmem:[%s3650_s2 + $0x148] sm:$0xff] %v1374_v22  ;;  %v1376_v24 = vpop.f32.mrb[54].mxu0  ;;  %v1513_v26 = vpop.f32.mrb[52].mxu1 }
 0x180   :  { %1769 = vst [vmem:[%s3650_s2 + $0x188] sm:$0xff] %v1376_v24  ;;  %v1378_v25 = vpop.f32.mrb[55].mxu0  ;;  %1762 = vst [vmem:[%s3650_s2 + $0x150] sm:$0xff] %v1513_v26  ;;  %v1515_v27 = vpop.f32.mrb[53].mxu1 }
 0x181   :  { %1770 = vst [vmem:[%s3650_s2 + $0x190] sm:$0xff] %v1378_v25  ;;  %1763 = vst [vmem:[%s3650_s2 + $0x158] sm:$0xff] %v1515_v27  ;;  %v1517_v28 = vpop.f32.mrb[54].mxu1 }
 0x182   :  { %1771 = vst [vmem:[%s3650_s2 + $0x198] sm:$0xff] %v1517_v28  ;;  %v1519_v29 = vpop.f32.mrb[55].mxu1 }
 0x183   :  { %1772 = vst [vmem:[%s3650_s2 + $0x1a0] sm:$0xff] %v1519_v29 }
 0x185   :  { %v1382_v30 = vpop.f32.mrb[56].mxu0 }
 0x186   :  { %1778 = vst [vmem:[%s3650_s2 + $0x1d0] sm:$0xff] %v1382_v30  ;;  %v1384_v33 = vpop.f32.mrb[57].mxu0 }
 0x187   :  { %1779 = vst [vmem:[%s3650_s2 + $0x1d8] sm:$0xff] %v1384_v33  ;;  %v1386_v34 = vpop.f32.mrb[58].mxu0  ;;  %v1523_v36 = vpop.f32.mrb[56].mxu1 }
 0x188   :  { %1787 = vst [vmem:[%s3650_s2 + $0x218] sm:$0xff] %v1386_v34  ;;  %v1388_v35 = vpop.f32.mrb[59].mxu0  ;;  %1780 = vst [vmem:[%s3650_s2 + $0x1e0] sm:$0xff] %v1523_v36  ;;  %v1525_v37 = vpop.f32.mrb[57].mxu1 }
 0x189   :  { %1788 = vst [vmem:[%s3650_s2 + $0x220] sm:$0xff] %v1388_v35  ;;  %1781 = vst [vmem:[%s3650_s2 + $0x1e8] sm:$0xff] %v1525_v37  ;;  %v1527_v38 = vpop.f32.mrb[58].mxu1 }
 0x18a   :  { %1789 = vst [vmem:[%s3650_s2 + $0x228] sm:$0xff] %v1527_v38  ;;  %v1529_v39 = vpop.f32.mrb[59].mxu1 }
 0x18b   :  { %1790 = vst [vmem:[%s3650_s2 + $0x230] sm:$0xff] %v1529_v39 }
 0x18d   :  { %v1392_v41 = vpop.f32.mrb[60].mxu0 }
 0x18e   :  { %1796 = vst [vmem:[%s3650_s2 + $0x260] sm:$0xff] %v1392_v41  ;;  %v1394_v43 = vpop.f32.mrb[61].mxu0 }
 0x18f   :  { %1797 = vst [vmem:[%s3650_s2 + $0x268] sm:$0xff] %v1394_v43  ;;  %v1396_v45 = vpop.f32.mrb[62].mxu0  ;;  %v1533_v47 = vpop.f32.mrb[60].mxu1 }
 0x190   :  { %1805 = vst [vmem:[%s3650_s2 + $0x2a8] sm:$0xff] %v1396_v45  ;;  %v1398_v46 = vpop.f32.mrb[63].mxu0  ;;  %1798 = vst [vmem:[%s3650_s2 + $0x270] sm:$0xff] %v1533_v47  ;;  %v1535_v48 = vpop.f32.mrb[61].mxu1 }
 0x191   :  { %1806 = vst [vmem:[%s3650_s2 + $0x2b0] sm:$0xff] %v1398_v46  ;;  %1799 = vst [vmem:[%s3650_s2 + $0x278] sm:$0xff] %v1535_v48  ;;  %v1537_v50 = vpop.f32.mrb[62].mxu1 }
 0x192   :  { %1807 = vst [vmem:[%s3650_s2 + $0x2b8] sm:$0xff] %v1537_v50  ;;  %v1539_v51 = vpop.f32.mrb[63].mxu1 }
 0x193   :  { %1808 = vst [vmem:[%s3650_s2 + $0x2c0] sm:$0xff] %v1539_v51 }
 0x195   :  { %v1402_v44 = vpop.f32.mrb[64].mxu0 }
 0x196   :  { %1814 = vst [vmem:[%s3650_s2 + $0x2f0] sm:$0xff] %v1402_v44  ;;  %v1404_v1 = vpop.f32.mrb[65].mxu0 }
 0x197   :  { %1815 = vst [vmem:[%s3650_s2 + $0x2f8] sm:$0xff] %v1404_v1  ;;  %v1406_v5 = vpop.f32.mrb[66].mxu0  ;;  %v1543_v13 = vpop.f32.mrb[64].mxu1 }
 0x198   :  { %1823 = vst [vmem:[%s3650_s2 + $0x338] sm:$0xff] %v1406_v5  ;;  %v1408_v11 = vpop.f32.mrb[67].mxu0  ;;  %1816 = vst [vmem:[%s3650_s2 + $0x300] sm:$0xff] %v1543_v13  ;;  %v1545_v21 = vpop.f32.mrb[65].mxu1 }
 0x199   :  { %1824 = vst [vmem:[%s3650_s2 + $0x340] sm:$0xff] %v1408_v11  ;;  %1817 = vst [vmem:[%s3650_s2 + $0x308] sm:$0xff] %v1545_v21  ;;  %v1547_v23 = vpop.f32.mrb[66].mxu1 }
 0x19a   :  { %1825 = vst [vmem:[%s3650_s2 + $0x348] sm:$0xff] %v1547_v23  ;;  %v1549_v31 = vpop.f32.mrb[67].mxu1 }
 0x19b   :  { %1826 = vst [vmem:[%s3650_s2 + $0x350] sm:$0xff] %v1549_v31 }
 0x19d   :  { %v1412_v32 = vpop.f32.mrb[68].mxu0 }
 0x19e   :  { %1832 = vst [vmem:[%s3650_s2 + $0x380] sm:$0xff] %v1412_v32  ;;  %v1414_v40 = vpop.f32.mrb[69].mxu0 }
 0x19f   :  { %1833 = vst [vmem:[%s3650_s2 + $0x388] sm:$0xff] %v1414_v40  ;;  %v1416_v42 = vpop.f32.mrb[70].mxu0  ;;  %v1553_v52 = vpop.f32.mrb[68].mxu1 }
 0x1a0   :  { %1841 = vst [vmem:[%s3650_s2 + $0x3c8] sm:$0xff] %v1416_v42  ;;  %v1418_v49 = vpop.f32.mrb[71].mxu0  ;;  %1834 = vst [vmem:[%s3650_s2 + $0x390] sm:$0xff] %v1553_v52  ;;  %v1555_v53 = vpop.f32.mrb[69].mxu1 }
 0x1a1   :  { %1842 = vst [vmem:[%s3650_s2 + $0x3d0] sm:$0xff] %v1418_v49  ;;  %1835 = vst [vmem:[%s3650_s2 + $0x398] sm:$0xff] %v1555_v53  ;;  %v1557_v54 = vpop.f32.mrb[70].mxu1 }
 0x1a2   :  { %1843 = vst [vmem:[%s3650_s2 + $0x3d8] sm:$0xff] %v1557_v54  ;;  %v1559_v55 = vpop.f32.mrb[71].mxu1 }
 0x1a3   :  { %1844 = vst [vmem:[%s3650_s2 + $0x3e0] sm:$0xff] %v1559_v55 }
 0x1a5   :  { %v1422_v56 = vpop.f32.mrb[72].mxu0 }
 0x1a6   :  { %1850 = vst [vmem:[%s3650_s2 + $0x410] sm:$0xff] %v1422_v56  ;;  %v1424_v57 = vpop.f32.mrb[73].mxu0 }
 0x1a7   :  { %1851 = vst [vmem:[%s3650_s2 + $0x418] sm:$0xff] %v1424_v57  ;;  %v1426_v58 = vpop.f32.mrb[74].mxu0  ;;  %v1563_v60 = vpop.f32.mrb[72].mxu1 }
 0x1a8   :  { %1859 = vst [vmem:[%s3650_s2 + $0x458] sm:$0xff] %v1426_v58  ;;  %v1428_v59 = vpop.f32.mrb[75].mxu0  ;;  %1852 = vst [vmem:[%s3650_s2 + $0x420] sm:$0xff] %v1563_v60  ;;  %v1565_v61 = vpop.f32.mrb[73].mxu1 }
 0x1a9   :  { %1860 = vst [vmem:[%s3650_s2 + $0x460] sm:$0xff] %v1428_v59  ;;  %1853 = vst [vmem:[%s3650_s2 + $0x428] sm:$0xff] %v1565_v61  ;;  %v1567_v62 = vpop.f32.mrb[74].mxu1 }
 0x1aa   :  { %1861 = vst [vmem:[%s3650_s2 + $0x468] sm:$0xff] %v1567_v62  ;;  %v1569_v63 = vpop.f32.mrb[75].mxu1 }
 0x1ab   :  { %1862 = vst [vmem:[%s3650_s2 + $0x470] sm:$0xff] %v1569_v63 }
 0x1ad   :  { %v1432_v0 = vpop.f32.mrb[76].mxu0 }
 0x1ae   :  { %1868 = vst [vmem:[%s3650_s2 + $0x4a0] sm:$0xff] %v1432_v0  ;;  %v1434_v2 = vpop.f32.mrb[77].mxu0 }
 0x1af   :  { %1869 = vst [vmem:[%s3650_s2 + $0x4a8] sm:$0xff] %v1434_v2  ;;  %v1436_v3 = vpop.f32.mrb[78].mxu0  ;;  %v1573_v6 = vpop.f32.mrb[76].mxu1 }
 0x1b0   :  { %1877 = vst [vmem:[%s3650_s2 + $0x4e8] sm:$0xff] %v1436_v3  ;;  %v1438_v4 = vpop.f32.mrb[79].mxu0  ;;  %1870 = vst [vmem:[%s3650_s2 + $0x4b0] sm:$0xff] %v1573_v6  ;;  %v1575_v7 = vpop.f32.mrb[77].mxu1 }
 0x1b1   :  { %1878 = vst [vmem:[%s3650_s2 + $0x4f0] sm:$0xff] %v1438_v4  ;;  %1871 = vst [vmem:[%s3650_s2 + $0x4b8] sm:$0xff] %v1575_v7  ;;  %v1577_v8 = vpop.f32.mrb[78].mxu1 }
 0x1b2   :  { %1879 = vst [vmem:[%s3650_s2 + $0x4f8] sm:$0xff] %v1577_v8  ;;  %v1579_v9 = vpop.f32.mrb[79].mxu1 }
 0x1b3   :  { %1880 = vst [vmem:[%s3650_s2 + $0x500] sm:$0xff] %v1579_v9 }
 0x1b5   :  { %v1442_v10 = vpop.f32.mrb[80].mxu0 }
 0x1b6   :  { %1886 = vst [vmem:[%s3650_s2 + $0x530] sm:$0xff] %v1442_v10  ;;  %v1444_v12 = vpop.f32.mrb[81].mxu0 }
 0x1b7   :  { %1887 = vst [vmem:[%s3650_s2 + $0x538] sm:$0xff] %v1444_v12  ;;  %v1446_v14 = vpop.f32.mrb[82].mxu0  ;;  %v1583_v16 = vpop.f32.mrb[80].mxu1 }
 0x1b8   :  { %1895 = vst [vmem:[%s3650_s2 + $0x578] sm:$0xff] %v1446_v14  ;;  %v1448_v15 = vpop.f32.mrb[83].mxu0  ;;  %1888 = vst [vmem:[%s3650_s2 + $0x540] sm:$0xff] %v1583_v16  ;;  %v1585_v17 = vpop.f32.mrb[81].mxu1 }
 0x1b9   :  { %1896 = vst [vmem:[%s3650_s2 + $0x580] sm:$0xff] %v1448_v15  ;;  %1889 = vst [vmem:[%s3650_s2 + $0x548] sm:$0xff] %v1585_v17  ;;  %v1587_v18 = vpop.f32.mrb[82].mxu1 }
 0x1ba   :  { %1897 = vst [vmem:[%s3650_s2 + $0x588] sm:$0xff] %v1587_v18  ;;  %v1589_v19 = vpop.f32.mrb[83].mxu1 }
 0x1bb   :  { %1898 = vst [vmem:[%s3650_s2 + $0x590] sm:$0xff] %v1589_v19 }
 0x1bd   :  { %v1452_v20 = vpop.f32.mrb[84].mxu0 }
 0x1be   :  { %1904 = vst [vmem:[%s3650_s2 + $0x5c0] sm:$0x3] %v1452_v20  ;;  %v1454_v22 = vpop.f32.mrb[85].mxu0 }
 0x1bf   :  { %1905 = vst [vmem:[%s3650_s2 + $0x5c8] sm:$0x3] %v1454_v22  ;;  %v1456_v24 = vpop.f32.mrb[86].mxu0  ;;  %v1593_v26 = vpop.f32.mrb[84].mxu1 }
 0x1c0   :  { %v1457_v25 = vpop.f32.mrb[87].mxu0  ;;  %1906 = vst [vmem:[%s3650_s2 + $0x5d0] sm:$0x3] %v1593_v26  ;;  %v1595_v27 = vpop.f32.mrb[85].mxu1 }
 0x1c1   :  { %1907 = vst [vmem:[%s3650_s2 + $0x5d8] sm:$0x3] %v1595_v27  ;;  %v1597_v28 = vpop.f32.mrb[86].mxu1 }
 0x1c2   :  { %v1598_v29 = vpop.f32.mrb[87].mxu1 }
 0x1c5   :  { %v2095_v30 = vpop.f32.mrb[88].mxu0 }
 0x1c6   :  { %v2096_v33 = vpop.f32.mrb[89].mxu0 }
 0x1c7   :  { %v2097_v34 = vadd.f32 %v2096_v33, %v2095_v30  ;;  %v2098_v35 = vpop.f32.mrb[90].mxu0  ;;  %v2131_v38 = vpop.f32.mrb[88].mxu1 }
 0x1c8   :  { %v2099_v36 = vpop.f32.mrb[91].mxu0  ;;  %v2132_v39 = vpop.f32.mrb[89].mxu1 }
 0x1c9   :  { %1728 = vst [vmem:[%s3650_s2 + $0x40] sm:$0xff] %v2097_v34  ;;  %v2100_v37 = vadd.f32 %v2099_v36, %v2098_v35  ;;  %v2133_v41 = vadd.f32 %v2132_v39, %v2131_v38  ;;  %v2134_v43 = vpop.f32.mrb[90].mxu1 }
 0x1ca   :  { %v2135_v45 = vpop.f32.mrb[91].mxu1 }
 0x1cb   :  { %1737 = vst [vmem:[%s3650_s2 + $0x88] sm:$0xff] %v2100_v37  ;;  %1836 = vst [vmem:[%s3650_s2 + $0x3a0] sm:$0xff] %v2133_v41  ;;  %v2136_v47 = vadd.f32 %v2135_v45, %v2134_v43 }
 0x1cd   :  { %v2101_v46 = vpop.f32.mrb[92].mxu0  ;;  %1845 = vst [vmem:[%s3650_s2 + $0x3e8] sm:$0xff] %v2136_v47 }
 0x1ce   :  { %v2102_v48 = vpop.f32.mrb[93].mxu0 }
 0x1cf   :  { %v2103_v50 = vadd.f32 %v2102_v48, %v2101_v46  ;;  %v2104_v51 = vpop.f32.mrb[94].mxu0  ;;  %v2137_v5 = vpop.f32.mrb[92].mxu1 }
 0x1d0   :  { %v2105_v44 = vpop.f32.mrb[95].mxu0  ;;  %v2138_v11 = vpop.f32.mrb[93].mxu1 }
 0x1d1   :  { %1746 = vst [vmem:[%s3650_s2 + $0xd0] sm:$0xff] %v2103_v50  ;;  %v2106_v1 = vadd.f32 %v2105_v44, %v2104_v51  ;;  %v2139_v13 = vadd.f32 %v2138_v11, %v2137_v5  ;;  %v2140_v21 = vpop.f32.mrb[94].mxu1 }
 0x1d2   :  { %v2141_v23 = vpop.f32.mrb[95].mxu1 }
 0x1d3   :  { %1755 = vst [vmem:[%s3650_s2 + $0x118] sm:$0xff] %v2106_v1  ;;  %1854 = vst [vmem:[%s3650_s2 + $0x430] sm:$0xff] %v2139_v13  ;;  %v2142_v32 = vadd.f32 %v2141_v23, %v2140_v21 }
 0x1d5   :  { %v2107_v31 = vpop.f32.mrb[96].mxu0  ;;  %1863 = vst [vmem:[%s3650_s2 + $0x478] sm:$0xff] %v2142_v32 }
 0x1d6   :  { %v2108_v40 = vpop.f32.mrb[97].mxu0 }
 0x1d7   :  { %v2109_v42 = vadd.f32 %v2108_v40, %v2107_v31  ;;  %v2110_v49 = vpop.f32.mrb[98].mxu0  ;;  %v2143_v54 = vpop.f32.mrb[96].mxu1 }
 0x1d8   :  { %v2111_v52 = vpop.f32.mrb[99].mxu0  ;;  %v2144_v55 = vpop.f32.mrb[97].mxu1 }
 0x1d9   :  { %1764 = vst [vmem:[%s3650_s2 + $0x160] sm:$0xff] %v2109_v42  ;;  %v2112_v53 = vadd.f32 %v2111_v52, %v2110_v49  ;;  %v2145_v56 = vadd.f32 %v2144_v55, %v2143_v54  ;;  %v2146_v57 = vpop.f32.mrb[98].mxu1 }
 0x1da   :  { %v2147_v58 = vpop.f32.mrb[99].mxu1 }
 0x1db   :  { %1773 = vst [vmem:[%s3650_s2 + $0x1a8] sm:$0xff] %v2112_v53  ;;  %1872 = vst [vmem:[%s3650_s2 + $0x4c0] sm:$0xff] %v2145_v56  ;;  %v2148_v60 = vadd.f32 %v2147_v58, %v2146_v57 }
 0x1dd   :  { %v2113_v59 = vpop.f32.mrb[100].mxu0  ;;  %1881 = vst [vmem:[%s3650_s2 + $0x508] sm:$0xff] %v2148_v60 }
 0x1de   :  { %v2114_v61 = vpop.f32.mrb[101].mxu0 }
 0x1df   :  { %v2115_v62 = vadd.f32 %v2114_v61, %v2113_v59  ;;  %v2116_v63 = vpop.f32.mrb[102].mxu0  ;;  %v2149_v3 = vpop.f32.mrb[100].mxu1 }
 0x1e0   :  { %v2117_v0 = vpop.f32.mrb[103].mxu0  ;;  %v2150_v4 = vpop.f32.mrb[101].mxu1 }
 0x1e1   :  { %1782 = vst [vmem:[%s3650_s2 + $0x1f0] sm:$0xff] %v2115_v62  ;;  %v2118_v2 = vadd.f32 %v2117_v0, %v2116_v63  ;;  %v2151_v6 = vadd.f32 %v2150_v4, %v2149_v3  ;;  %v2152_v7 = vpop.f32.mrb[102].mxu1 }
 0x1e2   :  { %v2153_v8 = vpop.f32.mrb[103].mxu1 }
 0x1e3   :  { %1791 = vst [vmem:[%s3650_s2 + $0x238] sm:$0xff] %v2118_v2  ;;  %1890 = vst [vmem:[%s3650_s2 + $0x550] sm:$0xff] %v2151_v6  ;;  %v2154_v10 = vadd.f32 %v2153_v8, %v2152_v7 }
 0x1e5   :  { %v2119_v9 = vpop.f32.mrb[104].mxu0  ;;  %1899 = vst [vmem:[%s3650_s2 + $0x598] sm:$0xff] %v2154_v10 }
 0x1e6   :  { %v2120_v12 = vpop.f32.mrb[105].mxu0 }
 0x1e7   :  { %v2121_v14 = vadd.f32 %v2120_v12, %v2119_v9  ;;  %v2122_v15 = vpop.f32.mrb[106].mxu0  ;;  %v2155_v18 = vpop.f32.mrb[104].mxu1 }
 0x1e8   :  { %v2123_v16 = vpop.f32.mrb[107].mxu0  ;;  %v2156_v19 = vpop.f32.mrb[105].mxu1 }
 0x1e9   :  { %1800 = vst [vmem:[%s3650_s2 + $0x280] sm:$0xff] %v2121_v14  ;;  %v2124_v17 = vadd.f32 %v2123_v16, %v2122_v15  ;;  %v2157_v20 = vadd.f32 %v2156_v19, %v2155_v18  ;;  %v2158_v22 = vpop.f32.mrb[106].mxu1 }
 0x1ea   :  { %v2159_v24 = vpop.f32.mrb[107].mxu1 }
 0x1eb   :  { %1809 = vst [vmem:[%s3650_s2 + $0x2c8] sm:$0xff] %v2124_v17  ;;  %1908 = vst [vmem:[%s3650_s2 + $0x5e0] sm:$0x3] %v2157_v20 }
 0x1ed   :  { %v2125_v25 = vpop.f32.mrb[108].mxu0 }
 0x1ee   :  { %v2126_v26 = vpop.f32.mrb[109].mxu0 }
 0x1ef   :  { %v2127_v27 = vadd.f32 %v2126_v26, %v2125_v25  ;;  %v2128_v28 = vpop.f32.mrb[110].mxu0 }
 0x1f0   :  { %v2129_v29 = vpop.f32.mrb[111].mxu0 }
 0x1f1   :  { %1818 = vst [vmem:[%s3650_s2 + $0x310] sm:$0xff] %v2127_v27  ;;  %v2130_v30 = vadd.f32 %v2129_v29, %v2128_v28 }
 0x1f3   :  { %1827 = vst [vmem:[%s3650_s2 + $0x358] sm:$0xff] %v2130_v30 }

// kernel: heatmap_decoder_forward.9
= control target key start
LH: loop header
LB: loop body
LE: loop exit
PB: predicated region body
PF: predicated region fallthrough
CT: control target
= control target key end

     0   :  { %v103_v0 = vlaneseq  ;;  %vm287_vm0 = vcmask 1041408   ;;  %s3783_s1 = inlined_call_operand.vmem [shape: f32[8,128], index: 1, kind: input, shape index: {}]   ;;  %s3784_s0 = inlined_call_operand.vmem [shape: f32[722,128], index: 0, kind: input, shape index: {}]   ;;  %s3785_s2 = inlined_call_operand.vmem [shape: bf16[722,128], index: 2, kind: output, shape index: {}]  }
   0x1   :  { %v11_v3 = vld [vmem:[%s3783_s1] sm:$0xff]  ;;  %v13_v5 = vld [vmem:[%s3784_s0 + $0x8] sm:$0xff]  ;;  %v14_v6 = vld [vmem:[%s3784_s0 + $0x10] sm:$0xff] }
   0x2   :  { %v1980_v1 = vshrl.u32 %v103_v0, 7  ;;  %v12_v4 = vld [vmem:[%s3784_s0] sm:$0xff]  ;;  %v15_v8 = vld [vmem:[%s3784_s0 + $0x18] sm:$0xff]  ;;  %v45_v9 = vld [vmem:[%s3784_s0 + $0x108] sm:$0xff] }
   0x3   :  { %v46_v10 = vld [vmem:[%s3784_s0 + $0x110] sm:$0xff]  ;;  %v47_v11 = vld [vmem:[%s3784_s0 + $0x118] sm:$0xff]  ;;  %v48_v12 = vld [vmem:[%s3784_s0 + $0x120] sm:$0xff] }
   0x4   :  { %3892 = vst [vmem:[#allocation2_spill] sm:$0xff] %v1980_v1  ;;  %v105_v2 = vsub.s32 0, %v1980_v1  ;;  %v49_v13 = vld [vmem:[%s3784_s0 + $0x128] sm:$0xff]  ;;  %v50_v14 = vld [vmem:[%s3784_s0 + $0x130] sm:$0xff]  ;;  %v51_v15 = vld [vmem:[%s3784_s0 + $0x138] sm:$0xff] }
   0x5   :  { %v52_v16 = vld [vmem:[%s3784_s0 + $0x140] sm:$0xff]  ;;  %v53_v17 = vld [vmem:[%s3784_s0 + $0x148] sm:$0xff]  ;;  %v54_v18 = vld [vmem:[%s3784_s0 + $0x150] sm:$0xff] }
   0x6   :  { %v1995_v7 = vrot.slane %v11_v3, %v105_v2  ;;  %v55_v19 = vld [vmem:[%s3784_s0 + $0x158] sm:$0xff]  ;;  %v56_v23 = vld [vmem:[%s3784_s0 + $0x160] sm:$0xff]  ;;  %v57_v24 = vld [vmem:[%s3784_s0 + $0x168] sm:$0xff] }
   0x7   :  { %v58_v25 = vld [vmem:[%s3784_s0 + $0x170] sm:$0xff]  ;;  %v59_v30 = vld [vmem:[%s3784_s0 + $0x178] sm:$0xff]  ;;  %v60_v31 = vld [vmem:[%s3784_s0 + $0x180] sm:$0xff] }
   0x8   :  { %v2034_v20 = vadd.f32 %v1995_v7, %v12_v4  ;;  %v2037_v21 = vadd.f32 %v1995_v7, %v13_v5  ;;  %v2040_v22 = vadd.f32 %v1995_v7, %v14_v6  ;;  %v2052_v26 = vadd.f32 %v1995_v7, %v15_v8  ;;  %v61_v32 = vld [vmem:[%s3784_s0 + $0x188] sm:$0xff]  ;;  %v62_v37 = vld [vmem:[%s3784_s0 + $0x190] sm:$0xff]  ;;  %v63_v38 = vld [vmem:[%s3784_s0 + $0x198] sm:$0xff] }
   0x9   :  { %v2055_v27 = vadd.f32 %v1995_v7, %v45_v9  ;;  %v2058_v28 = vadd.f32 %v1995_v7, %v46_v10  ;;  %v2061_v29 = vadd.f32 %v1995_v7, %v47_v11  ;;  %v2073_v33 = vadd.f32 %v1995_v7, %v48_v12  ;;  %v64_v39 = vld [vmem:[%s3784_s0 + $0x1a0] sm:$0xff]  ;;  %v65_v44 = vld [vmem:[%s3784_s0 + $0x1a8] sm:$0xff]  ;;  %v66_v45 = vld [vmem:[%s3784_s0 + $0x1b0] sm:$0xff] }
   0xa   :  { %3893 = vst [vmem:[#allocation3_spill] sm:$0xff] %v2034_v20  ;;  %3894 = vst [vmem:[#allocation4_spill] sm:$0xff] %v2037_v21  ;;  %v2076_v34 = vadd.f32 %v1995_v7, %v49_v13  ;;  %v2079_v35 = vadd.f32 %v1995_v7, %v50_v14  ;;  %v2082_v36 = vadd.f32 %v1995_v7, %v51_v15  ;;  %v67_v46 = vld [vmem:[%s3784_s0 + $0x1b8] sm:$0xff]  ;;  %v68_v51 = vld [vmem:[%s3784_s0 + $0x1c0] sm:$0xff] }
   0xb   :  { %3895 = vst [vmem:[#allocation5_spill] sm:$0xff] %v2040_v22  ;;  %3896 = vst [vmem:[#allocation6_spill] sm:$0xff] %v2052_v26  ;;  %v2094_v40 = vadd.f32 %v1995_v7, %v52_v16  ;;  %v2097_v41 = vadd.f32 %v1995_v7, %v53_v17  ;;  %v2100_v42 = vadd.f32 %v1995_v7, %v54_v18  ;;  %v69_v52 = vld [vmem:[%s3784_s0 + $0x1c8] sm:$0xff]  ;;  %v70_v53 = vld [vmem:[%s3784_s0 + $0x1d0] sm:$0xff] }
   0xc   :  { %v2103_v43 = vadd.f32 %v1995_v7, %v55_v19  ;;  %v2115_v47 = vadd.f32 %v1995_v7, %v56_v23  ;;  %v2118_v48 = vadd.f32 %v1995_v7, %v57_v24  ;;  %v2121_v49 = vadd.f32 %v1995_v7, %v58_v25  ;;  %v16_v58 = vld [vmem:[%s3784_s0 + $0x20] sm:$0xff]  ;;  %v71_v59 = vld [vmem:[%s3784_s0 + $0x1d8] sm:$0xff]  ;;  %v73_v61 = vld [vmem:[%s3784_s0 + $0x1e8] sm:$0xff] }
   0xd   :  { %v2124_v50 = vadd.f32 %v1995_v7, %v59_v30  ;;  %v2136_v54 = vadd.f32 %v1995_v7, %v60_v31  ;;  %v2139_v55 = vadd.f32 %v1995_v7, %v61_v32  ;;  %v2142_v56 = vadd.f32 %v1995_v7, %v62_v37  ;;  %v72_v60 = vld [vmem:[%s3784_s0 + $0x1e0] sm:$0xff]  ;;  %v74_v3 = vld [vmem:[%s3784_s0 + $0x1f0] sm:$0xff]  ;;  %v75_v4 = vld [vmem:[%s3784_s0 + $0x1f8] sm:$0xff] }
   0xe   :  { %v2145_v57 = vadd.f32 %v1995_v7, %v63_v38  ;;  %v2160_v62 = vadd.f32 %v1995_v7, %v64_v39  ;;  %v2163_v63 = vadd.f32 %v1995_v7, %v65_v44  ;;  %v2166_v0 = vadd.f32 %v1995_v7, %v66_v45  ;;  %v76_v5 = vld [vmem:[%s3784_s0 + $0x200] sm:$0xff]  ;;  %v17_v11 = vld [vmem:[%s3784_s0 + $0x28] sm:$0xff]  ;;  %v78_v13 = vld [vmem:[%s3784_s0 + $0x210] sm:$0xff] }
   0xf   :  { %v2169_v2 = vadd.f32 %v1995_v7, %v67_v46  ;;  %v2181_v6 = vadd.f32 %v1995_v7, %v68_v51  ;;  %v2184_v8 = vadd.f32 %v1995_v7, %v69_v52  ;;  %v2187_v9 = vadd.f32 %v1995_v7, %v70_v53  ;;  %v77_v12 = vld [vmem:[%s3784_s0 + $0x208] sm:$0xff]  ;;  %v79_v14 = vld [vmem:[%s3784_s0 + $0x218] sm:$0xff]  ;;  %v80_v19 = vld [vmem:[%s3784_s0 + $0x220] sm:$0xff] }
  0x10   :  { %v2190_v10 = vadd.f32 %v1995_v7, %v71_v59  ;;  %v2205_v15 = vadd.f32 %v1995_v7, %v72_v60  ;;  %v2208_v16 = vadd.f32 %v1995_v7, %v73_v61  ;;  %v2211_v17 = vadd.f32 %v1995_v7, %v74_v3  ;;  %v81_v23 = vld [vmem:[%s3784_s0 + $0x228] sm:$0xff]  ;;  %v82_v24 = vld [vmem:[%s3784_s0 + $0x230] sm:$0xff]  ;;  %v83_v38 = vld [vmem:[%s3784_s0 + $0x238] sm:$0xff] }
  0x11   :  { %v2214_v18 = vadd.f32 %v1995_v7, %v75_v4  ;;  %v2226_v25 = vadd.f32 %v1995_v7, %v76_v5  ;;  %v2229_v30 = vadd.f32 %v1995_v7, %v77_v12  ;;  %v2232_v31 = vadd.f32 %v1995_v7, %v78_v13  ;;  %v18_v37 = vld [vmem:[%s3784_s0 + $0x30] sm:$0xff]  ;;  %v84_v39 = vld [vmem:[%s3784_s0 + $0x240] sm:$0xff]  ;;  %v85_v44 = vld [vmem:[%s3784_s0 + $0x248] sm:$0xff] }
  0x12   :  { %v2235_v32 = vadd.f32 %v1995_v7, %v79_v14  ;;  %v2250_v45 = vadd.f32 %v1995_v7, %v80_v19  ;;  %v2253_v46 = vadd.f32 %v1995_v7, %v81_v23  ;;  %v2256_v51 = vadd.f32 %v1995_v7, %v82_v24  ;;  %v86_v53 = vld [vmem:[%s3784_s0 + $0x250] sm:$0xff]  ;;  %v87_v59 = vld [vmem:[%s3784_s0 + $0x258] sm:$0xff]  ;;  %v88_v60 = vld [vmem:[%s3784_s0 + $0x260] sm:$0xff] }
  0x13   :  { %3897 = vst [vmem:[#allocation7_spill] sm:$0xff] %v2214_v18  ;;  %3898 = vst [vmem:[#allocation8_spill] sm:$0xff] %v2226_v25  ;;  %v198_v52 = vadd.f32 %v2037_v21, %v2034_v20  ;;  %v2270_v61 = vadd.f32 %v1995_v7, %v16_v58  ;;  %v2273_v3 = vadd.f32 %v1995_v7, %v83_v38  ;;  %v89_v12 = vld [vmem:[%s3784_s0 + $0x268] sm:$0xff]  ;;  %v90_v13 = vld [vmem:[%s3784_s0 + $0x270] sm:$0xff] }
  0x14   :  { %3899 = vst [vmem:[#allocation9_spill] sm:$0xff] %v2229_v30  ;;  %3900 = vst [vmem:[#allocation10_spill] sm:$0xff] %v2232_v31  ;;  %v2276_v4 = vadd.f32 %v1995_v7, %v84_v39  ;;  %v2279_v5 = vadd.f32 %v1995_v7, %v85_v44  ;;  %v91_v58 = vld [vmem:[%s3784_s0 + $0x278] sm:$0xff]  ;;  %v2291_v14 = vadd.f32 %v1995_v7, %v86_v53  ;;  %v92_v39 = vld [vmem:[%s3784_s0 + $0x280] sm:$0xff] }
  0x15   :  { %3901 = vst [vmem:[#allocation11_spill] sm:$0xff] %v2235_v32  ;;  %3902 = vst [vmem:[#allocation12_spill] sm:$0xff] %v2250_v45  ;;  %v2294_v19 = vadd.f32 %v1995_v7, %v87_v59  ;;  %v2297_v23 = vadd.f32 %v1995_v7, %v88_v60  ;;  %v199_v24 = vadd.f32 %v198_v52, %v2040_v22  ;;  %v19_v38 = vld [vmem:[%s3784_s0 + $0x38] sm:$0xff]  ;;  %v93_v44 = vld [vmem:[%s3784_s0 + $0x288] sm:$0xff] }
  0x16   :  { %3903 = vst [vmem:[#allocation13_spill] sm:$0xff] %v2253_v46  ;;  %3904 = vst [vmem:[#allocation14_spill] sm:$0xff] %v2256_v51  ;;  %v94_v53 = vld [vmem:[%s3784_s0 + $0x290] sm:$0xff]  ;;  %v2313_v59 = vadd.f32 %v1995_v7, %v17_v11  ;;  %v2316_v52 = vadd.f32 %v1995_v7, %v89_v12  ;;  %v2319_v60 = vadd.f32 %v1995_v7, %v90_v13  ;;  %v95_v22 = vld [vmem:[%s3784_s0 + $0x298] sm:$0xff] }
  0x17   :  { %3905 = vst [vmem:[#allocation15_spill] sm:$0xff] %v2270_v61  ;;  %3906 = vst [vmem:[#allocation16_spill] sm:$0xff] %v2273_v3  ;;  %v2322_v1 = vadd.f32 %v1995_v7, %v91_v58  ;;  %v96_v21 = vld [vmem:[%s3784_s0 + $0x2a0] sm:$0xff]  ;;  %v97_v11 = vld [vmem:[%s3784_s0 + $0x2a8] sm:$0xff]  ;;  %v2334_v12 = vadd.f32 %v1995_v7, %v92_v39  ;;  %v2337_v13 = vadd.f32 %v1995_v7, %v93_v44 }
  0x18   :  { %3907 = vst [vmem:[#allocation17_spill] sm:$0xff] %v2276_v4  ;;  %3908 = vst [vmem:[#allocation18_spill] sm:$0xff] %v2279_v5  ;;  %v2340_v58 = vadd.f32 %v1995_v7, %v94_v53  ;;  %v200_v20 = vadd.f32 %v199_v24, %v2052_v26  ;;  %v100_v39 = vld [vmem:[%s3784_s0 + $0x2c0] sm:$0xff]  ;;  %v2353_v44 = vadd.f32 %v1995_v7, %v18_v37 }
  0x19   :  { %3909 = vst [vmem:[#allocation19_spill] sm:$0xff] %v2291_v14  ;;  %3910 = vst [vmem:[#allocation20_spill] sm:$0xff] %v2313_v59  ;;  %v2356_v53 = vadd.f32 %v1995_v7, %v95_v22  ;;  %v2359_v24 = vadd.f32 %v1995_v7, %v96_v21  ;;  %v2362_v26 = vadd.f32 %v1995_v7, %v97_v11 }
  0x1a   :  { %3911 = vst [vmem:[#allocation21_spill] sm:$0xff] %v2319_v60  ;;  %3912 = vst [vmem:[#allocation22_spill] sm:$0xff] %v2322_v1  ;;  %v98_v1 = vld [vmem:[%s3784_s0 + $0x2b0] sm:$0xff]  ;;  %v99_v60 = vld [vmem:[%s3784_s0 + $0x2b8] sm:$0xff]  ;;  %v2377_v21 = vadd.f32 %v1995_v7, %v100_v39  ;;  %v201_v11 = vadd.f32 %v200_v20, %v2270_v61 }
  0x1b   :  { %3913 = vst [vmem:[#allocation23_spill] sm:$0xff] %v2337_v13  ;;  %3914 = vst [vmem:[#allocation24_spill] sm:$0xff] %v2340_v58  ;;  %v101_v58 = vld [vmem:[%s3784_s0 + $0x2c8] sm:$0xff]  ;;  %v102_v13 = vld [vmem:[%s3784_s0 + $0x2d0] sm:$0x3]  ;;  %v2371_v37 = vadd.f32 %v1995_v7, %v98_v1  ;;  %v2374_v22 = vadd.f32 %v1995_v7, %v99_v60  ;;  %v2390_v1 = vadd.f32 %v1995_v7, %v19_v38 }
  0x1c   :  { %3915 = vst [vmem:[#allocation25_spill] sm:$0xff] %v2353_v44  ;;  %3916 = vst [vmem:[#allocation26_spill] sm:$0xff] %v2356_v53  ;;  %v2387_v53 = vadd.f32 %v1995_v7, %v102_v13  ;;  %v202_v60 = vadd.f32 %v201_v11, %v2313_v59  ;;  %v21_v39 = vld [vmem:[%s3784_s0 + $0x48] sm:$0xff]  ;;  %v23_v11 = vld [vmem:[%s3784_s0 + $0x58] sm:$0xff] }
  0x1d   :  { %3917 = vst [vmem:[#allocation27_spill] sm:$0xff] %v2359_v24  ;;  %3918 = vst [vmem:[#allocation28_spill] sm:$0xff] %v2362_v26  ;;  %v20_v26 = vld [vmem:[%s3784_s0 + $0x40] sm:$0xff]  ;;  %v2384_v24 = vadd.f32 %v1995_v7, %v101_v58  ;;  %v22_v58 = vld [vmem:[%s3784_s0 + $0x50] sm:$0xff]  ;;  %v2404_v13 = vadd.f32 %v1995_v7, %v21_v39 }
  0x1e   :  { %3919 = vst [vmem:[#allocation29_spill] sm:$0xff] %v2377_v21  ;;  %3921 = vst [vmem:[#allocation31_spill] sm:$0xff] %v2387_v53  ;;  %v2397_v20 = vadd.f32 %v1995_v7, %v20_v26  ;;  %v203_v61 = vadd.f32 %v202_v60, %v2353_v44  ;;  %v2411_v59 = vadd.f32 %v1995_v7, %v22_v58  ;;  %v24_v60 = vld [vmem:[%s3784_s0 + $0x60] sm:$0xff] }
  0x1f   :  { %3920 = vst [vmem:[#allocation30_spill] sm:$0xff] %v2384_v24  ;;  %3922 = vst [vmem:[#allocation32_spill] sm:$0xff] %v2390_v1  ;;  %v2418_v44 = vadd.f32 %v1995_v7, %v23_v11 }
  0x20   :  { %3923 = vst [vmem:[#allocation33_spill] sm:$0xff] %v2397_v20  ;;  %3924 = vst [vmem:[#allocation34_spill] sm:$0xff] %v2404_v13  ;;  %v204_v38 = vadd.f32 %v203_v61, %v2390_v1  ;;  %v25_v61 = vld [vmem:[%s3784_s0 + $0x68] sm:$0xff]  ;;  %v2425_v1 = vadd.f32 %v1995_v7, %v24_v60 }
  0x21   :  { %3925 = vst [vmem:[#allocation35_spill] sm:$0xff] %v2411_v59  ;;  %3926 = vst [vmem:[#allocation36_spill] sm:$0xff] %v2418_v44 }
  0x22   :  { %v205_v26 = vadd.f32 %v204_v38, %v2397_v20  ;;  %3927 = vst [vmem:[#allocation37_spill] sm:$0xff] %v2425_v1  ;;  %v26_v38 = vld [vmem:[%s3784_s0 + $0x70] sm:$0xff]  ;;  %v2432_v20 = vadd.f32 %v1995_v7, %v25_v61 }
  0x24   :  { %v206_v39 = vadd.f32 %v205_v26, %v2404_v13  ;;  %3928 = vst [vmem:[#allocation38_spill] sm:$0xff] %v2432_v20  ;;  %v27_v26 = vld [vmem:[%s3784_s0 + $0x78] sm:$0xff]  ;;  %v2439_v13 = vadd.f32 %v1995_v7, %v26_v38 }
  0x26   :  { %v207_v58 = vadd.f32 %v206_v39, %v2411_v59  ;;  %3929 = vst [vmem:[#allocation39_spill] sm:$0xff] %v2439_v13  ;;  %v28_v39 = vld [vmem:[%s3784_s0 + $0x80] sm:$0xff]  ;;  %v2446_v59 = vadd.f32 %v1995_v7, %v27_v26 }
  0x28   :  { %v208_v11 = vadd.f32 %v207_v58, %v2418_v44  ;;  %3930 = vst [vmem:[#allocation40_spill] sm:$0xff] %v2446_v59  ;;  %v29_v58 = vld [vmem:[%s3784_s0 + $0x88] sm:$0xff]  ;;  %v2453_v44 = vadd.f32 %v1995_v7, %v28_v39 }
  0x2a   :  { %v209_v60 = vadd.f32 %v208_v11, %v2425_v1  ;;  %3931 = vst [vmem:[#allocation41_spill] sm:$0xff] %v2453_v44  ;;  %v30_v11 = vld [vmem:[%s3784_s0 + $0x90] sm:$0xff]  ;;  %v2460_v1 = vadd.f32 %v1995_v7, %v29_v58 }
  0x2c   :  { %v210_v61 = vadd.f32 %v209_v60, %v2432_v20  ;;  %3932 = vst [vmem:[#allocation42_spill] sm:$0xff] %v2460_v1  ;;  %v31_v60 = vld [vmem:[%s3784_s0 + $0x98] sm:$0xff]  ;;  %v2467_v20 = vadd.f32 %v1995_v7, %v30_v11 }
  0x2e   :  { %v211_v38 = vadd.f32 %v210_v61, %v2439_v13  ;;  %3933 = vst [vmem:[#allocation43_spill] sm:$0xff] %v2467_v20  ;;  %v32_v61 = vld [vmem:[%s3784_s0 + $0xa0] sm:$0xff]  ;;  %v2474_v13 = vadd.f32 %v1995_v7, %v31_v60 }
  0x30   :  { %v212_v26 = vadd.f32 %v211_v38, %v2446_v59  ;;  %3934 = vst [vmem:[#allocation44_spill] sm:$0xff] %v2474_v13  ;;  %v33_v38 = vld [vmem:[%s3784_s0 + $0xa8] sm:$0xff]  ;;  %v2481_v59 = vadd.f32 %v1995_v7, %v32_v61 }
  0x32   :  { %v213_v39 = vadd.f32 %v212_v26, %v2453_v44  ;;  %3935 = vst [vmem:[#allocation45_spill] sm:$0xff] %v2481_v59  ;;  %v34_v26 = vld [vmem:[%s3784_s0 + $0xb0] sm:$0xff]  ;;  %v2488_v44 = vadd.f32 %v1995_v7, %v33_v38 }
  0x34   :  { %v214_v58 = vadd.f32 %v213_v39, %v2460_v1  ;;  %3936 = vst [vmem:[#allocation46_spill] sm:$0xff] %v2488_v44  ;;  %v35_v39 = vld [vmem:[%s3784_s0 + $0xb8] sm:$0xff]  ;;  %v2495_v1 = vadd.f32 %v1995_v7, %v34_v26 }
  0x36   :  { %v215_v11 = vadd.f32 %v214_v58, %v2467_v20  ;;  %3937 = vst [vmem:[#allocation47_spill] sm:$0xff] %v2495_v1  ;;  %v36_v58 = vld [vmem:[%s3784_s0 + $0xc0] sm:$0xff]  ;;  %v2502_v20 = vadd.f32 %v1995_v7, %v35_v39 }
  0x38   :  { %v216_v60 = vadd.f32 %v215_v11, %v2474_v13  ;;  %3938 = vst [vmem:[#allocation48_spill] sm:$0xff] %v2502_v20  ;;  %v37_v11 = vld [vmem:[%s3784_s0 + $0xc8] sm:$0xff]  ;;  %v2509_v13 = vadd.f32 %v1995_v7, %v36_v58 }
  0x3a   :  { %v217_v61 = vadd.f32 %v216_v60, %v2481_v59  ;;  %3939 = vst [vmem:[#allocation49_spill] sm:$0xff] %v2509_v13  ;;  %v38_v60 = vld [vmem:[%s3784_s0 + $0xd0] sm:$0xff]  ;;  %v2516_v59 = vadd.f32 %v1995_v7, %v37_v11 }
  0x3c   :  { %v218_v38 = vadd.f32 %v217_v61, %v2488_v44  ;;  %3940 = vst [vmem:[#allocation50_spill] sm:$0xff] %v2516_v59  ;;  %v39_v61 = vld [vmem:[%s3784_s0 + $0xd8] sm:$0xff]  ;;  %v2523_v44 = vadd.f32 %v1995_v7, %v38_v60 }
  0x3e   :  { %v219_v26 = vadd.f32 %v218_v38, %v2495_v1  ;;  %3941 = vst [vmem:[#allocation51_spill] sm:$0xff] %v2523_v44  ;;  %v40_v38 = vld [vmem:[%s3784_s0 + $0xe0] sm:$0xff]  ;;  %v2530_v1 = vadd.f32 %v1995_v7, %v39_v61 }
  0x40   :  { %v220_v39 = vadd.f32 %v219_v26, %v2502_v20  ;;  %3942 = vst [vmem:[#allocation52_spill] sm:$0xff] %v2530_v1  ;;  %v41_v26 = vld [vmem:[%s3784_s0 + $0xe8] sm:$0xff]  ;;  %v2537_v20 = vadd.f32 %v1995_v7, %v40_v38 }
  0x42   :  { %v221_v58 = vadd.f32 %v220_v39, %v2509_v13  ;;  %3943 = vst [vmem:[#allocation53_spill] sm:$0xff] %v2537_v20  ;;  %v42_v39 = vld [vmem:[%s3784_s0 + $0xf0] sm:$0xff]  ;;  %v2544_v13 = vadd.f32 %v1995_v7, %v41_v26 }
  0x44   :  { %v222_v11 = vadd.f32 %v221_v58, %v2516_v59  ;;  %v43_v58 = vld [vmem:[%s3784_s0 + $0xf8] sm:$0xff]  ;;  %v2551_v59 = vadd.f32 %v1995_v7, %v42_v39 }
  0x46   :  { %v223_v60 = vadd.f32 %v222_v11, %v2523_v44  ;;  %v44_v11 = vld [vmem:[%s3784_s0 + $0x100] sm:$0xff]  ;;  %v2558_v44 = vadd.f32 %v1995_v7, %v43_v58 }
  0x48   :  { %v224_v61 = vadd.f32 %v223_v60, %v2530_v1  ;;  %v2562_v60 = vadd.f32 %v1995_v7, %v44_v11 }
  0x4a   :  { %v225_v38 = vadd.f32 %v224_v61, %v2537_v20 }
  0x4c   :  { %v226_v26 = vadd.f32 %v225_v38, %v2544_v13 }
  0x4e   :  { %v227_v1 = vadd.f32 %v226_v26, %v2551_v59 }
  0x50   :  { %v228_v53 = vadd.f32 %v227_v1, %v2558_v44 }
  0x52   :  { %v229_v39 = vadd.f32 %v228_v53, %v2562_v60 }
  0x54   :  { %v230_v61 = vadd.f32 %v229_v39, %v2055_v27 }
  0x56   :  { %v231_v20 = vadd.f32 %v230_v61, %v2058_v28 }
  0x58   :  { %v232_v24 = vadd.f32 %v231_v20, %v2061_v29 }
  0x5a   :  { %v233_v58 = vadd.f32 %v232_v24, %v2073_v33 }
  0x5c   :  { %v234_v21 = vadd.f32 %v233_v58, %v2076_v34 }
  0x5e   :  { %v235_v38 = vadd.f32 %v234_v21, %v2079_v35 }
  0x60   :  { %v236_v7 = vadd.f32 %v235_v38, %v2082_v36 }
  0x62   :  { %v237_v11 = vadd.f32 %v236_v7, %v2094_v40 }
  0x64   :  { %v238_v1 = vadd.f32 %v237_v11, %v2097_v41 }
  0x66   :  { %v239_v53 = vadd.f32 %v238_v1, %v2100_v42 }
  0x68   :  { %v240_v26 = vadd.f32 %v239_v53, %v2103_v43 }
  0x6a   :  { %v241_v39 = vadd.f32 %v240_v26, %v2115_v47 }
  0x6c   :  { %v242_v20 = vadd.f32 %v241_v39, %v2118_v48 }
  0x6e   :  { %v243_v24 = vadd.f32 %v242_v20, %v2121_v49 }
  0x70   :  { %v244_v61 = vadd.f32 %v243_v24, %v2124_v50 }
  0x72   :  { %v245_v21 = vadd.f32 %v244_v61, %v2136_v54 }
  0x74   :  { %v246_v58 = vadd.f32 %v245_v21, %v2139_v55 }
  0x76   :  { %v247_v38 = vadd.f32 %v246_v58, %v2142_v56 }
  0x78   :  { %v248_v7 = vadd.f32 %v247_v38, %v2145_v57 }
  0x7a   :  { %v249_v11 = vadd.f32 %v248_v7, %v2160_v62 }
  0x7c   :  { %v250_v1 = vadd.f32 %v249_v11, %v2163_v63 }
  0x7e   :  { %v251_v53 = vadd.f32 %v250_v1, %v2166_v0 }
  0x80   :  { %v252_v26 = vadd.f32 %v251_v53, %v2169_v2 }
  0x82   :  { %v253_v39 = vadd.f32 %v252_v26, %v2181_v6 }
  0x84   :  { %v254_v20 = vadd.f32 %v253_v39, %v2184_v8 }
  0x86   :  { %v255_v24 = vadd.f32 %v254_v20, %v2187_v9 }
  0x88   :  { %v256_v61 = vadd.f32 %v255_v24, %v2190_v10 }
  0x8a   :  { %v257_v21 = vadd.f32 %v256_v61, %v2205_v15 }
  0x8c   :  { %v258_v58 = vadd.f32 %v257_v21, %v2208_v16 }
  0x8e   :  { %v259_v38 = vadd.f32 %v258_v58, %v2211_v17 }
  0x90   :  { %v260_v7 = vadd.f32 %v259_v38, %v2214_v18 }
  0x92   :  { %v261_v11 = vadd.f32 %v260_v7, %v2226_v25 }
  0x94   :  { %v262_v1 = vadd.f32 %v261_v11, %v2229_v30 }
  0x96   :  { %v263_v53 = vadd.f32 %v262_v1, %v2232_v31 }
  0x98   :  { %v264_v26 = vadd.f32 %v263_v53, %v2235_v32  ;;  %v3944_v53 = vld [vmem:[#allocation21_spill] sm:$0xff]  ;;  %v3952_v32 = vld [vmem:[#allocation30_spill] sm:$0xff] }
  0x9a   :  { %v265_v39 = vadd.f32 %v264_v26, %v2250_v45  ;;  %v3945_v45 = vld [vmem:[#allocation22_spill] sm:$0xff] }
  0x9c   :  { %v266_v20 = vadd.f32 %v265_v39, %v2253_v46  ;;  %v3951_v46 = vld [vmem:[#allocation29_spill] sm:$0xff] }
  0x9e   :  { %v267_v24 = vadd.f32 %v266_v20, %v2256_v51  ;;  %v3946_v51 = vld [vmem:[#allocation23_spill] sm:$0xff] }
  0xa0   :  { %v268_v61 = vadd.f32 %v267_v24, %v2273_v3  ;;  %v3947_v3 = vld [vmem:[#allocation24_spill] sm:$0xff] }
  0xa2   :  { %v269_v21 = vadd.f32 %v268_v61, %v2276_v4  ;;  %v3948_v4 = vld [vmem:[#allocation26_spill] sm:$0xff] }
  0xa4   :  { %v270_v58 = vadd.f32 %v269_v21, %v2279_v5  ;;  %v3949_v5 = vld [vmem:[#allocation27_spill] sm:$0xff] }
  0xa6   :  { %v271_v38 = vadd.f32 %v270_v58, %v2291_v14  ;;  %v3950_v14 = vld [vmem:[#allocation28_spill] sm:$0xff] }
  0xa8   :  { %v272_v7 = vadd.f32 %v271_v38, %v2294_v19 }
  0xaa   :  { %v273_v11 = vadd.f32 %v272_v7, %v2297_v23 }
  0xac   :  { %v274_v1 = vadd.f32 %v273_v11, %v2316_v52 }
  0xae   :  { %v275_v26 = vadd.f32 %v274_v1, %v3944_v53 }
  0xb0   :  { %v276_v39 = vadd.f32 %v275_v26, %v3945_v45 }
  0xb2   :  { %v277_v20 = vadd.f32 %v276_v39, %v2334_v12  ;;  %v3953_v39 = vld [vmem:[#allocation31_spill] sm:$0xff] }
  0xb4   :  { %v278_v24 = vadd.f32 %v277_v20, %v3946_v51  ;;  %v288_v20 = vsel %vm287_vm0, %v3953_v39, 0.0  ;;  %v3984_v39 = vld [vmem:[#allocation33_spill] sm:$0xff] }
  0xb6   :  { %v279_v61 = vadd.f32 %v278_v24, %v3947_v3 }
  0xb8   :  { %v280_v21 = vadd.f32 %v279_v61, %v3948_v4 }
  0xba   :  { %v281_v58 = vadd.f32 %v280_v21, %v3949_v5 }
  0xbc   :  { %v282_v38 = vadd.f32 %v281_v58, %v3950_v14 }
  0xbe   :  { %v283_v7 = vadd.f32 %v282_v38, %v2371_v37 }
  0xc0   :  { %v284_v11 = vadd.f32 %v283_v7, %v2374_v22 }
  0xc2   :  { %v285_v1 = vadd.f32 %v284_v11, %v3951_v46 }
  0xc4   :  { %v286_v26 = vadd.f32 %v285_v1, %v3952_v32  ;;  %v3972_v1 = vld [vmem:[#allocation5_spill] sm:$0xff] }
  0xc6   :  { %v289_v31 = vadd.f32 %v288_v20, %v286_v26  ;;  %v3974_v26 = vld [vmem:[#allocation6_spill] sm:$0xff] }
  0xc8   :  { %v290_v24 = vrot.slane %v289_v31, 4 }
  0xca   :  { %v291_v30 = vadd.f32 %v290_v24, %v289_v31  ;;  %v3976_v24 = vld [vmem:[#allocation15_spill] sm:$0xff] }
  0xcc   :  { %v292_v61 = vrot.slane %v291_v30, 2 }
  0xce   :  { %v293_v25 = vadd.f32 %v292_v61, %v291_v30 }
  0xd0   :  { %v294_v21 = vrot.slane %v293_v25, 1 }
  0xd2   :  { %v295_v18 = vadd.f32 %v294_v21, %v293_v25 }
  0xd4   :  { %v2626_v58 = vmul.f32 0.0013850415, %v295_v18 }
  0xd6   :  { %v2630_v38 = vsub.f32 %v2294_v19, %v2626_v58  ;;  %v2634_v7 = vsub.f32 %v2297_v23, %v2626_v58  ;;  %v2638_v11 = vsub.f32 %v2316_v52, %v2626_v58  ;;  %v2642_v31 = vsub.f32 %v3944_v53, %v2626_v58  ;;  %v3970_v53 = vld [vmem:[#allocation4_spill] sm:$0xff] }
  0xd7   :  { %v2646_v18 = vsub.f32 %v3945_v45, %v2626_v58  ;;  %v2650_v25 = vsub.f32 %v2334_v12, %v2626_v58  ;;  %v2654_v30 = vsub.f32 %v3946_v51, %v2626_v58  ;;  %v2658_v19 = vsub.f32 %v3947_v3, %v2626_v58  ;;  %v3968_v12 = vld [vmem:[#allocation3_spill] sm:$0xff] }
  0xd8   :  { %3954 = vst [vmem:[#allocation21_spill] sm:$0xff] %v2634_v7  ;;  %3955 = vst [vmem:[#allocation22_spill] sm:$0xff] %v2638_v11  ;;  %v2662_v23 = vsub.f32 %v3948_v4, %v2626_v58  ;;  %v2666_v45 = vsub.f32 %v3949_v5, %v2626_v58  ;;  %v2670_v52 = vsub.f32 %v3950_v14, %v2626_v58 }
  0xd9   :  { %3956 = vst [vmem:[#allocation23_spill] sm:$0xff] %v2642_v31  ;;  %3957 = vst [vmem:[#allocation24_spill] sm:$0xff] %v2646_v18  ;;  %v2674_v51 = vsub.f32 %v2371_v37, %v2626_v58  ;;  %v2678_v3 = vsub.f32 %v2374_v22, %v2626_v58  ;;  %v2682_v4 = vsub.f32 %v3951_v46, %v2626_v58 }
  0xda   :  { %3958 = vst [vmem:[#allocation26_spill] sm:$0xff] %v2650_v25  ;;  %3959 = vst [vmem:[#allocation27_spill] sm:$0xff] %v2654_v30  ;;  %v2686_v5 = vsub.f32 %v3952_v32, %v2626_v58  ;;  %v2690_v14 = vsub.f32 %v3968_v12, %v2626_v58  ;;  %v2694_v37 = vsub.f32 %v3970_v53, %v2626_v58  ;;  %v3978_v12 = vld [vmem:[#allocation20_spill] sm:$0xff] }
  0xdb   :  { %3960 = vst [vmem:[#allocation28_spill] sm:$0xff] %v2658_v19  ;;  %3961 = vst [vmem:[#allocation29_spill] sm:$0xff] %v2662_v23  ;;  %v2698_v22 = vsub.f32 %v3972_v1, %v2626_v58  ;;  %v2702_v46 = vsub.f32 %v3974_v26, %v2626_v58  ;;  %v2710_v61 = vsub.f32 %v3976_v24, %v2626_v58 }
  0xdc   :  { %3962 = vst [vmem:[#allocation30_spill] sm:$0xff] %v2666_v45  ;;  %3963 = vst [vmem:[#allocation54_spill] sm:$0xff] %v2670_v52  ;;  %v388_v32 = vmul.f32 %v2690_v14, %v2690_v14  ;;  %v389_v20 = vmul.f32 %v2694_v37, %v2694_v37  ;;  %v2716_v53 = vsub.f32 %v3978_v12, %v2626_v58 }
  0xdd   :  { %3964 = vst [vmem:[#allocation55_spill] sm:$0xff] %v2674_v51  ;;  %3965 = vst [vmem:[#allocation56_spill] sm:$0xff] %v2678_v3  ;;  %v390_v21 = vmul.f32 %v2698_v22, %v2698_v22  ;;  %v391_v1 = vmul.f32 %v2702_v46, %v2702_v46 }
  0xde   :  { %3966 = vst [vmem:[#allocation57_spill] sm:$0xff] %v2682_v4  ;;  %3967 = vst [vmem:[#allocation58_spill] sm:$0xff] %v2686_v5  ;;  %v479_v26 = vadd.f32 %v389_v20, %v388_v32  ;;  %v3982_v4 = vld [vmem:[#allocation32_spill] sm:$0xff]  ;;  %v393_v12 = vmul.f32 %v2716_v53, %v2716_v53  ;;  %v3986_v20 = vld [vmem:[#allocation34_spill] sm:$0xff] }
  0xdf   :  { %3969 = vst [vmem:[#allocation3_spill] sm:$0xff] %v2690_v14  ;;  %3971 = vst [vmem:[#allocation4_spill] sm:$0xff] %v2694_v37  ;;  %v3980_v14 = vld [vmem:[#allocation25_spill] sm:$0xff]  ;;  %v392_v37 = vmul.f32 %v2710_v61, %v2710_v61  ;;  %v2728_v3 = vsub.f32 %v3982_v4, %v2626_v58 }
  0xe0   :  { %3973 = vst [vmem:[#allocation5_spill] sm:$0xff] %v2698_v22  ;;  %3975 = vst [vmem:[#allocation6_spill] sm:$0xff] %v2702_v46  ;;  %v2722_v5 = vsub.f32 %v3980_v14, %v2626_v58  ;;  %v480_v24 = vadd.f32 %v479_v26, %v390_v21  ;;  %v2734_v46 = vsub.f32 %v3984_v39, %v2626_v58  ;;  %v3988_v26 = vld [vmem:[#allocation35_spill] sm:$0xff] }
  0xe1   :  { %3977 = vst [vmem:[#allocation15_spill] sm:$0xff] %v2710_v61  ;;  %3979 = vst [vmem:[#allocation20_spill] sm:$0xff] %v2716_v53  ;;  %v2740_v61 = vsub.f32 %v3986_v20, %v2626_v58  ;;  %v395_v4 = vmul.f32 %v2728_v3, %v2728_v3  ;;  %v2746_v53 = vsub.f32 %v3988_v26, %v2626_v58  ;;  %v3992_v20 = vld [vmem:[#allocation37_spill] sm:$0xff]  ;;  %v3994_v26 = vld [vmem:[#allocation38_spill] sm:$0xff] }
  0xe2   :  { %3981 = vst [vmem:[#allocation25_spill] sm:$0xff] %v2722_v5  ;;  %3983 = vst [vmem:[#allocation32_spill] sm:$0xff] %v2728_v3  ;;  %v481_v22 = vadd.f32 %v480_v24, %v391_v1  ;;  %v394_v14 = vmul.f32 %v2722_v5, %v2722_v5  ;;  %v396_v39 = vmul.f32 %v2734_v46, %v2734_v46  ;;  %v3990_v24 = vld [vmem:[#allocation36_spill] sm:$0xff] }
  0xe3   :  { %3985 = vst [vmem:[#allocation33_spill] sm:$0xff] %v2734_v46  ;;  %3987 = vst [vmem:[#allocation34_spill] sm:$0xff] %v2740_v61  ;;  %v2752_v5 = vsub.f32 %v3990_v24, %v2626_v58  ;;  %v2758_v3 = vsub.f32 %v3992_v20, %v2626_v58  ;;  %v2764_v46 = vsub.f32 %v3994_v26, %v2626_v58  ;;  %v3996_v24 = vld [vmem:[#allocation39_spill] sm:$0xff]  ;;  %v3998_v20 = vld [vmem:[#allocation40_spill] sm:$0xff] }
  0xe4   :  { %v482_v32 = vadd.f32 %v481_v22, %v392_v37  ;;  %3989 = vst [vmem:[#allocation35_spill] sm:$0xff] %v2746_v53  ;;  %v397_v37 = vmul.f32 %v2740_v61, %v2740_v61  ;;  %v2770_v61 = vsub.f32 %v3996_v24, %v2626_v58  ;;  %v4000_v26 = vld [vmem:[#allocation41_spill] sm:$0xff]  ;;  %v4002_v24 = vld [vmem:[#allocation42_spill] sm:$0xff] }
  0xe5   :  { %3991 = vst [vmem:[#allocation36_spill] sm:$0xff] %v2752_v5  ;;  %3993 = vst [vmem:[#allocation37_spill] sm:$0xff] %v2758_v3 }
  0xe6   :  { %v483_v21 = vadd.f32 %v482_v32, %v393_v12  ;;  %v398_v12 = vmul.f32 %v2746_v53, %v2746_v53  ;;  %3995 = vst [vmem:[#allocation38_spill] sm:$0xff] %v2764_v46  ;;  %3997 = vst [vmem:[#allocation39_spill] sm:$0xff] %v2770_v61  ;;  %v2776_v53 = vsub.f32 %v3998_v20, %v2626_v58  ;;  %v4004_v20 = vld [vmem:[#allocation43_spill] sm:$0xff] }
  0xe8   :  { %v484_v1 = vadd.f32 %v483_v21, %v394_v14  ;;  %v399_v14 = vmul.f32 %v2752_v5, %v2752_v5  ;;  %3999 = vst [vmem:[#allocation40_spill] sm:$0xff] %v2776_v53  ;;  %v2782_v5 = vsub.f32 %v4000_v26, %v2626_v58  ;;  %v4006_v26 = vld [vmem:[#allocation44_spill] sm:$0xff] }
  0xea   :  { %v485_v22 = vadd.f32 %v484_v1, %v395_v4  ;;  %v400_v4 = vmul.f32 %v2758_v3, %v2758_v3  ;;  %4001 = vst [vmem:[#allocation41_spill] sm:$0xff] %v2782_v5  ;;  %v2788_v3 = vsub.f32 %v4002_v24, %v2626_v58  ;;  %v4008_v24 = vld [vmem:[#allocation45_spill] sm:$0xff] }
  0xec   :  { %v486_v32 = vadd.f32 %v485_v22, %v396_v39  ;;  %v401_v39 = vmul.f32 %v2764_v46, %v2764_v46  ;;  %4003 = vst [vmem:[#allocation42_spill] sm:$0xff] %v2788_v3  ;;  %v2794_v46 = vsub.f32 %v4004_v20, %v2626_v58  ;;  %v4010_v20 = vld [vmem:[#allocation46_spill] sm:$0xff] }
  0xee   :  { %v487_v21 = vadd.f32 %v486_v32, %v397_v37  ;;  %v402_v37 = vmul.f32 %v2770_v61, %v2770_v61  ;;  %4005 = vst [vmem:[#allocation43_spill] sm:$0xff] %v2794_v46  ;;  %v2800_v61 = vsub.f32 %v4006_v26, %v2626_v58  ;;  %v4012_v26 = vld [vmem:[#allocation47_spill] sm:$0xff] }
  0xf0   :  { %v488_v1 = vadd.f32 %v487_v21, %v398_v12  ;;  %v403_v12 = vmul.f32 %v2776_v53, %v2776_v53  ;;  %4007 = vst [vmem:[#allocation44_spill] sm:$0xff] %v2800_v61  ;;  %v2806_v53 = vsub.f32 %v4008_v24, %v2626_v58  ;;  %v4014_v24 = vld [vmem:[#allocation48_spill] sm:$0xff] }
  0xf2   :  { %v489_v22 = vadd.f32 %v488_v1, %v399_v14  ;;  %v404_v14 = vmul.f32 %v2782_v5, %v2782_v5  ;;  %4009 = vst [vmem:[#allocation45_spill] sm:$0xff] %v2806_v53  ;;  %v2812_v5 = vsub.f32 %v4010_v20, %v2626_v58  ;;  %v4016_v20 = vld [vmem:[#allocation49_spill] sm:$0xff] }
  0xf4   :  { %v490_v32 = vadd.f32 %v489_v22, %v400_v4  ;;  %v405_v4 = vmul.f32 %v2788_v3, %v2788_v3  ;;  %4011 = vst [vmem:[#allocation46_spill] sm:$0xff] %v2812_v5  ;;  %v2818_v3 = vsub.f32 %v4012_v26, %v2626_v58  ;;  %v4017_v26 = vld [vmem:[#allocation50_spill] sm:$0xff] }
  0xf6   :  { %v491_v21 = vadd.f32 %v490_v32, %v401_v39  ;;  %v406_v39 = vmul.f32 %v2794_v46, %v2794_v46  ;;  %4013 = vst [vmem:[#allocation47_spill] sm:$0xff] %v2818_v3  ;;  %v2824_v46 = vsub.f32 %v4014_v24, %v2626_v58  ;;  %v4018_v24 = vld [vmem:[#allocation51_spill] sm:$0xff] }
  0xf8   :  { %v492_v1 = vadd.f32 %v491_v21, %v402_v37  ;;  %v407_v37 = vmul.f32 %v2800_v61, %v2800_v61  ;;  %4015 = vst [vmem:[#allocation48_spill] sm:$0xff] %v2824_v46  ;;  %v2830_v61 = vsub.f32 %v4016_v20, %v2626_v58  ;;  %v4019_v20 = vld [vmem:[#allocation52_spill] sm:$0xff] }
  0xfa   :  { %v493_v22 = vadd.f32 %v492_v1, %v403_v12  ;;  %v408_v12 = vmul.f32 %v2806_v53, %v2806_v53  ;;  %v2836_v53 = vsub.f32 %v4017_v26, %v2626_v58  ;;  %v4020_v26 = vld [vmem:[#allocation53_spill] sm:$0xff] }
  0xfc   :  { %v494_v32 = vadd.f32 %v493_v22, %v404_v14  ;;  %v409_v14 = vmul.f32 %v2812_v5, %v2812_v5  ;;  %v2842_v5 = vsub.f32 %v4018_v24, %v2626_v58  ;;  %v2860_v24 = vsub.f32 %v2544_v13, %v2626_v58 }
  0xfe   :  { %v495_v21 = vadd.f32 %v494_v32, %v405_v4  ;;  %v410_v4 = vmul.f32 %v2818_v3, %v2818_v3  ;;  %v2848_v3 = vsub.f32 %v4019_v20, %v2626_v58  ;;  %v2866_v20 = vsub.f32 %v2551_v59, %v2626_v58 }
  0xff   :  { %v417_v13 = vmul.f32 %v2860_v24, %v2860_v24 }
 0x100   :  { %v496_v1 = vadd.f32 %v495_v21, %v406_v39  ;;  %v411_v39 = vmul.f32 %v2824_v46, %v2824_v46  ;;  %v2854_v46 = vsub.f32 %v4020_v26, %v2626_v58  ;;  %v2872_v26 = vsub.f32 %v2558_v44, %v2626_v58 }
 0x101   :  { %v418_v59 = vmul.f32 %v2866_v20, %v2866_v20 }
 0x102   :  { %v497_v22 = vadd.f32 %v496_v1, %v407_v37  ;;  %v412_v37 = vmul.f32 %v2830_v61, %v2830_v61  ;;  %v419_v44 = vmul.f32 %v2872_v26, %v2872_v26 }
 0x104   :  { %v498_v32 = vadd.f32 %v497_v22, %v408_v12  ;;  %v413_v12 = vmul.f32 %v2836_v53, %v2836_v53 }
 0x106   :  { %v499_v21 = vadd.f32 %v498_v32, %v409_v14  ;;  %v414_v14 = vmul.f32 %v2842_v5, %v2842_v5 }
 0x108   :  { %v500_v1 = vadd.f32 %v499_v21, %v410_v4  ;;  %v415_v4 = vmul.f32 %v2848_v3, %v2848_v3 }
 0x10a   :  { %v501_v22 = vadd.f32 %v500_v1, %v411_v39  ;;  %v416_v39 = vmul.f32 %v2854_v46, %v2854_v46 }
 0x10c   :  { %v502_v32 = vadd.f32 %v501_v22, %v412_v37  ;;  %v2878_v22 = vsub.f32 %v2562_v60, %v2626_v58 }
 0x10e   :  { %v503_v21 = vadd.f32 %v502_v32, %v413_v12  ;;  %v2884_v32 = vsub.f32 %v2055_v27, %v2626_v58  ;;  %v420_v60 = vmul.f32 %v2878_v22, %v2878_v22 }
 0x110   :  { %v504_v1 = vadd.f32 %v503_v21, %v414_v14  ;;  %v2890_v21 = vsub.f32 %v2058_v28, %v2626_v58  ;;  %v421_v27 = vmul.f32 %v2884_v32, %v2884_v32 }
 0x112   :  { %v505_v37 = vadd.f32 %v504_v1, %v415_v4  ;;  %v2896_v1 = vsub.f32 %v2061_v29, %v2626_v58  ;;  %v422_v28 = vmul.f32 %v2890_v21, %v2890_v21 }
 0x114   :  { %v506_v12 = vadd.f32 %v505_v37, %v416_v39  ;;  %v2902_v37 = vsub.f32 %v2073_v33, %v2626_v58  ;;  %v423_v29 = vmul.f32 %v2896_v1, %v2896_v1 }
 0x116   :  { %v507_v14 = vadd.f32 %v506_v12, %v417_v13  ;;  %v2908_v12 = vsub.f32 %v2076_v34, %v2626_v58  ;;  %v424_v33 = vmul.f32 %v2902_v37, %v2902_v37 }
 0x118   :  { %v508_v4 = vadd.f32 %v507_v14, %v418_v59  ;;  %v2914_v14 = vsub.f32 %v2079_v35, %v2626_v58  ;;  %v425_v34 = vmul.f32 %v2908_v12, %v2908_v12 }
 0x11a   :  { %v509_v39 = vadd.f32 %v508_v4, %v419_v44  ;;  %v2920_v4 = vsub.f32 %v2082_v36, %v2626_v58  ;;  %v426_v35 = vmul.f32 %v2914_v14, %v2914_v14 }
 0x11c   :  { %v510_v13 = vadd.f32 %v509_v39, %v420_v60  ;;  %v2926_v39 = vsub.f32 %v2094_v40, %v2626_v58  ;;  %v427_v36 = vmul.f32 %v2920_v4, %v2920_v4 }
 0x11e   :  { %v511_v59 = vadd.f32 %v510_v13, %v421_v27  ;;  %v2932_v13 = vsub.f32 %v2097_v41, %v2626_v58  ;;  %v428_v40 = vmul.f32 %v2926_v39, %v2926_v39 }
 0x120   :  { %v512_v44 = vadd.f32 %v511_v59, %v422_v28  ;;  %v2938_v59 = vsub.f32 %v2100_v42, %v2626_v58  ;;  %v429_v41 = vmul.f32 %v2932_v13, %v2932_v13 }
 0x122   :  { %v513_v60 = vadd.f32 %v512_v44, %v423_v29  ;;  %v2944_v44 = vsub.f32 %v2103_v43, %v2626_v58  ;;  %v430_v42 = vmul.f32 %v2938_v59, %v2938_v59 }
 0x124   :  { %v514_v27 = vadd.f32 %v513_v60, %v424_v33  ;;  %v2950_v60 = vsub.f32 %v2115_v47, %v2626_v58  ;;  %v431_v43 = vmul.f32 %v2944_v44, %v2944_v44 }
 0x126   :  { %v515_v28 = vadd.f32 %v514_v27, %v425_v34  ;;  %v2956_v27 = vsub.f32 %v2118_v48, %v2626_v58  ;;  %v432_v47 = vmul.f32 %v2950_v60, %v2950_v60 }
 0x128   :  { %v516_v29 = vadd.f32 %v515_v28, %v426_v35  ;;  %v2962_v28 = vsub.f32 %v2121_v49, %v2626_v58  ;;  %v433_v48 = vmul.f32 %v2956_v27, %v2956_v27 }
 0x12a   :  { %v517_v33 = vadd.f32 %v516_v29, %v427_v36  ;;  %v2968_v29 = vsub.f32 %v2124_v50, %v2626_v58  ;;  %v434_v49 = vmul.f32 %v2962_v28, %v2962_v28 }
 0x12c   :  { %v518_v34 = vadd.f32 %v517_v33, %v428_v40  ;;  %v2974_v33 = vsub.f32 %v2136_v54, %v2626_v58  ;;  %v435_v50 = vmul.f32 %v2968_v29, %v2968_v29 }
 0x12e   :  { %v519_v35 = vadd.f32 %v518_v34, %v429_v41  ;;  %v2980_v34 = vsub.f32 %v2139_v55, %v2626_v58  ;;  %v436_v54 = vmul.f32 %v2974_v33, %v2974_v33 }
 0x130   :  { %v520_v36 = vadd.f32 %v519_v35, %v430_v42  ;;  %v2986_v35 = vsub.f32 %v2142_v56, %v2626_v58  ;;  %v437_v55 = vmul.f32 %v2980_v34, %v2980_v34 }
 0x132   :  { %v521_v40 = vadd.f32 %v520_v36, %v431_v43  ;;  %v2992_v36 = vsub.f32 %v2145_v57, %v2626_v58  ;;  %v438_v56 = vmul.f32 %v2986_v35, %v2986_v35 }
 0x134   :  { %v522_v41 = vadd.f32 %v521_v40, %v432_v47  ;;  %v2998_v40 = vsub.f32 %v2160_v62, %v2626_v58  ;;  %v439_v57 = vmul.f32 %v2992_v36, %v2992_v36 }
 0x136   :  { %v523_v42 = vadd.f32 %v522_v41, %v433_v48  ;;  %v3004_v41 = vsub.f32 %v2163_v63, %v2626_v58  ;;  %v440_v62 = vmul.f32 %v2998_v40, %v2998_v40 }
 0x138   :  { %v524_v43 = vadd.f32 %v523_v42, %v434_v49  ;;  %v3010_v42 = vsub.f32 %v2166_v0, %v2626_v58  ;;  %v441_v63 = vmul.f32 %v3004_v41, %v3004_v41 }
 0x13a   :  { %v525_v47 = vadd.f32 %v524_v43, %v435_v50  ;;  %v3016_v43 = vsub.f32 %v2169_v2, %v2626_v58  ;;  %v442_v0 = vmul.f32 %v3010_v42, %v3010_v42 }
 0x13c   :  { %v526_v48 = vadd.f32 %v525_v47, %v436_v54  ;;  %v3022_v47 = vsub.f32 %v2181_v6, %v2626_v58  ;;  %v443_v2 = vmul.f32 %v3016_v43, %v3016_v43 }
 0x13e   :  { %v527_v49 = vadd.f32 %v526_v48, %v437_v55  ;;  %v3028_v48 = vsub.f32 %v2184_v8, %v2626_v58  ;;  %v444_v6 = vmul.f32 %v3022_v47, %v3022_v47 }
 0x140   :  { %v528_v50 = vadd.f32 %v527_v49, %v438_v56  ;;  %v3034_v49 = vsub.f32 %v2187_v9, %v2626_v58  ;;  %v445_v8 = vmul.f32 %v3028_v48, %v3028_v48 }
 0x142   :  { %v529_v54 = vadd.f32 %v528_v50, %v439_v57  ;;  %4021 = vst [vmem:[#allocation49_spill] sm:$0xff] %v3034_v49  ;;  %v3040_v50 = vsub.f32 %v2190_v10, %v2626_v58  ;;  %v446_v9 = vmul.f32 %v3034_v49, %v3034_v49 }
 0x144   :  { %v530_v55 = vadd.f32 %v529_v54, %v440_v62  ;;  %4022 = vst [vmem:[#allocation50_spill] sm:$0xff] %v3040_v50  ;;  %v3046_v54 = vsub.f32 %v2205_v15, %v2626_v58  ;;  %v447_v10 = vmul.f32 %v3040_v50, %v3040_v50 }
 0x146   :  { %v531_v56 = vadd.f32 %v530_v55, %v441_v63  ;;  %4023 = vst [vmem:[#allocation51_spill] sm:$0xff] %v3046_v54  ;;  %v3052_v55 = vsub.f32 %v2208_v16, %v2626_v58  ;;  %v448_v15 = vmul.f32 %v3046_v54, %v3046_v54 }
 0x148   :  { %v532_v57 = vadd.f32 %v531_v56, %v442_v0  ;;  %4024 = vst [vmem:[#allocation52_spill] sm:$0xff] %v3052_v55  ;;  %v3058_v56 = vsub.f32 %v2211_v17, %v2626_v58  ;;  %v449_v16 = vmul.f32 %v3052_v55, %v3052_v55 }
 0x14a   :  { %v533_v62 = vadd.f32 %v532_v57, %v443_v2  ;;  %4025 = vst [vmem:[#allocation53_spill] sm:$0xff] %v3058_v56  ;;  %v4026_v57 = vld [vmem:[#allocation7_spill] sm:$0xff]  ;;  %v450_v17 = vmul.f32 %v3058_v56, %v3058_v56 }
 0x14b   :  { %v3064_v49 = vsub.f32 %v4026_v57, %v2626_v58  ;;  %v4032_v57 = vld [vmem:[#allocation10_spill] sm:$0xff] }
 0x14c   :  { %v534_v63 = vadd.f32 %v533_v62, %v444_v6  ;;  %v4028_v62 = vld [vmem:[#allocation8_spill] sm:$0xff]  ;;  %v3082_v55 = vsub.f32 %v4032_v57, %v2626_v58  ;;  %v4038_v57 = vld [vmem:[#allocation13_spill] sm:$0xff] }
 0x14d   :  { %4027 = vst [vmem:[#allocation7_spill] sm:$0xff] %v3064_v49  ;;  %v3070_v50 = vsub.f32 %v4028_v62, %v2626_v58  ;;  %v4034_v62 = vld [vmem:[#allocation11_spill] sm:$0xff] }
 0x14e   :  { %v535_v0 = vadd.f32 %v534_v63, %v445_v8  ;;  %v4030_v63 = vld [vmem:[#allocation9_spill] sm:$0xff]  ;;  %4033 = vst [vmem:[#allocation10_spill] sm:$0xff] %v3082_v55  ;;  %v3088_v56 = vsub.f32 %v4034_v62, %v2626_v58  ;;  %v4040_v62 = vld [vmem:[#allocation14_spill] sm:$0xff] }
 0x14f   :  { %4029 = vst [vmem:[#allocation8_spill] sm:$0xff] %v3070_v50  ;;  %v3076_v54 = vsub.f32 %v4030_v63, %v2626_v58  ;;  %v4036_v63 = vld [vmem:[#allocation12_spill] sm:$0xff] }
 0x150   :  { %v536_v2 = vadd.f32 %v535_v0, %v446_v9  ;;  %v451_v9 = vmul.f32 %v3064_v49, %v3064_v49  ;;  %4035 = vst [vmem:[#allocation11_spill] sm:$0xff] %v3088_v56  ;;  %v3094_v49 = vsub.f32 %v4036_v63, %v2626_v58  ;;  %v4041_v63 = vld [vmem:[#allocation16_spill] sm:$0xff] }
 0x151   :  { %4031 = vst [vmem:[#allocation9_spill] sm:$0xff] %v3076_v54 }
 0x152   :  { %v537_v6 = vadd.f32 %v536_v2, %v447_v10  ;;  %v452_v10 = vmul.f32 %v3070_v50, %v3070_v50  ;;  %4037 = vst [vmem:[#allocation12_spill] sm:$0xff] %v3094_v49  ;;  %v3100_v50 = vsub.f32 %v4038_v57, %v2626_v58  ;;  %v4043_v57 = vld [vmem:[#allocation17_spill] sm:$0xff] }
 0x154   :  { %v538_v8 = vadd.f32 %v537_v6, %v448_v15  ;;  %v453_v15 = vmul.f32 %v3076_v54, %v3076_v54  ;;  %4039 = vst [vmem:[#allocation13_spill] sm:$0xff] %v3100_v50  ;;  %v3106_v54 = vsub.f32 %v4040_v62, %v2626_v58  ;;  %v4045_v62 = vld [vmem:[#allocation18_spill] sm:$0xff] }
 0x156   :  { %v539_v0 = vadd.f32 %v538_v8, %v449_v16  ;;  %v454_v16 = vmul.f32 %v3082_v55, %v3082_v55  ;;  %v3112_v55 = vsub.f32 %v4041_v63, %v2626_v58  ;;  %v4046_v63 = vld [vmem:[#allocation19_spill] sm:$0xff] }
 0x158   :  { %v540_v2 = vadd.f32 %v539_v0, %v450_v17  ;;  %v455_v17 = vmul.f32 %v3088_v56, %v3088_v56  ;;  %4042 = vst [vmem:[#allocation14_spill] sm:$0xff] %v3112_v55  ;;  %v3118_v56 = vsub.f32 %v4043_v57, %v2626_v58 }
 0x15a   :  { %v541_v6 = vadd.f32 %v540_v2, %v451_v9  ;;  %v456_v9 = vmul.f32 %v3094_v49, %v3094_v49  ;;  %4044 = vst [vmem:[#allocation16_spill] sm:$0xff] %v3118_v56  ;;  %v3124_v49 = vsub.f32 %v4045_v62, %v2626_v58 }
 0x15c   :  { %v542_v8 = vadd.f32 %v541_v6, %v452_v10  ;;  %v457_v10 = vmul.f32 %v3100_v50, %v3100_v50  ;;  %v3130_v50 = vsub.f32 %v4046_v63, %v2626_v58  ;;  %v461_v57 = vmul.f32 %v3124_v49, %v3124_v49 }
 0x15e   :  { %v543_v0 = vadd.f32 %v542_v8, %v453_v15  ;;  %v458_v15 = vmul.f32 %v3106_v54, %v3106_v54 }
 0x160   :  { %v544_v2 = vadd.f32 %v543_v0, %v454_v16  ;;  %v459_v16 = vmul.f32 %v3112_v55, %v3112_v55  ;;  %v463_v55 = vmul.f32 %v2630_v38, %v2630_v38 }
 0x162   :  { %v545_v6 = vadd.f32 %v544_v2, %v455_v17  ;;  %v460_v17 = vmul.f32 %v3118_v56, %v3118_v56  ;;  %v465_v56 = vmul.f32 %v2638_v11, %v2638_v11 }
 0x164   :  { %v546_v8 = vadd.f32 %v545_v6, %v456_v9  ;;  %v462_v6 = vmul.f32 %v3130_v50, %v3130_v50 }
 0x166   :  { %v547_v0 = vadd.f32 %v546_v8, %v457_v10  ;;  %v464_v8 = vmul.f32 %v2634_v7, %v2634_v7 }
 0x168   :  { %v548_v2 = vadd.f32 %v547_v0, %v458_v15  ;;  %v466_v0 = vmul.f32 %v2642_v31, %v2642_v31 }
 0x16a   :  { %v549_v9 = vadd.f32 %v548_v2, %v459_v16  ;;  %v467_v2 = vmul.f32 %v2646_v18, %v2646_v18 }
 0x16c   :  { %v550_v62 = vadd.f32 %v549_v9, %v460_v17  ;;  %v468_v9 = vmul.f32 %v2650_v25, %v2650_v25 }
 0x16e   :  { %v551_v10 = vadd.f32 %v550_v62, %v461_v57  ;;  %v469_v62 = vmul.f32 %v2654_v30, %v2654_v30 }
 0x170   :  { %v552_v63 = vadd.f32 %v551_v10, %v462_v6  ;;  %v470_v10 = vmul.f32 %v2658_v19, %v2658_v19 }
 0x172   :  { %v553_v15 = vadd.f32 %v552_v63, %v463_v55  ;;  %v471_v63 = vmul.f32 %v2662_v23, %v2662_v23 }
 0x174   :  { %v554_v16 = vadd.f32 %v553_v15, %v464_v8  ;;  %v472_v15 = vmul.f32 %v2666_v45, %v2666_v45 }
 0x176   :  { %v555_v17 = vadd.f32 %v554_v16, %v465_v56  ;;  %v473_v16 = vmul.f32 %v2670_v52, %v2670_v52 }
 0x178   :  { %v556_v57 = vadd.f32 %v555_v17, %v466_v0  ;;  %v474_v17 = vmul.f32 %v2674_v51, %v2674_v51 }
 0x17a   :  { %v557_v6 = vadd.f32 %v556_v57, %v467_v2  ;;  %v4047_v57 = vld [vmem:[#allocation31_spill] sm:$0xff] }
 0x17b   :  { %v3164_v19 = vsub.f32 %v4047_v57, %v2626_v58 }
 0x17c   :  { %v558_v55 = vadd.f32 %v557_v6, %v468_v9  ;;  %v4049_v9 = vld [vmem:[#allocation56_spill] sm:$0xff] }
 0x17d   :  { %4048 = vst [vmem:[#allocation17_spill] sm:$0xff] %v3164_v19  ;;  %v475_v6 = vmul.f32 %v4049_v9, %v4049_v9 }
 0x17e   :  { %v559_v8 = vadd.f32 %v558_v55, %v469_v62  ;;  %v4050_v55 = vld [vmem:[#allocation57_spill] sm:$0xff] }
 0x17f   :  { %v476_v45 = vmul.f32 %v4050_v55, %v4050_v55 }
 0x180   :  { %v560_v56 = vadd.f32 %v559_v8, %v470_v10  ;;  %v478_v8 = vmul.f32 %v3164_v19, %v3164_v19 }
 0x182   :  { %v561_v0 = vadd.f32 %v560_v56, %v471_v63  ;;  %v4051_v63 = vld [vmem:[#allocation58_spill] sm:$0xff] }
 0x183   :  { %v477_v56 = vmul.f32 %v4051_v63, %v4051_v63 }
 0x184   :  { %v562_v2 = vadd.f32 %v561_v0, %v472_v15  ;;  %v568_v0 = vsel %vm287_vm0, %v478_v8, 0.0 }
 0x186   :  { %v563_v62 = vadd.f32 %v562_v2, %v473_v16 }
 0x188   :  { %v564_v10 = vadd.f32 %v563_v62, %v474_v17  ;;  %v4052_v62 = vld [vmem:[#allocation2_spill] sm:$0xff] }
 0x189   :  { %v582_v19 = vsub.s32 1, %v4052_v62  ;;  %v677_v25 = vsub.s32 2, %v4052_v62 }
 0x18a   :  { %v565_v51 = vadd.f32 %v564_v10, %v475_v6  ;;  %v4053_v10 = vld [vmem:[#allocation3_spill] sm:$0xff] }
 0x18c   :  { %v566_v15 = vadd.f32 %v565_v51, %v476_v45  ;;  %v863_v45 = vsub.s32 3, %v4052_v62  ;;  %v958_v51 = vsub.s32 4, %v4052_v62 }
 0x18e   :  { %v567_v58 = vadd.f32 %v566_v15, %v477_v56  ;;  %v4054_v56 = vld [vmem:[#allocation4_spill] sm:$0xff] }
 0x190   :  { %v569_v57 = vadd.f32 %v568_v0, %v567_v58  ;;  %v4055_v0 = vld [vmem:[#allocation5_spill] sm:$0xff] }
 0x192   :  { %v570_v52 = vrot.slane %v569_v57, 4 }
 0x194   :  { %v571_v23 = vadd.f32 %v570_v52, %v569_v57  ;;  %v1964_v52 = vld [vmem:[%s3783_s1] sm:$0xff] }
 0x195   :  { %v4056_v57 = vld [vmem:[#allocation6_spill] sm:$0xff] }
 0x196   :  { %v572_v9 = vrot.slane %v571_v23, 2 }
 0x198   :  { %v573_v16 = vadd.f32 %v572_v9, %v571_v23  ;;  %v3184_v9 = vrot.slane %v1964_v52, %v677_v25 }
 0x19a   :  { %v574_v2 = vrot.slane %v573_v16, 1 }
 0x19c   :  { %v575_v30 = vadd.f32 %v574_v2, %v573_v16  ;;  %v4058_v16 = vld [vmem:[#allocation20_spill] sm:$0xff] }
 0x19e   :  { %v576_v55 = vmul.f32 0.0013850415, %v575_v30  ;;  %v3186_v30 = vrot.slane %v1964_v52, %v863_v45  ;;  %v4060_v45 = vld [vmem:[#allocation32_spill] sm:$0xff] }
 0x1a0   :  { %v577_v17 = vadd.f32 1e-05, %v576_v55  ;;  %v3188_v55 = vrot.slane %v1964_v52, %v958_v51 }
 0x1a2   :  { %1962 = vrsqrt.f32 %v577_v17  ;;  %v4059_v17 = vld [vmem:[#allocation25_spill] sm:$0xff] }
 0x1ac   :  { %v1963_v63 = vpop.eup %1962 }
 0x1ad   :  { %v579_v6 = vmul.f32 %v1964_v52, %v1963_v63 }
 0x1af   :  { %v3182_v23 = vrot.slane %v579_v6, %v582_v19  ;;  %v4057_v19 = vld [vmem:[#allocation15_spill] sm:$0xff] }
 0x1b1   :  { %v584_v8 = vmul.f32 %v3182_v23, %v4053_v10  ;;  %v585_v15 = vmul.f32 %v3182_v23, %v4054_v56  ;;  %v586_v58 = vmul.f32 %v3182_v23, %v4055_v0  ;;  %v587_v63 = vmul.f32 %v3182_v23, %v4056_v57 }
 0x1b2   :  { %v588_v25 = vmul.f32 %v3182_v23, %v4057_v19  ;;  %v589_v2 = vmul.f32 %v3182_v23, %v4058_v16  ;;  %v590_v62 = vmul.f32 %v3182_v23, %v4059_v17  ;;  %v591_v51 = vmul.f32 %v3182_v23, %v4060_v45 }
 0x1b3   :  { %v679_v52 = vadd.f32 %v3184_v9, %v584_v8  ;;  %v680_v6 = vadd.f32 %v3184_v9, %v585_v15  ;;  %v681_v10 = vadd.f32 %v3184_v9, %v586_v58  ;;  %v682_v56 = vadd.f32 %v3184_v9, %v587_v63 }
 0x1b4   :  { %v683_v0 = vadd.f32 %v3184_v9, %v588_v25  ;;  %v684_v57 = vadd.f32 %v3184_v9, %v589_v2  ;;  %v685_v19 = vadd.f32 %v3184_v9, %v590_v62  ;;  %v686_v16 = vadd.f32 %v3184_v9, %v591_v51 }
 0x1b5   :  { %v770_v17 = vmax.f32 %v679_v52, 0.0  ;;  %v771_v18 = vmax.f32 %v680_v6, 0.0  ;;  %v772_v31 = vmax.f32 %v681_v10, 0.0  ;;  %v773_v45 = vmax.f32 %v682_v56, 0.0 }
 0x1b6   :  { %v774_v11 = vmax.f32 %v683_v0, 0.0  ;;  %v775_v8 = vmax.f32 %v684_v57, 0.0  ;;  %v776_v7 = vmax.f32 %v685_v19, 0.0  ;;  %v777_v15 = vmax.f32 %v686_v16, 0.0 }
 0x1b7   :  { %v865_v58 = vmul.f32 %v3186_v30, %v770_v17  ;;  %v866_v63 = vmul.f32 %v3186_v30, %v771_v18  ;;  %v867_v25 = vmul.f32 %v3186_v30, %v772_v31  ;;  %v868_v2 = vmul.f32 %v3186_v30, %v773_v45  ;;  %v4061_v17 = vld [vmem:[#allocation33_spill] sm:$0xff] }
 0x1b8   :  { %v869_v62 = vmul.f32 %v3186_v30, %v774_v11  ;;  %v870_v51 = vmul.f32 %v3186_v30, %v775_v8  ;;  %v871_v52 = vmul.f32 %v3186_v30, %v776_v7  ;;  %v872_v6 = vmul.f32 %v3186_v30, %v777_v15  ;;  %v4062_v8 = vld [vmem:[#allocation34_spill] sm:$0xff] }
 0x1b9   :  { %v960_v10 = vadd.f32 %v3188_v55, %v865_v58  ;;  %v961_v56 = vadd.f32 %v3188_v55, %v866_v63  ;;  %v962_v0 = vadd.f32 %v3188_v55, %v867_v25  ;;  %v963_v18 = vadd.f32 %v3188_v55, %v868_v2  ;;  %v4063_v25 = vld [vmem:[#allocation35_spill] sm:$0xff] }
 0x1ba   :  { %v964_v31 = vadd.f32 %v3188_v55, %v869_v62  ;;  %v965_v57 = vadd.f32 %v3188_v55, %v870_v51  ;;  %v966_v11 = vadd.f32 %v3188_v55, %v871_v52  ;;  %v967_v19 = vadd.f32 %v3188_v55, %v872_v6  ;;  %v4064_v62 = vld [vmem:[#allocation36_spill] sm:$0xff] }
 0x1bb   :  { %v1696_v16 = vpack.c.bf16 %v961_v56, %v960_v10  ;;  %v1701_v7 = vpack.c.bf16 %v963_v18, %v962_v0  ;;  %v592_v45 = vmul.f32 %v3182_v23, %v4061_v17  ;;  %v593_v15 = vmul.f32 %v3182_v23, %v4062_v8  ;;  %v4065_v10 = vld [vmem:[#allocation37_spill] sm:$0xff]  ;;  %v4066_v0 = vld [vmem:[#allocation38_spill] sm:$0xff] }
 0x1bc   :  { %v1706_v58 = vpack.c.bf16 %v965_v57, %v964_v31  ;;  %v1711_v63 = vpack.c.bf16 %v967_v19, %v966_v11  ;;  %v594_v2 = vmul.f32 %v3182_v23, %v4063_v25  ;;  %v595_v51 = vmul.f32 %v3182_v23, %v4064_v62  ;;  %v4067_v11 = vld [vmem:[#allocation39_spill] sm:$0xff] }
 0x1bd   :  { %1697 = vst [vmem:[%s3785_s2] sm:$0xff] %v1696_v16   ;;  %1918 = vst [vmem:[%s3785_s2 + $0x8] sm:$0xff] %v1701_v7   ;;  %v687_v52 = vadd.f32 %v3184_v9, %v592_v45  ;;  %v688_v6 = vadd.f32 %v3184_v9, %v593_v15  ;;  %v596_v56 = vmul.f32 %v3182_v23, %v4065_v10  ;;  %v4068_v16 = vld [vmem:[#allocation40_spill] sm:$0xff] }
 0x1be   :  { %v597_v18 = vmul.f32 %v3182_v23, %v4066_v0  ;;  %1919 = vst [vmem:[%s3785_s2 + $0x10] sm:$0xff] %v1706_v58   ;;  %1920 = vst [vmem:[%s3785_s2 + $0x18] sm:$0xff] %v1711_v63   ;;  %v689_v31 = vadd.f32 %v3184_v9, %v594_v2  ;;  %v690_v57 = vadd.f32 %v3184_v9, %v595_v51 }
 0x1bf   :  { %v598_v19 = vmul.f32 %v3182_v23, %v4067_v11  ;;  %v599_v7 = vmul.f32 %v3182_v23, %v4068_v16  ;;  %v778_v17 = vmax.f32 %v687_v52, 0.0  ;;  %v779_v45 = vmax.f32 %v688_v6, 0.0 }
 0x1c0   :  { %v691_v8 = vadd.f32 %v3184_v9, %v596_v56  ;;  %v692_v15 = vadd.f32 %v3184_v9, %v597_v18  ;;  %v780_v58 = vmax.f32 %v689_v31, 0.0  ;;  %v781_v25 = vmax.f32 %v690_v57, 0.0 }
 0x1c1   :  { %v693_v63 = vadd.f32 %v3184_v9, %v598_v19  ;;  %v694_v2 = vadd.f32 %v3184_v9, %v599_v7  ;;  %v873_v62 = vmul.f32 %v3186_v30, %v778_v17  ;;  %v874_v51 = vmul.f32 %v3186_v30, %v779_v45 }
 0x1c2   :  { %v782_v10 = vmax.f32 %v691_v8, 0.0  ;;  %v783_v0 = vmax.f32 %v692_v15, 0.0  ;;  %v875_v11 = vmul.f32 %v3186_v30, %v780_v58  ;;  %v876_v52 = vmul.f32 %v3186_v30, %v781_v25  ;;  %v4069_v25 = vld [vmem:[#allocation41_spill] sm:$0xff] }
 0x1c3   :  { %v784_v6 = vmax.f32 %v693_v63, 0.0  ;;  %v785_v56 = vmax.f32 %v694_v2, 0.0  ;;  %v968_v18 = vadd.f32 %v3188_v55, %v873_v62  ;;  %v969_v31 = vadd.f32 %v3188_v55, %v874_v51 }
 0x1c4   :  { %v877_v57 = vmul.f32 %v3186_v30, %v782_v10  ;;  %v878_v19 = vmul.f32 %v3186_v30, %v783_v0  ;;  %v970_v16 = vadd.f32 %v3188_v55, %v875_v11  ;;  %v971_v7 = vadd.f32 %v3188_v55, %v876_v52  ;;  %v4070_v10 = vld [vmem:[#allocation42_spill] sm:$0xff] }
 0x1c5   :  { %v879_v17 = vmul.f32 %v3186_v30, %v784_v6  ;;  %v880_v45 = vmul.f32 %v3186_v30, %v785_v56  ;;  %v1716_v8 = vpack.c.bf16 %v969_v31, %v968_v18  ;;  %v600_v63 = vmul.f32 %v3182_v23, %v4069_v25  ;;  %v4071_v6 = vld [vmem:[#allocation43_spill] sm:$0xff]  ;;  %v4072_v18 = vld [vmem:[#allocation44_spill] sm:$0xff] }
 0x1c6   :  { %v972_v15 = vadd.f32 %v3188_v55, %v877_v57  ;;  %v973_v58 = vadd.f32 %v3188_v55, %v878_v19  ;;  %v1721_v2 = vpack.c.bf16 %v971_v7, %v970_v16  ;;  %v601_v0 = vmul.f32 %v3182_v23, %v4070_v10  ;;  %v4073_v16 = vld [vmem:[#allocation45_spill] sm:$0xff]  ;;  %v4075_v25 = vld [vmem:[#allocation47_spill] sm:$0xff]  ;;  %v4076_v10 = vld [vmem:[#allocation48_spill] sm:$0xff] }
 0x1c7   :  { %v974_v62 = vadd.f32 %v3188_v55, %v879_v17  ;;  %v975_v51 = vadd.f32 %v3188_v55, %v880_v45  ;;  %1921 = vst [vmem:[%s3785_s2 + $0x20] sm:$0xff] %v1716_v8   ;;  %v695_v52 = vadd.f32 %v3184_v9, %v600_v63  ;;  %v602_v56 = vmul.f32 %v3182_v23, %v4071_v6  ;;  %v4074_v17 = vld [vmem:[#allocation46_spill] sm:$0xff] }
 0x1c8   :  { %v1726_v11 = vpack.c.bf16 %v973_v58, %v972_v15  ;;  %v603_v31 = vmul.f32 %v3182_v23, %v4072_v18  ;;  %1922 = vst [vmem:[%s3785_s2 + $0x28] sm:$0xff] %v1721_v2   ;;  %v696_v19 = vadd.f32 %v3184_v9, %v601_v0  ;;  %v604_v7 = vmul.f32 %v3182_v23, %v4073_v16 }
 0x1c9   :  { %v1731_v57 = vpack.c.bf16 %v975_v51, %v974_v62  ;;  %v605_v45 = vmul.f32 %v3182_v23, %v4074_v17  ;;  %v786_v8 = vmax.f32 %v695_v52, 0.0  ;;  %v697_v15 = vadd.f32 %v3184_v9, %v602_v56 }
 0x1ca   :  { %1923 = vst [vmem:[%s3785_s2 + $0x30] sm:$0xff] %v1726_v11   ;;  %v698_v58 = vadd.f32 %v3184_v9, %v603_v31  ;;  %v606_v63 = vmul.f32 %v3182_v23, %v4075_v25  ;;  %v787_v2 = vmax.f32 %v696_v19, 0.0  ;;  %v699_v62 = vadd.f32 %v3184_v9, %v604_v7 }
 0x1cb   :  { %1924 = vst [vmem:[%s3785_s2 + $0x38] sm:$0xff] %v1731_v57   ;;  %v700_v51 = vadd.f32 %v3184_v9, %v605_v45  ;;  %v607_v0 = vmul.f32 %v3182_v23, %v4076_v10  ;;  %v881_v11 = vmul.f32 %v3186_v30, %v786_v8  ;;  %v788_v52 = vmax.f32 %v697_v15, 0.0 }
 0x1cc   :  { %v789_v6 = vmax.f32 %v698_v58, 0.0  ;;  %v701_v56 = vadd.f32 %v3184_v9, %v606_v63  ;;  %v882_v18 = vmul.f32 %v3186_v30, %v787_v2  ;;  %v790_v31 = vmax.f32 %v699_v62, 0.0 }
 0x1cd   :  { %v791_v16 = vmax.f32 %v700_v51, 0.0  ;;  %v702_v57 = vadd.f32 %v3184_v9, %v607_v0  ;;  %v976_v19 = vadd.f32 %v3188_v55, %v881_v11  ;;  %v883_v7 = vmul.f32 %v3186_v30, %v788_v52 }
 0x1ce   :  { %v884_v17 = vmul.f32 %v3186_v30, %v789_v6  ;;  %v792_v45 = vmax.f32 %v701_v56, 0.0  ;;  %v977_v25 = vadd.f32 %v3188_v55, %v882_v18  ;;  %v885_v8 = vmul.f32 %v3186_v30, %v790_v31 }
 0x1cf   :  { %v886_v15 = vmul.f32 %v3186_v30, %v791_v16  ;;  %v793_v58 = vmax.f32 %v702_v57, 0.0  ;;  %v978_v63 = vadd.f32 %v3188_v55, %v883_v7  ;;  %v608_v51 = vmul.f32 %v3182_v23, %v2830_v61 }
 0x1d0   :  { %v979_v2 = vadd.f32 %v3188_v55, %v884_v17  ;;  %v887_v62 = vmul.f32 %v3186_v30, %v792_v45  ;;  %v1736_v10 = vpack.c.bf16 %v977_v25, %v976_v19  ;;  %v980_v0 = vadd.f32 %v3188_v55, %v885_v8 }
 0x1d1   :  { %v981_v11 = vadd.f32 %v3188_v55, %v886_v15  ;;  %v888_v52 = vmul.f32 %v3186_v30, %v793_v58  ;;  %v609_v18 = vmul.f32 %v3182_v23, %v2836_v53  ;;  %v703_v31 = vadd.f32 %v3184_v9, %v608_v51 }
 0x1d2   :  { %v1741_v6 = vpack.c.bf16 %v979_v2, %v978_v63  ;;  %v982_v56 = vadd.f32 %v3188_v55, %v887_v62  ;;  %1925 = vst [vmem:[%s3785_s2 + $0x40] sm:$0xff] %v1736_v10   ;;  %v610_v57 = vmul.f32 %v3182_v23, %v2842_v5  ;;  %v611_v19 = vmul.f32 %v3182_v23, %v2848_v3 }
 0x1d3   :  { %v1746_v61 = vpack.c.bf16 %v981_v11, %v980_v0  ;;  %v983_v16 = vadd.f32 %v3188_v55, %v888_v52  ;;  %v704_v53 = vadd.f32 %v3184_v9, %v609_v18  ;;  %v794_v7 = vmax.f32 %v703_v31, 0.0 }
 0x1d4   :  { %1926 = vst [vmem:[%s3785_s2 + $0x48] sm:$0xff] %v1741_v6   ;;  %v612_v17 = vmul.f32 %v3182_v23, %v2854_v46  ;;  %v613_v45 = vmul.f32 %v3182_v23, %v2860_v24  ;;  %v705_v3 = vadd.f32 %v3184_v9, %v610_v57  ;;  %v706_v25 = vadd.f32 %v3184_v9, %v611_v19 }
 0x1d5   :  { %1927 = vst [vmem:[%s3785_s2 + $0x50] sm:$0xff] %v1746_v61   ;;  %v1751_v5 = vpack.c.bf16 %v983_v16, %v982_v56  ;;  %v614_v8 = vmul.f32 %v3182_v23, %v2866_v20  ;;  %v795_v15 = vmax.f32 %v704_v53, 0.0  ;;  %v889_v58 = vmul.f32 %v3186_v30, %v794_v7 }
 0x1d6   :  { %v707_v46 = vadd.f32 %v3184_v9, %v612_v17  ;;  %v708_v63 = vadd.f32 %v3184_v9, %v613_v45  ;;  %v796_v24 = vmax.f32 %v705_v3, 0.0  ;;  %v797_v2 = vmax.f32 %v706_v25, 0.0 }
 0x1d7   :  { %1928 = vst [vmem:[%s3785_s2 + $0x58] sm:$0xff] %v1751_v5   ;;  %v615_v62 = vmul.f32 %v3182_v23, %v2872_v26  ;;  %v709_v51 = vadd.f32 %v3184_v9, %v614_v8  ;;  %v890_v20 = vmul.f32 %v3186_v30, %v795_v15  ;;  %v984_v10 = vadd.f32 %v3188_v55, %v889_v58 }
 0x1d8   :  { %v798_v0 = vmax.f32 %v707_v46, 0.0  ;;  %v799_v11 = vmax.f32 %v708_v63, 0.0  ;;  %v891_v52 = vmul.f32 %v3186_v30, %v796_v24  ;;  %v892_v6 = vmul.f32 %v3186_v30, %v797_v2 }
 0x1d9   :  { %v710_v56 = vadd.f32 %v3184_v9, %v615_v62  ;;  %v800_v18 = vmax.f32 %v709_v51, 0.0  ;;  %v985_v31 = vadd.f32 %v3188_v55, %v890_v20  ;;  %v616_v16 = vmul.f32 %v3182_v23, %v2878_v22 }
 0x1da   :  { %v893_v61 = vmul.f32 %v3186_v30, %v798_v0  ;;  %v894_v26 = vmul.f32 %v3186_v30, %v799_v11  ;;  %v986_v57 = vadd.f32 %v3188_v55, %v891_v52  ;;  %v987_v19 = vadd.f32 %v3188_v55, %v892_v6 }
 0x1db   :  { %v801_v53 = vmax.f32 %v710_v56, 0.0  ;;  %v895_v7 = vmul.f32 %v3186_v30, %v800_v18  ;;  %v1756_v17 = vpack.c.bf16 %v985_v31, %v984_v10  ;;  %v617_v3 = vmul.f32 %v3182_v23, %v2884_v32 }
 0x1dc   :  { %v988_v45 = vadd.f32 %v3188_v55, %v893_v61  ;;  %v989_v5 = vadd.f32 %v3188_v55, %v894_v26  ;;  %v1761_v25 = vpack.c.bf16 %v987_v19, %v986_v57  ;;  %v711_v15 = vadd.f32 %v3184_v9, %v616_v16 }
 0x1dd   :  { %v896_v8 = vmul.f32 %v3186_v30, %v801_v53  ;;  %v990_v22 = vadd.f32 %v3188_v55, %v895_v7  ;;  %1929 = vst [vmem:[%s3785_s2 + $0x60] sm:$0xff] %v1756_v17   ;;  %v712_v46 = vadd.f32 %v3184_v9, %v617_v3  ;;  %v618_v63 = vmul.f32 %v3182_v23, %v2890_v21 }
 0x1de   :  { %v1766_v58 = vpack.c.bf16 %v989_v5, %v988_v45  ;;  %v619_v32 = vmul.f32 %v3182_v23, %v2896_v1  ;;  %1930 = vst [vmem:[%s3785_s2 + $0x68] sm:$0xff] %v1761_v25   ;;  %v802_v2 = vmax.f32 %v711_v15, 0.0  ;;  %v620_v62 = vmul.f32 %v3182_v23, %v2902_v37 }
 0x1df   :  { %v991_v24 = vadd.f32 %v3188_v55, %v896_v8  ;;  %v621_v51 = vmul.f32 %v3182_v23, %v2908_v12  ;;  %v803_v21 = vmax.f32 %v712_v46, 0.0  ;;  %v713_v1 = vadd.f32 %v3184_v9, %v618_v63 }
 0x1e0   :  { %1931 = vst [vmem:[%s3785_s2 + $0x70] sm:$0xff] %v1766_v58   ;;  %v714_v20 = vadd.f32 %v3184_v9, %v619_v32  ;;  %v622_v10 = vmul.f32 %v3182_v23, %v2914_v14  ;;  %v897_v11 = vmul.f32 %v3186_v30, %v802_v2  ;;  %v715_v37 = vadd.f32 %v3184_v9, %v620_v62 }
 0x1e1   :  { %v1771_v0 = vpack.c.bf16 %v991_v24, %v990_v22  ;;  %v716_v52 = vadd.f32 %v3184_v9, %v621_v51  ;;  %v898_v12 = vmul.f32 %v3186_v30, %v803_v21  ;;  %v804_v6 = vmax.f32 %v713_v1, 0.0 }
 0x1e2   :  { %v805_v56 = vmax.f32 %v714_v20, 0.0  ;;  %v623_v18 = vmul.f32 %v3182_v23, %v2920_v4  ;;  %v992_v14 = vadd.f32 %v3188_v55, %v897_v11  ;;  %v806_v31 = vmax.f32 %v715_v37, 0.0 }
 0x1e3   :  { %1932 = vst [vmem:[%s3785_s2 + $0x78] sm:$0xff] %v1771_v0   ;;  %v807_v61 = vmax.f32 %v716_v52, 0.0  ;;  %v717_v26 = vadd.f32 %v3184_v9, %v622_v10  ;;  %v993_v16 = vadd.f32 %v3188_v55, %v898_v12  ;;  %v899_v57 = vmul.f32 %v3186_v30, %v804_v6 }
 0x1e4   :  { %v900_v19 = vmul.f32 %v3186_v30, %v805_v56  ;;  %v718_v53 = vadd.f32 %v3184_v9, %v623_v18  ;;  %v901_v4 = vmul.f32 %v3186_v30, %v806_v31  ;;  %v624_v45 = vmul.f32 %v3182_v23, %v2926_v39 }
 0x1e5   :  { %v902_v7 = vmul.f32 %v3186_v30, %v807_v61  ;;  %v808_v17 = vmax.f32 %v717_v26, 0.0  ;;  %v1776_v5 = vpack.c.bf16 %v993_v16, %v992_v14  ;;  %v994_v3 = vadd.f32 %v3188_v55, %v899_v57 }
 0x1e6   :  { %v995_v25 = vadd.f32 %v3188_v55, %v900_v19  ;;  %v809_v8 = vmax.f32 %v718_v53, 0.0  ;;  %v996_v22 = vadd.f32 %v3188_v55, %v901_v4  ;;  %v625_v46 = vmul.f32 %v3182_v23, %v2932_v13 }
 0x1e7   :  { %v997_v15 = vadd.f32 %v3188_v55, %v902_v7  ;;  %v903_v58 = vmul.f32 %v3186_v30, %v808_v17  ;;  %1933 = vst [vmem:[%s3785_s2 + $0x80] sm:$0xff] %v1776_v5   ;;  %v719_v32 = vadd.f32 %v3184_v9, %v624_v45  ;;  %v626_v24 = vmul.f32 %v3182_v23, %v2938_v59 }
 0x1e8   :  { %v1781_v39 = vpack.c.bf16 %v995_v25, %v994_v3  ;;  %v904_v63 = vmul.f32 %v3186_v30, %v809_v8  ;;  %v720_v51 = vadd.f32 %v3184_v9, %v625_v46  ;;  %v627_v13 = vmul.f32 %v3182_v23, %v2944_v44 }
 0x1e9   :  { %v1786_v2 = vpack.c.bf16 %v997_v15, %v996_v22  ;;  %v998_v62 = vadd.f32 %v3188_v55, %v903_v58  ;;  %v810_v1 = vmax.f32 %v719_v32, 0.0  ;;  %v721_v20 = vadd.f32 %v3184_v9, %v626_v24 }
 0x1ea   :  { %1934 = vst [vmem:[%s3785_s2 + $0x88] sm:$0xff] %v1781_v39   ;;  %v999_v21 = vadd.f32 %v3188_v55, %v904_v63  ;;  %v628_v59 = vmul.f32 %v3182_v23, %v2950_v60  ;;  %v811_v10 = vmax.f32 %v720_v51, 0.0  ;;  %v722_v0 = vadd.f32 %v3184_v9, %v627_v13 }
 0x1eb   :  { %1935 = vst [vmem:[%s3785_s2 + $0x90] sm:$0xff] %v1786_v2   ;;  %v629_v44 = vmul.f32 %v3182_v23, %v2956_v27  ;;  %v630_v11 = vmul.f32 %v3182_v23, %v2962_v28  ;;  %v905_v52 = vmul.f32 %v3186_v30, %v810_v1  ;;  %v812_v12 = vmax.f32 %v721_v20, 0.0 }
 0x1ec   :  { %v1791_v37 = vpack.c.bf16 %v999_v21, %v998_v62  ;;  %v723_v6 = vadd.f32 %v3184_v9, %v628_v59  ;;  %v906_v60 = vmul.f32 %v3186_v30, %v811_v10  ;;  %v813_v56 = vmax.f32 %v722_v0, 0.0 }
 0x1ed   :  { %v724_v18 = vadd.f32 %v3184_v9, %v629_v44  ;;  %v631_v14 = vmul.f32 %v3182_v23, %v2968_v29  ;;  %v1000_v27 = vadd.f32 %v3188_v55, %v905_v52  ;;  %v907_v28 = vmul.f32 %v3186_v30, %v812_v12 }
 0x1ee   :  { %1936 = vst [vmem:[%s3785_s2 + $0x98] sm:$0xff] %v1791_v37   ;;  %v814_v31 = vmax.f32 %v723_v6, 0.0  ;;  %v725_v61 = vadd.f32 %v3184_v9, %v630_v11  ;;  %v1001_v26 = vadd.f32 %v3188_v55, %v906_v60  ;;  %v908_v16 = vmul.f32 %v3186_v30, %v813_v56 }
 0x1ef   :  { %v815_v57 = vmax.f32 %v724_v18, 0.0  ;;  %v726_v19 = vadd.f32 %v3184_v9, %v631_v14  ;;  %v1002_v29 = vadd.f32 %v3188_v55, %v907_v28  ;;  %v632_v7 = vmul.f32 %v3182_v23, %v2974_v33 }
 0x1f0   :  { %v909_v53 = vmul.f32 %v3186_v30, %v814_v31  ;;  %v816_v4 = vmax.f32 %v725_v61, 0.0  ;;  %v1796_v17 = vpack.c.bf16 %v1001_v26, %v1000_v27  ;;  %v1003_v45 = vadd.f32 %v3188_v55, %v908_v16 }
 0x1f1   :  { %v910_v5 = vmul.f32 %v3186_v30, %v815_v57  ;;  %v817_v3 = vmax.f32 %v726_v19, 0.0  ;;  %v633_v22 = vmul.f32 %v3182_v23, %v2980_v34  ;;  %v727_v15 = vadd.f32 %v3184_v9, %v632_v7 }
 0x1f2   :  { %v1004_v25 = vadd.f32 %v3188_v55, %v909_v53  ;;  %v911_v8 = vmul.f32 %v3186_v30, %v816_v4  ;;  %1937 = vst [vmem:[%s3785_s2 + $0xa0] sm:$0xff] %v1796_v17   ;;  %v1801_v33 = vpack.c.bf16 %v1003_v45, %v1002_v29  ;;  %v634_v39 = vmul.f32 %v3182_v23, %v2986_v35  ;;  %v4077_v17 = vld [vmem:[#allocation49_spill] sm:$0xff] }
 0x1f3   :  { %v1005_v58 = vadd.f32 %v3188_v55, %v910_v5  ;;  %v912_v46 = vmul.f32 %v3186_v30, %v817_v3  ;;  %v728_v32 = vadd.f32 %v3184_v9, %v633_v22  ;;  %v818_v24 = vmax.f32 %v727_v15, 0.0 }
 0x1f4   :  { %v1006_v63 = vadd.f32 %v3188_v55, %v911_v8  ;;  %v635_v34 = vmul.f32 %v3182_v23, %v2992_v36  ;;  %1938 = vst [vmem:[%s3785_s2 + $0xa8] sm:$0xff] %v1801_v33   ;;  %v729_v51 = vadd.f32 %v3184_v9, %v634_v39  ;;  %v636_v35 = vmul.f32 %v3182_v23, %v2998_v40 }
 0x1f5   :  { %v1806_v2 = vpack.c.bf16 %v1005_v58, %v1004_v25  ;;  %v1007_v62 = vadd.f32 %v3188_v55, %v912_v46  ;;  %v819_v13 = vmax.f32 %v728_v32, 0.0  ;;  %v913_v21 = vmul.f32 %v3186_v30, %v818_v24  ;;  %v4078_v25 = vld [vmem:[#allocation50_spill] sm:$0xff]  ;;  %v4079_v58 = vld [vmem:[#allocation51_spill] sm:$0xff]  ;;  %v4080_v24 = vld [vmem:[#allocation52_spill] sm:$0xff] }
 0x1f6   :  { %v730_v1 = vadd.f32 %v3184_v9, %v635_v34  ;;  %v637_v36 = vmul.f32 %v3182_v23, %v3004_v41  ;;  %v820_v59 = vmax.f32 %v729_v51, 0.0  ;;  %v731_v10 = vadd.f32 %v3184_v9, %v636_v35  ;;  %v4081_v35 = vld [vmem:[#allocation53_spill] sm:$0xff] }
 0x1f7   :  { %1939 = vst [vmem:[%s3785_s2 + $0xb0] sm:$0xff] %v1806_v2   ;;  %v1811_v20 = vpack.c.bf16 %v1007_v62, %v1006_v63  ;;  %v638_v0 = vmul.f32 %v3182_v23, %v3010_v42  ;;  %v914_v40 = vmul.f32 %v3186_v30, %v819_v13  ;;  %v1008_v44 = vadd.f32 %v3188_v55, %v913_v21 }
 0x1f8   :  { %v821_v11 = vmax.f32 %v730_v1, 0.0  ;;  %v732_v37 = vadd.f32 %v3184_v9, %v637_v36  ;;  %v915_v41 = vmul.f32 %v3186_v30, %v820_v59  ;;  %v822_v52 = vmax.f32 %v731_v10, 0.0 }
 0x1f9   :  { %1940 = vst [vmem:[%s3785_s2 + $0xb8] sm:$0xff] %v1811_v20   ;;  %v639_v12 = vmul.f32 %v3182_v23, %v3016_v43  ;;  %v733_v6 = vadd.f32 %v3184_v9, %v638_v0  ;;  %v1009_v42 = vadd.f32 %v3188_v55, %v914_v40  ;;  %v640_v18 = vmul.f32 %v3182_v23, %v3022_v47  ;;  %v4082_v40 = vld [vmem:[#allocation7_spill] sm:$0xff] }
 0x1fa   :  { %v916_v60 = vmul.f32 %v3186_v30, %v821_v11  ;;  %v823_v56 = vmax.f32 %v732_v37, 0.0  ;;  %v1010_v14 = vadd.f32 %v3188_v55, %v915_v41  ;;  %v917_v27 = vmul.f32 %v3186_v30, %v822_v52  ;;  %v4083_v52 = vld [vmem:[#allocation8_spill] sm:$0xff] }
 0x1fb   :  { %v734_v28 = vadd.f32 %v3184_v9, %v639_v12  ;;  %v824_v31 = vmax.f32 %v733_v6, 0.0  ;;  %v1816_v61 = vpack.c.bf16 %v1009_v42, %v1008_v44  ;;  %v641_v16 = vmul.f32 %v3182_v23, %v3028_v48 }
 0x1fc   :  { %v1011_v43 = vadd.f32 %v3188_v55, %v916_v60  ;;  %v918_v26 = vmul.f32 %v3186_v30, %v823_v56  ;;  %v1012_v57 = vadd.f32 %v3188_v55, %v917_v27  ;;  %v735_v29 = vadd.f32 %v3184_v9, %v640_v18 }
 0x1fd   :  { %v825_v19 = vmax.f32 %v734_v28, 0.0  ;;  %v919_v47 = vmul.f32 %v3186_v30, %v824_v31  ;;  %1941 = vst [vmem:[%s3785_s2 + $0xc0] sm:$0xff] %v1816_v61   ;;  %v736_v7 = vadd.f32 %v3184_v9, %v641_v16  ;;  %v642_v45 = vmul.f32 %v3182_v23, %v4077_v17  ;;  %v4084_v28 = vld [vmem:[#allocation9_spill] sm:$0xff]  ;;  %v4085_v16 = vld [vmem:[#allocation10_spill] sm:$0xff]  ;;  %v4086_v17 = vld [vmem:[#allocation11_spill] sm:$0xff] }
 0x1fe   :  { %v1821_v53 = vpack.c.bf16 %v1011_v43, %v1010_v14  ;;  %v1013_v4 = vadd.f32 %v3188_v55, %v918_v26  ;;  %v826_v3 = vmax.f32 %v735_v29, 0.0  ;;  %v643_v8 = vmul.f32 %v3182_v23, %v4078_v25 }
 0x1ff   :  { %v920_v48 = vmul.f32 %v3186_v30, %v825_v19  ;;  %v1014_v5 = vadd.f32 %v3188_v55, %v919_v47  ;;  %v827_v15 = vmax.f32 %v736_v7, 0.0  ;;  %v737_v33 = vadd.f32 %v3184_v9, %v642_v45 }
 0x200   :  { %1942 = vst [vmem:[%s3785_s2 + $0xc8] sm:$0xff] %v1821_v53   ;;  %v1826_v22 = vpack.c.bf16 %v1013_v4, %v1012_v57  ;;  %v644_v46 = vmul.f32 %v3182_v23, %v4079_v58  ;;  %v921_v63 = vmul.f32 %v3186_v30, %v826_v3  ;;  %v738_v32 = vadd.f32 %v3184_v9, %v643_v8  ;;  %v4087_v8 = vld [vmem:[#allocation12_spill] sm:$0xff] }
 0x201   :  { %v1015_v39 = vadd.f32 %v3188_v55, %v920_v48  ;;  %v645_v34 = vmul.f32 %v3182_v23, %v4080_v24  ;;  %v922_v2 = vmul.f32 %v3186_v30, %v827_v15  ;;  %v828_v62 = vmax.f32 %v737_v33, 0.0 }
 0x202   :  { %1943 = vst [vmem:[%s3785_s2 + $0xd0] sm:$0xff] %v1826_v22   ;;  %v739_v51 = vadd.f32 %v3184_v9, %v644_v46  ;;  %v646_v13 = vmul.f32 %v3182_v23, %v4081_v35  ;;  %v1016_v1 = vadd.f32 %v3188_v55, %v921_v63  ;;  %v829_v36 = vmax.f32 %v738_v32, 0.0  ;;  %v4088_v63 = vld [vmem:[#allocation13_spill] sm:$0xff] }
 0x203   :  { %v1831_v21 = vpack.c.bf16 %v1015_v39, %v1014_v5  ;;  %v740_v20 = vadd.f32 %v3184_v9, %v645_v34  ;;  %v1017_v59 = vadd.f32 %v3188_v55, %v922_v2  ;;  %v923_v10 = vmul.f32 %v3186_v30, %v828_v62 }
 0x204   :  { %v830_v0 = vmax.f32 %v739_v51, 0.0  ;;  %v647_v44 = vmul.f32 %v3182_v23, %v4082_v40  ;;  %v924_v11 = vmul.f32 %v3186_v30, %v829_v36  ;;  %v741_v41 = vadd.f32 %v3184_v9, %v646_v13  ;;  %v4089_v36 = vld [vmem:[#allocation14_spill] sm:$0xff] }
 0x205   :  { %1944 = vst [vmem:[%s3785_s2 + $0xd8] sm:$0xff] %v1831_v21   ;;  %v831_v37 = vmax.f32 %v740_v20, 0.0  ;;  %v648_v12 = vmul.f32 %v3182_v23, %v4083_v52  ;;  %v1836_v6 = vpack.c.bf16 %v1017_v59, %v1016_v1  ;;  %v1018_v42 = vadd.f32 %v3188_v55, %v923_v10 }
 0x206   :  { %v925_v60 = vmul.f32 %v3186_v30, %v830_v0  ;;  %v742_v56 = vadd.f32 %v3184_v9, %v647_v44  ;;  %v1019_v18 = vadd.f32 %v3188_v55, %v924_v11  ;;  %v832_v27 = vmax.f32 %v741_v41, 0.0  ;;  %v4090_v0 = vld [vmem:[#allocation16_spill] sm:$0xff] }
 0x207   :  { %v926_v14 = vmul.f32 %v3186_v30, %v831_v37  ;;  %v649_v31 = vmul.f32 %v3182_v23, %v4084_v28  ;;  %1945 = vst [vmem:[%s3785_s2 + $0xe0] sm:$0xff] %v1836_v6   ;;  %v743_v26 = vadd.f32 %v3184_v9, %v648_v12  ;;  %v650_v57 = vmul.f32 %v3182_v23, %v4085_v16 }
 0x208   :  { %v1020_v61 = vadd.f32 %v3188_v55, %v925_v60  ;;  %v833_v43 = vmax.f32 %v742_v56, 0.0  ;;  %v1841_v19 = vpack.c.bf16 %v1019_v18, %v1018_v42  ;;  %v927_v29 = vmul.f32 %v3186_v30, %v832_v27 }
 0x209   :  { %v1021_v47 = vadd.f32 %v3188_v55, %v926_v14  ;;  %v744_v53 = vadd.f32 %v3184_v9, %v649_v31  ;;  %v834_v7 = vmax.f32 %v743_v26, 0.0  ;;  %v651_v45 = vmul.f32 %v3182_v23, %v4086_v17 }
 0x20a   :  { %v928_v4 = vmul.f32 %v3186_v30, %v833_v43  ;;  %v745_v48 = vadd.f32 %v3184_v9, %v650_v57  ;;  %1946 = vst [vmem:[%s3785_s2 + $0xe8] sm:$0xff] %v1841_v19   ;;  %v1022_v3 = vadd.f32 %v3188_v55, %v927_v29  ;;  %v652_v22 = vmul.f32 %v3182_v23, %v4087_v8 }
 0x20b   :  { %v1846_v5 = vpack.c.bf16 %v1021_v47, %v1020_v61  ;;  %v835_v25 = vmax.f32 %v744_v53, 0.0  ;;  %v929_v33 = vmul.f32 %v3186_v30, %v834_v7  ;;  %v746_v58 = vadd.f32 %v3184_v9, %v651_v45  ;;  %v4091_v47 = vld [vmem:[#allocation21_spill] sm:$0xff] }
 0x20c   :  { %v1023_v15 = vadd.f32 %v3188_v55, %v928_v4  ;;  %v836_v46 = vmax.f32 %v745_v48, 0.0  ;;  %v653_v32 = vmul.f32 %v3182_v23, %v4088_v63  ;;  %v747_v24 = vadd.f32 %v3184_v9, %v652_v22  ;;  %v4092_v48 = vld [vmem:[#allocation22_spill] sm:$0xff]  ;;  %v4094_v63 = vld [vmem:[#allocation24_spill] sm:$0xff] }
 0x20d   :  { %1947 = vst [vmem:[%s3785_s2 + $0xf0] sm:$0xff] %v1846_v5   ;;  %v930_v39 = vmul.f32 %v3186_v30, %v835_v25  ;;  %v654_v34 = vmul.f32 %v3182_v23, %v3106_v54  ;;  %v1024_v62 = vadd.f32 %v3188_v55, %v929_v33  ;;  %v837_v51 = vmax.f32 %v746_v58, 0.0 }
 0x20e   :  { %v1851_v2 = vpack.c.bf16 %v1023_v15, %v1022_v3  ;;  %v931_v35 = vmul.f32 %v3186_v30, %v836_v46  ;;  %v748_v21 = vadd.f32 %v3184_v9, %v653_v32  ;;  %v838_v1 = vmax.f32 %v747_v24, 0.0  ;;  %v4093_v15 = vld [vmem:[#allocation23_spill] sm:$0xff] }
 0x20f   :  { %v1025_v13 = vadd.f32 %v3188_v55, %v930_v39  ;;  %v655_v20 = vmul.f32 %v3182_v23, %v4089_v36  ;;  %v932_v54 = vmul.f32 %v3186_v30, %v837_v51  ;;  %v749_v10 = vadd.f32 %v3184_v9, %v654_v34 }
 0x210   :  { %1948 = vst [vmem:[%s3785_s2 + $0xf8] sm:$0xff] %v1851_v2   ;;  %v1026_v59 = vadd.f32 %v3188_v55, %v931_v35  ;;  %v656_v40 = vmul.f32 %v3182_v23, %v4090_v0  ;;  %v839_v11 = vmax.f32 %v748_v21, 0.0  ;;  %v933_v37 = vmul.f32 %v3186_v30, %v838_v1 }
 0x211   :  { %v1856_v44 = vpack.c.bf16 %v1025_v13, %v1024_v62  ;;  %v750_v41 = vadd.f32 %v3184_v9, %v655_v20  ;;  %v1027_v52 = vadd.f32 %v3188_v55, %v932_v54  ;;  %v840_v12 = vmax.f32 %v749_v10, 0.0  ;;  %v4095_v62 = vld [vmem:[#allocation26_spill] sm:$0xff]  ;;  %v4096_v54 = vld [vmem:[#allocation27_spill] sm:$0xff] }
 0x212   :  { %v657_v6 = vmul.f32 %v3182_v23, %v3124_v49  ;;  %v751_v42 = vadd.f32 %v3184_v9, %v656_v40  ;;  %v934_v60 = vmul.f32 %v3186_v30, %v839_v11  ;;  %v1028_v56 = vadd.f32 %v3188_v55, %v933_v37  ;;  %v4097_v11 = vld [vmem:[#allocation28_spill] sm:$0xff] }
 0x213   :  { %1949 = vst [vmem:[%s3785_s2 + $0x100] sm:$0xff] %v1856_v44   ;;  %v841_v18 = vmax.f32 %v750_v41, 0.0  ;;  %v658_v14 = vmul.f32 %v3182_v23, %v3130_v50  ;;  %v1861_v27 = vpack.c.bf16 %v1027_v52, %v1026_v59  ;;  %v935_v28 = vmul.f32 %v3186_v30, %v840_v12 }
 0x214   :  { %v752_v31 = vadd.f32 %v3184_v9, %v657_v6  ;;  %v842_v49 = vmax.f32 %v751_v42, 0.0  ;;  %v1029_v61 = vadd.f32 %v3188_v55, %v934_v60  ;;  %v659_v26 = vmul.f32 %v3182_v23, %v2630_v38 }
 0x215   :  { %v936_v43 = vmul.f32 %v3186_v30, %v841_v18  ;;  %v753_v16 = vadd.f32 %v3184_v9, %v658_v14  ;;  %1950 = vst [vmem:[%s3785_s2 + $0x108] sm:$0xff] %v1861_v27   ;;  %v1030_v50 = vadd.f32 %v3188_v55, %v935_v28  ;;  %v660_v29 = vmul.f32 %v3182_v23, %v4091_v47  ;;  %v4100_v47 = vld [vmem:[#allocation54_spill] sm:$0xff] }
 0x216   :  { %v843_v57 = vmax.f32 %v752_v31, 0.0  ;;  %v937_v19 = vmul.f32 %v3186_v30, %v842_v49  ;;  %v1866_v53 = vpack.c.bf16 %v1029_v61, %v1028_v56  ;;  %v754_v7 = vadd.f32 %v3184_v9, %v659_v26  ;;  %v4098_v56 = vld [vmem:[#allocation29_spill] sm:$0xff]  ;;  %v4099_v49 = vld [vmem:[#allocation30_spill] sm:$0xff] }
 0x217   :  { %v1031_v4 = vadd.f32 %v3188_v55, %v936_v43  ;;  %v844_v38 = vmax.f32 %v753_v16, 0.0  ;;  %v661_v5 = vmul.f32 %v3182_v23, %v4092_v48  ;;  %v755_v3 = vadd.f32 %v3184_v9, %v660_v29 }
 0x218   :  { %v938_v17 = vmul.f32 %v3186_v30, %v843_v57  ;;  %v1032_v45 = vadd.f32 %v3188_v55, %v937_v19  ;;  %1951 = vst [vmem:[%s3785_s2 + $0x110] sm:$0xff] %v1866_v53   ;;  %v845_v8 = vmax.f32 %v754_v7, 0.0  ;;  %v662_v33 = vmul.f32 %v3182_v23, %v4093_v15 }
 0x219   :  { %v1871_v25 = vpack.c.bf16 %v1031_v4, %v1030_v50  ;;  %v939_v22 = vmul.f32 %v3186_v30, %v844_v38  ;;  %v756_v46 = vadd.f32 %v3184_v9, %v661_v5  ;;  %v846_v39 = vmax.f32 %v755_v3, 0.0 }
 0x21a   :  { %v1033_v58 = vadd.f32 %v3188_v55, %v938_v17  ;;  %v663_v32 = vmul.f32 %v3182_v23, %v4094_v63  ;;  %v940_v24 = vmul.f32 %v3186_v30, %v845_v8  ;;  %v757_v2 = vadd.f32 %v3184_v9, %v662_v33  ;;  %v4101_v17 = vld [vmem:[#allocation55_spill] sm:$0xff] }
 0x21b   :  { %1952 = vst [vmem:[%s3785_s2 + $0x118] sm:$0xff] %v1871_v25   ;;  %v1034_v34 = vadd.f32 %v3188_v55, %v939_v22  ;;  %v664_v51 = vmul.f32 %v3182_v23, %v4095_v62  ;;  %v847_v13 = vmax.f32 %v756_v46, 0.0  ;;  %v941_v21 = vmul.f32 %v3186_v30, %v846_v39  ;;  %v4102_v25 = vld [vmem:[#allocation56_spill] sm:$0xff]  ;;  %v4104_v62 = vld [vmem:[#allocation58_spill] sm:$0xff] }
 0x21c   :  { %v1876_v35 = vpack.c.bf16 %v1033_v58, %v1032_v45  ;;  %v758_v1 = vadd.f32 %v3184_v9, %v663_v32  ;;  %v1035_v36 = vadd.f32 %v3188_v55, %v940_v24  ;;  %v848_v20 = vmax.f32 %v757_v2, 0.0  ;;  %v4103_v58 = vld [vmem:[#allocation57_spill] sm:$0xff] }
 0x21d   :  { %v665_v59 = vmul.f32 %v3182_v23, %v4096_v54  ;;  %v759_v10 = vadd.f32 %v3184_v9, %v664_v51  ;;  %v942_v0 = vmul.f32 %v3186_v30, %v847_v13  ;;  %v1036_v40 = vadd.f32 %v3188_v55, %v941_v21 }
 0x21e   :  { %1953 = vst [vmem:[%s3785_s2 + $0x120] sm:$0xff] %v1876_v35   ;;  %v849_v44 = vmax.f32 %v758_v1, 0.0  ;;  %v666_v37 = vmul.f32 %v3182_v23, %v4097_v11  ;;  %v1881_v41 = vpack.c.bf16 %v1035_v36, %v1034_v34  ;;  %v943_v52 = vmul.f32 %v3186_v30, %v848_v20  ;;  %v4105_v36 = vld [vmem:[#allocation17_spill] sm:$0xff] }
 0x21f   :  { %v760_v12 = vadd.f32 %v3184_v9, %v665_v59  ;;  %v850_v6 = vmax.f32 %v759_v10, 0.0  ;;  %v1037_v42 = vadd.f32 %v3188_v55, %v942_v0  ;;  %v667_v18 = vmul.f32 %v3182_v23, %v4098_v56 }
 0x220   :  { %v944_v60 = vmul.f32 %v3186_v30, %v849_v44  ;;  %v761_v14 = vadd.f32 %v3184_v9, %v666_v37  ;;  %1954 = vst [vmem:[%s3785_s2 + $0x128] sm:$0xff] %v1881_v41   ;;  %v1038_v27 = vadd.f32 %v3188_v55, %v943_v52  ;;  %v668_v61 = vmul.f32 %v3182_v23, %v4099_v49 }
 0x221   :  { %v851_v28 = vmax.f32 %v760_v12, 0.0  ;;  %v945_v31 = vmul.f32 %v3186_v30, %v850_v6  ;;  %v1886_v43 = vpack.c.bf16 %v1037_v42, %v1036_v40  ;;  %v762_v16 = vadd.f32 %v3184_v9, %v667_v18 }
 0x222   :  { %v1039_v26 = vadd.f32 %v3188_v55, %v944_v60  ;;  %v852_v50 = vmax.f32 %v761_v14, 0.0  ;;  %v669_v29 = vmul.f32 %v3182_v23, %v4100_v47  ;;  %v763_v53 = vadd.f32 %v3184_v9, %v668_v61 }
 0x223   :  { %v946_v57 = vmul.f32 %v3186_v30, %v851_v28  ;;  %v1040_v19 = vadd.f32 %v3188_v55, %v945_v31  ;;  %1955 = vst [vmem:[%s3785_s2 + $0x130] sm:$0xff] %v1886_v43   ;;  %v853_v7 = vmax.f32 %v762_v16, 0.0  ;;  %v670_v45 = vmul.f32 %v3182_v23, %v4101_v17 }
 0x224   :  { %v1891_v4 = vpack.c.bf16 %v1039_v26, %v1038_v27  ;;  %v947_v38 = vmul.f32 %v3186_v30, %v852_v50  ;;  %v764_v5 = vadd.f32 %v3184_v9, %v669_v29  ;;  %v854_v3 = vmax.f32 %v763_v53, 0.0 }
 0x225   :  { %v1041_v48 = vadd.f32 %v3188_v55, %v946_v57  ;;  %v671_v8 = vmul.f32 %v3182_v23, %v4102_v25  ;;  %v948_v22 = vmul.f32 %v3186_v30, %v853_v7  ;;  %v765_v33 = vadd.f32 %v3184_v9, %v670_v45 }
 0x226   :  { %1956 = vst [vmem:[%s3785_s2 + $0x138] sm:$0xff] %v1891_v4   ;;  %v1042_v15 = vadd.f32 %v3188_v55, %v947_v38  ;;  %v672_v46 = vmul.f32 %v3182_v23, %v4103_v58  ;;  %v855_v63 = vmax.f32 %v764_v5, 0.0  ;;  %v949_v32 = vmul.f32 %v3186_v30, %v854_v3 }
 0x227   :  { %v1896_v39 = vpack.c.bf16 %v1041_v48, %v1040_v19  ;;  %v766_v24 = vadd.f32 %v3184_v9, %v671_v8  ;;  %v1043_v34 = vadd.f32 %v3188_v55, %v948_v22  ;;  %v856_v2 = vmax.f32 %v765_v33, 0.0 }
 0x228   :  { %v673_v51 = vmul.f32 %v3182_v23, %v4104_v62  ;;  %v767_v35 = vadd.f32 %v3184_v9, %v672_v46  ;;  %v950_v13 = vmul.f32 %v3186_v30, %v855_v63  ;;  %v1044_v21 = vadd.f32 %v3188_v55, %v949_v32 }
 0x229   :  { %1957 = vst [vmem:[%s3785_s2 + $0x140] sm:$0xff] %v1896_v39   ;;  %v857_v1 = vmax.f32 %v766_v24, 0.0  ;;  %v674_v20 = vmul.f32 %v3182_v23, %v4105_v36  ;;  %v1901_v54 = vpack.c.bf16 %v1043_v34, %v1042_v15  ;;  %v951_v59 = vmul.f32 %v3186_v30, %v856_v2 }
 0x22a   :  { %v768_v10 = vadd.f32 %v3184_v9, %v673_v51  ;;  %v858_v0 = vmax.f32 %v767_v35, 0.0  ;;  %v1045_v40 = vadd.f32 %v3188_v55, %v950_v13 }
 0x22b   :  { %v952_v44 = vmul.f32 %v3186_v30, %v857_v1  ;;  %v769_v11 = vadd.f32 %v3184_v9, %v674_v20  ;;  %1958 = vst [vmem:[%s3785_s2 + $0x148] sm:$0xff] %v1901_v54   ;;  %v1046_v37 = vadd.f32 %v3188_v55, %v951_v59 }
 0x22c   :  { %v859_v41 = vmax.f32 %v768_v10, 0.0  ;;  %v953_v23 = vmul.f32 %v3186_v30, %v858_v0  ;;  %v1906_v52 = vpack.c.bf16 %v1045_v40, %v1044_v21 }
 0x22d   :  { %v1047_v12 = vadd.f32 %v3188_v55, %v952_v44  ;;  %v860_v6 = vmax.f32 %v769_v11, 0.0 }
 0x22e   :  { %v954_v42 = vmul.f32 %v3186_v30, %v859_v41  ;;  %v1048_v60 = vadd.f32 %v3188_v55, %v953_v23  ;;  %1959 = vst [vmem:[%s3785_s2 + $0x150] sm:$0xff] %v1906_v52  }
 0x22f   :  { %v1911_v9 = vpack.c.bf16 %v1047_v12, %v1046_v37  ;;  %v955_v56 = vmul.f32 %v3186_v30, %v860_v6 }
 0x230   :  { %v1049_v18 = vadd.f32 %v3188_v55, %v954_v42 }
 0x231   :  { %1960 = vst [vmem:[%s3785_s2 + $0x158] sm:$0xff] %v1911_v9   ;;  %v1050_v14 = vadd.f32 %v3188_v55, %v955_v56 }
 0x232   :  { %v1916_v27 = vpack.c.bf16 %v1049_v18, %v1048_v60 }
 0x233   :  { %v1692_v28 = vpack.c.bf16 %v1050_v14, %v1050_v14 }
 0x234   :  { %1961 = vst [vmem:[%s3785_s2 + $0x160] sm:$0xff] %v1916_v27  }
 0x235   :  { %1506 = vst [vmem:[%s3785_s2 + $0x168] sm:$0x1] %v1692_v28 }

// kernel: heatmap_decoder_forward.10
= control target key start
LH: loop header
LB: loop body
LE: loop exit
PB: predicated region body
PF: predicated region fallthrough
CT: control target
= control target key end

     0   :  { %s1672_s1 = inlined_call_operand.vmem [shape: bf16[128,128], index: 1, kind: input, shape index: {}]   ;;  %s1673_s0 = inlined_call_operand.vmem [shape: bf16[722,128], index: 0, kind: input, shape index: {}]   ;;  %s1674_s2 = inlined_call_operand.vmem [shape: f32[722,128], index: 2, kind: output, shape index: {}]  }
   0x1   :  { %v1168_v0 = vld [vmem:[%s1672_s1] sm:$0xff]   ;;  %v1169_v1 = vld [vmem:[%s1672_s1 + $0x8] sm:$0xff]   ;;  %v1170_v2 = vld [vmem:[%s1672_s1 + $0x10] sm:$0xff]  }
   0x2   :  { %1044 = vmatprep.subr.bf16.mxu0 %v1168_v0  ;;  %1152 = vmatprep.subr.bf16.mxu1 %v1168_v0  ;;  %v1171_v3 = vld [vmem:[%s1672_s1 + $0x18] sm:$0xff]   ;;  %v1176_v4 = vld [vmem:[%s1673_s0] sm:$0xff]   ;;  %v1173_v7 = vld [vmem:[%s1672_s1 + $0x28] sm:$0xff]  }
   0x3   :  { %1045 = vmatpush3.bf16.msra.mxu0 %v1168_v0  ;;  %1160 = vmatpush3.bf16.msra.mxu1 %v1168_v0  ;;  %v1178_v5 = vld [vmem:[%s1673_s0 + $0xc0] sm:$0xff]   ;;  %v1174_v8 = vld [vmem:[%s1672_s1 + $0x30] sm:$0xff]   ;;  %v1175_v9 = vld [vmem:[%s1672_s1 + $0x38] sm:$0xff]  }
   0x4   :  { %1046 = vmatprep.subr.bf16.mxu0 %v1169_v1  ;;  %1153 = vmatprep.subr.bf16.mxu1 %v1169_v1  ;;  %v1172_v6 = vld [vmem:[%s1672_s1 + $0x20] sm:$0xff]   ;;  %v1177_v10 = vld [vmem:[%s1673_s0 + $0x8] sm:$0xff]   ;;  %v1180_v12 = vld [vmem:[%s1673_s0 + $0x10] sm:$0xff]  }
   0x5   :  { %1060 = vmatprep.mubr.bf16.mxu0 %v1176_v4  ;;  %1108 = vmatprep.mubr.bf16.mxu1 %v1178_v5  ;;  %v1179_v11 = vld [vmem:[%s1673_s0 + $0xc8] sm:$0xff]   ;;  %v1182_v13 = vld [vmem:[%s1673_s0 + $0xd0] sm:$0xff]   ;;  %v1181_v14 = vld [vmem:[%s1673_s0 + $0x18] sm:$0xff]  }
   0x6   :  { %v1183_v15 = vld [vmem:[%s1673_s0 + $0xd8] sm:$0xff]   ;;  %v1184_v16 = vld [vmem:[%s1673_s0 + $0x20] sm:$0xff]   ;;  %v1185_v18 = vld [vmem:[%s1673_s0 + $0x28] sm:$0xff]  }
   0x7   :  { %1047 = vmatpush3.bf16.msra.mxu0 %v1169_v1  ;;  %1161 = vmatpush3.bf16.msra.mxu1 %v1169_v1  ;;  %v1186_v17 = vld [vmem:[%s1673_s0 + $0xe0] sm:$0xff]   ;;  %v1187_v19 = vld [vmem:[%s1673_s0 + $0xe8] sm:$0xff]   ;;  %v1188_v20 = vld [vmem:[%s1673_s0 + $0x30] sm:$0xff]  }
   0x8   :  { %1048 = vmatprep.subr.bf16.mxu0 %v1170_v2  ;;  %1154 = vmatprep.subr.bf16.mxu1 %v1170_v2  ;;  %v1190_v21 = vld [vmem:[%s1673_s0 + $0xf0] sm:$0xff]   ;;  %v1189_v22 = vld [vmem:[%s1673_s0 + $0x38] sm:$0xff]   ;;  %v1192_v24 = vld [vmem:[%s1673_s0 + $0x40] sm:$0xff]  }
   0x9   :  { %v1191_v23 = vld [vmem:[%s1673_s0 + $0xf8] sm:$0xff]   ;;  %v1194_v25 = vld [vmem:[%s1673_s0 + $0x100] sm:$0xff]   ;;  %v1193_v26 = vld [vmem:[%s1673_s0 + $0x48] sm:$0xff]  }
   0xa   :  { %v1195_v27 = vld [vmem:[%s1673_s0 + $0x108] sm:$0xff]   ;;  %v1196_v28 = vld [vmem:[%s1673_s0 + $0x50] sm:$0xff]   ;;  %v1197_v30 = vld [vmem:[%s1673_s0 + $0x58] sm:$0xff]  }
   0xb   :  { %1049 = vmatpush3.bf16.msra.mxu0 %v1170_v2  ;;  %1162 = vmatpush3.bf16.msra.mxu1 %v1170_v2  ;;  %v1198_v29 = vld [vmem:[%s1673_s0 + $0x110] sm:$0xff]   ;;  %v1199_v31 = vld [vmem:[%s1673_s0 + $0x118] sm:$0xff]   ;;  %v1200_v32 = vld [vmem:[%s1673_s0 + $0x60] sm:$0xff]  }
   0xc   :  { %1050 = vmatprep.subr.bf16.mxu0 %v1171_v3  ;;  %1155 = vmatprep.subr.bf16.mxu1 %v1171_v3  ;;  %v1202_v33 = vld [vmem:[%s1673_s0 + $0x120] sm:$0xff]   ;;  %v1201_v34 = vld [vmem:[%s1673_s0 + $0x68] sm:$0xff]   ;;  %v1204_v36 = vld [vmem:[%s1673_s0 + $0x70] sm:$0xff]  }
   0xd   :  { %v1203_v35 = vld [vmem:[%s1673_s0 + $0x128] sm:$0xff]   ;;  %v1206_v37 = vld [vmem:[%s1673_s0 + $0x130] sm:$0xff]   ;;  %v1205_v38 = vld [vmem:[%s1673_s0 + $0x78] sm:$0xff]  }
   0xe   :  { %v1207_v39 = vld [vmem:[%s1673_s0 + $0x138] sm:$0xff]   ;;  %v1208_v40 = vld [vmem:[%s1673_s0 + $0x80] sm:$0xff]   ;;  %v1209_v42 = vld [vmem:[%s1673_s0 + $0x88] sm:$0xff]  }
   0xf   :  { %1051 = vmatpush3.bf16.msra.mxu0 %v1171_v3  ;;  %1163 = vmatpush3.bf16.msra.mxu1 %v1171_v3  ;;  %v1210_v41 = vld [vmem:[%s1673_s0 + $0x140] sm:$0xff]   ;;  %v1211_v43 = vld [vmem:[%s1673_s0 + $0x148] sm:$0xff]   ;;  %v1212_v44 = vld [vmem:[%s1673_s0 + $0x90] sm:$0xff]  }
  0x10   :  { %1052 = vmatprep.subr.bf16.mxu0 %v1172_v6  ;;  %1156 = vmatprep.subr.bf16.mxu1 %v1172_v6  ;;  %v1214_v45 = vld [vmem:[%s1673_s0 + $0x150] sm:$0xff]   ;;  %v1213_v46 = vld [vmem:[%s1673_s0 + $0x98] sm:$0xff]   ;;  %v1216_v48 = vld [vmem:[%s1673_s0 + $0xa0] sm:$0xff]  }
  0x11   :  { %v1215_v47 = vld [vmem:[%s1673_s0 + $0x158] sm:$0xff]   ;;  %v1218_v49 = vld [vmem:[%s1673_s0 + $0x160] sm:$0xff]   ;;  %v1217_v50 = vld [vmem:[%s1673_s0 + $0xa8] sm:$0xff]  }
  0x12   :  { %v1219_v51 = vld [vmem:[%s1673_s0 + $0x168] ss:$0 sps:$4 sm:$0x11]   ;;  %v1220_v52 = vld [vmem:[%s1673_s0 + $0xb0] sm:$0xff]   ;;  %v1221_v53 = vld [vmem:[%s1673_s0 + $0xb8] sm:$0xff]  }
  0x13   :  { %1053 = vmatpush3.bf16.msra.mxu0 %v1172_v6  ;;  %1164 = vmatpush3.bf16.msra.mxu1 %v1172_v6 }
  0x14   :  { %1054 = vmatprep.subr.bf16.mxu0 %v1173_v7  ;;  %1157 = vmatprep.subr.bf16.mxu1 %v1173_v7 }
  0x17   :  { %1055 = vmatpush3.bf16.msra.mxu0 %v1173_v7  ;;  %1165 = vmatpush3.bf16.msra.mxu1 %v1173_v7 }
  0x18   :  { %1056 = vmatprep.subr.bf16.mxu0 %v1174_v8  ;;  %1158 = vmatprep.subr.bf16.mxu1 %v1174_v8 }
  0x1b   :  { %1057 = vmatpush3.bf16.msra.mxu0 %v1174_v8  ;;  %1166 = vmatpush3.bf16.msra.mxu1 %v1174_v8 }
  0x1c   :  { %1058 = vmatprep.subr.bf16.mxu0 %v1175_v9  ;;  %1159 = vmatprep.subr.bf16.mxu1 %v1175_v9 }
  0x1f   :  { %1059 = vmatpush3.bf16.msra.mxu0 %v1175_v9  ;;  %1167 = vmatpush3.bf16.msra.mxu1 %v1175_v9 }
  0x22   :  { %1061 = vmatmul.mubr.bf16.vlgmr.msra.gmra.mrb[0].mxu0 %v1177_v10  ;;  %1109 = vmatmul.mubr.bf16.vlgmr.msra.gmra.mrb[0].mxu1 %v1179_v11 }
  0x23   :  { %1064 = vmatprep.mubr.bf16.mxu0 %v1180_v12  ;;  %1112 = vmatprep.mubr.bf16.mxu1 %v1182_v13 }
  0x2a   :  { %1065 = vmatmul.mubr.bf16.gmra.mrb[4].mxu0 %v1181_v14  ;;  %1113 = vmatmul.mubr.bf16.gmra.mrb[4].mxu1 %v1183_v15 }
  0x2b   :  { %1068 = vmatprep.mubr.bf16.mxu0 %v1184_v16  ;;  %1116 = vmatprep.mubr.bf16.mxu1 %v1186_v17 }
  0x32   :  { %1069 = vmatmul.mubr.bf16.gmra.mrb[8].mxu0 %v1185_v18  ;;  %1117 = vmatmul.mubr.bf16.gmra.mrb[8].mxu1 %v1187_v19 }
  0x33   :  { %1072 = vmatprep.mubr.bf16.mxu0 %v1188_v20  ;;  %1120 = vmatprep.mubr.bf16.mxu1 %v1190_v21 }
  0x3a   :  { %1073 = vmatmul.mubr.bf16.gmra.mrb[12].mxu0 %v1189_v22  ;;  %1121 = vmatmul.mubr.bf16.gmra.mrb[12].mxu1 %v1191_v23 }
  0x3b   :  { %1076 = vmatprep.mubr.bf16.mxu0 %v1192_v24  ;;  %1124 = vmatprep.mubr.bf16.mxu1 %v1194_v25 }
  0x42   :  { %1077 = vmatmul.mubr.bf16.gmra.mrb[16].mxu0 %v1193_v26  ;;  %1125 = vmatmul.mubr.bf16.gmra.mrb[16].mxu1 %v1195_v27 }
  0x43   :  { %1080 = vmatprep.mubr.bf16.mxu0 %v1196_v28  ;;  %1128 = vmatprep.mubr.bf16.mxu1 %v1198_v29 }
  0x4a   :  { %1081 = vmatmul.mubr.bf16.gmra.mrb[20].mxu0 %v1197_v30  ;;  %1129 = vmatmul.mubr.bf16.gmra.mrb[20].mxu1 %v1199_v31 }
  0x4b   :  { %1084 = vmatprep.mubr.bf16.mxu0 %v1200_v32  ;;  %1132 = vmatprep.mubr.bf16.mxu1 %v1202_v33 }
  0x52   :  { %1085 = vmatmul.mubr.bf16.gmra.mrb[24].mxu0 %v1201_v34  ;;  %1133 = vmatmul.mubr.bf16.gmra.mrb[24].mxu1 %v1203_v35 }
  0x53   :  { %1088 = vmatprep.mubr.bf16.mxu0 %v1204_v36  ;;  %1136 = vmatprep.mubr.bf16.mxu1 %v1206_v37 }
  0x5a   :  { %1089 = vmatmul.mubr.bf16.gmra.mrb[28].mxu0 %v1205_v38  ;;  %1137 = vmatmul.mubr.bf16.gmra.mrb[28].mxu1 %v1207_v39 }
  0x5b   :  { %1092 = vmatprep.mubr.bf16.mxu0 %v1208_v40  ;;  %1140 = vmatprep.mubr.bf16.mxu1 %v1210_v41 }
  0x62   :  { %1093 = vmatmul.mubr.bf16.gmra.mrb[32].mxu0 %v1209_v42  ;;  %1141 = vmatmul.mubr.bf16.gmra.mrb[32].mxu1 %v1211_v43 }
  0x63   :  { %1096 = vmatprep.mubr.bf16.mxu0 %v1212_v44  ;;  %1144 = vmatprep.mubr.bf16.mxu1 %v1214_v45 }
  0x6a   :  { %1097 = vmatmul.mubr.bf16.gmra.mrb[36].mxu0 %v1213_v46  ;;  %1145 = vmatmul.mubr.bf16.gmra.mrb[36].mxu1 %v1215_v47 }
  0x6b   :  { %1100 = vmatprep.mubr.bf16.mxu0 %v1216_v48  ;;  %1148 = vmatprep.mubr.bf16.mxu1 %v1218_v49 }
  0x72   :  { %1101 = vmatmul.mubr.bf16.gmra.mrb[40].mxu0 %v1217_v50  ;;  %1149 = vmatmul.mubr.bf16.gmra.mrb[40].mxu1 %v1219_v51 }
  0x73   :  { %1104 = vmatprep.mubr.bf16.mxu0 %v1220_v52 }
  0x7a   :  { %1105 = vmatmul.mubr.bf16.gmra.mrb[44].mxu0 %v1221_v53 }
  0xf5   :  { %v1062_v54 = vpop.f32.mrb[0].mxu0  ;;  %v1110_v55 = vpop.f32.mrb[0].mxu1 }
  0xf6   :  { %843 = vst [vmem:[%s1674_s2 + $0x10] sm:$0xff] %v1062_v54  ;;  %v475_v56 = vpop.f32.mrb[1].mxu0  ;;  %891 = vst [vmem:[%s1674_s2 + $0x190] sm:$0xff] %v1110_v55  ;;  %v667_v57 = vpop.f32.mrb[1].mxu1 }
  0xf7   :  { %841 = vst [vmem:[%s1674_s2] sm:$0xff] %v475_v56  ;;  %v1063_v58 = vpop.f32.mrb[2].mxu0  ;;  %889 = vst [vmem:[%s1674_s2 + $0x180] sm:$0xff] %v667_v57  ;;  %v1111_v59 = vpop.f32.mrb[2].mxu1 }
  0xf8   :  { %844 = vst [vmem:[%s1674_s2 + $0x18] sm:$0xff] %v1063_v58  ;;  %v478_v60 = vpop.f32.mrb[3].mxu0  ;;  %892 = vst [vmem:[%s1674_s2 + $0x198] sm:$0xff] %v1111_v59  ;;  %v670_v61 = vpop.f32.mrb[3].mxu1 }
  0xf9   :  { %842 = vst [vmem:[%s1674_s2 + $0x8] sm:$0xff] %v478_v60  ;;  %890 = vst [vmem:[%s1674_s2 + $0x188] sm:$0xff] %v670_v61 }
  0xfd   :  { %v1066_v62 = vpop.f32.mrb[4].mxu0  ;;  %v1114_v63 = vpop.f32.mrb[4].mxu1 }
  0xfe   :  { %847 = vst [vmem:[%s1674_s2 + $0x30] sm:$0xff] %v1066_v62  ;;  %v491_v0 = vpop.f32.mrb[5].mxu0  ;;  %895 = vst [vmem:[%s1674_s2 + $0x1b0] sm:$0xff] %v1114_v63  ;;  %v683_v1 = vpop.f32.mrb[5].mxu1 }
  0xff   :  { %845 = vst [vmem:[%s1674_s2 + $0x20] sm:$0xff] %v491_v0  ;;  %v1067_v2 = vpop.f32.mrb[6].mxu0  ;;  %893 = vst [vmem:[%s1674_s2 + $0x1a0] sm:$0xff] %v683_v1  ;;  %v1115_v3 = vpop.f32.mrb[6].mxu1 }
 0x100   :  { %848 = vst [vmem:[%s1674_s2 + $0x38] sm:$0xff] %v1067_v2  ;;  %v494_v4 = vpop.f32.mrb[7].mxu0  ;;  %896 = vst [vmem:[%s1674_s2 + $0x1b8] sm:$0xff] %v1115_v3  ;;  %v686_v5 = vpop.f32.mrb[7].mxu1 }
 0x101   :  { %846 = vst [vmem:[%s1674_s2 + $0x28] sm:$0xff] %v494_v4  ;;  %894 = vst [vmem:[%s1674_s2 + $0x1a8] sm:$0xff] %v686_v5 }
 0x105   :  { %v1070_v6 = vpop.f32.mrb[8].mxu0  ;;  %v1118_v7 = vpop.f32.mrb[8].mxu1 }
 0x106   :  { %851 = vst [vmem:[%s1674_s2 + $0x50] sm:$0xff] %v1070_v6  ;;  %v507_v8 = vpop.f32.mrb[9].mxu0  ;;  %899 = vst [vmem:[%s1674_s2 + $0x1d0] sm:$0xff] %v1118_v7  ;;  %v699_v9 = vpop.f32.mrb[9].mxu1 }
 0x107   :  { %849 = vst [vmem:[%s1674_s2 + $0x40] sm:$0xff] %v507_v8  ;;  %v1071_v10 = vpop.f32.mrb[10].mxu0  ;;  %897 = vst [vmem:[%s1674_s2 + $0x1c0] sm:$0xff] %v699_v9  ;;  %v1119_v11 = vpop.f32.mrb[10].mxu1 }
 0x108   :  { %852 = vst [vmem:[%s1674_s2 + $0x58] sm:$0xff] %v1071_v10  ;;  %v510_v12 = vpop.f32.mrb[11].mxu0  ;;  %900 = vst [vmem:[%s1674_s2 + $0x1d8] sm:$0xff] %v1119_v11  ;;  %v702_v13 = vpop.f32.mrb[11].mxu1 }
 0x109   :  { %850 = vst [vmem:[%s1674_s2 + $0x48] sm:$0xff] %v510_v12  ;;  %898 = vst [vmem:[%s1674_s2 + $0x1c8] sm:$0xff] %v702_v13 }
 0x10d   :  { %v1074_v14 = vpop.f32.mrb[12].mxu0  ;;  %v1122_v15 = vpop.f32.mrb[12].mxu1 }
 0x10e   :  { %855 = vst [vmem:[%s1674_s2 + $0x70] sm:$0xff] %v1074_v14  ;;  %v523_v16 = vpop.f32.mrb[13].mxu0  ;;  %903 = vst [vmem:[%s1674_s2 + $0x1f0] sm:$0xff] %v1122_v15  ;;  %v715_v17 = vpop.f32.mrb[13].mxu1 }
 0x10f   :  { %853 = vst [vmem:[%s1674_s2 + $0x60] sm:$0xff] %v523_v16  ;;  %v1075_v18 = vpop.f32.mrb[14].mxu0  ;;  %901 = vst [vmem:[%s1674_s2 + $0x1e0] sm:$0xff] %v715_v17  ;;  %v1123_v19 = vpop.f32.mrb[14].mxu1 }
 0x110   :  { %856 = vst [vmem:[%s1674_s2 + $0x78] sm:$0xff] %v1075_v18  ;;  %v526_v20 = vpop.f32.mrb[15].mxu0  ;;  %904 = vst [vmem:[%s1674_s2 + $0x1f8] sm:$0xff] %v1123_v19  ;;  %v718_v21 = vpop.f32.mrb[15].mxu1 }
 0x111   :  { %854 = vst [vmem:[%s1674_s2 + $0x68] sm:$0xff] %v526_v20  ;;  %902 = vst [vmem:[%s1674_s2 + $0x1e8] sm:$0xff] %v718_v21 }
 0x115   :  { %v1078_v22 = vpop.f32.mrb[16].mxu0  ;;  %v1126_v23 = vpop.f32.mrb[16].mxu1 }
 0x116   :  { %859 = vst [vmem:[%s1674_s2 + $0x90] sm:$0xff] %v1078_v22  ;;  %v539_v24 = vpop.f32.mrb[17].mxu0  ;;  %907 = vst [vmem:[%s1674_s2 + $0x210] sm:$0xff] %v1126_v23  ;;  %v731_v25 = vpop.f32.mrb[17].mxu1 }
 0x117   :  { %857 = vst [vmem:[%s1674_s2 + $0x80] sm:$0xff] %v539_v24  ;;  %v1079_v26 = vpop.f32.mrb[18].mxu0  ;;  %905 = vst [vmem:[%s1674_s2 + $0x200] sm:$0xff] %v731_v25  ;;  %v1127_v27 = vpop.f32.mrb[18].mxu1 }
 0x118   :  { %860 = vst [vmem:[%s1674_s2 + $0x98] sm:$0xff] %v1079_v26  ;;  %v542_v28 = vpop.f32.mrb[19].mxu0  ;;  %908 = vst [vmem:[%s1674_s2 + $0x218] sm:$0xff] %v1127_v27  ;;  %v734_v29 = vpop.f32.mrb[19].mxu1 }
 0x119   :  { %858 = vst [vmem:[%s1674_s2 + $0x88] sm:$0xff] %v542_v28  ;;  %906 = vst [vmem:[%s1674_s2 + $0x208] sm:$0xff] %v734_v29 }
 0x11d   :  { %v1082_v30 = vpop.f32.mrb[20].mxu0  ;;  %v1130_v31 = vpop.f32.mrb[20].mxu1 }
 0x11e   :  { %863 = vst [vmem:[%s1674_s2 + $0xb0] sm:$0xff] %v1082_v30  ;;  %v555_v32 = vpop.f32.mrb[21].mxu0  ;;  %911 = vst [vmem:[%s1674_s2 + $0x230] sm:$0xff] %v1130_v31  ;;  %v747_v33 = vpop.f32.mrb[21].mxu1 }
 0x11f   :  { %861 = vst [vmem:[%s1674_s2 + $0xa0] sm:$0xff] %v555_v32  ;;  %v1083_v34 = vpop.f32.mrb[22].mxu0  ;;  %909 = vst [vmem:[%s1674_s2 + $0x220] sm:$0xff] %v747_v33  ;;  %v1131_v35 = vpop.f32.mrb[22].mxu1 }
 0x120   :  { %864 = vst [vmem:[%s1674_s2 + $0xb8] sm:$0xff] %v1083_v34  ;;  %v558_v36 = vpop.f32.mrb[23].mxu0  ;;  %912 = vst [vmem:[%s1674_s2 + $0x238] sm:$0xff] %v1131_v35  ;;  %v750_v37 = vpop.f32.mrb[23].mxu1 }
 0x121   :  { %862 = vst [vmem:[%s1674_s2 + $0xa8] sm:$0xff] %v558_v36  ;;  %910 = vst [vmem:[%s1674_s2 + $0x228] sm:$0xff] %v750_v37 }
 0x125   :  { %v1086_v38 = vpop.f32.mrb[24].mxu0  ;;  %v1134_v39 = vpop.f32.mrb[24].mxu1 }
 0x126   :  { %867 = vst [vmem:[%s1674_s2 + $0xd0] sm:$0xff] %v1086_v38  ;;  %v571_v40 = vpop.f32.mrb[25].mxu0  ;;  %915 = vst [vmem:[%s1674_s2 + $0x250] sm:$0xff] %v1134_v39  ;;  %v763_v41 = vpop.f32.mrb[25].mxu1 }
 0x127   :  { %865 = vst [vmem:[%s1674_s2 + $0xc0] sm:$0xff] %v571_v40  ;;  %v1087_v42 = vpop.f32.mrb[26].mxu0  ;;  %913 = vst [vmem:[%s1674_s2 + $0x240] sm:$0xff] %v763_v41  ;;  %v1135_v43 = vpop.f32.mrb[26].mxu1 }
 0x128   :  { %868 = vst [vmem:[%s1674_s2 + $0xd8] sm:$0xff] %v1087_v42  ;;  %v574_v44 = vpop.f32.mrb[27].mxu0  ;;  %916 = vst [vmem:[%s1674_s2 + $0x258] sm:$0xff] %v1135_v43  ;;  %v766_v45 = vpop.f32.mrb[27].mxu1 }
 0x129   :  { %866 = vst [vmem:[%s1674_s2 + $0xc8] sm:$0xff] %v574_v44  ;;  %914 = vst [vmem:[%s1674_s2 + $0x248] sm:$0xff] %v766_v45 }
 0x12d   :  { %v1090_v46 = vpop.f32.mrb[28].mxu0  ;;  %v1138_v47 = vpop.f32.mrb[28].mxu1 }
 0x12e   :  { %871 = vst [vmem:[%s1674_s2 + $0xf0] sm:$0xff] %v1090_v46  ;;  %v587_v48 = vpop.f32.mrb[29].mxu0  ;;  %919 = vst [vmem:[%s1674_s2 + $0x270] sm:$0xff] %v1138_v47  ;;  %v779_v49 = vpop.f32.mrb[29].mxu1 }
 0x12f   :  { %869 = vst [vmem:[%s1674_s2 + $0xe0] sm:$0xff] %v587_v48  ;;  %v1091_v50 = vpop.f32.mrb[30].mxu0  ;;  %917 = vst [vmem:[%s1674_s2 + $0x260] sm:$0xff] %v779_v49  ;;  %v1139_v51 = vpop.f32.mrb[30].mxu1 }
 0x130   :  { %872 = vst [vmem:[%s1674_s2 + $0xf8] sm:$0xff] %v1091_v50  ;;  %v590_v52 = vpop.f32.mrb[31].mxu0  ;;  %920 = vst [vmem:[%s1674_s2 + $0x278] sm:$0xff] %v1139_v51  ;;  %v782_v53 = vpop.f32.mrb[31].mxu1 }
 0x131   :  { %870 = vst [vmem:[%s1674_s2 + $0xe8] sm:$0xff] %v590_v52  ;;  %918 = vst [vmem:[%s1674_s2 + $0x268] sm:$0xff] %v782_v53 }
 0x135   :  { %v1094_v54 = vpop.f32.mrb[32].mxu0  ;;  %v1142_v55 = vpop.f32.mrb[32].mxu1 }
 0x136   :  { %875 = vst [vmem:[%s1674_s2 + $0x110] sm:$0xff] %v1094_v54  ;;  %v603_v56 = vpop.f32.mrb[33].mxu0  ;;  %923 = vst [vmem:[%s1674_s2 + $0x290] sm:$0xff] %v1142_v55  ;;  %v795_v57 = vpop.f32.mrb[33].mxu1 }
 0x137   :  { %873 = vst [vmem:[%s1674_s2 + $0x100] sm:$0xff] %v603_v56  ;;  %v1095_v58 = vpop.f32.mrb[34].mxu0  ;;  %921 = vst [vmem:[%s1674_s2 + $0x280] sm:$0xff] %v795_v57  ;;  %v1143_v59 = vpop.f32.mrb[34].mxu1 }
 0x138   :  { %876 = vst [vmem:[%s1674_s2 + $0x118] sm:$0xff] %v1095_v58  ;;  %v606_v60 = vpop.f32.mrb[35].mxu0  ;;  %924 = vst [vmem:[%s1674_s2 + $0x298] sm:$0xff] %v1143_v59  ;;  %v798_v61 = vpop.f32.mrb[35].mxu1 }
 0x139   :  { %874 = vst [vmem:[%s1674_s2 + $0x108] sm:$0xff] %v606_v60  ;;  %922 = vst [vmem:[%s1674_s2 + $0x288] sm:$0xff] %v798_v61 }
 0x13d   :  { %v1098_v62 = vpop.f32.mrb[36].mxu0  ;;  %v1146_v63 = vpop.f32.mrb[36].mxu1 }
 0x13e   :  { %879 = vst [vmem:[%s1674_s2 + $0x130] sm:$0xff] %v1098_v62  ;;  %v619_v0 = vpop.f32.mrb[37].mxu0  ;;  %927 = vst [vmem:[%s1674_s2 + $0x2b0] sm:$0xff] %v1146_v63  ;;  %v811_v1 = vpop.f32.mrb[37].mxu1 }
 0x13f   :  { %877 = vst [vmem:[%s1674_s2 + $0x120] sm:$0xff] %v619_v0  ;;  %v1099_v2 = vpop.f32.mrb[38].mxu0  ;;  %925 = vst [vmem:[%s1674_s2 + $0x2a0] sm:$0xff] %v811_v1  ;;  %v1147_v3 = vpop.f32.mrb[38].mxu1 }
 0x140   :  { %880 = vst [vmem:[%s1674_s2 + $0x138] sm:$0xff] %v1099_v2  ;;  %v622_v4 = vpop.f32.mrb[39].mxu0  ;;  %928 = vst [vmem:[%s1674_s2 + $0x2b8] sm:$0xff] %v1147_v3  ;;  %v814_v5 = vpop.f32.mrb[39].mxu1 }
 0x141   :  { %878 = vst [vmem:[%s1674_s2 + $0x128] sm:$0xff] %v622_v4  ;;  %926 = vst [vmem:[%s1674_s2 + $0x2a8] sm:$0xff] %v814_v5 }
 0x145   :  { %v1102_v6 = vpop.f32.mrb[40].mxu0  ;;  %v1150_v7 = vpop.f32.mrb[40].mxu1 }
 0x146   :  { %883 = vst [vmem:[%s1674_s2 + $0x150] sm:$0xff] %v1102_v6  ;;  %v635_v8 = vpop.f32.mrb[41].mxu0  ;;  %931 = vst [vmem:[%s1674_s2 + $0x2d0] sm:$0x3] %v1150_v7  ;;  %v827_v9 = vpop.f32.mrb[41].mxu1 }
 0x147   :  { %881 = vst [vmem:[%s1674_s2 + $0x140] sm:$0xff] %v635_v8  ;;  %v1103_v10 = vpop.f32.mrb[42].mxu0  ;;  %929 = vst [vmem:[%s1674_s2 + $0x2c0] sm:$0xff] %v827_v9  ;;  %v1151_v11 = vpop.f32.mrb[42].mxu1 }
 0x148   :  { %884 = vst [vmem:[%s1674_s2 + $0x158] sm:$0xff] %v1103_v10  ;;  %v638_v12 = vpop.f32.mrb[43].mxu0  ;;  %v830_v13 = vpop.f32.mrb[43].mxu1 }
 0x149   :  { %882 = vst [vmem:[%s1674_s2 + $0x148] sm:$0xff] %v638_v12  ;;  %930 = vst [vmem:[%s1674_s2 + $0x2c8] sm:$0xff] %v830_v13 }
 0x14d   :  { %v1106_v14 = vpop.f32.mrb[44].mxu0 }
 0x14e   :  { %887 = vst [vmem:[%s1674_s2 + $0x170] sm:$0xff] %v1106_v14  ;;  %v651_v15 = vpop.f32.mrb[45].mxu0 }
 0x14f   :  { %885 = vst [vmem:[%s1674_s2 + $0x160] sm:$0xff] %v651_v15  ;;  %v1107_v16 = vpop.f32.mrb[46].mxu0 }
 0x150   :  { %888 = vst [vmem:[%s1674_s2 + $0x178] sm:$0xff] %v1107_v16  ;;  %v654_v17 = vpop.f32.mrb[47].mxu0 }
 0x151   :  { %886 = vst [vmem:[%s1674_s2 + $0x168] sm:$0xff] %v654_v17 }

// kernel: heatmap_decoder_forward.11
= control target key start
LH: loop header
LB: loop body
LE: loop exit
PB: predicated region body
PF: predicated region fallthrough
CT: control target
= control target key end

     0   :  { %7 = vsyncpa [#allocation3], 0  ;;  %s186_s0 = inlined_call_operand.vmem [shape: f32[25,128], index: 0, kind: input, shape index: {}]   ;;  %s187_s1 = inlined_call_operand.vmem [shape: f32[8], index: 1, kind: input, shape index: {}]   ;;  %s188_s2 = inlined_call_operand.vmem [shape: f32[25,128], index: 2, kind: output, shape index: {}]  }
   0x1   :  { %s16_s11 = sshll.u32 %s187_s1, 4  ;;  %s17_s11 = int_to_ptr.vmem [resolvable:$true] %s16_s11 }
   0x2   :  { %s127_s12 = scalar_lea.vmem %s17_s11, 16  ;;  %p132_p1 = scmp.lt.s32.totalorder %s17_s11, %s17_s11 }
   0x3   :  { %p128_p0 = scmp.ne.s32.totalorder %s17_s11, %s127_s12  ;;  %p133_p2 = scmp.lt.s32.totalorder %s127_s12, %s127_s12 }
   0x5   :  { %p134_p3 = por %p133_p2, %p132_p1 }
   0x7   :  { %p135_p4 = pnand %p134_p3, %p128_p0 }
   0x9   :  { %138 = shalt.err (!%p135_p4)
}
   0xa   :  { %s141_s13 = smov [#allocation2]  }
   0xb   :  { %19 = dma.vmem_to_smem %s17_s11, 16, %s141_s13, [#allocation3]  }
   0xc   :  { %139 = dma.done.wait [#allocation3], 16  }
   0xd   :  { %140 = vsyncadd [#allocation3], 4294967280 }
   0xe   :  { %23 = sfence }
   0xf   :  { %s28_s14 = sld [smem:[#allocation2]]  ;;  %v24_v0 = vld [vmem:[%s186_s0] sm:$0xff]  ;;  %v25_v1 = vld [vmem:[%s186_s0 + $0x8] sm:$0xff]  ;;  %v26_v2 = vld [vmem:[%s186_s0 + $0x10] sm:$0xff]  ;;  %vm36_vm0 = vcmask 1040384   ;;  %s114_s26 = sld [smem:[#allocation2 + $0x1]] }
  0x10   :  { %v27_v3 = vld [vmem:[%s186_s0 + $0x18] sm:$0x1]  ;;  %s115_s27 = sld [smem:[#allocation2 + $0x2]]  ;;  %s116_s28 = sld [smem:[#allocation2 + $0x3]] }
  0x11   :  { %s117_s3 = sld [smem:[#allocation2 + $0x4]] }
  0x15   :  { %v29_v4 = vstv %s28_s14 }
  0x16   :  { %v30_v5 = vadd.f32 %v29_v4, %v24_v0  ;;  %v31_v6 = vadd.f32 %v29_v4, %v25_v1  ;;  %v32_v7 = vadd.f32 %v29_v4, %v26_v2  ;;  %v33_v8 = vadd.f32 %v29_v4, %v27_v3 }
  0x17   :  { %v84_v43 = vstv %s115_s27  ;;  %v94_v52 = vstv %s116_s28  ;;  %v100_v57 = vstv %s117_s3 }
  0x18   :  { %v34_v9 = vadd.f32 %v31_v6, %v30_v5  ;;  %v37_v10 = vsel %vm36_vm0, %v33_v8, 0.0 }
  0x1a   :  { %v35_v11 = vadd.f32 %v34_v9, %v32_v7 }
  0x1c   :  { %v38_v12 = vadd.f32 %v37_v10, %v35_v11 }
  0x1e   :  { %39 = vadd.xlane.f32.xlu0 %v38_v12 }
  0xab   :  { %v40_v13 = vpop.xlane.xlu0 %39 }
  0xac   :  { %v41_v14 = vrot.slane %v40_v13, 4 }
  0xae   :  { %v42_v15 = vadd.f32 %v41_v14, %v40_v13 }
  0xb0   :  { %v43_v16 = vrot.slane %v42_v15, 2 }
  0xb2   :  { %v44_v17 = vadd.f32 %v43_v16, %v42_v15 }
  0xb4   :  { %v45_v18 = vrot.slane %v44_v17, 1 }
  0xb6   :  { %v46_v19 = vadd.f32 %v45_v18, %v44_v17 }
  0xb8   :  { %118 = vpush %v46_v19 }
  0xe9   :  { %s119_s0 = spop %118 }
  0xea   :  { %s48_s22 = smul.f32 0.0003125, %s119_s0 }
  0xec   :  { %v49_v20 = vstv %s48_s22 }
  0xed   :  { %v50_v21 = vsub.f32 %v30_v5, %v49_v20  ;;  %v51_v22 = vsub.f32 %v31_v6, %v49_v20  ;;  %v52_v23 = vsub.f32 %v32_v7, %v49_v20  ;;  %v53_v24 = vsub.f32 %v33_v8, %v49_v20 }
  0xef   :  { %v54_v25 = vmul.f32 %v50_v21, %v50_v21  ;;  %v55_v26 = vmul.f32 %v51_v22, %v51_v22  ;;  %v57_v27 = vmul.f32 %v53_v24, %v53_v24  ;;  %v56_v28 = vmul.f32 %v52_v23, %v52_v23 }
  0xf1   :  { %v58_v29 = vadd.f32 %v55_v26, %v54_v25  ;;  %v60_v31 = vsel %vm36_vm0, %v57_v27, 0.0 }
  0xf3   :  { %v59_v30 = vadd.f32 %v58_v29, %v56_v28 }
  0xf5   :  { %v61_v32 = vadd.f32 %v60_v31, %v59_v30 }
  0xf7   :  { %62 = vadd.xlane.f32.xlu0 %v61_v32 }
 0x184   :  { %v63_v33 = vpop.xlane.xlu0 %62 }
 0x185   :  { %v64_v34 = vrot.slane %v63_v33, 4 }
 0x187   :  { %v65_v35 = vadd.f32 %v64_v34, %v63_v33 }
 0x189   :  { %v66_v36 = vrot.slane %v65_v35, 2 }
 0x18b   :  { %v67_v37 = vadd.f32 %v66_v36, %v65_v35 }
 0x18d   :  { %v68_v38 = vrot.slane %v67_v37, 1 }
 0x18f   :  { %v69_v39 = vadd.f32 %v68_v38, %v67_v37 }
 0x191   :  { %120 = vpush %v69_v39 }
 0x1c2   :  { %s121_s23 = spop %120 }
 0x1c3   :  { %s71_s24 = smul.f32 0.0003125, %s121_s23 }
 0x1c5   :  { %s73_s25 = sadd.f32 1e-05, %s71_s24 }
 0x1c7   :  { %v74_v40 = vstv %s73_s25 }
 0x1c8   :  { %125 = vrsqrt.f32 %v74_v40 }
 0x1d2   :  { %v126_v41 = vpop.eup %125 }
 0x1d3   :  { %122 = vpush %v126_v41 }
 0x204   :  { %s123_s29 = spop %122 }
 0x205   :  { %s77_s30 = smul.f32 %s123_s29, %s114_s26 }
 0x207   :  { %v78_v42 = vstv %s77_s30 }
 0x208   :  { %v79_v44 = vmul.f32 %v78_v42, %v50_v21  ;;  %v80_v45 = vmul.f32 %v78_v42, %v51_v22  ;;  %v81_v46 = vmul.f32 %v78_v42, %v52_v23  ;;  %v82_v47 = vmul.f32 %v78_v42, %v53_v24 }
 0x20a   :  { %v85_v48 = vadd.f32 %v84_v43, %v79_v44  ;;  %v86_v49 = vadd.f32 %v84_v43, %v80_v45  ;;  %v87_v50 = vadd.f32 %v84_v43, %v81_v46  ;;  %v88_v51 = vadd.f32 %v84_v43, %v82_v47 }
 0x20c   :  { %v89_v53 = vmax.f32 %v85_v48, 0.0  ;;  %v90_v54 = vmax.f32 %v86_v49, 0.0  ;;  %v91_v55 = vmax.f32 %v87_v50, 0.0  ;;  %v92_v56 = vmax.f32 %v88_v51, 0.0 }
 0x20e   :  { %v95_v58 = vmul.f32 %v94_v52, %v89_v53  ;;  %v96_v59 = vmul.f32 %v94_v52, %v90_v54  ;;  %v97_v60 = vmul.f32 %v94_v52, %v91_v55  ;;  %v98_v61 = vmul.f32 %v94_v52, %v92_v56 }
 0x210   :  { %v101_v62 = vadd.f32 %v100_v57, %v95_v58  ;;  %v102_v63 = vadd.f32 %v100_v57, %v96_v59  ;;  %v103_v0 = vadd.f32 %v100_v57, %v97_v60  ;;  %v104_v1 = vadd.f32 %v100_v57, %v98_v61 }
 0x212   :  { %105 = vst [vmem:[%s188_s2] sm:$0xff] %v101_v62  ;;  %106 = vst [vmem:[%s188_s2 + $0x8] sm:$0xff] %v102_v63 }
 0x213   :  { %107 = vst [vmem:[%s188_s2 + $0x10] sm:$0xff] %v103_v0  ;;  %108 = vst [vmem:[%s188_s2 + $0x18] sm:$0x1] %v104_v1 }
 0x214   :  { %113 = vsyncpa [#allocation3], 1 }

</bundles_post_ra>
